<compile_context>
chip_gen: v7x
topology: tpu7x:2x2x1
jax: 0.10.0
libtpu: 0.0.40
codegen_flags: <defaults>
</compile_context>

<pallas_src>
import jax
import jax.numpy as jnp
from jax import lax
from jax.experimental import pallas as pl
from jax.experimental.pallas import tpu as pltpu


_TAPS = [(kd, kh, kw) for kd in range(3) for kh in range(3) for kw in range(3)]
_NEG = -1e30  # finite stand-in for -inf so masked pool values can safely feed a matmul


def _make_kernel(D, H, W, Cin, Cout):
    Do, Ho, Wo = (D + 1) // 2, (H + 1) // 2, (W + 1) // 2
    Hp, Wp = H + 2, W + 2                       # zero-padded stem-conv extents
    HpWp = Hp * Wp
    Pp = (D + 2) * HpWp                         # flat padded (conv-out / pool) volume
    L0 = (D - 1) * HpWp + (H - 1) * Wp + W      # flat stem-conv output length
    off0 = HpWp + Wp + 1                        # flat index of padded (1,1,1)
    Hr, Wr = Ho + 2, Wo + 2                     # zero-padded residual extents
    HrWr = Hr * Wr
    Rr = (Do + 2) * HrWr                        # flat padded residual volume
    Lr = (Do - 1) * HrWr + (Ho - 1) * Wr + Wo   # flat residual-conv output length
    offr = HrWr + Wr + 1
    # widths of the three shifted-max pooling passes
    n3 = 2 * ((Do - 1) * HpWp + (Ho - 1) * Wp + (Wo - 1)) + 1
    nH = n3 + 2 * HpWp
    nW = nH + 2 * Wp
    f32, bf16 = jnp.float32, jnp.bfloat16

    def kernel(x_ref, w0_ref, b0_ref, wr_ref, br_ref, a0_ref, mr_ref, s_ref,
               o_ref, pat0, pbuf, qbuf, xp, fr, patr):
        # ---- stem conv: one (Cout, 27Cin) @ (27Cin, L0) MXU matmul -----------------
        for t, (kd, kh, kw) in enumerate(_TAPS):
            off = (kd * Hp + kh) * Wp + kw
            pat0[t * Cin:(t + 1) * Cin, :] = x_ref[0, :, off:off + L0]
        g = jnp.dot(w0_ref[...], pat0[...].astype(bf16),
                    preferred_element_type=f32) + b0_ref[...]            # (Cout, L0)

        # ---- scatter into -inf padded pool volume: halo init + one dense store -----
        pbuf[:, :off0] = jnp.full((Cout, off0), _NEG, f32)
        pbuf[:, off0 + L0:] = jnp.full((Cout, Pp - off0 - L0), _NEG, f32)
        pbuf[:, off0:off0 + L0] = g + a0_ref[...]   # wrap-around columns -> -inf

        # ---- separable 3x3x3 / stride-2 max pool, fully vectorized -----------------
        mw = jnp.maximum(jnp.maximum(pbuf[:, 0:nW], pbuf[:, 1:1 + nW]),
                         pbuf[:, 2:2 + nW])
        qbuf[:, 0:nW] = mw
        mh = jnp.maximum(jnp.maximum(qbuf[:, 0:nH], qbuf[:, Wp:Wp + nH]),
                         qbuf[:, 2 * Wp:2 * Wp + nH])
        pbuf[:, 0:nH] = mh
        md = jnp.maximum(jnp.maximum(pbuf[:, 0:n3], pbuf[:, HpWp:HpWp + n3]),
                         pbuf[:, 2 * HpWp:2 * HpWp + n3])                 # (Cout, n3)
        # stride-2 center selection + scatter into the zero-padded residual volume.
        # s_ref is a constant 0/1 matrix, so halo columns come out exactly 0.
        xp[...] = jnp.dot(md, s_ref[...], preferred_element_type=f32)     # (Cout, Rr)

        # ---- two residual blocks ----------------------------------------------------
        mr = mr_ref[...]                                                  # (1, Lr) 0/1

        def res_conv(widx):
            for t, (kd, kh, kw) in enumerate(_TAPS):
                off = (kd * Hr + kh) * Wr + kw
                patr[t * Cout:(t + 1) * Cout, :] = fr[:, off:off + Lr].astype(bf16)
            return (jnp.dot(wr_ref[widx], patr[...], preferred_element_type=f32)
                    + br_ref[widx])                                       # (Cout, Lr)

        for blk in range(2):
            fr[...] = jnp.maximum(xp[...], 0.0)            # relu(x); halos stay 0
            t0 = res_conv(2 * blk)
            fr[:, offr:offr + Lr] = jnp.maximum(t0 * mr, 0.0)   # relu(conv0), padded
            t1 = res_conv(2 * blk + 1)
            xp[:, offr:offr + Lr] = xp[:, offr:offr + Lr] + t1 * mr       # skip add

        o_ref[0] = xp[...]

    return kernel


def conv_sequence_forward(x_ncdhw, params):
    """ConvSequence forward matching the PyTorch module.  x: (N, Cin, D, H, W)."""
    N, Cin, D, H, W = x_ncdhw.shape
    Cout = int(params["conv_b"].shape[0])
    Do, Ho, Wo = (D + 1) // 2, (H + 1) // 2, (W + 1) // 2
    Hp, Wp = H + 2, W + 2
    HpWp = Hp * Wp
    Pp = (D + 2) * HpWp
    L0 = (D - 1) * HpWp + (H - 1) * Wp + W
    Hr, Wr = Ho + 2, Wo + 2
    HrWr = Hr * Wr
    Rr = (Do + 2) * HrWr
    Lr = (Do - 1) * HrWr + (Ho - 1) * Wr + Wo
    n3 = 2 * ((Do - 1) * HpWp + (Ho - 1) * Wp + (Wo - 1)) + 1
    f32, bf16 = jnp.float32, jnp.bfloat16

    # Zero-pad once in HBM and flatten spatial -> lane-dense (minor = Dp*Hp*Wp) input.
    xpad = jnp.pad(x_ncdhw.astype(f32),
                   ((0, 0), (0, 0), (1, 1), (1, 1), (1, 1))).reshape(N, Cin, Pp)

    def conv_mat(w):   # (3,3,3,Ci,Co) "DHWIO" -> (Co, 27*Ci), row order = tap*Ci + ci
        ci, co = w.shape[3], w.shape[4]
        return jnp.transpose(w.reshape(27, ci, co), (2, 0, 1)).reshape(co, 27 * ci)

    w0 = conv_mat(params["conv_w"]).astype(bf16)
    b0 = params["conv_b"].reshape(Cout, 1).astype(f32)
    wr = jnp.stack([conv_mat(params["res0_w0"]), conv_mat(params["res0_w1"]),
                    conv_mat(params["res1_w0"]), conv_mat(params["res1_w1"])]
                   ).astype(bf16)
    br = jnp.stack([params["res0_b0"], params["res0_b1"],
                    params["res1_b0"], params["res1_b1"]]
                   ).reshape(4, Cout, 1).astype(f32)

    # Additive mask (0 / -1e30): which flat stem-conv-output columns are real outputs.
    idx = jnp.arange(L0)
    rem = idx % HpWp
    valid0 = (rem // Wp < H) & (rem % Wp < W)
    a0 = jnp.where(valid0, 0.0, _NEG).astype(f32)[None, :]
    # Multiplicative mask (1 / 0) for the residual convs' flat outputs.
    idr = jnp.arange(Lr)
    remr = idr % HrWr
    validr = (remr // Wr < Ho) & (remr % Wr < Wo)
    mr = jnp.where(validr, 1.0, 0.0).astype(f32)[None, :]
    # 0/1 selection matrix: pooled stride-2 centers -> interior of the zero-padded
    # residual volume (all other columns are zero -> zero halos come for free).
    do_, ho_, wo_ = jnp.meshgrid(jnp.arange(Do), jnp.arange(Ho), jnp.arange(Wo),
                                 indexing="ij")
    rows = (2 * (do_ * HpWp + ho_ * Wp + wo_)).ravel()
    cols = ((do_ + 1) * HrWr + (ho_ + 1) * Wr + (wo_ + 1)).ravel()
    sel = jnp.zeros((n3, Rr), f32).at[rows, cols].set(1.0)

    kernel = _make_kernel(D, H, W, Cin, Cout)

    out_flat = pl.pallas_call(
        kernel,
        out_shape=jax.ShapeDtypeStruct((N, Cout, Rr), f32),
        grid=(N,),
        in_specs=[
            pl.BlockSpec((1, Cin, Pp), lambda n: (n, 0, 0)),
            pl.BlockSpec((Cout, 27 * Cin), lambda n: (0, 0)),
            pl.BlockSpec((Cout, 1), lambda n: (0, 0)),
            pl.BlockSpec((4, Cout, 27 * Cout), lambda n: (0, 0, 0)),
            pl.BlockSpec((4, Cout, 1), lambda n: (0, 0, 0)),
            pl.BlockSpec((1, L0), lambda n: (0, 0)),
            pl.BlockSpec((1, Lr), lambda n: (0, 0)),
            pl.BlockSpec((n3, Rr), lambda n: (0, 0)),
        ],
        out_specs=pl.BlockSpec((1, Cout, Rr), lambda n: (n, 0, 0)),
        scratch_shapes=[
            pltpu.VMEM((27 * Cin, L0), f32),     # stem im2col
            pltpu.VMEM((Cout, Pp), f32),         # padded conv-out / pool workspace A
            pltpu.VMEM((Cout, Pp), f32),         # pool workspace B (ping-pong)
            pltpu.VMEM((Cout, Rr), f32),         # running residual activation (padded)
            pltpu.VMEM((Cout, Rr), f32),         # relu'd padded conv input
            pltpu.VMEM((27 * Cout, Lr), bf16),   # residual im2col (bf16)
        ],
        compiler_params=pltpu.CompilerParams(
            dimension_semantics=("parallel",),
            vmem_limit_bytes=64 * 1024 * 1024),
    )(xpad, w0, b0, wr, br, a0, mr, sel)

    out = out_flat.reshape(N, Cout, Do + 2, Ho + 2, Wo + 2)[:, :, 1:-1, 1:-1, 1:-1]
    return out.astype(x_ncdhw.dtype)


# --------------------------------------------------------------------------
# Pure-JAX reference for validation.
# --------------------------------------------------------------------------
def reference_forward(x_ncdhw, params):
    x = jnp.transpose(x_ncdhw, (0, 2, 3, 4, 1))

    def conv(x, w, b):
        y = lax.conv_general_dilated(
            x, w, window_strides=(1, 1, 1),
            padding=((1, 1), (1, 1), (1, 1)),
            dimension_numbers=("NDHWC", "DHWIO", "NDHWC"),
            precision=lax.Precision.HIGHEST)
        return y + b

    x = conv(x, params["conv_w"], params["conv_b"])
    x = lax.reduce_window(x, -jnp.inf, lax.max,
                          (1, 3, 3, 3, 1), (1, 2, 2, 2, 1),
                          ((0, 0), (1, 1), (1, 1), (1, 1), (0, 0)))
    for blk in ("res0", "res1"):
        inputs = x
        t = conv(jax.nn.relu(x), params[blk + "_w0"], params[blk + "_b0"])
        x = conv(jax.nn.relu(t), params[blk + "_w1"], params[blk + "_b1"]) + inputs
    return jnp.transpose(x, (0, 4, 1, 2, 3))


if __name__ == "__main__":
    N, Cin, D, H, W = 2, 4, 8, 8, 8
    Cout = 8

    key = jax.random.PRNGKey(0)
    keys = jax.random.split(key, 6)
    x = jax.random.normal(keys[0], (N, Cin, D, H, W), jnp.float32)

    def init_conv(k, cin, cout):
        kw, kb = jax.random.split(k)
        scale = 1.0 / float((27 * cin) ** 0.5)
        w = jax.random.normal(kw, (3, 3, 3, cin, cout), jnp.float32) * scale
        b = jax.random.normal(kb, (cout,), jnp.float32) * 0.01
        return w, b

    params = {}
    params["conv_w"], params["conv_b"] = init_conv(keys[1], Cin, Cout)
    params["res0_w0"], params["res0_b0"] = init_conv(keys[2], Cout, Cout)
    params["res0_w1"], params["res0_b1"] = init_conv(keys[3], Cout, Cout)
    params["res1_w0"], params["res1_b0"] = init_conv(keys[4], Cout, Cout)
    params["res1_w1"], params["res1_b1"] = init_conv(keys[5], Cout, Cout)

    out = jax.jit(conv_sequence_forward)(x, params)
    out = jax.block_until_ready(out)

    expected_shape = (N, Cout, (D + 1) // 2, (H + 1) // 2, (W + 1) // 2)
    assert out.shape == expected_shape, (out.shape, expected_shape)

    ref = jax.block_until_ready(reference_forward(x, params))
    # Conv matmuls use bf16 MXU operands (per perf review) with f32 accumulation;
    # the reference is f32/HIGHEST, so allow a slightly looser tolerance.
    err = float(jnp.max(jnp.abs(out - ref)))
    assert jnp.allclose(out, ref, atol=3e-2, rtol=3e-2), err

    print("KERNEL_OK")
</pallas_src>

<mosaic_0001>
module attributes {stable_mosaic.version = 11 : i64} {
  func.func @kernel(%arg0: i32, %arg1: memref<1x4x1000xf32, #tpu.memory_space<vmem>>, %arg2: memref<8x108xbf16, #tpu.memory_space<vmem>>, %arg3: memref<8x1xf32, #tpu.memory_space<vmem>>, %arg4: memref<4x8x216xbf16, #tpu.memory_space<vmem>>, %arg5: memref<4x8x1xf32, #tpu.memory_space<vmem>>, %arg6: memref<1x778xf32, #tpu.memory_space<vmem>>, %arg7: memref<1x130xf32, #tpu.memory_space<vmem>>, %arg8: memref<667x216xf32, #tpu.memory_space<vmem>>, %arg9: memref<1x8x216xf32, #tpu.memory_space<vmem>>, %arg10: memref<108x778xf32, #tpu.memory_space<vmem>>, %arg11: memref<8x1000xf32, #tpu.memory_space<vmem>>, %arg12: memref<8x1000xf32, #tpu.memory_space<vmem>>, %arg13: memref<8x216xf32, #tpu.memory_space<vmem>>, %arg14: memref<8x216xf32, #tpu.memory_space<vmem>>, %arg15: memref<216x130xbf16, #tpu.memory_space<vmem>>) attributes {dimension_semantics = [#tpu.dimension_semantics<parallel>], iteration_bounds = array<i64: 2>, scalar_prefetch = 0 : i64, scratch_operands = 6 : i64, tpu.core_type = #tpu.core_type<tc>, window_params = [{transform_indices = @transform_0, window_bounds = array<i64: 1, 4, 1000>}, {pipeline_mode = #tpu.pipeline_mode<synchronous>, transform_indices = @transform_1, window_bounds = array<i64: 8, 108>}, {pipeline_mode = #tpu.pipeline_mode<synchronous>, transform_indices = @transform_2, window_bounds = array<i64: 8, 1>}, {pipeline_mode = #tpu.pipeline_mode<synchronous>, transform_indices = @transform_3, window_bounds = array<i64: 4, 8, 216>}, {pipeline_mode = #tpu.pipeline_mode<synchronous>, transform_indices = @transform_4, window_bounds = array<i64: 4, 8, 1>}, {pipeline_mode = #tpu.pipeline_mode<synchronous>, transform_indices = @transform_5, window_bounds = array<i64: 1, 778>}, {pipeline_mode = #tpu.pipeline_mode<synchronous>, transform_indices = @transform_6, window_bounds = array<i64: 1, 130>}, {pipeline_mode = #tpu.pipeline_mode<synchronous>, transform_indices = @transform_7, window_bounds = array<i64: 667, 216>}, {transform_indices = @transform_8, window_bounds = array<i64: 1, 8, 216>}]} {
    %c0 = arith.constant 0 : index
    %c0_0 = arith.constant 0 : index
    %c0_1 = arith.constant 0 : index
    %0 = vector.load %arg1[%c0, %c0_0, %c0_1] : memref<1x4x1000xf32, #tpu.memory_space<vmem>>, vector<1x4x778xf32>
    %1 = vector.shape_cast %0 : vector<1x4x778xf32> to vector<4x778xf32>
    %c0_2 = arith.constant 0 : index
    %c0_3 = arith.constant 0 : index
    %2 = vector.load %arg10[%c0_2, %c0_3] : memref<108x778xf32, #tpu.memory_space<vmem>>, vector<4x778xf32>
    tpu.vector_store %arg10[%c0_2, %c0_3], %1 {strides = array<i32>} : memref<108x778xf32, #tpu.memory_space<vmem>>, vector<4x778xf32>,
    %c0_4 = arith.constant 0 : index
    %c0_5 = arith.constant 0 : index
    %c1 = arith.constant 1 : index
    %3 = vector.load %arg1[%c0_4, %c0_5, %c1] : memref<1x4x1000xf32, #tpu.memory_space<vmem>>, vector<1x4x778xf32>
    %4 = vector.shape_cast %3 : vector<1x4x778xf32> to vector<4x778xf32>
    %c4 = arith.constant 4 : index
    %c0_6 = arith.constant 0 : index
    %5 = vector.load %arg10[%c4, %c0_6] : memref<108x778xf32, #tpu.memory_space<vmem>>, vector<4x778xf32>
    tpu.vector_store %arg10[%c4, %c0_6], %4 {strides = array<i32>} : memref<108x778xf32, #tpu.memory_space<vmem>>, vector<4x778xf32>,
    %c0_7 = arith.constant 0 : index
    %c0_8 = arith.constant 0 : index
    %c2 = arith.constant 2 : index
    %6 = vector.load %arg1[%c0_7, %c0_8, %c2] : memref<1x4x1000xf32, #tpu.memory_space<vmem>>, vector<1x4x778xf32>
    %7 = vector.shape_cast %6 : vector<1x4x778xf32> to vector<4x778xf32>
    %c8 = arith.constant 8 : index
    %c0_9 = arith.constant 0 : index
    %8 = vector.load %arg10[%c8, %c0_9] : memref<108x778xf32, #tpu.memory_space<vmem>>, vector<4x778xf32>
    tpu.vector_store %arg10[%c8, %c0_9], %7 {strides = array<i32>} : memref<108x778xf32, #tpu.memory_space<vmem>>, vector<4x778xf32>,
    %c0_10 = arith.constant 0 : index
    %c0_11 = arith.constant 0 : index
    %c10 = arith.constant 10 : index
    %9 = vector.load %arg1[%c0_10, %c0_11, %c10] : memref<1x4x1000xf32, #tpu.memory_space<vmem>>, vector<1x4x778xf32>
    %10 = vector.shape_cast %9 : vector<1x4x778xf32> to vector<4x778xf32>
    %c12 = arith.constant 12 : index
    %c0_12 = arith.constant 0 : index
    %11 = vector.load %arg10[%c12, %c0_12] : memref<108x778xf32, #tpu.memory_space<vmem>>, vector<4x778xf32>
    tpu.vector_store %arg10[%c12, %c0_12], %10 {strides = array<i32>} : memref<108x778xf32, #tpu.memory_space<vmem>>, vector<4x778xf32>,
    %c0_13 = arith.constant 0 : index
    %c0_14 = arith.constant 0 : index
    %c11 = arith.constant 11 : index
    %12 = vector.load %arg1[%c0_13, %c0_14, %c11] : memref<1x4x1000xf32, #tpu.memory_space<vmem>>, vector<1x4x778xf32>
    %13 = vector.shape_cast %12 : vector<1x4x778xf32> to vector<4x778xf32>
    %c16 = arith.constant 16 : index
    %c0_15 = arith.constant 0 : index
    %14 = vector.load %arg10[%c16, %c0_15] : memref<108x778xf32, #tpu.memory_space<vmem>>, vector<4x778xf32>
    tpu.vector_store %arg10[%c16, %c0_15], %13 {strides = array<i32>} : memref<108x778xf32, #tpu.memory_space<vmem>>, vector<4x778xf32>,
    %c0_16 = arith.constant 0 : index
    %c0_17 = arith.constant 0 : index
    %c12_18 = arith.constant 12 : index
    %15 = vector.load %arg1[%c0_16, %c0_17, %c12_18] : memref<1x4x1000xf32, #tpu.memory_space<vmem>>, vector<1x4x778xf32>
    %16 = vector.shape_cast %15 : vector<1x4x778xf32> to vector<4x778xf32>
    %c20 = arith.constant 20 : index
    %c0_19 = arith.constant 0 : index
    %17 = vector.load %arg10[%c20, %c0_19] : memref<108x778xf32, #tpu.memory_space<vmem>>, vector<4x778xf32>
    tpu.vector_store %arg10[%c20, %c0_19], %16 {strides = array<i32>} : memref<108x778xf32, #tpu.memory_space<vmem>>, vector<4x778xf32>,
    %c0_20 = arith.constant 0 : index
    %c0_21 = arith.constant 0 : index
    %c20_22 = arith.constant 20 : index
    %18 = vector.load %arg1[%c0_20, %c0_21, %c20_22] : memref<1x4x1000xf32, #tpu.memory_space<vmem>>, vector<1x4x778xf32>
    %19 = vector.shape_cast %18 : vector<1x4x778xf32> to vector<4x778xf32>
    %c24 = arith.constant 24 : index
    %c0_23 = arith.constant 0 : index
    %20 = vector.load %arg10[%c24, %c0_23] : memref<108x778xf32, #tpu.memory_space<vmem>>, vector<4x778xf32>
    tpu.vector_store %arg10[%c24, %c0_23], %19 {strides = array<i32>} : memref<108x778xf32, #tpu.memory_space<vmem>>, vector<4x778xf32>,
    %c0_24 = arith.constant 0 : index
    %c0_25 = arith.constant 0 : index
    %c21 = arith.constant 21 : index
    %21 = vector.load %arg1[%c0_24, %c0_25, %c21] : memref<1x4x1000xf32, #tpu.memory_space<vmem>>, vector<1x4x778xf32>
    %22 = vector.shape_cast %21 : vector<1x4x778xf32> to vector<4x778xf32>
    %c28 = arith.constant 28 : index
    %c0_26 = arith.constant 0 : index
    %23 = vector.load %arg10[%c28, %c0_26] : memref<108x778xf32, #tpu.memory_space<vmem>>, vector<4x778xf32>
    tpu.vector_store %arg10[%c28, %c0_26], %22 {strides = array<i32>} : memref<108x778xf32, #tpu.memory_space<vmem>>, vector<4x778xf32>,
    %c0_27 = arith.constant 0 : index
    %c0_28 = arith.constant 0 : index
    %c22 = arith.constant 22 : index
    %24 = vector.load %arg1[%c0_27, %c0_28, %c22] : memref<1x4x1000xf32, #tpu.memory_space<vmem>>, vector<1x4x778xf32>
    %25 = vector.shape_cast %24 : vector<1x4x778xf32> to vector<4x778xf32>
    %c32 = arith.constant 32 : index
    %c0_29 = arith.constant 0 : index
    %26 = vector.load %arg10[%c32, %c0_29] : memref<108x778xf32, #tpu.memory_space<vmem>>, vector<4x778xf32>
    tpu.vector_store %arg10[%c32, %c0_29], %25 {strides = array<i32>} : memref<108x778xf32, #tpu.memory_space<vmem>>, vector<4x778xf32>,
    %c0_30 = arith.constant 0 : index
    %c0_31 = arith.constant 0 : index
    %c100 = arith.constant 100 : index
    %27 = vector.load %arg1[%c0_30, %c0_31, %c100] : memref<1x4x1000xf32, #tpu.memory_space<vmem>>, vector<1x4x778xf32>
    %28 = vector.shape_cast %27 : vector<1x4x778xf32> to vector<4x778xf32>
    %c36 = arith.constant 36 : index
    %c0_32 = arith.constant 0 : index
    %29 = vector.load %arg10[%c36, %c0_32] : memref<108x778xf32, #tpu.memory_space<vmem>>, vector<4x778xf32>
    tpu.vector_store %arg10[%c36, %c0_32], %28 {strides = array<i32>} : memref<108x778xf32, #tpu.memory_space<vmem>>, vector<4x778xf32>,
    %c0_33 = arith.constant 0 : index
    %c0_34 = arith.constant 0 : index
    %c101 = arith.constant 101 : index
    %30 = vector.load %arg1[%c0_33, %c0_34, %c101] : memref<1x4x1000xf32, #tpu.memory_space<vmem>>, vector<1x4x778xf32>
    %31 = vector.shape_cast %30 : vector<1x4x778xf32> to vector<4x778xf32>
    %c40 = arith.constant 40 : index
    %c0_35 = arith.constant 0 : index
    %32 = vector.load %arg10[%c40, %c0_35] : memref<108x778xf32, #tpu.memory_space<vmem>>, vector<4x778xf32>
    tpu.vector_store %arg10[%c40, %c0_35], %31 {strides = array<i32>} : memref<108x778xf32, #tpu.memory_space<vmem>>, vector<4x778xf32>,
    %c0_36 = arith.constant 0 : index
    %c0_37 = arith.constant 0 : index
    %c102 = arith.constant 102 : index
    %33 = vector.load %arg1[%c0_36, %c0_37, %c102] : memref<1x4x1000xf32, #tpu.memory_space<vmem>>, vector<1x4x778xf32>
    %34 = vector.shape_cast %33 : vector<1x4x778xf32> to vector<4x778xf32>
    %c44 = arith.constant 44 : index
    %c0_38 = arith.constant 0 : index
    %35 = vector.load %arg10[%c44, %c0_38] : memref<108x778xf32, #tpu.memory_space<vmem>>, vector<4x778xf32>
    tpu.vector_store %arg10[%c44, %c0_38], %34 {strides = array<i32>} : memref<108x778xf32, #tpu.memory_space<vmem>>, vector<4x778xf32>,
    %c0_39 = arith.constant 0 : index
    %c0_40 = arith.constant 0 : index
    %c110 = arith.constant 110 : index
    %36 = vector.load %arg1[%c0_39, %c0_40, %c110] : memref<1x4x1000xf32, #tpu.memory_space<vmem>>, vector<1x4x778xf32>
    %37 = vector.shape_cast %36 : vector<1x4x778xf32> to vector<4x778xf32>
    %c48 = arith.constant 48 : index
    %c0_41 = arith.constant 0 : index
    %38 = vector.load %arg10[%c48, %c0_41] : memref<108x778xf32, #tpu.memory_space<vmem>>, vector<4x778xf32>
    tpu.vector_store %arg10[%c48, %c0_41], %37 {strides = array<i32>} : memref<108x778xf32, #tpu.memory_space<vmem>>, vector<4x778xf32>,
    %c0_42 = arith.constant 0 : index
    %c0_43 = arith.constant 0 : index
    %c111 = arith.constant 111 : index
    %39 = vector.load %arg1[%c0_42, %c0_43, %c111] : memref<1x4x1000xf32, #tpu.memory_space<vmem>>, vector<1x4x778xf32>
    %40 = vector.shape_cast %39 : vector<1x4x778xf32> to vector<4x778xf32>
    %c52 = arith.constant 52 : index
    %c0_44 = arith.constant 0 : index
    %41 = vector.load %arg10[%c52, %c0_44] : memref<108x778xf32, #tpu.memory_space<vmem>>, vector<4x778xf32>
    tpu.vector_store %arg10[%c52, %c0_44], %40 {strides = array<i32>} : memref<108x778xf32, #tpu.memory_space<vmem>>, vector<4x778xf32>,
    %c0_45 = arith.constant 0 : index
    %c0_46 = arith.constant 0 : index
    %c112 = arith.constant 112 : index
    %42 = vector.load %arg1[%c0_45, %c0_46, %c112] : memref<1x4x1000xf32, #tpu.memory_space<vmem>>, vector<1x4x778xf32>
    %43 = vector.shape_cast %42 : vector<1x4x778xf32> to vector<4x778xf32>
    %c56 = arith.constant 56 : index
    %c0_47 = arith.constant 0 : index
    %44 = vector.load %arg10[%c56, %c0_47] : memref<108x778xf32, #tpu.memory_space<vmem>>, vector<4x778xf32>
    tpu.vector_store %arg10[%c56, %c0_47], %43 {strides = array<i32>} : memref<108x778xf32, #tpu.memory_space<vmem>>, vector<4x778xf32>,
    %c0_48 = arith.constant 0 : index
    %c0_49 = arith.constant 0 : index
    %c120 = arith.constant 120 : index
    %45 = vector.load %arg1[%c0_48, %c0_49, %c120] : memref<1x4x1000xf32, #tpu.memory_space<vmem>>, vector<1x4x778xf32>
    %46 = vector.shape_cast %45 : vector<1x4x778xf32> to vector<4x778xf32>
    %c60 = arith.constant 60 : index
    %c0_50 = arith.constant 0 : index
    %47 = vector.load %arg10[%c60, %c0_50] : memref<108x778xf32, #tpu.memory_space<vmem>>, vector<4x778xf32>
    tpu.vector_store %arg10[%c60, %c0_50], %46 {strides = array<i32>} : memref<108x778xf32, #tpu.memory_space<vmem>>, vector<4x778xf32>,
    %c0_51 = arith.constant 0 : index
    %c0_52 = arith.constant 0 : index
    %c121 = arith.constant 121 : index
    %48 = vector.load %arg1[%c0_51, %c0_52, %c121] : memref<1x4x1000xf32, #tpu.memory_space<vmem>>, vector<1x4x778xf32>
    %49 = vector.shape_cast %48 : vector<1x4x778xf32> to vector<4x778xf32>
    %c64 = arith.constant 64 : index
    %c0_53 = arith.constant 0 : index
    %50 = vector.load %arg10[%c64, %c0_53] : memref<108x778xf32, #tpu.memory_space<vmem>>, vector<4x778xf32>
    tpu.vector_store %arg10[%c64, %c0_53], %49 {strides = array<i32>} : memref<108x778xf32, #tpu.memory_space<vmem>>, vector<4x778xf32>,
    %c0_54 = arith.constant 0 : index
    %c0_55 = arith.constant 0 : index
    %c122 = arith.constant 122 : index
    %51 = vector.load %arg1[%c0_54, %c0_55, %c122] : memref<1x4x1000xf32, #tpu.memory_space<vmem>>, vector<1x4x778xf32>
    %52 = vector.shape_cast %51 : vector<1x4x778xf32> to vector<4x778xf32>
    %c68 = arith.constant 68 : index
    %c0_56 = arith.constant 0 : index
    %53 = vector.load %arg10[%c68, %c0_56] : memref<108x778xf32, #tpu.memory_space<vmem>>, vector<4x778xf32>
    tpu.vector_store %arg10[%c68, %c0_56], %52 {strides = array<i32>} : memref<108x778xf32, #tpu.memory_space<vmem>>, vector<4x778xf32>,
    %c0_57 = arith.constant 0 : index
    %c0_58 = arith.constant 0 : index
    %c200 = arith.constant 200 : index
    %54 = vector.load %arg1[%c0_57, %c0_58, %c200] : memref<1x4x1000xf32, #tpu.memory_space<vmem>>, vector<1x4x778xf32>
    %55 = vector.shape_cast %54 : vector<1x4x778xf32> to vector<4x778xf32>
    %c72 = arith.constant 72 : index
    %c0_59 = arith.constant 0 : index
    %56 = vector.load %arg10[%c72, %c0_59] : memref<108x778xf32, #tpu.memory_space<vmem>>, vector<4x778xf32>
    tpu.vector_store %arg10[%c72, %c0_59], %55 {strides = array<i32>} : memref<108x778xf32, #tpu.memory_space<vmem>>, vector<4x778xf32>,
    %c0_60 = arith.constant 0 : index
    %c0_61 = arith.constant 0 : index
    %c201 = arith.constant 201 : index
    %57 = vector.load %arg1[%c0_60, %c0_61, %c201] : memref<1x4x1000xf32, #tpu.memory_space<vmem>>, vector<1x4x778xf32>
    %58 = vector.shape_cast %57 : vector<1x4x778xf32> to vector<4x778xf32>
    %c76 = arith.constant 76 : index
    %c0_62 = arith.constant 0 : index
    %59 = vector.load %arg10[%c76, %c0_62] : memref<108x778xf32, #tpu.memory_space<vmem>>, vector<4x778xf32>
    tpu.vector_store %arg10[%c76, %c0_62], %58 {strides = array<i32>} : memref<108x778xf32, #tpu.memory_space<vmem>>, vector<4x778xf32>,
    %c0_63 = arith.constant 0 : index
    %c0_64 = arith.constant 0 : index
    %c202 = arith.constant 202 : index
    %60 = vector.load %arg1[%c0_63, %c0_64, %c202] : memref<1x4x1000xf32, #tpu.memory_space<vmem>>, vector<1x4x778xf32>
    %61 = vector.shape_cast %60 : vector<1x4x778xf32> to vector<4x778xf32>
    %c80 = arith.constant 80 : index
    %c0_65 = arith.constant 0 : index
    %62 = vector.load %arg10[%c80, %c0_65] : memref<108x778xf32, #tpu.memory_space<vmem>>, vector<4x778xf32>
    tpu.vector_store %arg10[%c80, %c0_65], %61 {strides = array<i32>} : memref<108x778xf32, #tpu.memory_space<vmem>>, vector<4x778xf32>,
    %c0_66 = arith.constant 0 : index
    %c0_67 = arith.constant 0 : index
    %c210 = arith.constant 210 : index
    %63 = vector.load %arg1[%c0_66, %c0_67, %c210] : memref<1x4x1000xf32, #tpu.memory_space<vmem>>, vector<1x4x778xf32>
    %64 = vector.shape_cast %63 : vector<1x4x778xf32> to vector<4x778xf32>
    %c84 = arith.constant 84 : index
    %c0_68 = arith.constant 0 : index
    %65 = vector.load %arg10[%c84, %c0_68] : memref<108x778xf32, #tpu.memory_space<vmem>>, vector<4x778xf32>
    tpu.vector_store %arg10[%c84, %c0_68], %64 {strides = array<i32>} : memref<108x778xf32, #tpu.memory_space<vmem>>, vector<4x778xf32>,
    %c0_69 = arith.constant 0 : index
    %c0_70 = arith.constant 0 : index
    %c211 = arith.constant 211 : index
    %66 = vector.load %arg1[%c0_69, %c0_70, %c211] : memref<1x4x1000xf32, #tpu.memory_space<vmem>>, vector<1x4x778xf32>
    %67 = vector.shape_cast %66 : vector<1x4x778xf32> to vector<4x778xf32>
    %c88 = arith.constant 88 : index
    %c0_71 = arith.constant 0 : index
    %68 = vector.load %arg10[%c88, %c0_71] : memref<108x778xf32, #tpu.memory_space<vmem>>, vector<4x778xf32>
    tpu.vector_store %arg10[%c88, %c0_71], %67 {strides = array<i32>} : memref<108x778xf32, #tpu.memory_space<vmem>>, vector<4x778xf32>,
    %c0_72 = arith.constant 0 : index
    %c0_73 = arith.constant 0 : index
    %c212 = arith.constant 212 : index
    %69 = vector.load %arg1[%c0_72, %c0_73, %c212] : memref<1x4x1000xf32, #tpu.memory_space<vmem>>, vector<1x4x778xf32>
    %70 = vector.shape_cast %69 : vector<1x4x778xf32> to vector<4x778xf32>
    %c92 = arith.constant 92 : index
    %c0_74 = arith.constant 0 : index
    %71 = vector.load %arg10[%c92, %c0_74] : memref<108x778xf32, #tpu.memory_space<vmem>>, vector<4x778xf32>
    tpu.vector_store %arg10[%c92, %c0_74], %70 {strides = array<i32>} : memref<108x778xf32, #tpu.memory_space<vmem>>, vector<4x778xf32>,
    %c0_75 = arith.constant 0 : index
    %c0_76 = arith.constant 0 : index
    %c220 = arith.constant 220 : index
    %72 = vector.load %arg1[%c0_75, %c0_76, %c220] : memref<1x4x1000xf32, #tpu.memory_space<vmem>>, vector<1x4x778xf32>
    %73 = vector.shape_cast %72 : vector<1x4x778xf32> to vector<4x778xf32>
    %c96 = arith.constant 96 : index
    %c0_77 = arith.constant 0 : index
    %74 = vector.load %arg10[%c96, %c0_77] : memref<108x778xf32, #tpu.memory_space<vmem>>, vector<4x778xf32>
    tpu.vector_store %arg10[%c96, %c0_77], %73 {strides = array<i32>} : memref<108x778xf32, #tpu.memory_space<vmem>>, vector<4x778xf32>,
    %c0_78 = arith.constant 0 : index
    %c0_79 = arith.constant 0 : index
    %c221 = arith.constant 221 : index
    %75 = vector.load %arg1[%c0_78, %c0_79, %c221] : memref<1x4x1000xf32, #tpu.memory_space<vmem>>, vector<1x4x778xf32>
    %76 = vector.shape_cast %75 : vector<1x4x778xf32> to vector<4x778xf32>
    %c100_80 = arith.constant 100 : index
    %c0_81 = arith.constant 0 : index
    %77 = vector.load %arg10[%c100_80, %c0_81] : memref<108x778xf32, #tpu.memory_space<vmem>>, vector<4x778xf32>
    tpu.vector_store %arg10[%c100_80, %c0_81], %76 {strides = array<i32>} : memref<108x778xf32, #tpu.memory_space<vmem>>, vector<4x778xf32>,
    %c0_82 = arith.constant 0 : index
    %c0_83 = arith.constant 0 : index
    %c222 = arith.constant 222 : index
    %78 = vector.load %arg1[%c0_82, %c0_83, %c222] : memref<1x4x1000xf32, #tpu.memory_space<vmem>>, vector<1x4x778xf32>
    %79 = vector.shape_cast %78 : vector<1x4x778xf32> to vector<4x778xf32>
    %c104 = arith.constant 104 : index
    %c0_84 = arith.constant 0 : index
    %80 = vector.load %arg10[%c104, %c0_84] : memref<108x778xf32, #tpu.memory_space<vmem>>, vector<4x778xf32>
    tpu.vector_store %arg10[%c104, %c0_84], %79 {strides = array<i32>} : memref<108x778xf32, #tpu.memory_space<vmem>>, vector<4x778xf32>,
    %c0_85 = arith.constant 0 : index
    %c0_86 = arith.constant 0 : index
    %81 = vector.load %arg2[%c0_85, %c0_86] : memref<8x108xbf16, #tpu.memory_space<vmem>>, vector<8x108xbf16>
    %c0_87 = arith.constant 0 : index
    %c0_88 = arith.constant 0 : index
    %82 = vector.load %arg10[%c0_87, %c0_88] : memref<108x778xf32, #tpu.memory_space<vmem>>, vector<108x778xf32>
    %83 = arith.truncf %82 : vector<108x778xf32> to vector<108x778xbf16>
    %cst = arith.constant dense<0.000000e+00> : vector<8x778xf32>
    %84 = tpu.matmul %81, %83, %cst {dimension_numbers = #tpu.dot_dimension_numbers<[1], [0], [0], [1], [0, 0, 1, 1], [], []>} : vector<8x108xbf16>, vector<108x778xbf16>, vector<8x778xf32> -> vector<8x778xf32>
    %c0_89 = arith.constant 0 : index
    %c0_90 = arith.constant 0 : index
    %85 = vector.load %arg3[%c0_89, %c0_90] : memref<8x1xf32, #tpu.memory_space<vmem>>, vector<8x1xf32>
    %86 = vector.broadcast %85 : vector<8x1xf32> to vector<8x778xf32>
    %87 = arith.addf %84, %86 : vector<8x778xf32>
    %cst_91 = arith.constant -1.000000e+30 : f32
    %88 = vector.broadcast %cst_91 : f32 to vector<8x111xf32>
    %c0_92 = arith.constant 0 : index
    %c0_93 = arith.constant 0 : index
    %89 = vector.load %arg11[%c0_92, %c0_93] : memref<8x1000xf32, #tpu.memory_space<vmem>>, vector<8x111xf32>
    tpu.vector_store %arg11[%c0_92, %c0_93], %88 {strides = array<i32>} : memref<8x1000xf32, #tpu.memory_space<vmem>>, vector<8x111xf32>,
    %cst_94 = arith.constant -1.000000e+30 : f32
    %90 = vector.broadcast %cst_94 : f32 to vector<8x111xf32>
    %c0_95 = arith.constant 0 : index
    %c889 = arith.constant 889 : index
    %91 = vector.load %arg11[%c0_95, %c889] : memref<8x1000xf32, #tpu.memory_space<vmem>>, vector<8x111xf32>
    tpu.vector_store %arg11[%c0_95, %c889], %90 {strides = array<i32>} : memref<8x1000xf32, #tpu.memory_space<vmem>>, vector<8x111xf32>,
    %c0_96 = arith.constant 0 : index
    %c0_97 = arith.constant 0 : index
    %92 = vector.load %arg6[%c0_96, %c0_97] : memref<1x778xf32, #tpu.memory_space<vmem>>, vector<1x778xf32>
    %93 = vector.broadcast %92 : vector<1x778xf32> to vector<8x778xf32>
    %94 = arith.addf %87, %93 : vector<8x778xf32>
    %c0_98 = arith.constant 0 : index
    %c111_99 = arith.constant 111 : index
    %95 = vector.load %arg11[%c0_98, %c111_99] : memref<8x1000xf32, #tpu.memory_space<vmem>>, vector<8x778xf32>
    tpu.vector_store %arg11[%c0_98, %c111_99], %94 {strides = array<i32>} : memref<8x1000xf32, #tpu.memory_space<vmem>>, vector<8x778xf32>,
    %c0_100 = arith.constant 0 : index
    %c0_101 = arith.constant 0 : index
    %96 = vector.load %arg11[%c0_100, %c0_101] : memref<8x1000xf32, #tpu.memory_space<vmem>>, vector<8x887xf32>
    %c0_102 = arith.constant 0 : index
    %c1_103 = arith.constant 1 : index
    %97 = vector.load %arg11[%c0_102, %c1_103] : memref<8x1000xf32, #tpu.memory_space<vmem>>, vector<8x887xf32>
    %98 = arith.maximumf %96, %97 : vector<8x887xf32>
    %c0_104 = arith.constant 0 : index
    %c2_105 = arith.constant 2 : index
    %99 = vector.load %arg11[%c0_104, %c2_105] : memref<8x1000xf32, #tpu.memory_space<vmem>>, vector<8x887xf32>
    %100 = arith.maximumf %98, %99 : vector<8x887xf32>
    %c0_106 = arith.constant 0 : index
    %c0_107 = arith.constant 0 : index
    %101 = vector.load %arg12[%c0_106, %c0_107] : memref<8x1000xf32, #tpu.memory_space<vmem>>, vector<8x887xf32>
    tpu.vector_store %arg12[%c0_106, %c0_107], %100 {strides = array<i32>} : memref<8x1000xf32, #tpu.memory_space<vmem>>, vector<8x887xf32>,
    %c0_108 = arith.constant 0 : index
    %c0_109 = arith.constant 0 : index
    %102 = vector.load %arg12[%c0_108, %c0_109] : memref<8x1000xf32, #tpu.memory_space<vmem>>, vector<8x867xf32>
    %c0_110 = arith.constant 0 : index
    %c10_111 = arith.constant 10 : index
    %103 = vector.load %arg12[%c0_110, %c10_111] : memref<8x1000xf32, #tpu.memory_space<vmem>>, vector<8x867xf32>
    %104 = arith.maximumf %102, %103 : vector<8x867xf32>
    %c0_112 = arith.constant 0 : index
    %c20_113 = arith.constant 20 : index
    %105 = vector.load %arg12[%c0_112, %c20_113] : memref<8x1000xf32, #tpu.memory_space<vmem>>, vector<8x867xf32>
    %106 = arith.maximumf %104, %105 : vector<8x867xf32>
    %c0_114 = arith.constant 0 : index
    %c0_115 = arith.constant 0 : index
    %107 = vector.load %arg11[%c0_114, %c0_115] : memref<8x1000xf32, #tpu.memory_space<vmem>>, vector<8x867xf32>
    tpu.vector_store %arg11[%c0_114, %c0_115], %106 {strides = array<i32>} : memref<8x1000xf32, #tpu.memory_space<vmem>>, vector<8x867xf32>,
    %c0_116 = arith.constant 0 : index
    %c0_117 = arith.constant 0 : index
    %108 = vector.load %arg11[%c0_116, %c0_117] : memref<8x1000xf32, #tpu.memory_space<vmem>>, vector<8x667xf32>
    %c0_118 = arith.constant 0 : index
    %c100_119 = arith.constant 100 : index
    %109 = vector.load %arg11[%c0_118, %c100_119] : memref<8x1000xf32, #tpu.memory_space<vmem>>, vector<8x667xf32>
    %110 = arith.maximumf %108, %109 : vector<8x667xf32>
    %c0_120 = arith.constant 0 : index
    %c200_121 = arith.constant 200 : index
    %111 = vector.load %arg11[%c0_120, %c200_121] : memref<8x1000xf32, #tpu.memory_space<vmem>>, vector<8x667xf32>
    %112 = arith.maximumf %110, %111 : vector<8x667xf32>
    %c0_122 = arith.constant 0 : index
    %c0_123 = arith.constant 0 : index
    %113 = vector.load %arg8[%c0_122, %c0_123] : memref<667x216xf32, #tpu.memory_space<vmem>>, vector<667x216xf32>
    %cst_124 = arith.constant dense<0.000000e+00> : vector<8x216xf32>
    %114 = tpu.matmul %112, %113, %cst_124 {dimension_numbers = #tpu.dot_dimension_numbers<[1], [0], [0], [1], [0, 0, 1, 1], [], []>} : vector<8x667xf32>, vector<667x216xf32>, vector<8x216xf32> -> vector<8x216xf32>
    %c0_125 = arith.constant 0 : index
    %c0_126 = arith.constant 0 : index
    %115 = vector.load %arg13[%c0_125, %c0_126] : memref<8x216xf32, #tpu.memory_space<vmem>>, vector<8x216xf32>
    tpu.vector_store %arg13[%c0_125, %c0_126], %114 {strides = array<i32>} : memref<8x216xf32, #tpu.memory_space<vmem>>, vector<8x216xf32>,
    %c0_127 = arith.constant 0 : index
    %c0_128 = arith.constant 0 : index
    %116 = vector.load %arg7[%c0_127, %c0_128] : memref<1x130xf32, #tpu.memory_space<vmem>>, vector<1x130xf32>
    %c0_129 = arith.constant 0 : index
    %c0_130 = arith.constant 0 : index
    %117 = vector.load %arg13[%c0_129, %c0_130] : memref<8x216xf32, #tpu.memory_space<vmem>>, vector<8x216xf32>
    %cst_131 = arith.constant 0.000000e+00 : f32
    %118 = vector.broadcast %cst_131 : f32 to vector<8x216xf32>
    %119 = arith.maximumf %117, %118 : vector<8x216xf32>
    %c0_132 = arith.constant 0 : index
    %c0_133 = arith.constant 0 : index
    %120 = vector.load %arg14[%c0_132, %c0_133] : memref<8x216xf32, #tpu.memory_space<vmem>>, vector<8x216xf32>
    tpu.vector_store %arg14[%c0_132, %c0_133], %119 {strides = array<i32>} : memref<8x216xf32, #tpu.memory_space<vmem>>, vector<8x216xf32>,
    %c0_134 = arith.constant 0 : index
    %c0_135 = arith.constant 0 : index
    %121 = vector.load %arg14[%c0_134, %c0_135] : memref<8x216xf32, #tpu.memory_space<vmem>>, vector<8x130xf32>
    %122 = arith.truncf %121 : vector<8x130xf32> to vector<8x130xbf16>
    %c0_136 = arith.constant 0 : index
    %c0_137 = arith.constant 0 : index
    %123 = vector.load %arg15[%c0_136, %c0_137] : memref<216x130xbf16, #tpu.memory_space<vmem>>, vector<8x130xbf16>
    tpu.vector_store %arg15[%c0_136, %c0_137], %122 {strides = array<i32>} : memref<216x130xbf16, #tpu.memory_space<vmem>>, vector<8x130xbf16>,
    %c0_138 = arith.constant 0 : index
    %c1_139 = arith.constant 1 : index
    %124 = vector.load %arg14[%c0_138, %c1_139] : memref<8x216xf32, #tpu.memory_space<vmem>>, vector<8x130xf32>
    %125 = arith.truncf %124 : vector<8x130xf32> to vector<8x130xbf16>
    %c8_140 = arith.constant 8 : index
    %c0_141 = arith.constant 0 : index
    %126 = vector.load %arg15[%c8_140, %c0_141] : memref<216x130xbf16, #tpu.memory_space<vmem>>, vector<8x130xbf16>
    tpu.vector_store %arg15[%c8_140, %c0_141], %125 {strides = array<i32>} : memref<216x130xbf16, #tpu.memory_space<vmem>>, vector<8x130xbf16>,
    %c0_142 = arith.constant 0 : index
    %c2_143 = arith.constant 2 : index
    %127 = vector.load %arg14[%c0_142, %c2_143] : memref<8x216xf32, #tpu.memory_space<vmem>>, vector<8x130xf32>
    %128 = arith.truncf %127 : vector<8x130xf32> to vector<8x130xbf16>
    %c16_144 = arith.constant 16 : index
    %c0_145 = arith.constant 0 : index
    %129 = vector.load %arg15[%c16_144, %c0_145] : memref<216x130xbf16, #tpu.memory_space<vmem>>, vector<8x130xbf16>
    tpu.vector_store %arg15[%c16_144, %c0_145], %128 {strides = array<i32>} : memref<216x130xbf16, #tpu.memory_space<vmem>>, vector<8x130xbf16>,
    %c0_146 = arith.constant 0 : index
    %c6 = arith.constant 6 : index
    %130 = vector.load %arg14[%c0_146, %c6] : memref<8x216xf32, #tpu.memory_space<vmem>>, vector<8x130xf32>
    %131 = arith.truncf %130 : vector<8x130xf32> to vector<8x130xbf16>
    %c24_147 = arith.constant 24 : index
    %c0_148 = arith.constant 0 : index
    %132 = vector.load %arg15[%c24_147, %c0_148] : memref<216x130xbf16, #tpu.memory_space<vmem>>, vector<8x130xbf16>
    tpu.vector_store %arg15[%c24_147, %c0_148], %131 {strides = array<i32>} : memref<216x130xbf16, #tpu.memory_space<vmem>>, vector<8x130xbf16>,
    %c0_149 = arith.constant 0 : index
    %c7 = arith.constant 7 : index
    %133 = vector.load %arg14[%c0_149, %c7] : memref<8x216xf32, #tpu.memory_space<vmem>>, vector<8x130xf32>
    %134 = arith.truncf %133 : vector<8x130xf32> to vector<8x130xbf16>
    %c32_150 = arith.constant 32 : index
    %c0_151 = arith.constant 0 : index
    %135 = vector.load %arg15[%c32_150, %c0_151] : memref<216x130xbf16, #tpu.memory_space<vmem>>, vector<8x130xbf16>
    tpu.vector_store %arg15[%c32_150, %c0_151], %134 {strides = array<i32>} : memref<216x130xbf16, #tpu.memory_space<vmem>>, vector<8x130xbf16>,
    %c0_152 = arith.constant 0 : index
    %c8_153 = arith.constant 8 : index
    %136 = vector.load %arg14[%c0_152, %c8_153] : memref<8x216xf32, #tpu.memory_space<vmem>>, vector<8x130xf32>
    %137 = arith.truncf %136 : vector<8x130xf32> to vector<8x130xbf16>
    %c40_154 = arith.constant 40 : index
    %c0_155 = arith.constant 0 : index
    %138 = vector.load %arg15[%c40_154, %c0_155] : memref<216x130xbf16, #tpu.memory_space<vmem>>, vector<8x130xbf16>
    tpu.vector_store %arg15[%c40_154, %c0_155], %137 {strides = array<i32>} : memref<216x130xbf16, #tpu.memory_space<vmem>>, vector<8x130xbf16>,
    %c0_156 = arith.constant 0 : index
    %c12_157 = arith.constant 12 : index
    %139 = vector.load %arg14[%c0_156, %c12_157] : memref<8x216xf32, #tpu.memory_space<vmem>>, vector<8x130xf32>
    %140 = arith.truncf %139 : vector<8x130xf32> to vector<8x130xbf16>
    %c48_158 = arith.constant 48 : index
    %c0_159 = arith.constant 0 : index
    %141 = vector.load %arg15[%c48_158, %c0_159] : memref<216x130xbf16, #tpu.memory_space<vmem>>, vector<8x130xbf16>
    tpu.vector_store %arg15[%c48_158, %c0_159], %140 {strides = array<i32>} : memref<216x130xbf16, #tpu.memory_space<vmem>>, vector<8x130xbf16>,
    %c0_160 = arith.constant 0 : index
    %c13 = arith.constant 13 : index
    %142 = vector.load %arg14[%c0_160, %c13] : memref<8x216xf32, #tpu.memory_space<vmem>>, vector<8x130xf32>
    %143 = arith.truncf %142 : vector<8x130xf32> to vector<8x130xbf16>
    %c56_161 = arith.constant 56 : index
    %c0_162 = arith.constant 0 : index
    %144 = vector.load %arg15[%c56_161, %c0_162] : memref<216x130xbf16, #tpu.memory_space<vmem>>, vector<8x130xbf16>
    tpu.vector_store %arg15[%c56_161, %c0_162], %143 {strides = array<i32>} : memref<216x130xbf16, #tpu.memory_space<vmem>>, vector<8x130xbf16>,
    %c0_163 = arith.constant 0 : index
    %c14 = arith.constant 14 : index
    %145 = vector.load %arg14[%c0_163, %c14] : memref<8x216xf32, #tpu.memory_space<vmem>>, vector<8x130xf32>
    %146 = arith.truncf %145 : vector<8x130xf32> to vector<8x130xbf16>
    %c64_164 = arith.constant 64 : index
    %c0_165 = arith.constant 0 : index
    %147 = vector.load %arg15[%c64_164, %c0_165] : memref<216x130xbf16, #tpu.memory_space<vmem>>, vector<8x130xbf16>
    tpu.vector_store %arg15[%c64_164, %c0_165], %146 {strides = array<i32>} : memref<216x130xbf16, #tpu.memory_space<vmem>>, vector<8x130xbf16>,
    %c0_166 = arith.constant 0 : index
    %c36_167 = arith.constant 36 : index
    %148 = vector.load %arg14[%c0_166, %c36_167] : memref<8x216xf32, #tpu.memory_space<vmem>>, vector<8x130xf32>
    %149 = arith.truncf %148 : vector<8x130xf32> to vector<8x130xbf16>
    %c72_168 = arith.constant 72 : index
    %c0_169 = arith.constant 0 : index
    %150 = vector.load %arg15[%c72_168, %c0_169] : memref<216x130xbf16, #tpu.memory_space<vmem>>, vector<8x130xbf16>
    tpu.vector_store %arg15[%c72_168, %c0_169], %149 {strides = array<i32>} : memref<216x130xbf16, #tpu.memory_space<vmem>>, vector<8x130xbf16>,
    %c0_170 = arith.constant 0 : index
    %c37 = arith.constant 37 : index
    %151 = vector.load %arg14[%c0_170, %c37] : memref<8x216xf32, #tpu.memory_space<vmem>>, vector<8x130xf32>
    %152 = arith.truncf %151 : vector<8x130xf32> to vector<8x130xbf16>
    %c80_171 = arith.constant 80 : index
    %c0_172 = arith.constant 0 : index
    %153 = vector.load %arg15[%c80_171, %c0_172] : memref<216x130xbf16, #tpu.memory_space<vmem>>, vector<8x130xbf16>
    tpu.vector_store %arg15[%c80_171, %c0_172], %152 {strides = array<i32>} : memref<216x130xbf16, #tpu.memory_space<vmem>>, vector<8x130xbf16>,
    %c0_173 = arith.constant 0 : index
    %c38 = arith.constant 38 : index
    %154 = vector.load %arg14[%c0_173, %c38] : memref<8x216xf32, #tpu.memory_space<vmem>>, vector<8x130xf32>
    %155 = arith.truncf %154 : vector<8x130xf32> to vector<8x130xbf16>
    %c88_174 = arith.constant 88 : index
    %c0_175 = arith.constant 0 : index
    %156 = vector.load %arg15[%c88_174, %c0_175] : memref<216x130xbf16, #tpu.memory_space<vmem>>, vector<8x130xbf16>
    tpu.vector_store %arg15[%c88_174, %c0_175], %155 {strides = array<i32>} : memref<216x130xbf16, #tpu.memory_space<vmem>>, vector<8x130xbf16>,
    %c0_176 = arith.constant 0 : index
    %c42 = arith.constant 42 : index
    %157 = vector.load %arg14[%c0_176, %c42] : memref<8x216xf32, #tpu.memory_space<vmem>>, vector<8x130xf32>
    %158 = arith.truncf %157 : vector<8x130xf32> to vector<8x130xbf16>
    %c96_177 = arith.constant 96 : index
    %c0_178 = arith.constant 0 : index
    %159 = vector.load %arg15[%c96_177, %c0_178] : memref<216x130xbf16, #tpu.memory_space<vmem>>, vector<8x130xbf16>
    tpu.vector_store %arg15[%c96_177, %c0_178], %158 {strides = array<i32>} : memref<216x130xbf16, #tpu.memory_space<vmem>>, vector<8x130xbf16>,
    %c0_179 = arith.constant 0 : index
    %c43 = arith.constant 43 : index
    %160 = vector.load %arg14[%c0_179, %c43] : memref<8x216xf32, #tpu.memory_space<vmem>>, vector<8x130xf32>
    %161 = arith.truncf %160 : vector<8x130xf32> to vector<8x130xbf16>
    %c104_180 = arith.constant 104 : index
    %c0_181 = arith.constant 0 : index
    %162 = vector.load %arg15[%c104_180, %c0_181] : memref<216x130xbf16, #tpu.memory_space<vmem>>, vector<8x130xbf16>
    tpu.vector_store %arg15[%c104_180, %c0_181], %161 {strides = array<i32>} : memref<216x130xbf16, #tpu.memory_space<vmem>>, vector<8x130xbf16>,
    %c0_182 = arith.constant 0 : index
    %c44_183 = arith.constant 44 : index
    %163 = vector.load %arg14[%c0_182, %c44_183] : memref<8x216xf32, #tpu.memory_space<vmem>>, vector<8x130xf32>
    %164 = arith.truncf %163 : vector<8x130xf32> to vector<8x130xbf16>
    %c112_184 = arith.constant 112 : index
    %c0_185 = arith.constant 0 : index
    %165 = vector.load %arg15[%c112_184, %c0_185] : memref<216x130xbf16, #tpu.memory_space<vmem>>, vector<8x130xbf16>
    tpu.vector_store %arg15[%c112_184, %c0_185], %164 {strides = array<i32>} : memref<216x130xbf16, #tpu.memory_space<vmem>>, vector<8x130xbf16>,
    %c0_186 = arith.constant 0 : index
    %c48_187 = arith.constant 48 : index
    %166 = vector.load %arg14[%c0_186, %c48_187] : memref<8x216xf32, #tpu.memory_space<vmem>>, vector<8x130xf32>
    %167 = arith.truncf %166 : vector<8x130xf32> to vector<8x130xbf16>
    %c120_188 = arith.constant 120 : index
    %c0_189 = arith.constant 0 : index
    %168 = vector.load %arg15[%c120_188, %c0_189] : memref<216x130xbf16, #tpu.memory_space<vmem>>, vector<8x130xbf16>
    tpu.vector_store %arg15[%c120_188, %c0_189], %167 {strides = array<i32>} : memref<216x130xbf16, #tpu.memory_space<vmem>>, vector<8x130xbf16>,
    %c0_190 = arith.constant 0 : index
    %c49 = arith.constant 49 : index
    %169 = vector.load %arg14[%c0_190, %c49] : memref<8x216xf32, #tpu.memory_space<vmem>>, vector<8x130xf32>
    %170 = arith.truncf %169 : vector<8x130xf32> to vector<8x130xbf16>
    %c128 = arith.constant 128 : index
    %c0_191 = arith.constant 0 : index
    %171 = vector.load %arg15[%c128, %c0_191] : memref<216x130xbf16, #tpu.memory_space<vmem>>, vector<8x130xbf16>
    tpu.vector_store %arg15[%c128, %c0_191], %170 {strides = array<i32>} : memref<216x130xbf16, #tpu.memory_space<vmem>>, vector<8x130xbf16>,
    %c0_192 = arith.constant 0 : index
    %c50 = arith.constant 50 : index
    %172 = vector.load %arg14[%c0_192, %c50] : memref<8x216xf32, #tpu.memory_space<vmem>>, vector<8x130xf32>
    %173 = arith.truncf %172 : vector<8x130xf32> to vector<8x130xbf16>
    %c136 = arith.constant 136 : index
    %c0_193 = arith.constant 0 : index
    %174 = vector.load %arg15[%c136, %c0_193] : memref<216x130xbf16, #tpu.memory_space<vmem>>, vector<8x130xbf16>
    tpu.vector_store %arg15[%c136, %c0_193], %173 {strides = array<i32>} : memref<216x130xbf16, #tpu.memory_space<vmem>>, vector<8x130xbf16>,
    %c0_194 = arith.constant 0 : index
    %c72_195 = arith.constant 72 : index
    %175 = vector.load %arg14[%c0_194, %c72_195] : memref<8x216xf32, #tpu.memory_space<vmem>>, vector<8x130xf32>
    %176 = arith.truncf %175 : vector<8x130xf32> to vector<8x130xbf16>
    %c144 = arith.constant 144 : index
    %c0_196 = arith.constant 0 : index
    %177 = vector.load %arg15[%c144, %c0_196] : memref<216x130xbf16, #tpu.memory_space<vmem>>, vector<8x130xbf16>
    tpu.vector_store %arg15[%c144, %c0_196], %176 {strides = array<i32>} : memref<216x130xbf16, #tpu.memory_space<vmem>>, vector<8x130xbf16>,
    %c0_197 = arith.constant 0 : index
    %c73 = arith.constant 73 : index
    %178 = vector.load %arg14[%c0_197, %c73] : memref<8x216xf32, #tpu.memory_space<vmem>>, vector<8x130xf32>
    %179 = arith.truncf %178 : vector<8x130xf32> to vector<8x130xbf16>
    %c152 = arith.constant 152 : index
    %c0_198 = arith.constant 0 : index
    %180 = vector.load %arg15[%c152, %c0_198] : memref<216x130xbf16, #tpu.memory_space<vmem>>, vector<8x130xbf16>
    tpu.vector_store %arg15[%c152, %c0_198], %179 {strides = array<i32>} : memref<216x130xbf16, #tpu.memory_space<vmem>>, vector<8x130xbf16>,
    %c0_199 = arith.constant 0 : index
    %c74 = arith.constant 74 : index
    %181 = vector.load %arg14[%c0_199, %c74] : memref<8x216xf32, #tpu.memory_space<vmem>>, vector<8x130xf32>
    %182 = arith.truncf %181 : vector<8x130xf32> to vector<8x130xbf16>
    %c160 = arith.constant 160 : index
    %c0_200 = arith.constant 0 : index
    %183 = vector.load %arg15[%c160, %c0_200] : memref<216x130xbf16, #tpu.memory_space<vmem>>, vector<8x130xbf16>
    tpu.vector_store %arg15[%c160, %c0_200], %182 {strides = array<i32>} : memref<216x130xbf16, #tpu.memory_space<vmem>>, vector<8x130xbf16>,
    %c0_201 = arith.constant 0 : index
    %c78 = arith.constant 78 : index
    %184 = vector.load %arg14[%c0_201, %c78] : memref<8x216xf32, #tpu.memory_space<vmem>>, vector<8x130xf32>
    %185 = arith.truncf %184 : vector<8x130xf32> to vector<8x130xbf16>
    %c168 = arith.constant 168 : index
    %c0_202 = arith.constant 0 : index
    %186 = vector.load %arg15[%c168, %c0_202] : memref<216x130xbf16, #tpu.memory_space<vmem>>, vector<8x130xbf16>
    tpu.vector_store %arg15[%c168, %c0_202], %185 {strides = array<i32>} : memref<216x130xbf16, #tpu.memory_space<vmem>>, vector<8x130xbf16>,
    %c0_203 = arith.constant 0 : index
    %c79 = arith.constant 79 : index
    %187 = vector.load %arg14[%c0_203, %c79] : memref<8x216xf32, #tpu.memory_space<vmem>>, vector<8x130xf32>
    %188 = arith.truncf %187 : vector<8x130xf32> to vector<8x130xbf16>
    %c176 = arith.constant 176 : index
    %c0_204 = arith.constant 0 : index
    %189 = vector.load %arg15[%c176, %c0_204] : memref<216x130xbf16, #tpu.memory_space<vmem>>, vector<8x130xbf16>
    tpu.vector_store %arg15[%c176, %c0_204], %188 {strides = array<i32>} : memref<216x130xbf16, #tpu.memory_space<vmem>>, vector<8x130xbf16>,
    %c0_205 = arith.constant 0 : index
    %c80_206 = arith.constant 80 : index
    %190 = vector.load %arg14[%c0_205, %c80_206] : memref<8x216xf32, #tpu.memory_space<vmem>>, vector<8x130xf32>
    %191 = arith.truncf %190 : vector<8x130xf32> to vector<8x130xbf16>
    %c184 = arith.constant 184 : index
    %c0_207 = arith.constant 0 : index
    %192 = vector.load %arg15[%c184, %c0_207] : memref<216x130xbf16, #tpu.memory_space<vmem>>, vector<8x130xbf16>
    tpu.vector_store %arg15[%c184, %c0_207], %191 {strides = array<i32>} : memref<216x130xbf16, #tpu.memory_space<vmem>>, vector<8x130xbf16>,
    %c0_208 = arith.constant 0 : index
    %c84_209 = arith.constant 84 : index
    %193 = vector.load %arg14[%c0_208, %c84_209] : memref<8x216xf32, #tpu.memory_space<vmem>>, vector<8x130xf32>
    %194 = arith.truncf %193 : vector<8x130xf32> to vector<8x130xbf16>
    %c192 = arith.constant 192 : index
    %c0_210 = arith.constant 0 : index
    %195 = vector.load %arg15[%c192, %c0_210] : memref<216x130xbf16, #tpu.memory_space<vmem>>, vector<8x130xbf16>
    tpu.vector_store %arg15[%c192, %c0_210], %194 {strides = array<i32>} : memref<216x130xbf16, #tpu.memory_space<vmem>>, vector<8x130xbf16>,
    %c0_211 = arith.constant 0 : index
    %c85 = arith.constant 85 : index
    %196 = vector.load %arg14[%c0_211, %c85] : memref<8x216xf32, #tpu.memory_space<vmem>>, vector<8x130xf32>
    %197 = arith.truncf %196 : vector<8x130xf32> to vector<8x130xbf16>
    %c200_212 = arith.constant 200 : index
    %c0_213 = arith.constant 0 : index
    %198 = vector.load %arg15[%c200_212, %c0_213] : memref<216x130xbf16, #tpu.memory_space<vmem>>, vector<8x130xbf16>
    tpu.vector_store %arg15[%c200_212, %c0_213], %197 {strides = array<i32>} : memref<216x130xbf16, #tpu.memory_space<vmem>>, vector<8x130xbf16>,
    %c0_214 = arith.constant 0 : index
    %c86 = arith.constant 86 : index
    %199 = vector.load %arg14[%c0_214, %c86] : memref<8x216xf32, #tpu.memory_space<vmem>>, vector<8x130xf32>
    %200 = arith.truncf %199 : vector<8x130xf32> to vector<8x130xbf16>
    %c208 = arith.constant 208 : index
    %c0_215 = arith.constant 0 : index
    %201 = vector.load %arg15[%c208, %c0_215] : memref<216x130xbf16, #tpu.memory_space<vmem>>, vector<8x130xbf16>
    tpu.vector_store %arg15[%c208, %c0_215], %200 {strides = array<i32>} : memref<216x130xbf16, #tpu.memory_space<vmem>>, vector<8x130xbf16>,
    %c0_216 = arith.constant 0 : index
    %c0_217 = arith.constant 0 : index
    %c0_218 = arith.constant 0 : index
    %202 = vector.load %arg4[%c0_216, %c0_217, %c0_218] : memref<4x8x216xbf16, #tpu.memory_space<vmem>>, vector<1x8x216xbf16>
    %203 = vector.shape_cast %202 : vector<1x8x216xbf16> to vector<8x216xbf16>
    %c0_219 = arith.constant 0 : index
    %c0_220 = arith.constant 0 : index
    %204 = vector.load %arg15[%c0_219, %c0_220] : memref<216x130xbf16, #tpu.memory_space<vmem>>, vector<216x130xbf16>
    %cst_221 = arith.constant dense<0.000000e+00> : vector<8x130xf32>
    %205 = tpu.matmul %203, %204, %cst_221 {dimension_numbers = #tpu.dot_dimension_numbers<[1], [0], [0], [1], [0, 0, 1, 1], [], []>} : vector<8x216xbf16>, vector<216x130xbf16>, vector<8x130xf32> -> vector<8x130xf32>
    %c0_222 = arith.constant 0 : index
    %c0_223 = arith.constant 0 : index
    %c0_224 = arith.constant 0 : index
    %206 = vector.load %arg5[%c0_222, %c0_223, %c0_224] : memref<4x8x1xf32, #tpu.memory_space<vmem>>, vector<1x8x1xf32>
    %207 = vector.shape_cast %206 : vector<1x8x1xf32> to vector<8x1xf32>
    %208 = vector.broadcast %207 : vector<8x1xf32> to vector<8x130xf32>
    %209 = arith.addf %205, %208 : vector<8x130xf32>
    %210 = vector.broadcast %116 : vector<1x130xf32> to vector<8x130xf32>
    %211 = arith.mulf %209, %210 : vector<8x130xf32>
    %cst_225 = arith.constant 0.000000e+00 : f32
    %212 = vector.broadcast %cst_225 : f32 to vector<8x130xf32>
    %213 = arith.maximumf %211, %212 : vector<8x130xf32>
    %c0_226 = arith.constant 0 : index
    %c43_227 = arith.constant 43 : index
    %214 = vector.load %arg14[%c0_226, %c43_227] : memref<8x216xf32, #tpu.memory_space<vmem>>, vector<8x130xf32>
    tpu.vector_store %arg14[%c0_226, %c43_227], %213 {strides = array<i32>} : memref<8x216xf32, #tpu.memory_space<vmem>>, vector<8x130xf32>,
    %c0_228 = arith.constant 0 : index
    %c0_229 = arith.constant 0 : index
    %215 = vector.load %arg14[%c0_228, %c0_229] : memref<8x216xf32, #tpu.memory_space<vmem>>, vector<8x130xf32>
    %216 = arith.truncf %215 : vector<8x130xf32> to vector<8x130xbf16>
    %c0_230 = arith.constant 0 : index
    %c0_231 = arith.constant 0 : index
    %217 = vector.load %arg15[%c0_230, %c0_231] : memref<216x130xbf16, #tpu.memory_space<vmem>>, vector<8x130xbf16>
    tpu.vector_store %arg15[%c0_230, %c0_231], %216 {strides = array<i32>} : memref<216x130xbf16, #tpu.memory_space<vmem>>, vector<8x130xbf16>,
    %c0_232 = arith.constant 0 : index
    %c1_233 = arith.constant 1 : index
    %218 = vector.load %arg14[%c0_232, %c1_233] : memref<8x216xf32, #tpu.memory_space<vmem>>, vector<8x130xf32>
    %219 = arith.truncf %218 : vector<8x130xf32> to vector<8x130xbf16>
    %c8_234 = arith.constant 8 : index
    %c0_235 = arith.constant 0 : index
    %220 = vector.load %arg15[%c8_234, %c0_235] : memref<216x130xbf16, #tpu.memory_space<vmem>>, vector<8x130xbf16>
    tpu.vector_store %arg15[%c8_234, %c0_235], %219 {strides = array<i32>} : memref<216x130xbf16, #tpu.memory_space<vmem>>, vector<8x130xbf16>,
    %c0_236 = arith.constant 0 : index
    %c2_237 = arith.constant 2 : index
    %221 = vector.load %arg14[%c0_236, %c2_237] : memref<8x216xf32, #tpu.memory_space<vmem>>, vector<8x130xf32>
    %222 = arith.truncf %221 : vector<8x130xf32> to vector<8x130xbf16>
    %c16_238 = arith.constant 16 : index
    %c0_239 = arith.constant 0 : index
    %223 = vector.load %arg15[%c16_238, %c0_239] : memref<216x130xbf16, #tpu.memory_space<vmem>>, vector<8x130xbf16>
    tpu.vector_store %arg15[%c16_238, %c0_239], %222 {strides = array<i32>} : memref<216x130xbf16, #tpu.memory_space<vmem>>, vector<8x130xbf16>,
    %c0_240 = arith.constant 0 : index
    %c6_241 = arith.constant 6 : index
    %224 = vector.load %arg14[%c0_240, %c6_241] : memref<8x216xf32, #tpu.memory_space<vmem>>, vector<8x130xf32>
    %225 = arith.truncf %224 : vector<8x130xf32> to vector<8x130xbf16>
    %c24_242 = arith.constant 24 : index
    %c0_243 = arith.constant 0 : index
    %226 = vector.load %arg15[%c24_242, %c0_243] : memref<216x130xbf16, #tpu.memory_space<vmem>>, vector<8x130xbf16>
    tpu.vector_store %arg15[%c24_242, %c0_243], %225 {strides = array<i32>} : memref<216x130xbf16, #tpu.memory_space<vmem>>, vector<8x130xbf16>,
    %c0_244 = arith.constant 0 : index
    %c7_245 = arith.constant 7 : index
    %227 = vector.load %arg14[%c0_244, %c7_245] : memref<8x216xf32, #tpu.memory_space<vmem>>, vector<8x130xf32>
    %228 = arith.truncf %227 : vector<8x130xf32> to vector<8x130xbf16>
    %c32_246 = arith.constant 32 : index
    %c0_247 = arith.constant 0 : index
    %229 = vector.load %arg15[%c32_246, %c0_247] : memref<216x130xbf16, #tpu.memory_space<vmem>>, vector<8x130xbf16>
    tpu.vector_store %arg15[%c32_246, %c0_247], %228 {strides = array<i32>} : memref<216x130xbf16, #tpu.memory_space<vmem>>, vector<8x130xbf16>,
    %c0_248 = arith.constant 0 : index
    %c8_249 = arith.constant 8 : index
    %230 = vector.load %arg14[%c0_248, %c8_249] : memref<8x216xf32, #tpu.memory_space<vmem>>, vector<8x130xf32>
    %231 = arith.truncf %230 : vector<8x130xf32> to vector<8x130xbf16>
    %c40_250 = arith.constant 40 : index
    %c0_251 = arith.constant 0 : index
    %232 = vector.load %arg15[%c40_250, %c0_251] : memref<216x130xbf16, #tpu.memory_space<vmem>>, vector<8x130xbf16>
    tpu.vector_store %arg15[%c40_250, %c0_251], %231 {strides = array<i32>} : memref<216x130xbf16, #tpu.memory_space<vmem>>, vector<8x130xbf16>,
    %c0_252 = arith.constant 0 : index
    %c12_253 = arith.constant 12 : index
    %233 = vector.load %arg14[%c0_252, %c12_253] : memref<8x216xf32, #tpu.memory_space<vmem>>, vector<8x130xf32>
    %234 = arith.truncf %233 : vector<8x130xf32> to vector<8x130xbf16>
    %c48_254 = arith.constant 48 : index
    %c0_255 = arith.constant 0 : index
    %235 = vector.load %arg15[%c48_254, %c0_255] : memref<216x130xbf16, #tpu.memory_space<vmem>>, vector<8x130xbf16>
    tpu.vector_store %arg15[%c48_254, %c0_255], %234 {strides = array<i32>} : memref<216x130xbf16, #tpu.memory_space<vmem>>, vector<8x130xbf16>,
    %c0_256 = arith.constant 0 : index
    %c13_257 = arith.constant 13 : index
    %236 = vector.load %arg14[%c0_256, %c13_257] : memref<8x216xf32, #tpu.memory_space<vmem>>, vector<8x130xf32>
    %237 = arith.truncf %236 : vector<8x130xf32> to vector<8x130xbf16>
    %c56_258 = arith.constant 56 : index
    %c0_259 = arith.constant 0 : index
    %238 = vector.load %arg15[%c56_258, %c0_259] : memref<216x130xbf16, #tpu.memory_space<vmem>>, vector<8x130xbf16>
    tpu.vector_store %arg15[%c56_258, %c0_259], %237 {strides = array<i32>} : memref<216x130xbf16, #tpu.memory_space<vmem>>, vector<8x130xbf16>,
    %c0_260 = arith.constant 0 : index
    %c14_261 = arith.constant 14 : index
    %239 = vector.load %arg14[%c0_260, %c14_261] : memref<8x216xf32, #tpu.memory_space<vmem>>, vector<8x130xf32>
    %240 = arith.truncf %239 : vector<8x130xf32> to vector<8x130xbf16>
    %c64_262 = arith.constant 64 : index
    %c0_263 = arith.constant 0 : index
    %241 = vector.load %arg15[%c64_262, %c0_263] : memref<216x130xbf16, #tpu.memory_space<vmem>>, vector<8x130xbf16>
    tpu.vector_store %arg15[%c64_262, %c0_263], %240 {strides = array<i32>} : memref<216x130xbf16, #tpu.memory_space<vmem>>, vector<8x130xbf16>,
    %c0_264 = arith.constant 0 : index
    %c36_265 = arith.constant 36 : index
    %242 = vector.load %arg14[%c0_264, %c36_265] : memref<8x216xf32, #tpu.memory_space<vmem>>, vector<8x130xf32>
    %243 = arith.truncf %242 : vector<8x130xf32> to vector<8x130xbf16>
    %c72_266 = arith.constant 72 : index
    %c0_267 = arith.constant 0 : index
    %244 = vector.load %arg15[%c72_266, %c0_267] : memref<216x130xbf16, #tpu.memory_space<vmem>>, vector<8x130xbf16>
    tpu.vector_store %arg15[%c72_266, %c0_267], %243 {strides = array<i32>} : memref<216x130xbf16, #tpu.memory_space<vmem>>, vector<8x130xbf16>,
    %c0_268 = arith.constant 0 : index
    %c37_269 = arith.constant 37 : index
    %245 = vector.load %arg14[%c0_268, %c37_269] : memref<8x216xf32, #tpu.memory_space<vmem>>, vector<8x130xf32>
    %246 = arith.truncf %245 : vector<8x130xf32> to vector<8x130xbf16>
    %c80_270 = arith.constant 80 : index
    %c0_271 = arith.constant 0 : index
    %247 = vector.load %arg15[%c80_270, %c0_271] : memref<216x130xbf16, #tpu.memory_space<vmem>>, vector<8x130xbf16>
    tpu.vector_store %arg15[%c80_270, %c0_271], %246 {strides = array<i32>} : memref<216x130xbf16, #tpu.memory_space<vmem>>, vector<8x130xbf16>,
    %c0_272 = arith.constant 0 : index
    %c38_273 = arith.constant 38 : index
    %248 = vector.load %arg14[%c0_272, %c38_273] : memref<8x216xf32, #tpu.memory_space<vmem>>, vector<8x130xf32>
    %249 = arith.truncf %248 : vector<8x130xf32> to vector<8x130xbf16>
    %c88_274 = arith.constant 88 : index
    %c0_275 = arith.constant 0 : index
    %250 = vector.load %arg15[%c88_274, %c0_275] : memref<216x130xbf16, #tpu.memory_space<vmem>>, vector<8x130xbf16>
    tpu.vector_store %arg15[%c88_274, %c0_275], %249 {strides = array<i32>} : memref<216x130xbf16, #tpu.memory_space<vmem>>, vector<8x130xbf16>,
    %c0_276 = arith.constant 0 : index
    %c42_277 = arith.constant 42 : index
    %251 = vector.load %arg14[%c0_276, %c42_277] : memref<8x216xf32, #tpu.memory_space<vmem>>, vector<8x130xf32>
    %252 = arith.truncf %251 : vector<8x130xf32> to vector<8x130xbf16>
    %c96_278 = arith.constant 96 : index
    %c0_279 = arith.constant 0 : index
    %253 = vector.load %arg15[%c96_278, %c0_279] : memref<216x130xbf16, #tpu.memory_space<vmem>>, vector<8x130xbf16>
    tpu.vector_store %arg15[%c96_278, %c0_279], %252 {strides = array<i32>} : memref<216x130xbf16, #tpu.memory_space<vmem>>, vector<8x130xbf16>,
    %c0_280 = arith.constant 0 : index
    %c43_281 = arith.constant 43 : index
    %254 = vector.load %arg14[%c0_280, %c43_281] : memref<8x216xf32, #tpu.memory_space<vmem>>, vector<8x130xf32>
    %255 = arith.truncf %254 : vector<8x130xf32> to vector<8x130xbf16>
    %c104_282 = arith.constant 104 : index
    %c0_283 = arith.constant 0 : index
    %256 = vector.load %arg15[%c104_282, %c0_283] : memref<216x130xbf16, #tpu.memory_space<vmem>>, vector<8x130xbf16>
    tpu.vector_store %arg15[%c104_282, %c0_283], %255 {strides = array<i32>} : memref<216x130xbf16, #tpu.memory_space<vmem>>, vector<8x130xbf16>,
    %c0_284 = arith.constant 0 : index
    %c44_285 = arith.constant 44 : index
    %257 = vector.load %arg14[%c0_284, %c44_285] : memref<8x216xf32, #tpu.memory_space<vmem>>, vector<8x130xf32>
    %258 = arith.truncf %257 : vector<8x130xf32> to vector<8x130xbf16>
    %c112_286 = arith.constant 112 : index
    %c0_287 = arith.constant 0 : index
    %259 = vector.load %arg15[%c112_286, %c0_287] : memref<216x130xbf16, #tpu.memory_space<vmem>>, vector<8x130xbf16>
    tpu.vector_store %arg15[%c112_286, %c0_287], %258 {strides = array<i32>} : memref<216x130xbf16, #tpu.memory_space<vmem>>, vector<8x130xbf16>,
    %c0_288 = arith.constant 0 : index
    %c48_289 = arith.constant 48 : index
    %260 = vector.load %arg14[%c0_288, %c48_289] : memref<8x216xf32, #tpu.memory_space<vmem>>, vector<8x130xf32>
    %261 = arith.truncf %260 : vector<8x130xf32> to vector<8x130xbf16>
    %c120_290 = arith.constant 120 : index
    %c0_291 = arith.constant 0 : index
    %262 = vector.load %arg15[%c120_290, %c0_291] : memref<216x130xbf16, #tpu.memory_space<vmem>>, vector<8x130xbf16>
    tpu.vector_store %arg15[%c120_290, %c0_291], %261 {strides = array<i32>} : memref<216x130xbf16, #tpu.memory_space<vmem>>, vector<8x130xbf16>,
    %c0_292 = arith.constant 0 : index
    %c49_293 = arith.constant 49 : index
    %263 = vector.load %arg14[%c0_292, %c49_293] : memref<8x216xf32, #tpu.memory_space<vmem>>, vector<8x130xf32>
    %264 = arith.truncf %263 : vector<8x130xf32> to vector<8x130xbf16>
    %c128_294 = arith.constant 128 : index
    %c0_295 = arith.constant 0 : index
    %265 = vector.load %arg15[%c128_294, %c0_295] : memref<216x130xbf16, #tpu.memory_space<vmem>>, vector<8x130xbf16>
    tpu.vector_store %arg15[%c128_294, %c0_295], %264 {strides = array<i32>} : memref<216x130xbf16, #tpu.memory_space<vmem>>, vector<8x130xbf16>,
    %c0_296 = arith.constant 0 : index
    %c50_297 = arith.constant 50 : index
    %266 = vector.load %arg14[%c0_296, %c50_297] : memref<8x216xf32, #tpu.memory_space<vmem>>, vector<8x130xf32>
    %267 = arith.truncf %266 : vector<8x130xf32> to vector<8x130xbf16>
    %c136_298 = arith.constant 136 : index
    %c0_299 = arith.constant 0 : index
    %268 = vector.load %arg15[%c136_298, %c0_299] : memref<216x130xbf16, #tpu.memory_space<vmem>>, vector<8x130xbf16>
    tpu.vector_store %arg15[%c136_298, %c0_299], %267 {strides = array<i32>} : memref<216x130xbf16, #tpu.memory_space<vmem>>, vector<8x130xbf16>,
    %c0_300 = arith.constant 0 : index
    %c72_301 = arith.constant 72 : index
    %269 = vector.load %arg14[%c0_300, %c72_301] : memref<8x216xf32, #tpu.memory_space<vmem>>, vector<8x130xf32>
    %270 = arith.truncf %269 : vector<8x130xf32> to vector<8x130xbf16>
    %c144_302 = arith.constant 144 : index
    %c0_303 = arith.constant 0 : index
    %271 = vector.load %arg15[%c144_302, %c0_303] : memref<216x130xbf16, #tpu.memory_space<vmem>>, vector<8x130xbf16>
    tpu.vector_store %arg15[%c144_302, %c0_303], %270 {strides = array<i32>} : memref<216x130xbf16, #tpu.memory_space<vmem>>, vector<8x130xbf16>,
    %c0_304 = arith.constant 0 : index
    %c73_305 = arith.constant 73 : index
    %272 = vector.load %arg14[%c0_304, %c73_305] : memref<8x216xf32, #tpu.memory_space<vmem>>, vector<8x130xf32>
    %273 = arith.truncf %272 : vector<8x130xf32> to vector<8x130xbf16>
    %c152_306 = arith.constant 152 : index
    %c0_307 = arith.constant 0 : index
    %274 = vector.load %arg15[%c152_306, %c0_307] : memref<216x130xbf16, #tpu.memory_space<vmem>>, vector<8x130xbf16>
    tpu.vector_store %arg15[%c152_306, %c0_307], %273 {strides = array<i32>} : memref<216x130xbf16, #tpu.memory_space<vmem>>, vector<8x130xbf16>,
    %c0_308 = arith.constant 0 : index
    %c74_309 = arith.constant 74 : index
    %275 = vector.load %arg14[%c0_308, %c74_309] : memref<8x216xf32, #tpu.memory_space<vmem>>, vector<8x130xf32>
    %276 = arith.truncf %275 : vector<8x130xf32> to vector<8x130xbf16>
    %c160_310 = arith.constant 160 : index
    %c0_311 = arith.constant 0 : index
    %277 = vector.load %arg15[%c160_310, %c0_311] : memref<216x130xbf16, #tpu.memory_space<vmem>>, vector<8x130xbf16>
    tpu.vector_store %arg15[%c160_310, %c0_311], %276 {strides = array<i32>} : memref<216x130xbf16, #tpu.memory_space<vmem>>, vector<8x130xbf16>,
    %c0_312 = arith.constant 0 : index
    %c78_313 = arith.constant 78 : index
    %278 = vector.load %arg14[%c0_312, %c78_313] : memref<8x216xf32, #tpu.memory_space<vmem>>, vector<8x130xf32>
    %279 = arith.truncf %278 : vector<8x130xf32> to vector<8x130xbf16>
    %c168_314 = arith.constant 168 : index
    %c0_315 = arith.constant 0 : index
    %280 = vector.load %arg15[%c168_314, %c0_315] : memref<216x130xbf16, #tpu.memory_space<vmem>>, vector<8x130xbf16>
    tpu.vector_store %arg15[%c168_314, %c0_315], %279 {strides = array<i32>} : memref<216x130xbf16, #tpu.memory_space<vmem>>, vector<8x130xbf16>,
    %c0_316 = arith.constant 0 : index
    %c79_317 = arith.constant 79 : index
    %281 = vector.load %arg14[%c0_316, %c79_317] : memref<8x216xf32, #tpu.memory_space<vmem>>, vector<8x130xf32>
    %282 = arith.truncf %281 : vector<8x130xf32> to vector<8x130xbf16>
    %c176_318 = arith.constant 176 : index
    %c0_319 = arith.constant 0 : index
    %283 = vector.load %arg15[%c176_318, %c0_319] : memref<216x130xbf16, #tpu.memory_space<vmem>>, vector<8x130xbf16>
    tpu.vector_store %arg15[%c176_318, %c0_319], %282 {strides = array<i32>} : memref<216x130xbf16, #tpu.memory_space<vmem>>, vector<8x130xbf16>,
    %c0_320 = arith.constant 0 : index
    %c80_321 = arith.constant 80 : index
    %284 = vector.load %arg14[%c0_320, %c80_321] : memref<8x216xf32, #tpu.memory_space<vmem>>, vector<8x130xf32>
    %285 = arith.truncf %284 : vector<8x130xf32> to vector<8x130xbf16>
    %c184_322 = arith.constant 184 : index
    %c0_323 = arith.constant 0 : index
    %286 = vector.load %arg15[%c184_322, %c0_323] : memref<216x130xbf16, #tpu.memory_space<vmem>>, vector<8x130xbf16>
    tpu.vector_store %arg15[%c184_322, %c0_323], %285 {strides = array<i32>} : memref<216x130xbf16, #tpu.memory_space<vmem>>, vector<8x130xbf16>,
    %c0_324 = arith.constant 0 : index
    %c84_325 = arith.constant 84 : index
    %287 = vector.load %arg14[%c0_324, %c84_325] : memref<8x216xf32, #tpu.memory_space<vmem>>, vector<8x130xf32>
    %288 = arith.truncf %287 : vector<8x130xf32> to vector<8x130xbf16>
    %c192_326 = arith.constant 192 : index
    %c0_327 = arith.constant 0 : index
    %289 = vector.load %arg15[%c192_326, %c0_327] : memref<216x130xbf16, #tpu.memory_space<vmem>>, vector<8x130xbf16>
    tpu.vector_store %arg15[%c192_326, %c0_327], %288 {strides = array<i32>} : memref<216x130xbf16, #tpu.memory_space<vmem>>, vector<8x130xbf16>,
    %c0_328 = arith.constant 0 : index
    %c85_329 = arith.constant 85 : index
    %290 = vector.load %arg14[%c0_328, %c85_329] : memref<8x216xf32, #tpu.memory_space<vmem>>, vector<8x130xf32>
    %291 = arith.truncf %290 : vector<8x130xf32> to vector<8x130xbf16>
    %c200_330 = arith.constant 200 : index
    %c0_331 = arith.constant 0 : index
    %292 = vector.load %arg15[%c200_330, %c0_331] : memref<216x130xbf16, #tpu.memory_space<vmem>>, vector<8x130xbf16>
    tpu.vector_store %arg15[%c200_330, %c0_331], %291 {strides = array<i32>} : memref<216x130xbf16, #tpu.memory_space<vmem>>, vector<8x130xbf16>,
    %c0_332 = arith.constant 0 : index
    %c86_333 = arith.constant 86 : index
    %293 = vector.load %arg14[%c0_332, %c86_333] : memref<8x216xf32, #tpu.memory_space<vmem>>, vector<8x130xf32>
    %294 = arith.truncf %293 : vector<8x130xf32> to vector<8x130xbf16>
    %c208_334 = arith.constant 208 : index
    %c0_335 = arith.constant 0 : index
    %295 = vector.load %arg15[%c208_334, %c0_335] : memref<216x130xbf16, #tpu.memory_space<vmem>>, vector<8x130xbf16>
    tpu.vector_store %arg15[%c208_334, %c0_335], %294 {strides = array<i32>} : memref<216x130xbf16, #tpu.memory_space<vmem>>, vector<8x130xbf16>,
    %c1_336 = arith.constant 1 : index
    %c0_337 = arith.constant 0 : index
    %c0_338 = arith.constant 0 : index
    %296 = vector.load %arg4[%c1_336, %c0_337, %c0_338] : memref<4x8x216xbf16, #tpu.memory_space<vmem>>, vector<1x8x216xbf16>
    %297 = vector.shape_cast %296 : vector<1x8x216xbf16> to vector<8x216xbf16>
    %c0_339 = arith.constant 0 : index
    %c0_340 = arith.constant 0 : index
    %298 = vector.load %arg15[%c0_339, %c0_340] : memref<216x130xbf16, #tpu.memory_space<vmem>>, vector<216x130xbf16>
    %cst_341 = arith.constant dense<0.000000e+00> : vector<8x130xf32>
    %299 = tpu.matmul %297, %298, %cst_341 {dimension_numbers = #tpu.dot_dimension_numbers<[1], [0], [0], [1], [0, 0, 1, 1], [], []>} : vector<8x216xbf16>, vector<216x130xbf16>, vector<8x130xf32> -> vector<8x130xf32>
    %c1_342 = arith.constant 1 : index
    %c0_343 = arith.constant 0 : index
    %c0_344 = arith.constant 0 : index
    %300 = vector.load %arg5[%c1_342, %c0_343, %c0_344] : memref<4x8x1xf32, #tpu.memory_space<vmem>>, vector<1x8x1xf32>
    %301 = vector.shape_cast %300 : vector<1x8x1xf32> to vector<8x1xf32>
    %302 = vector.broadcast %301 : vector<8x1xf32> to vector<8x130xf32>
    %303 = arith.addf %299, %302 : vector<8x130xf32>
    %c0_345 = arith.constant 0 : index
    %c43_346 = arith.constant 43 : index
    %304 = vector.load %arg13[%c0_345, %c43_346] : memref<8x216xf32, #tpu.memory_space<vmem>>, vector<8x130xf32>
    %305 = vector.broadcast %116 : vector<1x130xf32> to vector<8x130xf32>
    %306 = arith.mulf %303, %305 : vector<8x130xf32>
    %307 = arith.addf %304, %306 : vector<8x130xf32>
    %c0_347 = arith.constant 0 : index
    %c43_348 = arith.constant 43 : index
    %308 = vector.load %arg13[%c0_347, %c43_348] : memref<8x216xf32, #tpu.memory_space<vmem>>, vector<8x130xf32>
    tpu.vector_store %arg13[%c0_347, %c43_348], %307 {strides = array<i32>} : memref<8x216xf32, #tpu.memory_space<vmem>>, vector<8x130xf32>,
    %c0_349 = arith.constant 0 : index
    %c0_350 = arith.constant 0 : index
    %309 = vector.load %arg13[%c0_349, %c0_350] : memref<8x216xf32, #tpu.memory_space<vmem>>, vector<8x216xf32>
    %cst_351 = arith.constant 0.000000e+00 : f32
    %310 = vector.broadcast %cst_351 : f32 to vector<8x216xf32>
    %311 = arith.maximumf %309, %310 : vector<8x216xf32>
    %c0_352 = arith.constant 0 : index
    %c0_353 = arith.constant 0 : index
    %312 = vector.load %arg14[%c0_352, %c0_353] : memref<8x216xf32, #tpu.memory_space<vmem>>, vector<8x216xf32>
    tpu.vector_store %arg14[%c0_352, %c0_353], %311 {strides = array<i32>} : memref<8x216xf32, #tpu.memory_space<vmem>>, vector<8x216xf32>,
    %c0_354 = arith.constant 0 : index
    %c0_355 = arith.constant 0 : index
    %313 = vector.load %arg14[%c0_354, %c0_355] : memref<8x216xf32, #tpu.memory_space<vmem>>, vector<8x130xf32>
    %314 = arith.truncf %313 : vector<8x130xf32> to vector<8x130xbf16>
    %c0_356 = arith.constant 0 : index
    %c0_357 = arith.constant 0 : index
    %315 = vector.load %arg15[%c0_356, %c0_357] : memref<216x130xbf16, #tpu.memory_space<vmem>>, vector<8x130xbf16>
    tpu.vector_store %arg15[%c0_356, %c0_357], %314 {strides = array<i32>} : memref<216x130xbf16, #tpu.memory_space<vmem>>, vector<8x130xbf16>,
    %c0_358 = arith.constant 0 : index
    %c1_359 = arith.constant 1 : index
    %316 = vector.load %arg14[%c0_358, %c1_359] : memref<8x216xf32, #tpu.memory_space<vmem>>, vector<8x130xf32>
    %317 = arith.truncf %316 : vector<8x130xf32> to vector<8x130xbf16>
    %c8_360 = arith.constant 8 : index
    %c0_361 = arith.constant 0 : index
    %318 = vector.load %arg15[%c8_360, %c0_361] : memref<216x130xbf16, #tpu.memory_space<vmem>>, vector<8x130xbf16>
    tpu.vector_store %arg15[%c8_360, %c0_361], %317 {strides = array<i32>} : memref<216x130xbf16, #tpu.memory_space<vmem>>, vector<8x130xbf16>,
    %c0_362 = arith.constant 0 : index
    %c2_363 = arith.constant 2 : index
    %319 = vector.load %arg14[%c0_362, %c2_363] : memref<8x216xf32, #tpu.memory_space<vmem>>, vector<8x130xf32>
    %320 = arith.truncf %319 : vector<8x130xf32> to vector<8x130xbf16>
    %c16_364 = arith.constant 16 : index
    %c0_365 = arith.constant 0 : index
    %321 = vector.load %arg15[%c16_364, %c0_365] : memref<216x130xbf16, #tpu.memory_space<vmem>>, vector<8x130xbf16>
    tpu.vector_store %arg15[%c16_364, %c0_365], %320 {strides = array<i32>} : memref<216x130xbf16, #tpu.memory_space<vmem>>, vector<8x130xbf16>,
    %c0_366 = arith.constant 0 : index
    %c6_367 = arith.constant 6 : index
    %322 = vector.load %arg14[%c0_366, %c6_367] : memref<8x216xf32, #tpu.memory_space<vmem>>, vector<8x130xf32>
    %323 = arith.truncf %322 : vector<8x130xf32> to vector<8x130xbf16>
    %c24_368 = arith.constant 24 : index
    %c0_369 = arith.constant 0 : index
    %324 = vector.load %arg15[%c24_368, %c0_369] : memref<216x130xbf16, #tpu.memory_space<vmem>>, vector<8x130xbf16>
    tpu.vector_store %arg15[%c24_368, %c0_369], %323 {strides = array<i32>} : memref<216x130xbf16, #tpu.memory_space<vmem>>, vector<8x130xbf16>,
    %c0_370 = arith.constant 0 : index
    %c7_371 = arith.constant 7 : index
    %325 = vector.load %arg14[%c0_370, %c7_371] : memref<8x216xf32, #tpu.memory_space<vmem>>, vector<8x130xf32>
    %326 = arith.truncf %325 : vector<8x130xf32> to vector<8x130xbf16>
    %c32_372 = arith.constant 32 : index
    %c0_373 = arith.constant 0 : index
    %327 = vector.load %arg15[%c32_372, %c0_373] : memref<216x130xbf16, #tpu.memory_space<vmem>>, vector<8x130xbf16>
    tpu.vector_store %arg15[%c32_372, %c0_373], %326 {strides = array<i32>} : memref<216x130xbf16, #tpu.memory_space<vmem>>, vector<8x130xbf16>,
    %c0_374 = arith.constant 0 : index
    %c8_375 = arith.constant 8 : index
    %328 = vector.load %arg14[%c0_374, %c8_375] : memref<8x216xf32, #tpu.memory_space<vmem>>, vector<8x130xf32>
    %329 = arith.truncf %328 : vector<8x130xf32> to vector<8x130xbf16>
    %c40_376 = arith.constant 40 : index
    %c0_377 = arith.constant 0 : index
    %330 = vector.load %arg15[%c40_376, %c0_377] : memref<216x130xbf16, #tpu.memory_space<vmem>>, vector<8x130xbf16>
    tpu.vector_store %arg15[%c40_376, %c0_377], %329 {strides = array<i32>} : memref<216x130xbf16, #tpu.memory_space<vmem>>, vector<8x130xbf16>,
    %c0_378 = arith.constant 0 : index
    %c12_379 = arith.constant 12 : index
    %331 = vector.load %arg14[%c0_378, %c12_379] : memref<8x216xf32, #tpu.memory_space<vmem>>, vector<8x130xf32>
    %332 = arith.truncf %331 : vector<8x130xf32> to vector<8x130xbf16>
    %c48_380 = arith.constant 48 : index
    %c0_381 = arith.constant 0 : index
    %333 = vector.load %arg15[%c48_380, %c0_381] : memref<216x130xbf16, #tpu.memory_space<vmem>>, vector<8x130xbf16>
    tpu.vector_store %arg15[%c48_380, %c0_381], %332 {strides = array<i32>} : memref<216x130xbf16, #tpu.memory_space<vmem>>, vector<8x130xbf16>,
    %c0_382 = arith.constant 0 : index
    %c13_383 = arith.constant 13 : index
    %334 = vector.load %arg14[%c0_382, %c13_383] : memref<8x216xf32, #tpu.memory_space<vmem>>, vector<8x130xf32>
    %335 = arith.truncf %334 : vector<8x130xf32> to vector<8x130xbf16>
    %c56_384 = arith.constant 56 : index
    %c0_385 = arith.constant 0 : index
    %336 = vector.load %arg15[%c56_384, %c0_385] : memref<216x130xbf16, #tpu.memory_space<vmem>>, vector<8x130xbf16>
    tpu.vector_store %arg15[%c56_384, %c0_385], %335 {strides = array<i32>} : memref<216x130xbf16, #tpu.memory_space<vmem>>, vector<8x130xbf16>,
    %c0_386 = arith.constant 0 : index
    %c14_387 = arith.constant 14 : index
    %337 = vector.load %arg14[%c0_386, %c14_387] : memref<8x216xf32, #tpu.memory_space<vmem>>, vector<8x130xf32>
    %338 = arith.truncf %337 : vector<8x130xf32> to vector<8x130xbf16>
    %c64_388 = arith.constant 64 : index
    %c0_389 = arith.constant 0 : index
    %339 = vector.load %arg15[%c64_388, %c0_389] : memref<216x130xbf16, #tpu.memory_space<vmem>>, vector<8x130xbf16>
    tpu.vector_store %arg15[%c64_388, %c0_389], %338 {strides = array<i32>} : memref<216x130xbf16, #tpu.memory_space<vmem>>, vector<8x130xbf16>,
    %c0_390 = arith.constant 0 : index
    %c36_391 = arith.constant 36 : index
    %340 = vector.load %arg14[%c0_390, %c36_391] : memref<8x216xf32, #tpu.memory_space<vmem>>, vector<8x130xf32>
    %341 = arith.truncf %340 : vector<8x130xf32> to vector<8x130xbf16>
    %c72_392 = arith.constant 72 : index
    %c0_393 = arith.constant 0 : index
    %342 = vector.load %arg15[%c72_392, %c0_393] : memref<216x130xbf16, #tpu.memory_space<vmem>>, vector<8x130xbf16>
    tpu.vector_store %arg15[%c72_392, %c0_393], %341 {strides = array<i32>} : memref<216x130xbf16, #tpu.memory_space<vmem>>, vector<8x130xbf16>,
    %c0_394 = arith.constant 0 : index
    %c37_395 = arith.constant 37 : index
    %343 = vector.load %arg14[%c0_394, %c37_395] : memref<8x216xf32, #tpu.memory_space<vmem>>, vector<8x130xf32>
    %344 = arith.truncf %343 : vector<8x130xf32> to vector<8x130xbf16>
    %c80_396 = arith.constant 80 : index
    %c0_397 = arith.constant 0 : index
    %345 = vector.load %arg15[%c80_396, %c0_397] : memref<216x130xbf16, #tpu.memory_space<vmem>>, vector<8x130xbf16>
    tpu.vector_store %arg15[%c80_396, %c0_397], %344 {strides = array<i32>} : memref<216x130xbf16, #tpu.memory_space<vmem>>, vector<8x130xbf16>,
    %c0_398 = arith.constant 0 : index
    %c38_399 = arith.constant 38 : index
    %346 = vector.load %arg14[%c0_398, %c38_399] : memref<8x216xf32, #tpu.memory_space<vmem>>, vector<8x130xf32>
    %347 = arith.truncf %346 : vector<8x130xf32> to vector<8x130xbf16>
    %c88_400 = arith.constant 88 : index
    %c0_401 = arith.constant 0 : index
    %348 = vector.load %arg15[%c88_400, %c0_401] : memref<216x130xbf16, #tpu.memory_space<vmem>>, vector<8x130xbf16>
    tpu.vector_store %arg15[%c88_400, %c0_401], %347 {strides = array<i32>} : memref<216x130xbf16, #tpu.memory_space<vmem>>, vector<8x130xbf16>,
    %c0_402 = arith.constant 0 : index
    %c42_403 = arith.constant 42 : index
    %349 = vector.load %arg14[%c0_402, %c42_403] : memref<8x216xf32, #tpu.memory_space<vmem>>, vector<8x130xf32>
    %350 = arith.truncf %349 : vector<8x130xf32> to vector<8x130xbf16>
    %c96_404 = arith.constant 96 : index
    %c0_405 = arith.constant 0 : index
    %351 = vector.load %arg15[%c96_404, %c0_405] : memref<216x130xbf16, #tpu.memory_space<vmem>>, vector<8x130xbf16>
    tpu.vector_store %arg15[%c96_404, %c0_405], %350 {strides = array<i32>} : memref<216x130xbf16, #tpu.memory_space<vmem>>, vector<8x130xbf16>,
    %c0_406 = arith.constant 0 : index
    %c43_407 = arith.constant 43 : index
    %352 = vector.load %arg14[%c0_406, %c43_407] : memref<8x216xf32, #tpu.memory_space<vmem>>, vector<8x130xf32>
    %353 = arith.truncf %352 : vector<8x130xf32> to vector<8x130xbf16>
    %c104_408 = arith.constant 104 : index
    %c0_409 = arith.constant 0 : index
    %354 = vector.load %arg15[%c104_408, %c0_409] : memref<216x130xbf16, #tpu.memory_space<vmem>>, vector<8x130xbf16>
    tpu.vector_store %arg15[%c104_408, %c0_409], %353 {strides = array<i32>} : memref<216x130xbf16, #tpu.memory_space<vmem>>, vector<8x130xbf16>,
    %c0_410 = arith.constant 0 : index
    %c44_411 = arith.constant 44 : index
    %355 = vector.load %arg14[%c0_410, %c44_411] : memref<8x216xf32, #tpu.memory_space<vmem>>, vector<8x130xf32>
    %356 = arith.truncf %355 : vector<8x130xf32> to vector<8x130xbf16>
    %c112_412 = arith.constant 112 : index
    %c0_413 = arith.constant 0 : index
    %357 = vector.load %arg15[%c112_412, %c0_413] : memref<216x130xbf16, #tpu.memory_space<vmem>>, vector<8x130xbf16>
    tpu.vector_store %arg15[%c112_412, %c0_413], %356 {strides = array<i32>} : memref<216x130xbf16, #tpu.memory_space<vmem>>, vector<8x130xbf16>,
    %c0_414 = arith.constant 0 : index
    %c48_415 = arith.constant 48 : index
    %358 = vector.load %arg14[%c0_414, %c48_415] : memref<8x216xf32, #tpu.memory_space<vmem>>, vector<8x130xf32>
    %359 = arith.truncf %358 : vector<8x130xf32> to vector<8x130xbf16>
    %c120_416 = arith.constant 120 : index
    %c0_417 = arith.constant 0 : index
    %360 = vector.load %arg15[%c120_416, %c0_417] : memref<216x130xbf16, #tpu.memory_space<vmem>>, vector<8x130xbf16>
    tpu.vector_store %arg15[%c120_416, %c0_417], %359 {strides = array<i32>} : memref<216x130xbf16, #tpu.memory_space<vmem>>, vector<8x130xbf16>,
    %c0_418 = arith.constant 0 : index
    %c49_419 = arith.constant 49 : index
    %361 = vector.load %arg14[%c0_418, %c49_419] : memref<8x216xf32, #tpu.memory_space<vmem>>, vector<8x130xf32>
    %362 = arith.truncf %361 : vector<8x130xf32> to vector<8x130xbf16>
    %c128_420 = arith.constant 128 : index
    %c0_421 = arith.constant 0 : index
    %363 = vector.load %arg15[%c128_420, %c0_421] : memref<216x130xbf16, #tpu.memory_space<vmem>>, vector<8x130xbf16>
    tpu.vector_store %arg15[%c128_420, %c0_421], %362 {strides = array<i32>} : memref<216x130xbf16, #tpu.memory_space<vmem>>, vector<8x130xbf16>,
    %c0_422 = arith.constant 0 : index
    %c50_423 = arith.constant 50 : index
    %364 = vector.load %arg14[%c0_422, %c50_423] : memref<8x216xf32, #tpu.memory_space<vmem>>, vector<8x130xf32>
    %365 = arith.truncf %364 : vector<8x130xf32> to vector<8x130xbf16>
    %c136_424 = arith.constant 136 : index
    %c0_425 = arith.constant 0 : index
    %366 = vector.load %arg15[%c136_424, %c0_425] : memref<216x130xbf16, #tpu.memory_space<vmem>>, vector<8x130xbf16>
    tpu.vector_store %arg15[%c136_424, %c0_425], %365 {strides = array<i32>} : memref<216x130xbf16, #tpu.memory_space<vmem>>, vector<8x130xbf16>,
    %c0_426 = arith.constant 0 : index
    %c72_427 = arith.constant 72 : index
    %367 = vector.load %arg14[%c0_426, %c72_427] : memref<8x216xf32, #tpu.memory_space<vmem>>, vector<8x130xf32>
    %368 = arith.truncf %367 : vector<8x130xf32> to vector<8x130xbf16>
    %c144_428 = arith.constant 144 : index
    %c0_429 = arith.constant 0 : index
    %369 = vector.load %arg15[%c144_428, %c0_429] : memref<216x130xbf16, #tpu.memory_space<vmem>>, vector<8x130xbf16>
    tpu.vector_store %arg15[%c144_428, %c0_429], %368 {strides = array<i32>} : memref<216x130xbf16, #tpu.memory_space<vmem>>, vector<8x130xbf16>,
    %c0_430 = arith.constant 0 : index
    %c73_431 = arith.constant 73 : index
    %370 = vector.load %arg14[%c0_430, %c73_431] : memref<8x216xf32, #tpu.memory_space<vmem>>, vector<8x130xf32>
    %371 = arith.truncf %370 : vector<8x130xf32> to vector<8x130xbf16>
    %c152_432 = arith.constant 152 : index
    %c0_433 = arith.constant 0 : index
    %372 = vector.load %arg15[%c152_432, %c0_433] : memref<216x130xbf16, #tpu.memory_space<vmem>>, vector<8x130xbf16>
    tpu.vector_store %arg15[%c152_432, %c0_433], %371 {strides = array<i32>} : memref<216x130xbf16, #tpu.memory_space<vmem>>, vector<8x130xbf16>,
    %c0_434 = arith.constant 0 : index
    %c74_435 = arith.constant 74 : index
    %373 = vector.load %arg14[%c0_434, %c74_435] : memref<8x216xf32, #tpu.memory_space<vmem>>, vector<8x130xf32>
    %374 = arith.truncf %373 : vector<8x130xf32> to vector<8x130xbf16>
    %c160_436 = arith.constant 160 : index
    %c0_437 = arith.constant 0 : index
    %375 = vector.load %arg15[%c160_436, %c0_437] : memref<216x130xbf16, #tpu.memory_space<vmem>>, vector<8x130xbf16>
    tpu.vector_store %arg15[%c160_436, %c0_437], %374 {strides = array<i32>} : memref<216x130xbf16, #tpu.memory_space<vmem>>, vector<8x130xbf16>,
    %c0_438 = arith.constant 0 : index
    %c78_439 = arith.constant 78 : index
    %376 = vector.load %arg14[%c0_438, %c78_439] : memref<8x216xf32, #tpu.memory_space<vmem>>, vector<8x130xf32>
    %377 = arith.truncf %376 : vector<8x130xf32> to vector<8x130xbf16>
    %c168_440 = arith.constant 168 : index
    %c0_441 = arith.constant 0 : index
    %378 = vector.load %arg15[%c168_440, %c0_441] : memref<216x130xbf16, #tpu.memory_space<vmem>>, vector<8x130xbf16>
    tpu.vector_store %arg15[%c168_440, %c0_441], %377 {strides = array<i32>} : memref<216x130xbf16, #tpu.memory_space<vmem>>, vector<8x130xbf16>,
    %c0_442 = arith.constant 0 : index
    %c79_443 = arith.constant 79 : index
    %379 = vector.load %arg14[%c0_442, %c79_443] : memref<8x216xf32, #tpu.memory_space<vmem>>, vector<8x130xf32>
    %380 = arith.truncf %379 : vector<8x130xf32> to vector<8x130xbf16>
    %c176_444 = arith.constant 176 : index
    %c0_445 = arith.constant 0 : index
    %381 = vector.load %arg15[%c176_444, %c0_445] : memref<216x130xbf16, #tpu.memory_space<vmem>>, vector<8x130xbf16>
    tpu.vector_store %arg15[%c176_444, %c0_445], %380 {strides = array<i32>} : memref<216x130xbf16, #tpu.memory_space<vmem>>, vector<8x130xbf16>,
    %c0_446 = arith.constant 0 : index
    %c80_447 = arith.constant 80 : index
    %382 = vector.load %arg14[%c0_446, %c80_447] : memref<8x216xf32, #tpu.memory_space<vmem>>, vector<8x130xf32>
    %383 = arith.truncf %382 : vector<8x130xf32> to vector<8x130xbf16>
    %c184_448 = arith.constant 184 : index
    %c0_449 = arith.constant 0 : index
    %384 = vector.load %arg15[%c184_448, %c0_449] : memref<216x130xbf16, #tpu.memory_space<vmem>>, vector<8x130xbf16>
    tpu.vector_store %arg15[%c184_448, %c0_449], %383 {strides = array<i32>} : memref<216x130xbf16, #tpu.memory_space<vmem>>, vector<8x130xbf16>,
    %c0_450 = arith.constant 0 : index
    %c84_451 = arith.constant 84 : index
    %385 = vector.load %arg14[%c0_450, %c84_451] : memref<8x216xf32, #tpu.memory_space<vmem>>, vector<8x130xf32>
    %386 = arith.truncf %385 : vector<8x130xf32> to vector<8x130xbf16>
    %c192_452 = arith.constant 192 : index
    %c0_453 = arith.constant 0 : index
    %387 = vector.load %arg15[%c192_452, %c0_453] : memref<216x130xbf16, #tpu.memory_space<vmem>>, vector<8x130xbf16>
    tpu.vector_store %arg15[%c192_452, %c0_453], %386 {strides = array<i32>} : memref<216x130xbf16, #tpu.memory_space<vmem>>, vector<8x130xbf16>,
    %c0_454 = arith.constant 0 : index
    %c85_455 = arith.constant 85 : index
    %388 = vector.load %arg14[%c0_454, %c85_455] : memref<8x216xf32, #tpu.memory_space<vmem>>, vector<8x130xf32>
    %389 = arith.truncf %388 : vector<8x130xf32> to vector<8x130xbf16>
    %c200_456 = arith.constant 200 : index
    %c0_457 = arith.constant 0 : index
    %390 = vector.load %arg15[%c200_456, %c0_457] : memref<216x130xbf16, #tpu.memory_space<vmem>>, vector<8x130xbf16>
    tpu.vector_store %arg15[%c200_456, %c0_457], %389 {strides = array<i32>} : memref<216x130xbf16, #tpu.memory_space<vmem>>, vector<8x130xbf16>,
    %c0_458 = arith.constant 0 : index
    %c86_459 = arith.constant 86 : index
    %391 = vector.load %arg14[%c0_458, %c86_459] : memref<8x216xf32, #tpu.memory_space<vmem>>, vector<8x130xf32>
    %392 = arith.truncf %391 : vector<8x130xf32> to vector<8x130xbf16>
    %c208_460 = arith.constant 208 : index
    %c0_461 = arith.constant 0 : index
    %393 = vector.load %arg15[%c208_460, %c0_461] : memref<216x130xbf16, #tpu.memory_space<vmem>>, vector<8x130xbf16>
    tpu.vector_store %arg15[%c208_460, %c0_461], %392 {strides = array<i32>} : memref<216x130xbf16, #tpu.memory_space<vmem>>, vector<8x130xbf16>,
    %c2_462 = arith.constant 2 : index
    %c0_463 = arith.constant 0 : index
    %c0_464 = arith.constant 0 : index
    %394 = vector.load %arg4[%c2_462, %c0_463, %c0_464] : memref<4x8x216xbf16, #tpu.memory_space<vmem>>, vector<1x8x216xbf16>
    %395 = vector.shape_cast %394 : vector<1x8x216xbf16> to vector<8x216xbf16>
    %c0_465 = arith.constant 0 : index
    %c0_466 = arith.constant 0 : index
    %396 = vector.load %arg15[%c0_465, %c0_466] : memref<216x130xbf16, #tpu.memory_space<vmem>>, vector<216x130xbf16>
    %cst_467 = arith.constant dense<0.000000e+00> : vector<8x130xf32>
    %397 = tpu.matmul %395, %396, %cst_467 {dimension_numbers = #tpu.dot_dimension_numbers<[1], [0], [0], [1], [0, 0, 1, 1], [], []>} : vector<8x216xbf16>, vector<216x130xbf16>, vector<8x130xf32> -> vector<8x130xf32>
    %c2_468 = arith.constant 2 : index
    %c0_469 = arith.constant 0 : index
    %c0_470 = arith.constant 0 : index
    %398 = vector.load %arg5[%c2_468, %c0_469, %c0_470] : memref<4x8x1xf32, #tpu.memory_space<vmem>>, vector<1x8x1xf32>
    %399 = vector.shape_cast %398 : vector<1x8x1xf32> to vector<8x1xf32>
    %400 = vector.broadcast %399 : vector<8x1xf32> to vector<8x130xf32>
    %401 = arith.addf %397, %400 : vector<8x130xf32>
    %402 = vector.broadcast %116 : vector<1x130xf32> to vector<8x130xf32>
    %403 = arith.mulf %401, %402 : vector<8x130xf32>
    %cst_471 = arith.constant 0.000000e+00 : f32
    %404 = vector.broadcast %cst_471 : f32 to vector<8x130xf32>
    %405 = arith.maximumf %403, %404 : vector<8x130xf32>
    %c0_472 = arith.constant 0 : index
    %c43_473 = arith.constant 43 : index
    %406 = vector.load %arg14[%c0_472, %c43_473] : memref<8x216xf32, #tpu.memory_space<vmem>>, vector<8x130xf32>
    tpu.vector_store %arg14[%c0_472, %c43_473], %405 {strides = array<i32>} : memref<8x216xf32, #tpu.memory_space<vmem>>, vector<8x130xf32>,
    %c0_474 = arith.constant 0 : index
    %c0_475 = arith.constant 0 : index
    %407 = vector.load %arg14[%c0_474, %c0_475] : memref<8x216xf32, #tpu.memory_space<vmem>>, vector<8x130xf32>
    %408 = arith.truncf %407 : vector<8x130xf32> to vector<8x130xbf16>
    %c0_476 = arith.constant 0 : index
    %c0_477 = arith.constant 0 : index
    %409 = vector.load %arg15[%c0_476, %c0_477] : memref<216x130xbf16, #tpu.memory_space<vmem>>, vector<8x130xbf16>
    tpu.vector_store %arg15[%c0_476, %c0_477], %408 {strides = array<i32>} : memref<216x130xbf16, #tpu.memory_space<vmem>>, vector<8x130xbf16>,
    %c0_478 = arith.constant 0 : index
    %c1_479 = arith.constant 1 : index
    %410 = vector.load %arg14[%c0_478, %c1_479] : memref<8x216xf32, #tpu.memory_space<vmem>>, vector<8x130xf32>
    %411 = arith.truncf %410 : vector<8x130xf32> to vector<8x130xbf16>
    %c8_480 = arith.constant 8 : index
    %c0_481 = arith.constant 0 : index
    %412 = vector.load %arg15[%c8_480, %c0_481] : memref<216x130xbf16, #tpu.memory_space<vmem>>, vector<8x130xbf16>
    tpu.vector_store %arg15[%c8_480, %c0_481], %411 {strides = array<i32>} : memref<216x130xbf16, #tpu.memory_space<vmem>>, vector<8x130xbf16>,
    %c0_482 = arith.constant 0 : index
    %c2_483 = arith.constant 2 : index
    %413 = vector.load %arg14[%c0_482, %c2_483] : memref<8x216xf32, #tpu.memory_space<vmem>>, vector<8x130xf32>
    %414 = arith.truncf %413 : vector<8x130xf32> to vector<8x130xbf16>
    %c16_484 = arith.constant 16 : index
    %c0_485 = arith.constant 0 : index
    %415 = vector.load %arg15[%c16_484, %c0_485] : memref<216x130xbf16, #tpu.memory_space<vmem>>, vector<8x130xbf16>
    tpu.vector_store %arg15[%c16_484, %c0_485], %414 {strides = array<i32>} : memref<216x130xbf16, #tpu.memory_space<vmem>>, vector<8x130xbf16>,
    %c0_486 = arith.constant 0 : index
    %c6_487 = arith.constant 6 : index
    %416 = vector.load %arg14[%c0_486, %c6_487] : memref<8x216xf32, #tpu.memory_space<vmem>>, vector<8x130xf32>
    %417 = arith.truncf %416 : vector<8x130xf32> to vector<8x130xbf16>
    %c24_488 = arith.constant 24 : index
    %c0_489 = arith.constant 0 : index
    %418 = vector.load %arg15[%c24_488, %c0_489] : memref<216x130xbf16, #tpu.memory_space<vmem>>, vector<8x130xbf16>
    tpu.vector_store %arg15[%c24_488, %c0_489], %417 {strides = array<i32>} : memref<216x130xbf16, #tpu.memory_space<vmem>>, vector<8x130xbf16>,
    %c0_490 = arith.constant 0 : index
    %c7_491 = arith.constant 7 : index
    %419 = vector.load %arg14[%c0_490, %c7_491] : memref<8x216xf32, #tpu.memory_space<vmem>>, vector<8x130xf32>
    %420 = arith.truncf %419 : vector<8x130xf32> to vector<8x130xbf16>
    %c32_492 = arith.constant 32 : index
    %c0_493 = arith.constant 0 : index
    %421 = vector.load %arg15[%c32_492, %c0_493] : memref<216x130xbf16, #tpu.memory_space<vmem>>, vector<8x130xbf16>
    tpu.vector_store %arg15[%c32_492, %c0_493], %420 {strides = array<i32>} : memref<216x130xbf16, #tpu.memory_space<vmem>>, vector<8x130xbf16>,
    %c0_494 = arith.constant 0 : index
    %c8_495 = arith.constant 8 : index
    %422 = vector.load %arg14[%c0_494, %c8_495] : memref<8x216xf32, #tpu.memory_space<vmem>>, vector<8x130xf32>
    %423 = arith.truncf %422 : vector<8x130xf32> to vector<8x130xbf16>
    %c40_496 = arith.constant 40 : index
    %c0_497 = arith.constant 0 : index
    %424 = vector.load %arg15[%c40_496, %c0_497] : memref<216x130xbf16, #tpu.memory_space<vmem>>, vector<8x130xbf16>
    tpu.vector_store %arg15[%c40_496, %c0_497], %423 {strides = array<i32>} : memref<216x130xbf16, #tpu.memory_space<vmem>>, vector<8x130xbf16>,
    %c0_498 = arith.constant 0 : index
    %c12_499 = arith.constant 12 : index
    %425 = vector.load %arg14[%c0_498, %c12_499] : memref<8x216xf32, #tpu.memory_space<vmem>>, vector<8x130xf32>
    %426 = arith.truncf %425 : vector<8x130xf32> to vector<8x130xbf16>
    %c48_500 = arith.constant 48 : index
    %c0_501 = arith.constant 0 : index
    %427 = vector.load %arg15[%c48_500, %c0_501] : memref<216x130xbf16, #tpu.memory_space<vmem>>, vector<8x130xbf16>
    tpu.vector_store %arg15[%c48_500, %c0_501], %426 {strides = array<i32>} : memref<216x130xbf16, #tpu.memory_space<vmem>>, vector<8x130xbf16>,
    %c0_502 = arith.constant 0 : index
    %c13_503 = arith.constant 13 : index
    %428 = vector.load %arg14[%c0_502, %c13_503] : memref<8x216xf32, #tpu.memory_space<vmem>>, vector<8x130xf32>
    %429 = arith.truncf %428 : vector<8x130xf32> to vector<8x130xbf16>
    %c56_504 = arith.constant 56 : index
    %c0_505 = arith.constant 0 : index
    %430 = vector.load %arg15[%c56_504, %c0_505] : memref<216x130xbf16, #tpu.memory_space<vmem>>, vector<8x130xbf16>
    tpu.vector_store %arg15[%c56_504, %c0_505], %429 {strides = array<i32>} : memref<216x130xbf16, #tpu.memory_space<vmem>>, vector<8x130xbf16>,
    %c0_506 = arith.constant 0 : index
    %c14_507 = arith.constant 14 : index
    %431 = vector.load %arg14[%c0_506, %c14_507] : memref<8x216xf32, #tpu.memory_space<vmem>>, vector<8x130xf32>
    %432 = arith.truncf %431 : vector<8x130xf32> to vector<8x130xbf16>
    %c64_508 = arith.constant 64 : index
    %c0_509 = arith.constant 0 : index
    %433 = vector.load %arg15[%c64_508, %c0_509] : memref<216x130xbf16, #tpu.memory_space<vmem>>, vector<8x130xbf16>
    tpu.vector_store %arg15[%c64_508, %c0_509], %432 {strides = array<i32>} : memref<216x130xbf16, #tpu.memory_space<vmem>>, vector<8x130xbf16>,
    %c0_510 = arith.constant 0 : index
    %c36_511 = arith.constant 36 : index
    %434 = vector.load %arg14[%c0_510, %c36_511] : memref<8x216xf32, #tpu.memory_space<vmem>>, vector<8x130xf32>
    %435 = arith.truncf %434 : vector<8x130xf32> to vector<8x130xbf16>
    %c72_512 = arith.constant 72 : index
    %c0_513 = arith.constant 0 : index
    %436 = vector.load %arg15[%c72_512, %c0_513] : memref<216x130xbf16, #tpu.memory_space<vmem>>, vector<8x130xbf16>
    tpu.vector_store %arg15[%c72_512, %c0_513], %435 {strides = array<i32>} : memref<216x130xbf16, #tpu.memory_space<vmem>>, vector<8x130xbf16>,
    %c0_514 = arith.constant 0 : index
    %c37_515 = arith.constant 37 : index
    %437 = vector.load %arg14[%c0_514, %c37_515] : memref<8x216xf32, #tpu.memory_space<vmem>>, vector<8x130xf32>
    %438 = arith.truncf %437 : vector<8x130xf32> to vector<8x130xbf16>
    %c80_516 = arith.constant 80 : index
    %c0_517 = arith.constant 0 : index
    %439 = vector.load %arg15[%c80_516, %c0_517] : memref<216x130xbf16, #tpu.memory_space<vmem>>, vector<8x130xbf16>
    tpu.vector_store %arg15[%c80_516, %c0_517], %438 {strides = array<i32>} : memref<216x130xbf16, #tpu.memory_space<vmem>>, vector<8x130xbf16>,
    %c0_518 = arith.constant 0 : index
    %c38_519 = arith.constant 38 : index
    %440 = vector.load %arg14[%c0_518, %c38_519] : memref<8x216xf32, #tpu.memory_space<vmem>>, vector<8x130xf32>
    %441 = arith.truncf %440 : vector<8x130xf32> to vector<8x130xbf16>
    %c88_520 = arith.constant 88 : index
    %c0_521 = arith.constant 0 : index
    %442 = vector.load %arg15[%c88_520, %c0_521] : memref<216x130xbf16, #tpu.memory_space<vmem>>, vector<8x130xbf16>
    tpu.vector_store %arg15[%c88_520, %c0_521], %441 {strides = array<i32>} : memref<216x130xbf16, #tpu.memory_space<vmem>>, vector<8x130xbf16>,
    %c0_522 = arith.constant 0 : index
    %c42_523 = arith.constant 42 : index
    %443 = vector.load %arg14[%c0_522, %c42_523] : memref<8x216xf32, #tpu.memory_space<vmem>>, vector<8x130xf32>
    %444 = arith.truncf %443 : vector<8x130xf32> to vector<8x130xbf16>
    %c96_524 = arith.constant 96 : index
    %c0_525 = arith.constant 0 : index
    %445 = vector.load %arg15[%c96_524, %c0_525] : memref<216x130xbf16, #tpu.memory_space<vmem>>, vector<8x130xbf16>
    tpu.vector_store %arg15[%c96_524, %c0_525], %444 {strides = array<i32>} : memref<216x130xbf16, #tpu.memory_space<vmem>>, vector<8x130xbf16>,
    %c0_526 = arith.constant 0 : index
    %c43_527 = arith.constant 43 : index
    %446 = vector.load %arg14[%c0_526, %c43_527] : memref<8x216xf32, #tpu.memory_space<vmem>>, vector<8x130xf32>
    %447 = arith.truncf %446 : vector<8x130xf32> to vector<8x130xbf16>
    %c104_528 = arith.constant 104 : index
    %c0_529 = arith.constant 0 : index
    %448 = vector.load %arg15[%c104_528, %c0_529] : memref<216x130xbf16, #tpu.memory_space<vmem>>, vector<8x130xbf16>
    tpu.vector_store %arg15[%c104_528, %c0_529], %447 {strides = array<i32>} : memref<216x130xbf16, #tpu.memory_space<vmem>>, vector<8x130xbf16>,
    %c0_530 = arith.constant 0 : index
    %c44_531 = arith.constant 44 : index
    %449 = vector.load %arg14[%c0_530, %c44_531] : memref<8x216xf32, #tpu.memory_space<vmem>>, vector<8x130xf32>
    %450 = arith.truncf %449 : vector<8x130xf32> to vector<8x130xbf16>
    %c112_532 = arith.constant 112 : index
    %c0_533 = arith.constant 0 : index
    %451 = vector.load %arg15[%c112_532, %c0_533] : memref<216x130xbf16, #tpu.memory_space<vmem>>, vector<8x130xbf16>
    tpu.vector_store %arg15[%c112_532, %c0_533], %450 {strides = array<i32>} : memref<216x130xbf16, #tpu.memory_space<vmem>>, vector<8x130xbf16>,
    %c0_534 = arith.constant 0 : index
    %c48_535 = arith.constant 48 : index
    %452 = vector.load %arg14[%c0_534, %c48_535] : memref<8x216xf32, #tpu.memory_space<vmem>>, vector<8x130xf32>
    %453 = arith.truncf %452 : vector<8x130xf32> to vector<8x130xbf16>
    %c120_536 = arith.constant 120 : index
    %c0_537 = arith.constant 0 : index
    %454 = vector.load %arg15[%c120_536, %c0_537] : memref<216x130xbf16, #tpu.memory_space<vmem>>, vector<8x130xbf16>
    tpu.vector_store %arg15[%c120_536, %c0_537], %453 {strides = array<i32>} : memref<216x130xbf16, #tpu.memory_space<vmem>>, vector<8x130xbf16>,
    %c0_538 = arith.constant 0 : index
    %c49_539 = arith.constant 49 : index
    %455 = vector.load %arg14[%c0_538, %c49_539] : memref<8x216xf32, #tpu.memory_space<vmem>>, vector<8x130xf32>
    %456 = arith.truncf %455 : vector<8x130xf32> to vector<8x130xbf16>
    %c128_540 = arith.constant 128 : index
    %c0_541 = arith.constant 0 : index
    %457 = vector.load %arg15[%c128_540, %c0_541] : memref<216x130xbf16, #tpu.memory_space<vmem>>, vector<8x130xbf16>
    tpu.vector_store %arg15[%c128_540, %c0_541], %456 {strides = array<i32>} : memref<216x130xbf16, #tpu.memory_space<vmem>>, vector<8x130xbf16>,
    %c0_542 = arith.constant 0 : index
    %c50_543 = arith.constant 50 : index
    %458 = vector.load %arg14[%c0_542, %c50_543] : memref<8x216xf32, #tpu.memory_space<vmem>>, vector<8x130xf32>
    %459 = arith.truncf %458 : vector<8x130xf32> to vector<8x130xbf16>
    %c136_544 = arith.constant 136 : index
    %c0_545 = arith.constant 0 : index
    %460 = vector.load %arg15[%c136_544, %c0_545] : memref<216x130xbf16, #tpu.memory_space<vmem>>, vector<8x130xbf16>
    tpu.vector_store %arg15[%c136_544, %c0_545], %459 {strides = array<i32>} : memref<216x130xbf16, #tpu.memory_space<vmem>>, vector<8x130xbf16>,
    %c0_546 = arith.constant 0 : index
    %c72_547 = arith.constant 72 : index
    %461 = vector.load %arg14[%c0_546, %c72_547] : memref<8x216xf32, #tpu.memory_space<vmem>>, vector<8x130xf32>
    %462 = arith.truncf %461 : vector<8x130xf32> to vector<8x130xbf16>
    %c144_548 = arith.constant 144 : index
    %c0_549 = arith.constant 0 : index
    %463 = vector.load %arg15[%c144_548, %c0_549] : memref<216x130xbf16, #tpu.memory_space<vmem>>, vector<8x130xbf16>
    tpu.vector_store %arg15[%c144_548, %c0_549], %462 {strides = array<i32>} : memref<216x130xbf16, #tpu.memory_space<vmem>>, vector<8x130xbf16>,
    %c0_550 = arith.constant 0 : index
    %c73_551 = arith.constant 73 : index
    %464 = vector.load %arg14[%c0_550, %c73_551] : memref<8x216xf32, #tpu.memory_space<vmem>>, vector<8x130xf32>
    %465 = arith.truncf %464 : vector<8x130xf32> to vector<8x130xbf16>
    %c152_552 = arith.constant 152 : index
    %c0_553 = arith.constant 0 : index
    %466 = vector.load %arg15[%c152_552, %c0_553] : memref<216x130xbf16, #tpu.memory_space<vmem>>, vector<8x130xbf16>
    tpu.vector_store %arg15[%c152_552, %c0_553], %465 {strides = array<i32>} : memref<216x130xbf16, #tpu.memory_space<vmem>>, vector<8x130xbf16>,
    %c0_554 = arith.constant 0 : index
    %c74_555 = arith.constant 74 : index
    %467 = vector.load %arg14[%c0_554, %c74_555] : memref<8x216xf32, #tpu.memory_space<vmem>>, vector<8x130xf32>
    %468 = arith.truncf %467 : vector<8x130xf32> to vector<8x130xbf16>
    %c160_556 = arith.constant 160 : index
    %c0_557 = arith.constant 0 : index
    %469 = vector.load %arg15[%c160_556, %c0_557] : memref<216x130xbf16, #tpu.memory_space<vmem>>, vector<8x130xbf16>
    tpu.vector_store %arg15[%c160_556, %c0_557], %468 {strides = array<i32>} : memref<216x130xbf16, #tpu.memory_space<vmem>>, vector<8x130xbf16>,
    %c0_558 = arith.constant 0 : index
    %c78_559 = arith.constant 78 : index
    %470 = vector.load %arg14[%c0_558, %c78_559] : memref<8x216xf32, #tpu.memory_space<vmem>>, vector<8x130xf32>
    %471 = arith.truncf %470 : vector<8x130xf32> to vector<8x130xbf16>
    %c168_560 = arith.constant 168 : index
    %c0_561 = arith.constant 0 : index
    %472 = vector.load %arg15[%c168_560, %c0_561] : memref<216x130xbf16, #tpu.memory_space<vmem>>, vector<8x130xbf16>
    tpu.vector_store %arg15[%c168_560, %c0_561], %471 {strides = array<i32>} : memref<216x130xbf16, #tpu.memory_space<vmem>>, vector<8x130xbf16>,
    %c0_562 = arith.constant 0 : index
    %c79_563 = arith.constant 79 : index
    %473 = vector.load %arg14[%c0_562, %c79_563] : memref<8x216xf32, #tpu.memory_space<vmem>>, vector<8x130xf32>
    %474 = arith.truncf %473 : vector<8x130xf32> to vector<8x130xbf16>
    %c176_564 = arith.constant 176 : index
    %c0_565 = arith.constant 0 : index
    %475 = vector.load %arg15[%c176_564, %c0_565] : memref<216x130xbf16, #tpu.memory_space<vmem>>, vector<8x130xbf16>
    tpu.vector_store %arg15[%c176_564, %c0_565], %474 {strides = array<i32>} : memref<216x130xbf16, #tpu.memory_space<vmem>>, vector<8x130xbf16>,
    %c0_566 = arith.constant 0 : index
    %c80_567 = arith.constant 80 : index
    %476 = vector.load %arg14[%c0_566, %c80_567] : memref<8x216xf32, #tpu.memory_space<vmem>>, vector<8x130xf32>
    %477 = arith.truncf %476 : vector<8x130xf32> to vector<8x130xbf16>
    %c184_568 = arith.constant 184 : index
    %c0_569 = arith.constant 0 : index
    %478 = vector.load %arg15[%c184_568, %c0_569] : memref<216x130xbf16, #tpu.memory_space<vmem>>, vector<8x130xbf16>
    tpu.vector_store %arg15[%c184_568, %c0_569], %477 {strides = array<i32>} : memref<216x130xbf16, #tpu.memory_space<vmem>>, vector<8x130xbf16>,
    %c0_570 = arith.constant 0 : index
    %c84_571 = arith.constant 84 : index
    %479 = vector.load %arg14[%c0_570, %c84_571] : memref<8x216xf32, #tpu.memory_space<vmem>>, vector<8x130xf32>
    %480 = arith.truncf %479 : vector<8x130xf32> to vector<8x130xbf16>
    %c192_572 = arith.constant 192 : index
    %c0_573 = arith.constant 0 : index
    %481 = vector.load %arg15[%c192_572, %c0_573] : memref<216x130xbf16, #tpu.memory_space<vmem>>, vector<8x130xbf16>
    tpu.vector_store %arg15[%c192_572, %c0_573], %480 {strides = array<i32>} : memref<216x130xbf16, #tpu.memory_space<vmem>>, vector<8x130xbf16>,
    %c0_574 = arith.constant 0 : index
    %c85_575 = arith.constant 85 : index
    %482 = vector.load %arg14[%c0_574, %c85_575] : memref<8x216xf32, #tpu.memory_space<vmem>>, vector<8x130xf32>
    %483 = arith.truncf %482 : vector<8x130xf32> to vector<8x130xbf16>
    %c200_576 = arith.constant 200 : index
    %c0_577 = arith.constant 0 : index
    %484 = vector.load %arg15[%c200_576, %c0_577] : memref<216x130xbf16, #tpu.memory_space<vmem>>, vector<8x130xbf16>
    tpu.vector_store %arg15[%c200_576, %c0_577], %483 {strides = array<i32>} : memref<216x130xbf16, #tpu.memory_space<vmem>>, vector<8x130xbf16>,
    %c0_578 = arith.constant 0 : index
    %c86_579 = arith.constant 86 : index
    %485 = vector.load %arg14[%c0_578, %c86_579] : memref<8x216xf32, #tpu.memory_space<vmem>>, vector<8x130xf32>
    %486 = arith.truncf %485 : vector<8x130xf32> to vector<8x130xbf16>
    %c208_580 = arith.constant 208 : index
    %c0_581 = arith.constant 0 : index
    %487 = vector.load %arg15[%c208_580, %c0_581] : memref<216x130xbf16, #tpu.memory_space<vmem>>, vector<8x130xbf16>
    tpu.vector_store %arg15[%c208_580, %c0_581], %486 {strides = array<i32>} : memref<216x130xbf16, #tpu.memory_space<vmem>>, vector<8x130xbf16>,
    %c3 = arith.constant 3 : index
    %c0_582 = arith.constant 0 : index
    %c0_583 = arith.constant 0 : index
    %488 = vector.load %arg4[%c3, %c0_582, %c0_583] : memref<4x8x216xbf16, #tpu.memory_space<vmem>>, vector<1x8x216xbf16>
    %489 = vector.shape_cast %488 : vector<1x8x216xbf16> to vector<8x216xbf16>
    %c0_584 = arith.constant 0 : index
    %c0_585 = arith.constant 0 : index
    %490 = vector.load %arg15[%c0_584, %c0_585] : memref<216x130xbf16, #tpu.memory_space<vmem>>, vector<216x130xbf16>
    %cst_586 = arith.constant dense<0.000000e+00> : vector<8x130xf32>
    %491 = tpu.matmul %489, %490, %cst_586 {dimension_numbers = #tpu.dot_dimension_numbers<[1], [0], [0], [1], [0, 0, 1, 1], [], []>} : vector<8x216xbf16>, vector<216x130xbf16>, vector<8x130xf32> -> vector<8x130xf32>
    %c3_587 = arith.constant 3 : index
    %c0_588 = arith.constant 0 : index
    %c0_589 = arith.constant 0 : index
    %492 = vector.load %arg5[%c3_587, %c0_588, %c0_589] : memref<4x8x1xf32, #tpu.memory_space<vmem>>, vector<1x8x1xf32>
    %493 = vector.shape_cast %492 : vector<1x8x1xf32> to vector<8x1xf32>
    %494 = vector.broadcast %493 : vector<8x1xf32> to vector<8x130xf32>
    %495 = arith.addf %491, %494 : vector<8x130xf32>
    %c0_590 = arith.constant 0 : index
    %c43_591 = arith.constant 43 : index
    %496 = vector.load %arg13[%c0_590, %c43_591] : memref<8x216xf32, #tpu.memory_space<vmem>>, vector<8x130xf32>
    %497 = vector.broadcast %116 : vector<1x130xf32> to vector<8x130xf32>
    %498 = arith.mulf %495, %497 : vector<8x130xf32>
    %499 = arith.addf %496, %498 : vector<8x130xf32>
    %c0_592 = arith.constant 0 : index
    %c43_593 = arith.constant 43 : index
    %500 = vector.load %arg13[%c0_592, %c43_593] : memref<8x216xf32, #tpu.memory_space<vmem>>, vector<8x130xf32>
    tpu.vector_store %arg13[%c0_592, %c43_593], %499 {strides = array<i32>} : memref<8x216xf32, #tpu.memory_space<vmem>>, vector<8x130xf32>,
    %c0_594 = arith.constant 0 : index
    %c0_595 = arith.constant 0 : index
    %501 = vector.load %arg13[%c0_594, %c0_595] : memref<8x216xf32, #tpu.memory_space<vmem>>, vector<8x216xf32>
    %c0_596 = arith.constant 0 : index
    %c0_597 = arith.constant 0 : index
    %c0_598 = arith.constant 0 : index
    %502 = vector.load %arg9[%c0_596, %c0_597, %c0_598] : memref<1x8x216xf32, #tpu.memory_space<vmem>>, vector<1x8x216xf32>
    %503 = vector.shape_cast %502 : vector<1x8x216xf32> to vector<8x216xf32>
    %504 = vector.shape_cast %501 : vector<8x216xf32> to vector<1x8x216xf32>
    tpu.vector_store %arg9[%c0_596, %c0_597, %c0_598], %504 {strides = array<i32>} : memref<1x8x216xf32, #tpu.memory_space<vmem>>, vector<1x8x216xf32>,
    return
  }
  func.func @transform_0(%arg0: i32) -> (i32, i32, i32) {
    %c0_i32 = arith.constant 0 : i32
    %c0_i32_0 = arith.constant 0 : i32
    %c0_i32_1 = arith.constant 0 : i32
    return %arg0, %c0_i32, %c0_i32_0 : i32, i32, i32
  }
  func.func @transform_1(%arg0: i32) -> (i32, i32) {
    %c0_i32 = arith.constant 0 : i32
    %c0_i32_0 = arith.constant 0 : i32
    %c0_i32_1 = arith.constant 0 : i32
    return %c0_i32, %c0_i32_0 : i32, i32
  }
  func.func @transform_2(%arg0: i32) -> (i32, i32) {
    %c0_i32 = arith.constant 0 : i32
    %c0_i32_0 = arith.constant 0 : i32
    %c0_i32_1 = arith.constant 0 : i32
    return %c0_i32, %c0_i32_0 : i32, i32
  }
  func.func @transform_3(%arg0: i32) -> (i32, i32, i32) {
    %c0_i32 = arith.constant 0 : i32
    %c0_i32_0 = arith.constant 0 : i32
    %c0_i32_1 = arith.constant 0 : i32
    %c0_i32_2 = arith.constant 0 : i32
    return %c0_i32, %c0_i32_0, %c0_i32_1 : i32, i32, i32
  }
  func.func @transform_4(%arg0: i32) -> (i32, i32, i32) {
    %c0_i32 = arith.constant 0 : i32
    %c0_i32_0 = arith.constant 0 : i32
    %c0_i32_1 = arith.constant 0 : i32
    %c0_i32_2 = arith.constant 0 : i32
    return %c0_i32, %c0_i32_0, %c0_i32_1 : i32, i32, i32
  }
  func.func @transform_5(%arg0: i32) -> (i32, i32) {
    %c0_i32 = arith.constant 0 : i32
    %c0_i32_0 = arith.constant 0 : i32
    %c0_i32_1 = arith.constant 0 : i32
    return %c0_i32, %c0_i32_0 : i32, i32
  }
  func.func @transform_6(%arg0: i32) -> (i32, i32) {
    %c0_i32 = arith.constant 0 : i32
    %c0_i32_0 = arith.constant 0 : i32
    %c0_i32_1 = arith.constant 0 : i32
    return %c0_i32, %c0_i32_0 : i32, i32
  }
  func.func @transform_7(%arg0: i32) -> (i32, i32) {
    %c0_i32 = arith.constant 0 : i32
    %c0_i32_0 = arith.constant 0 : i32
    %c0_i32_1 = arith.constant 0 : i32
    return %c0_i32, %c0_i32_0 : i32, i32
  }
  func.func @transform_8(%arg0: i32) -> (i32, i32, i32) {
    %c0_i32 = arith.constant 0 : i32
    %c0_i32_0 = arith.constant 0 : i32
    %c0_i32_1 = arith.constant 0 : i32
    return %arg0, %c0_i32, %c0_i32_0 : i32, i32, i32
  }
}

</mosaic_0001>

<bundles_post_ra>
// kernel: conv_sequence_forward.1
= control target key start
LH: loop header
LB: loop body
LE: loop exit
PB: predicated region body
PF: predicated region fallthrough
CT: control target
= control target key end

     0   :  { %s8733_s0 = inlined_call_operand.hbm [shape: f32[2,4,1000], index: 0, kind: input, shape index: {}]   ;;  %s8734_s1 = inlined_call_operand.hbm [shape: bf16[8,108], index: 1, kind: input, shape index: {}]   ;;  %s8735_s2 = inlined_call_operand.hbm [shape: f32[8,1], index: 2, kind: input, shape index: {}]   ;;  %s8736_s3 = inlined_call_operand.hbm [shape: bf16[4,8,216], index: 3, kind: input, shape index: {}]   ;;  %s8737_s4 = inlined_call_operand.hbm [shape: f32[4,8,1], index: 4, kind: input, shape index: {}]   ;;  %s8738_s5 = inlined_call_operand.hbm [shape: f32[1,778], index: 5, kind: input, shape index: {}]   ;;  %s8739_s6 = inlined_call_operand.hbm [shape: f32[1,130], index: 6, kind: input, shape index: {}]   ;;  %s8740_s7 = inlined_call_operand.hbm [shape: f32[667,216], index: 7, kind: input, shape index: {}]   ;;  %s8741_s8 = inlined_call_operand.hbm [shape: f32[2,8,216], index: 8, kind: output, shape index: {}]  }
   0x1   :  { %8856 = sst [smem:[#allocation35_spill]] %s8733_s0 }
   0x2   :  { %8857 = sst [smem:[#allocation36_spill]] %s8734_s1 }
   0x3   :  { %8858 = sst [smem:[#allocation37_spill]] %s8735_s2 }
   0x4   :  { %8859 = sst [smem:[#allocation38_spill]] %s8736_s3 }
   0x5   :  { %8860 = sst [smem:[#allocation39_spill]] %s8737_s4 }
   0x6   :  { %8861 = sst [smem:[#allocation40_spill]] %s8738_s5 }
   0x7   :  { %8862 = sst [smem:[#allocation41_spill]] %s8739_s6 }
   0x8   :  { %8863 = sst [smem:[#allocation42_spill]] %s8740_s7 }
   0x9   :  { %13 = vsyncpa [#allocation9], 0 }
   0xa   :  { %15 = vsyncpa [#allocation9 + $0x1], 0 }
   0xb   :  { %16 = vsyncpa [#allocation12], 0 }
   0xc   :  { %17 = vsyncpa [#allocation15], 0 }
   0xd   :  { %18 = vsyncpa [#allocation18], 0 }
   0xe   :  { %19 = vsyncpa [#allocation21], 0 }
   0xf   :  { %20 = vsyncpa [#allocation10], 0 }
  0x10   :  { %22 = vsyncpa [#allocation10 + $0x1], 0  ;;  %s6919_s27 = smov 0   ;;  %s6921_s28 = smov 0  }
  0x11   :  { %s6923_s29 = smov 0   ;;  %s6925_s30 = smov 0  }
  0x12 LB: > { %8864 = sst [smem:[#allocation29_spill]] %s6800_s28  ;;  %s6810_s9 = smov [#allocation11]   ;;  %s6808_s30 = sphi %s6925_s30, %s9061_s30   ;;  %s6804_s29 = sphi %s6923_s29, %s9064_s29   ;;  %s6800_s28 = sphi %s6921_s28, %s9063_s28   ;;  %s6796_s27 = sphi %s6919_s27, %s9062_s27  }
  0x13   : > { %8865 = sst [smem:[#allocation30_spill]] %s6804_s29  ;;  %s245_s10 = sshll.u32 %s6810_s9, 4  ;;  %s246_s10 = int_to_ptr.vmem [resolvable:$true] %s245_s10 }
  0x14   : > { %8866 = sst [smem:[#allocation31_spill]] %s6808_s30  ;;  %s6940_s11 = sadd.s32 4294967295, %s6808_s30  }
  0x15   : > { %p5525_p0 = scmp.ge.s32.totalorder %s6808_s30, 1  ;;  %p8742_p1 = scmp.eq.s32.totalorder %s6940_s11, 0 }
  0x16   : > { %p232_p2 = scmp.lt.s32.totalorder %s6808_s30, 3  ;;  %s6811_s13 = smov [#allocation14]  }
  0x17   : > { %s266_s14 = sshll.u32 %s6811_s13, 4  ;;  %s6812_s16 = smov [#allocation17]   ;;  %s6952_s14 = int_to_ptr.vmem [resolvable:$true] %s266_s14 }
  0x18   : > { %p6945_p3 = pnand %p5525_p0, %p232_p2  ;;  %s293_s17 = sshll.u32 %s6812_s16, 4  ;;  %s6960_s17 = int_to_ptr.vmem [resolvable:$true] %s293_s17 }
  0x19   : > { %s8869_s1 = sld [smem:[#allocation36_spill]] }
  0x1a   : > { %s8867_s12 = scalar_select %p6945_p3, 1, 0 }
  0x1b   : > { %p6140_p5 = pneg %p6945_p3 }
  0x1d   : > { %p6956_p6 = pnand %p6140_p5, %p8742_p1 }
  0x1f   : > { %s6500_s20 = scalar_lea.hbm %s8869_s1, 64  ;;  %p6970_p8 = pneg %p6956_p6 }
  0x20   : > { %p6501_p7 = scmp.ne.s32.totalorder %s8869_s1, %s6500_s20  ;;  %p6507_p11 = scmp.lt.u32.totalorder %s6500_s20, %s8869_s1 }
  0x22   : > { %p6503_p9 = pnand %p6970_p8, %p6501_p7 }
  0x24   : > { %p6504_p10 = pneg %p6503_p9 }
  0x26   : > { %p6509_p12 = pnand %p6507_p11, %p6504_p10 }
  0x28   : > { %6512 = shalt.err (!%p6509_p12)
}
  0x29   : > { %s6513_s26 = scalar_lea.vmem %s246_s10, 64  ;;  %p6521_p5 = scmp.lt.s32.totalorder %s246_s10, %s246_s10 }
  0x2a   : > { %p6514_p13 = scmp.ne.s32.totalorder %s246_s10, %s6513_s26  ;;  %p6522_p4 = scmp.lt.s32.totalorder %s6513_s26, %s6513_s26 }
  0x2c   : > { %p6516_p0 = pnand %p6514_p13, %p6970_p8  ;;  %p6523_p1 = por %p6522_p4, %p6521_p5 }
  0x2e   : > { %p6517_p2 = pneg %p6516_p0 }
  0x30   : > { %p6524_p3 = pnand %p6523_p1, %p6517_p2 }
  0x32   : > { %6527 = shalt.err (!%p6524_p3)
}
  0x33   : > { %6143 = dma.hbm_to_vmem [thread:$0]  (!%p6956_p6), %s8869_s1, 64, %s246_s10, [#allocation12]  }
  0x34   : > { %s8871_s3 = sld [smem:[#allocation38_spill]] }
  0x3a   : > { %s6528_s19 = scalar_lea.hbm %s8871_s3, 512 }
  0x3b   : > { %p6529_p7 = scmp.ne.s32.totalorder %s8871_s3, %s6528_s19  ;;  %p6535_p1 = scmp.lt.u32.totalorder %s6528_s19, %s8871_s3 }
  0x3d   : > { %p6531_p9 = pnand %p6529_p7, %p6970_p8 }
  0x3f   : > { %p6532_p4 = pneg %p6531_p9 }
  0x41   : > { %p6537_p3 = pnand %p6535_p1, %p6532_p4 }
  0x43   : > { %6540 = shalt.err (!%p6537_p3)
}
  0x44   : > { %s6541_s10 = scalar_lea.vmem %s6952_s14, 512  ;;  %p6549_p13 = scmp.lt.s32.totalorder %s6952_s14, %s6952_s14 }
  0x45   : > { %p6542_p10 = scmp.ne.s32.totalorder %s6952_s14, %s6541_s10  ;;  %p6550_p0 = scmp.lt.s32.totalorder %s6541_s10, %s6541_s10 }
  0x47   : > { %p6544_p11 = pnand %p6542_p10, %p6970_p8  ;;  %p6551_p2 = por %p6550_p0, %p6549_p13 }
  0x49   : > { %p6545_p12 = pneg %p6544_p11 }
  0x4b   : > { %p6552_p5 = pnand %p6551_p2, %p6545_p12 }
  0x4d   : > { %6555 = shalt.err (!%p6552_p5)
}
  0x4e   : > { %s8744_s25 = smov 128   ;;  %s6814_s26 = smov 8  }
  0x4f   : > { %6149 = dma.hbm_to_vmem [thread:$0]  (!%p6956_p6), %s8871_s3, 512, %s6952_s14, [#allocation15], %s8744_s25, %s8744_s25, %s6814_s26  }
  0x50   : > { %s8872_s5 = sld [smem:[#allocation40_spill]] }
  0x56   : > { %s6556_s19 = scalar_lea.hbm %s8872_s5, 112 }
  0x57   : > { %p6557_p7 = scmp.ne.s32.totalorder %s8872_s5, %s6556_s19  ;;  %p6563_p1 = scmp.lt.u32.totalorder %s6556_s19, %s8872_s5 }
  0x59   : > { %p6559_p9 = pnand %p6557_p7, %p6970_p8 }
  0x5b   : > { %p6560_p4 = pneg %p6559_p9 }
  0x5d   : > { %p6565_p3 = pnand %p6563_p1, %p6560_p4 }
  0x5f   : > { %6568 = shalt.err (!%p6565_p3)
}
  0x60   : > { %s6569_s14 = scalar_lea.vmem %s6960_s17, 112  ;;  %s6576_s10 = scalar_lea.vmem %s6960_s17, 128 }
  0x61   : > { %p6570_p10 = scmp.ne.s32.totalorder %s6960_s17, %s6569_s14  ;;  %p6577_p13 = scmp.lt.s32.totalorder %s6960_s17, %s6960_s17 }
  0x62   : > { %p6578_p0 = scmp.lt.s32.totalorder %s6576_s10, %s6569_s14 }
  0x63   : > { %p6572_p11 = pnand %p6570_p10, %p6970_p8 }
  0x64   : > { %p6579_p2 = por %p6578_p0, %p6577_p13 }
  0x65   : > { %p6573_p12 = pneg %p6572_p11 }
  0x67   : > { %p6580_p5 = pnand %p6579_p2, %p6573_p12 }
  0x69   : > { %6583 = shalt.err (!%p6580_p5)
}
  0x6a   : > { %6155 = dma.hbm_to_vmem [thread:$0]  (!%p6956_p6), %s8872_s5, 112, %s6960_s17, [#allocation18]  }
  0x6b   : > { %s6815_s16 = smov [#allocation13]   ;;  %s6816_s19 = smov [#allocation16]  }
  0x6c   : > { %s256_s18 = sshll.u32 %s6815_s16, 4  ;;  %s279_s20 = sshll.u32 %s6816_s19, 4  ;;  %s257_s18 = int_to_ptr.vmem [resolvable:$true] %s256_s18  ;;  %s280_s20 = int_to_ptr.vmem [resolvable:$true] %s279_s20 }
  0x6d   : > { %s8873_s2 = sld [smem:[#allocation37_spill]] }
  0x73   : > { %s6584_s24 = scalar_lea.hbm %s8873_s2, 128 }
  0x74   : > { %p6585_p7 = scmp.ne.s32.totalorder %s8873_s2, %s6584_s24  ;;  %p6591_p1 = scmp.lt.u32.totalorder %s6584_s24, %s8873_s2 }
  0x76   : > { %p6587_p9 = pnand %p6585_p7, %p6970_p8 }
  0x78   : > { %p6588_p4 = pneg %p6587_p9 }
  0x7a   : > { %p6593_p3 = pnand %p6591_p1, %p6588_p4 }
  0x7c   : > { %6596 = shalt.err (!%p6593_p3)
}
  0x7d   : > { %s6597_s17 = scalar_lea.vmem %s257_s18, 128  ;;  %p6605_p13 = scmp.lt.s32.totalorder %s257_s18, %s257_s18 }
  0x7e   : > { %p6598_p10 = scmp.ne.s32.totalorder %s257_s18, %s6597_s17  ;;  %p6606_p0 = scmp.lt.s32.totalorder %s6597_s17, %s6597_s17 }
  0x80   : > { %p6600_p11 = pnand %p6598_p10, %p6970_p8  ;;  %p6607_p2 = por %p6606_p0, %p6605_p13 }
  0x82   : > { %p6601_p12 = pneg %p6600_p11 }
  0x84   : > { %p6608_p5 = pnand %p6607_p2, %p6601_p12 }
  0x86   : > { %6611 = shalt.err (!%p6608_p5)
}
  0x87   : > { %6146 = dma.hbm_to_vmem [thread:$0]  (!%p6956_p6), %s8873_s2, 128, %s257_s18, [#allocation12]  }
  0x88   : > { %s8874_s4 = sld [smem:[#allocation39_spill]] }
  0x8e   : > { %s6612_s21 = scalar_lea.hbm %s8874_s4, 512 }
  0x8f   : > { %p6613_p7 = scmp.ne.s32.totalorder %s8874_s4, %s6612_s21  ;;  %p6619_p1 = scmp.lt.u32.totalorder %s6612_s21, %s8874_s4 }
  0x91   : > { %p6615_p9 = pnand %p6613_p7, %p6970_p8 }
  0x93   : > { %p6616_p4 = pneg %p6615_p9 }
  0x95   : > { %p6621_p3 = pnand %p6619_p1, %p6616_p4 }
  0x97   : > { %6624 = shalt.err (!%p6621_p3)
}
  0x98   : > { %s6625_s9 = scalar_lea.vmem %s280_s20, 512  ;;  %p6633_p13 = scmp.lt.s32.totalorder %s280_s20, %s280_s20 }
  0x99   : > { %p6626_p10 = scmp.ne.s32.totalorder %s280_s20, %s6625_s9  ;;  %p6634_p0 = scmp.lt.s32.totalorder %s6625_s9, %s6625_s9 }
  0x9b   : > { %p6628_p11 = pnand %p6626_p10, %p6970_p8  ;;  %p6635_p2 = por %p6634_p0, %p6633_p13 }
  0x9d   : > { %p6629_p12 = pneg %p6628_p11 }
  0x9f   : > { %p6636_p5 = pnand %p6635_p2, %p6629_p12 }
  0xa1   : > { %6639 = shalt.err (!%p6636_p5)
}
  0xa2   : > { %s8875_s18 = smov 128   ;;  %s6817_s16 = smov [#allocation19]  }
  0xa3   : > { %6152 = dma.hbm_to_vmem [thread:$0]  (!%p6956_p6), %s8874_s4, 512, %s280_s20, [#allocation15], %s8875_s18, %s8875_s18, %s6814_s26  }
  0xa4   : > { %s304_s25 = sshll.u32 %s6817_s16, 4  ;;  %s6818_s19 = smov [#allocation20]   ;;  %s305_s25 = int_to_ptr.vmem [resolvable:$true] %s304_s25 }
  0xa5   : > { %s314_s21 = sshll.u32 %s6818_s19, 4  ;;  %s8876_s6 = sld [smem:[#allocation41_spill]]  ;;  %s315_s21 = int_to_ptr.vmem [resolvable:$true] %s314_s21 }
  0xab   : > { %s6640_s14 = scalar_lea.hbm %s8876_s6, 32 }
  0xac   : > { %p6641_p7 = scmp.ne.s32.totalorder %s8876_s6, %s6640_s14  ;;  %p6647_p1 = scmp.lt.u32.totalorder %s6640_s14, %s8876_s6 }
  0xae   : > { %p6643_p9 = pnand %p6641_p7, %p6970_p8 }
  0xb0   : > { %p6644_p4 = pneg %p6643_p9 }
  0xb2   : > { %p6649_p3 = pnand %p6647_p1, %p6644_p4 }
  0xb4   : > { %6652 = shalt.err (!%p6649_p3)
}
  0xb5   : > { %s6653_s26 = scalar_lea.vmem %s305_s25, 32  ;;  %p6661_p13 = scmp.lt.s32.totalorder %s305_s25, %s305_s25 }
  0xb6   : > { %p6654_p10 = scmp.ne.s32.totalorder %s305_s25, %s6653_s26  ;;  %p6662_p0 = scmp.lt.s32.totalorder %s6653_s26, %s6653_s26 }
  0xb8   : > { %p6656_p11 = pnand %p6654_p10, %p6970_p8  ;;  %p6663_p2 = por %p6662_p0, %p6661_p13 }
  0xba   : > { %p6657_p12 = pneg %p6656_p11 }
  0xbc   : > { %p6664_p5 = pnand %p6663_p2, %p6657_p12 }
  0xbe   : > { %6667 = shalt.err (!%p6664_p5)
}
  0xbf   : > { %6158 = dma.hbm_to_vmem [thread:$0]  (!%p6956_p6), %s8876_s6, 32, %s305_s25, [#allocation18]  }
  0xc0   : > { %s8877_s7 = sld [smem:[#allocation42_spill]] }
  0xc6   : > { %s6668_s16 = scalar_lea.hbm %s8877_s7, 21504 }
  0xc7   : > { %p6669_p7 = scmp.ne.s32.totalorder %s8877_s7, %s6668_s16  ;;  %p6675_p1 = scmp.lt.u32.totalorder %s6668_s16, %s8877_s7 }
  0xc9   : > { %p6671_p9 = pnand %p6669_p7, %p6970_p8 }
  0xcb   : > { %p6672_p4 = pneg %p6671_p9 }
  0xcd   : > { %p6677_p3 = pnand %p6675_p1, %p6672_p4 }
  0xcf   : > { %6680 = shalt.err (!%p6677_p3)
}
  0xd0   : > { %s6681_s10 = scalar_lea.vmem %s315_s21, 21504  ;;  %p6689_p13 = scmp.lt.s32.totalorder %s315_s21, %s315_s21 }
  0xd1   : > { %p6682_p10 = scmp.ne.s32.totalorder %s315_s21, %s6681_s10  ;;  %p6690_p0 = scmp.lt.s32.totalorder %s6681_s10, %s6681_s10 }
  0xd3   : > { %p6684_p11 = pnand %p6682_p10, %p6970_p8  ;;  %p6691_p2 = por %p6690_p0, %p6689_p13 }
  0xd5   : > { %p6685_p12 = pneg %p6684_p11 }
  0xd7   : > { %p6692_p5 = pnand %p6691_p2, %p6685_p12 }
  0xd9   : > { %6695 = shalt.err (!%p6692_p5)
}
  0xda   : > { %s6819_s25 = smov 256   ;;  %s6820_s23 = smov 16  }
  0xdb   : > { %6161 = dma.hbm_to_vmem [thread:$0]  (!%p6956_p6), %s8877_s7, 21504, %s315_s21, [#allocation21], %s6819_s25, %s6819_s25, %s6820_s23  }
  0xdc   : > { %s5524_s26 = sadd.s32 4294967294, %s6808_s30   ;;  %s7113_s20 = sadd.s32 1, %s6808_s30  }
  0xdd   : > { %8878 = sst [smem:[#allocation32_spill]] %s7113_s20  ;;  %s35_s18 = sadd.s32 1, %s6804_s29 }
  0xde   : > { %s32_s1 = ssub.s32 %s6808_s30, %s7113_s20  ;;  %p42_p8 = scmp.ne.s32.totalorder %s6804_s29, %s6800_s28 }
  0xdf   : > { %p33_p7 = scmp.eq.s32.totalorder %s32_s1, 0  ;;  %p43_p9 = scmp.eq.s32.totalorder %s6808_s30, 0 }
  0xe0   : > { %p48_p4 = scmp.ne.s32.totalorder %s6800_s28, %s6796_s27  ;;  %p219_p1 = scmp.eq.s32.totalorder %s6940_s11, 1 }
  0xe1   : > { %s7125_s13 = scalar_select %p33_p7, %s6804_s29, %s35_s18  }
  0xe2   : > { %p44_p3 = por %p43_p9, %p42_p8  ;;  %p8880_p10 = scmp.eq.s32.totalorder %s6940_s11, 0 }
  0xe3   : > { %8879 = sst [smem:[#allocation33_spill]] %s7125_s13  ;;  %p7133_p6 = por %p219_p1, %p42_p8 }
  0xe4   : > { %p7129_p11 = por %p8880_p10, %p48_p4  ;;  %p225_p12 = scmp.eq.s32.totalorder %s5524_s26, 1 }
  0xe5   : > { %s8882_s21 = scalar_select %p7133_p6, 1, 0 }
  0xe6   : > { %p6177_p13 = scmp.lt.s32.totalorder %s6808_s30, 2  ;;  %s328_s16 = sand.u32 1, %s6804_s29  }
  0xe7   : > { %p7139_p0 = por %p225_p12, %p48_p4  ;;  %s5534_s22 = sshll.u32 %s328_s16, 5 }
  0xe8   : > { %s5798_s24 = sshll.u32 %s6808_s30, 9  ;;  %s8885_s0 = sld [smem:[#allocation35_spill]] }
  0xe9   : > { %s8883_s19 = scalar_select %p7139_p0, 1, 0 }
  0xea   : > { %s332_s23 = scalar_lea.vmem [#allocation8], %s5534_s22  ;;  %p7149_p2 = pnand %p6177_p13, %p44_p3 }
  0xeb   : > { %8884 = sst [smem:[#allocation34_spill]] %s8883_s19  ;;  %s340_s9 = sshll.u32 %s332_s23, 4  ;;  %s7153_s9 = int_to_ptr.vmem [resolvable:$true] %s340_s9 }
  0xec   : > { %s329_s26 = scalar_lea.sflag [#allocation9], %s328_s16  ;;  %p6698_p8 = pneg %p7149_p2 }
  0xee   : > { %s7147_s25 = scalar_lea.hbm %s8885_s0, %s5798_s24  ;;  %s6701_s24 = scalar_lea.hbm %s8885_s0, 1024 }
  0xef   : > { %s6696_s18 = scalar_lea.hbm %s7147_s25, 512  ;;  %p6702_p4 = scmp.lt.u32.totalorder %s7147_s25, %s8885_s0 }
  0xf0   : > { %p6697_p5 = scmp.ne.s32.totalorder %s7147_s25, %s6696_s18  ;;  %p6703_p1 = scmp.lt.u32.totalorder %s6701_s24, %s6696_s18 }
  0xf1   : > { %p6705_p10 = scmp.lt.u32.totalorder %s6696_s18, %s7147_s25 }
  0xf2   : > { %p6699_p7 = pnand %p6698_p8, %p6697_p5  ;;  %p6704_p3 = por %p6703_p1, %p6702_p4 }
  0xf4   : > { %p6700_p9 = pneg %p6699_p7  ;;  %p6706_p12 = por %p6705_p10, %p6704_p3 }
  0xf6   : > { %p6707_p13 = pnand %p6706_p12, %p6700_p9 }
  0xf8   : > { %6710 = shalt.err (!%p6707_p13)
}
  0xf9   : > { %s6711_s16 = scalar_lea.vmem %s7153_s9, 512  ;;  %s6821_s23 = smov [#allocation8]  }
  0xfa   : > { %p6712_p5 = scmp.ne.s32.totalorder %s7153_s9, %s6711_s16  ;;  %s6716_s1 = sshll.u32 %s6821_s23, 4  ;;  %s6717_s1 = int_to_ptr.vmem [resolvable:$false] %s6716_s1 }
  0xfb   : > { %s6718_s22 = scalar_lea.vmem %s6717_s1, 1024  ;;  %p6719_p6 = scmp.lt.s32.totalorder %s7153_s9, %s6717_s1 }
  0xfc   : > { %p6714_p7 = pnand %p6712_p5, %p6698_p8  ;;  %p6720_p4 = scmp.lt.s32.totalorder %s6718_s22, %s6711_s16 }
  0xfe   : > { %p6715_p0 = pneg %p6714_p7  ;;  %p6721_p1 = por %p6720_p4, %p6719_p6 }
 0x100   : > { %p6722_p3 = pnand %p6721_p1, %p6715_p0 }
 0x102   : > { %6725 = shalt.err (!%p6722_p3)
}
 0x103   : > { %6165 = dma.hbm_to_vmem [thread:$0]  (!%p7149_p2), %s7147_s25, 512, %s7153_s9, %s329_s26  }
 0x104   : > { %p8887_p9 = scmp.ne.s32.totalorder %s8867_s12, 0 }
 0x105   : > { %s7183_s18 = sand.u32 (!%p8887_p9), 1, %s6800_s28  }
 0x106   : > { %349 = sbr.rel (%p8887_p9) target bundleno = 3964 (0xf7c), region = 52  ;;  %s5538_s24 = sshll.u32 (!%p8887_p9), %s7183_s18, 5 }
 0x107   : > { %s352_s14 = scalar_lea.sflag (!%p8887_p9), [#allocation9], %s7183_s18  ;;  %s7187_s10 = scalar_lea.vmem (!%p8887_p9), [#allocation8], %s5538_s24 }
 0x10d   : > { %6771 = dma.done.wait (%p7129_p11), %s352_s14, 512  }
 0x10e   : > { %6773 = vsyncadd (%p7129_p11), %s352_s14, 4294966784  ;;  %p8888_p6 = scmp.eq.s32.totalorder %s6940_s11, 0 }
 0x110   : > { %6775 = dma.done.wait (%p8888_p6), [#allocation12], 192   ;;  %p8889_p0 = pmov %p8888_p6 }
 0x112   : > { %6777 = vsyncadd (%p8889_p0), [#allocation12], 4294967104  ;;  %p8890_p2 = pmov %p8889_p0 }
 0x113   : > { %p8891_p8 = pmov %p8889_p0 }
 0x114   : > { %6779 = dma.done.wait (%p8890_p2), [#allocation15], 1024  }
 0x115   : > { %6781 = vsyncadd (%p8891_p8), [#allocation15], 4294966272  ;;  %p8892_p10 = pmov %p8889_p0 }
 0x116   : > { %p8893_p12 = pmov %p8889_p0 }
 0x117   : > { %6783 = dma.done.wait (%p8892_p10), [#allocation18], 144  }
 0x118   : > { %6785 = vsyncadd (%p8893_p12), [#allocation18], 4294967152  ;;  %p8894_p11 = pmov %p8889_p0 }
 0x119   : > { %p8895_p13 = pmov %p8889_p0 }
 0x11a   : > { %6787 = dma.done.wait (%p8894_p11), [#allocation21], 21504  }
 0x11b   : > { %6789 = vsyncadd (%p8895_p13), [#allocation21], 4294945792  ;;  %v7210_v0 = vld [vmem:[%s7187_s10 + $0x8] sm:$0xff]  ;;  %v7213_v1 = vld [vmem:[%s7187_s10] sm:$0xff]  ;;  %s8793_s12 = smov 126   ;;  %s8795_s15 = smov 127  }
 0x11c   : > { %501 = vrot.lane.b32.xlu1 %v7210_v0, %s8793_s12  ;;  %452 = vrot.lane.b32.xlu0 %v7213_v1, %s8795_s15  ;;  %v7221_v2 = vcombine.high %v7213_v1, %v7213_v1  ;;  %430 = vst [vmem:[#allocation2] sm:$0xf] %v7213_v1  ;;  %s8774_s25 = smov 118   ;;  %v7231_v3 = vcombine.low %v7210_v0, %v7210_v0  ;;  %s6825_s9 = smov 117   ;;  %v7258_v5 = vld [vmem:[%s7187_s10 + $0x10] sm:$0xff]  ;;  %v7331_v7 = vld [vmem:[%s7187_s10 + $0x4] sm:$0xff] }
 0x11d   : > { %v7235_v4 = vcombine.low %v7213_v1, %v7213_v1  ;;  %s8780_s17 = smov 116   ;;  %s8782_s26 = smov 108   ;;  %434 = vst [vmem:[#allocation2 + $0x20] sm:$0xf] %v7258_v5  ;;  %v7271_v6 = vcombine.high %v7258_v5, %v7258_v5  ;;  %v7339_v8 = vcombine.high %v7331_v7, %v7331_v7  ;;  %v7346_v9 = vld [vmem:[%s7187_s10 + $0xc] sm:$0xff]  ;;  %v7362_v11 = vcombine.low %v7331_v7, %v7331_v7 }
 0x11e   : > { %431 = vst [vmem:[#allocation2 + $0x8] sm:$0xf] %v7221_v2  ;;  %s8746_s16 = smov 107   ;;  %s8748_s23 = smov 106   ;;  %v7354_v10 = vcombine.low %v7346_v9, %v7346_v9  ;;  %vm511_vm0 = vcmask 1031168   ;;  %vm558_vm1 = vcmask 965632   ;;  %v7449_v53 = vcombine.low %v7258_v5, %v7258_v5 }
 0x11f   : > { %435 = vst [vmem:[#allocation2 + $0x28] sm:$0xf] %v7271_v6  ;;  %s8754_s1 = smov 28   ;;  %s8750_s22 = smov 27   ;;  %vm464_vm2 = vcmask 1039360   ;;  %vm604_vm3 = vcmask 957440   ;;  %v7456_v60 = vcombine.high %v7210_v0, %v7210_v0 }
 0x120   : > { %499 = vrot.lane.b32.xlu1 %v7221_v2, %s8793_s12  ;;  %546 = vrot.lane.b32.xlu0 %v7213_v1, %s8774_s25  ;;  %s8752_s24 = smov 26   ;;  %s6833_s14 = smov 18   ;;  %vm8797_vm4 = vcmask 949248   ;;  %vm697_vm5 = vcmask 883712   ;;  %v418_v40 = vld [vmem:[%s7187_s10 + $0x8] sm:$0xff]  ;;  %vm744_vm6 = vcmask 875520  }
 0x121   : > { %v425_v43 = vcombine.high %v418_v40, %v418_v40  ;;  %432 = vst [vmem:[#allocation2 + $0x10] sm:$0xf] %v418_v40  ;;  %vm436_vm7 = vcmask 76800   ;;  %v420_v56 = vld [vmem:[%s7187_s10 + $0x18] sm:$0xf]  ;;  %vm790_vm8 = vcmask 867328  }
 0x122   : > { %437 = vst.msk [vmem:[#allocation2 + $0x30] sm:$0xf] %vm436_vm7, %v420_v56  ;;  %vm837_vm9 = vcmask 228352   ;;  %vm883_vm10 = vcmask 220160   ;;  %vm930_vm11 = vcmask 211968   ;;  %vm8779_vm12 = vcmask 146432  }
 0x123   : > { %433 = vst [vmem:[#allocation2 + $0x18] sm:$0xf] %v425_v43  ;;  %vm8778_vm13 = vcmask 138240   ;;  %vm8776_vm14 = vcmask 130048   ;;  %vm8777_vm15 = vcmask 64512   ;;  %s8808_s0 = smov 92  }
 0x124   : > { %548 = vrot.lane.b32.xlu1 %v7231_v3, %s8774_s25  ;;  %454 = vrot.lane.b32.xlu0 %v7231_v3, %s8795_s15  ;;  %s8812_s2 = smov 84   ;;  %s8986_s3 = smov 90  }
 0x125   : > { %s8987_s4 = smov 84   ;;  %s8988_s5 = smov 85  }
 0x126   : > { %s8989_s6 = smov 79   ;;  %s8990_s7 = smov 80  }
 0x127   : > { %s8991_s13 = smov 78   ;;  %s8994_s29 = smov 48  }
 0x128   : > { %497 = vrot.lane.b32.xlu1 %v7213_v1, %s8793_s12  ;;  %450 = vrot.lane.b32.xlu0 %v7235_v4, %s8795_s15  ;;  %s8995_s28 = smov 42   ;;  %s8996_s20 = smov 43  }
 0x129   : > { %s9014_s30 = smov 91   ;;  %s9015_s19 = smov 86  }
 0x12a   : > { %p9056_p7 = scmp.ne.s32.totalorder %s8882_s21, 0 }
 0x12c   : > { %592 = vrot.lane.b32.xlu1 %v7221_v2, %s6825_s9  ;;  %544 = vrot.lane.b32.xlu0 %v7235_v4, %s8774_s25 }
 0x130   : > { %639 = vrot.lane.b32.xlu1 %v7213_v1, %s8780_s17  ;;  %594 = vrot.lane.b32.xlu0 %v7210_v0, %s6825_s9 }
 0x134   : > { %685 = vrot.lane.b32.xlu1 %v7221_v2, %s8782_s26  ;;  %641 = vrot.lane.b32.xlu0 %v7231_v3, %s8780_s17 }
 0x138   : > { %732 = vrot.lane.b32.xlu1 %v7213_v1, %s8746_s16  ;;  %687 = vrot.lane.b32.xlu0 %v7210_v0, %s8782_s26 }
 0x13c   : > { %590 = vrot.lane.b32.xlu1 %v7213_v1, %s6825_s9  ;;  %734 = vrot.lane.b32.xlu0 %v7231_v3, %s8746_s16 }
 0x140   : > { %683 = vrot.lane.b32.xlu1 %v7213_v1, %s8782_s26  ;;  %637 = vrot.lane.b32.xlu0 %v7235_v4, %s8780_s17 }
 0x144   : > { %778 = vrot.lane.b32.xlu1 %v7221_v2, %s8748_s23  ;;  %730 = vrot.lane.b32.xlu0 %v7235_v4, %s8746_s16  ;;  %s8760_s16 = smov 17  }
 0x148   : > { %825 = vrot.lane.b32.xlu1 %v7213_v1, %s8754_s1  ;;  %780 = vrot.lane.b32.xlu0 %v7210_v0, %s8748_s23 }
 0x14c   : > { %871 = vrot.lane.b32.xlu1 %v7221_v2, %s8750_s22  ;;  %827 = vrot.lane.b32.xlu0 %v7231_v3, %s8754_s1 }
 0x150   : > { %918 = vrot.lane.b32.xlu1 %v7213_v1, %s8752_s24  ;;  %873 = vrot.lane.b32.xlu0 %v7210_v0, %s8750_s22 }
 0x154   : > { %776 = vrot.lane.b32.xlu1 %v7213_v1, %s8748_s23  ;;  %920 = vrot.lane.b32.xlu0 %v7231_v3, %s8752_s24  ;;  %s8756_s23 = smov 16  }
 0x158   : > { %869 = vrot.lane.b32.xlu1 %v7213_v1, %s8750_s22  ;;  %823 = vrot.lane.b32.xlu0 %v7235_v4, %s8754_s1  ;;  %s8758_s22 = smov 8   ;;  %s6838_s1 = smov 6  }
 0x15c   : > { %964 = vrot.lane.b32.xlu1 %v7221_v2, %s6833_s14  ;;  %916 = vrot.lane.b32.xlu0 %v7235_v4, %s8752_s24  ;;  %s8762_s24 = smov 7  }
 0x160   : > { %1011 = vrot.lane.b32.xlu1 %v7213_v1, %s8760_s16  ;;  %966 = vrot.lane.b32.xlu0 %v7210_v0, %s6833_s14 }
 0x164   : > { %1057 = vrot.lane.b32.xlu1 %v7221_v2, %s8756_s23  ;;  %1013 = vrot.lane.b32.xlu0 %v7231_v3, %s8760_s16 }
 0x168   : > { %1104 = vrot.lane.b32.xlu1 %v7213_v1, %s8758_s22  ;;  %1059 = vrot.lane.b32.xlu0 %v7210_v0, %s8756_s23 }
 0x16c   : > { %962 = vrot.lane.b32.xlu1 %v7213_v1, %s6833_s14  ;;  %1106 = vrot.lane.b32.xlu0 %v7231_v3, %s8758_s22 }
 0x170   : > { %1055 = vrot.lane.b32.xlu1 %v7213_v1, %s8756_s23  ;;  %1009 = vrot.lane.b32.xlu0 %v7235_v4, %s8760_s16  ;;  %s8764_s23 = smov 56   ;;  %s8768_s16 = smov 54  }
 0x174   : > { %1154 = vrot.lane.b32.xlu1 %v7221_v2, %s8762_s24  ;;  %1102 = vrot.lane.b32.xlu0 %v7235_v4, %s8758_s22  ;;  %s8766_s22 = smov 55   ;;  %v6848_v2 = vmov 0  }
 0x175   : > { %1869 = vmatprep.mubr.bf16.mxu1 %v6848_v2  ;;  %6280 = vset.pattern.permute.xlu1 %v6848_v2 }
 0x176   : > { %1951 = vmatprep.mubr.bf16.mxu0 %v6848_v2  ;;  %6301 = vset.pattern.permute.xlu0 %v6848_v2 }
 0x178   : > { %1204 = vrot.lane.b32.xlu1 %v7213_v1, %s6838_s1  ;;  %1156 = vrot.lane.b32.xlu0 %v7210_v0, %s8762_s24 }
 0x17c   : > { %1253 = vrot.lane.b32.xlu1 %v7339_v8, %s8764_s23  ;;  %1206 = vrot.lane.b32.xlu0 %v7231_v3, %s6838_s1 }
 0x180   : > { %1300 = vrot.lane.b32.xlu1 %v7331_v7, %s8766_s22  ;;  %1255 = vrot.lane.b32.xlu0 %v7346_v9, %s8764_s23 }
 0x184   : > { %1152 = vrot.lane.b32.xlu1 %v7213_v1, %s8762_s24  ;;  %1302 = vrot.lane.b32.xlu0 %v7354_v10, %s8766_s22  ;;  %s6842_s24 = smov 46  }
 0x188   : > { %1251 = vrot.lane.b32.xlu1 %v7331_v7, %s8764_s23  ;;  %1202 = vrot.lane.b32.xlu0 %v7235_v4, %s6838_s1  ;;  %s6843_s23 = smov 45  }
 0x18c   : > { %1346 = vrot.lane.b32.xlu1 %v7339_v8, %s8768_s16  ;;  %1298 = vrot.lane.b32.xlu0 %v7362_v11, %s8766_s22  ;;  %s8770_s22 = smov 44  }
 0x18e   : > { %v7372_v12 = vpop.permute.xlu1 %501  ;;  %v453_v13 = vpop.permute.xlu0 %452 }
 0x190   : > { %1393 = vrot.lane.b32.xlu1 %v7331_v7, %s6842_s24  ;;  %1348 = vrot.lane.b32.xlu0 %v7346_v9, %s8768_s16 }
 0x192   : > { %v500_v14 = vpop.permute.xlu1 %499  ;;  %v547_v15 = vpop.permute.xlu0 %546 }
 0x193   : > { %v513_v16 = vsel %vm511_vm0, %v500_v14, %v7372_v12 }
 0x194   : > { %526 = vst [vmem:[#allocation2 + $0x40] sm:$0xf] %v513_v16  ;;  %1439 = vrot.lane.b32.xlu1 %v7339_v8, %s6843_s23  ;;  %1395 = vrot.lane.b32.xlu0 %v7354_v10, %s6842_s24 }
 0x196   : > { %v7384_v17 = vpop.permute.xlu1 %548  ;;  %v7386_v18 = vpop.permute.xlu0 %454 }
 0x197   : > { %v560_v19 = vsel %vm558_vm1, %v547_v15, %v7384_v17  ;;  %v466_v20 = vsel %vm464_vm2, %v453_v13, %v7386_v18 }
 0x198   : > { %573 = vst [vmem:[#allocation2 + $0x40] sm:$0xf0] %v560_v19  ;;  %479 = vst [vmem:[#allocation2 + $0x8] sm:$0xf0] %v466_v20  ;;  %1486 = vrot.lane.b32.xlu1 %v7331_v7, %s8770_s22  ;;  %1441 = vrot.lane.b32.xlu0 %v7346_v9, %s6843_s23  ;;  %v489_v19 = vld [vmem:[%s7187_s10 + $0x18] sm:$0xf] }
 0x19a   : > { %v498_v21 = vpop.permute.xlu1 %497  ;;  %v451_v22 = vpop.permute.xlu0 %450 }
 0x19b   : > { %v512_v23 = vsel %vm511_vm0, %v498_v21, %v500_v14  ;;  %v465_v24 = vsel %vm464_vm2, %v451_v22, %v453_v13  ;;  %v6312_v13 = vld [vmem:[%s7187_s10 + $0x18] ss:$0 sps:$4 sm:$0xff]  }
 0x19c   : > { %525 = vst [vmem:[#allocation2 + $0x38] sm:$0xf] %v512_v23  ;;  %478 = vst [vmem:[#allocation2] sm:$0xf0] %v465_v24  ;;  %1344 = vrot.lane.b32.xlu1 %v7331_v7, %s8768_s16  ;;  %1488 = vrot.lane.b32.xlu0 %v7354_v10, %s8770_s22  ;;  %s8772_s16 = smov 36  }
 0x19d   : > { %v6313_v24 = vld [vmem:[%s7187_s10 + $0x18] ss:$0 sps:$4 sm:$0xff]  }
 0x19e   : > { %v593_v25 = vpop.permute.xlu1 %592  ;;  %v545_v26 = vpop.permute.xlu0 %544 }
 0x19f   : > { %v559_v27 = vsel %vm558_vm1, %v545_v26, %v547_v15  ;;  %v1660_v28 = vld [vmem:[#allocation2 + $0x8] sm:$0xff]  ;;  %v1667_v29 = vld [vmem:[#allocation2 + $0x40] sm:$0xff] }
 0x1a0   : > { %572 = vst [vmem:[#allocation2 + $0x38] sm:$0xf0] %v559_v27  ;;  %1437 = vrot.lane.b32.xlu1 %v7331_v7, %s6843_s23  ;;  %1391 = vrot.lane.b32.xlu0 %v7362_v11, %s6842_s24  ;;  %v1758_v30 = vpack.c.bf16 %v1667_v29, %v1660_v28 }
 0x1a2   : > { %v640_v31 = vpop.permute.xlu1 %639  ;;  %v7407_v32 = vpop.permute.xlu0 %594  ;;  %1837 = vmatprep.subr.bf16.mxu1 %v1758_v30 }
 0x1a3   : > { %v606_v33 = vsel %vm604_vm3, %v593_v25, %v7407_v32  ;;  %v1659_v37 = vld [vmem:[#allocation2] sm:$0xff] }
 0x1a4   : > { %619 = vst [vmem:[#allocation2 + $0x78] sm:$0xf] %v606_v33  ;;  %1530 = vrot.lane.b32.xlu1 %v7331_v7, %s8772_s16  ;;  %1484 = vrot.lane.b32.xlu0 %v7362_v11, %s8770_s22  ;;  %s6846_s22 = smov 35  }
 0x1a6   : > { %v686_v34 = vpop.permute.xlu1 %685  ;;  %v7415_v35 = vpop.permute.xlu0 %641 }
 0x1a7   : > { %v653_v36 = vsel %vm8797_vm4, %v640_v31, %v7415_v35  ;;  %v1666_v38 = vld [vmem:[#allocation2 + $0x38] sm:$0xff] }
 0x1a8   : > { %666 = vst [vmem:[#allocation2 + $0x78] sm:$0xf0] %v653_v36  ;;  %1534 = vrot.lane.b32.xlu1 %v7346_v9, %s8772_s16  ;;  %1532 = vrot.lane.b32.xlu0 %v7339_v8, %s8772_s16  ;;  %v1757_v39 = vpack.c.bf16 %v1666_v38, %v1659_v37  ;;  %s6847_s16 = smov 34  }
 0x1aa   : > { %v733_v41 = vpop.permute.xlu1 %732  ;;  %v7424_v42 = vpop.permute.xlu0 %687  ;;  %1838 = vmatpush1.bf16.msra.mxu1 %v1757_v39 }
 0x1ab   : > { %v699_v44 = vsel %vm697_vm5, %v686_v34, %v7424_v42 }
 0x1ac   : > { %712 = vst [vmem:[#allocation2 + $0xb0] sm:$0xf] %v699_v44  ;;  %1579 = vrot.lane.b32.xlu1 %v7331_v7, %s6846_s22  ;;  %1577 = vrot.lane.b32.xlu0 %v7362_v11, %s6846_s22 }
 0x1ae   : > { %v591_v45 = vpop.permute.xlu1 %590  ;;  %v7432_v46 = vpop.permute.xlu0 %734 }
 0x1af   : > { %v605_v47 = vsel %vm604_vm3, %v591_v45, %v593_v25  ;;  %v746_v48 = vsel %vm744_vm6, %v733_v41, %v7432_v46  ;;  %v1674_v58 = vld [vmem:[#allocation2 + $0x78] sm:$0xff] }
 0x1b0   : > { %618 = vst [vmem:[#allocation2 + $0x70] sm:$0xf] %v605_v47  ;;  %759 = vst [vmem:[#allocation2 + $0xb0] sm:$0xf0] %v746_v48  ;;  %1623 = vrot.lane.b32.xlu1 %v7331_v7, %s6847_s16  ;;  %1581 = vrot.lane.b32.xlu0 %v7354_v10, %s6846_s22 }
 0x1b2   : > { %v684_v49 = vpop.permute.xlu1 %683  ;;  %v638_v50 = vpop.permute.xlu0 %637 }
 0x1b3   : > { %v698_v51 = vsel %vm697_vm5, %v684_v49, %v686_v34  ;;  %v652_v52 = vsel %vm8797_vm4, %v638_v50, %v640_v31 }
 0x1b4   : > { %711 = vst [vmem:[#allocation2 + $0xa8] sm:$0xf] %v698_v51  ;;  %665 = vst [vmem:[#allocation2 + $0x70] sm:$0xf0] %v652_v52  ;;  %1627 = vrot.lane.b32.xlu1 %v7346_v9, %s6847_s16  ;;  %1625 = vrot.lane.b32.xlu0 %v7339_v8, %s6847_s16  ;;  %v582_v51 = vld [vmem:[%s7187_s10 + $0x18] sm:$0xf] }
 0x1b6   : > { %v779_v54 = vpop.permute.xlu1 %778  ;;  %v731_v55 = vpop.permute.xlu0 %730 }
 0x1b7   : > { %v745_v57 = vsel %vm744_vm6, %v731_v55, %v733_v41  ;;  %v1681_v59 = vld [vmem:[#allocation2 + $0xb0] sm:$0xff] }
 0x1b8   : > { %758 = vst [vmem:[#allocation2 + $0xa8] sm:$0xf0] %v745_v57  ;;  %458 = vrot.lane.b32.xlu1 %v7449_v53, %s8795_s15  ;;  %456 = vrot.lane.b32.xlu0 %v7210_v0, %s8795_s15  ;;  %v1765_v61 = vpack.c.bf16 %v1681_v59, %v1674_v58  ;;  %v6314_v57 = vld [vmem:[%s7187_s10 + $0x18] ss:$0 sps:$4 sm:$0xff]  }
 0x1ba   : > { %v826_v62 = vpop.permute.xlu1 %825  ;;  %v7462_v63 = vpop.permute.xlu0 %780  ;;  %1839 = vmatprep.subr.bf16.mxu1 %v1765_v61 }
 0x1bb   : > { %v792_v1 = vsel %vm790_vm8, %v779_v54, %v7462_v63  ;;  %v1673_v8 = vld [vmem:[#allocation2 + $0x70] sm:$0xff] }
 0x1bc   : > { %805 = vst [vmem:[#allocation2 + $0xe8] sm:$0xf] %v792_v1  ;;  %505 = vrot.lane.b32.xlu1 %v7258_v5, %s8793_s12  ;;  %503 = vrot.lane.b32.xlu0 %v7456_v60, %s8793_s12  ;;  %v675_v1 = vld [vmem:[%s7187_s10 + $0x18] sm:$0xf] }
 0x1be   : > { %v872_v3 = vpop.permute.xlu1 %871  ;;  %v7472_v4 = vpop.permute.xlu0 %827 }
 0x1bf   : > { %v839_v7 = vsel %vm837_vm9, %v826_v62, %v7472_v4  ;;  %v1680_v10 = vld [vmem:[#allocation2 + $0xa8] sm:$0xff] }
 0x1c0   : > { %852 = vst [vmem:[#allocation2 + $0xe8] sm:$0xf0] %v839_v7  ;;  %552 = vrot.lane.b32.xlu1 %v7449_v53, %s8774_s25  ;;  %550 = vrot.lane.b32.xlu0 %v7210_v0, %s8774_s25  ;;  %v1764_v11 = vpack.c.bf16 %v1680_v10, %v1673_v8 }
 0x1c2   : > { %v919_v14 = vpop.permute.xlu1 %918  ;;  %v7483_v15 = vpop.permute.xlu0 %873  ;;  %1840 = vmatpush1.bf16.msra.mxu1 %v1764_v11 }
 0x1c3   : > { %v885_v16 = vsel %vm883_vm10, %v872_v3, %v7483_v15 }
 0x1c4   : > { %898 = vst [vmem:[#allocation2 + $0x120] sm:$0xf] %v885_v16  ;;  %462 = vrot.lane.b32.xlu1 %v6312_v13, %s8795_s15  ;;  %460 = vrot.lane.b32.xlu0 %v7258_v5, %s8795_s15  ;;  %s8908_s15 = smov 44  }
 0x1c6   : > { %v777_v20 = vpop.permute.xlu1 %776  ;;  %v7491_v21 = vpop.permute.xlu0 %920 }
 0x1c7   : > { %v791_v22 = vsel %vm790_vm8, %v777_v20, %v779_v54  ;;  %v932_v23 = vsel %vm930_vm11, %v919_v14, %v7491_v21  ;;  %v1688_v33 = vld [vmem:[#allocation2 + $0xe8] sm:$0xff] }
 0x1c8   : > { %804 = vst [vmem:[#allocation2 + $0xe0] sm:$0xf] %v791_v22  ;;  %945 = vst [vmem:[#allocation2 + $0x120] sm:$0xf0] %v932_v23  ;;  %509 = vrot.lane.b32.xlu1 %v489_v19, %s8793_s12  ;;  %507 = vrot.lane.b32.xlu0 %v7271_v6, %s8793_s12  ;;  %s8907_s12 = smov 54  }
 0x1ca   : > { %v870_v25 = vpop.permute.xlu1 %869  ;;  %v824_v26 = vpop.permute.xlu0 %823 }
 0x1cb   : > { %v884_v27 = vsel %vm883_vm10, %v870_v25, %v872_v3  ;;  %v838_v28 = vsel %vm837_vm9, %v824_v26, %v826_v62 }
 0x1cc   : > { %897 = vst [vmem:[#allocation2 + $0x118] sm:$0xf] %v884_v27  ;;  %851 = vst [vmem:[#allocation2 + $0xe0] sm:$0xf0] %v838_v28  ;;  %556 = vrot.lane.b32.xlu1 %v6313_v24, %s8774_s25  ;;  %554 = vrot.lane.b32.xlu0 %v7258_v5, %s8774_s25  ;;  %s8896_s25 = smov 107  }
 0x1ce   : > { %v965_v29 = vpop.permute.xlu1 %964  ;;  %v917_v30 = vpop.permute.xlu0 %916 }
 0x1cf   : > { %v931_v31 = vsel %vm930_vm11, %v917_v30, %v919_v14  ;;  %v1695_v34 = vld [vmem:[#allocation2 + $0x120] sm:$0xff] }
 0x1d0   : > { %944 = vst [vmem:[#allocation2 + $0x118] sm:$0xf0] %v931_v31  ;;  %598 = vrot.lane.b32.xlu1 %v7258_v5, %s6825_s9  ;;  %596 = vrot.lane.b32.xlu0 %v7456_v60, %s6825_s9  ;;  %v1772_v36 = vpack.c.bf16 %v1695_v34, %v1688_v33  ;;  %v6315_v14 = vld [vmem:[%s7187_s10 + $0x18] ss:$0 sps:$4 sm:$0xff]  }
 0x1d2   : > { %v1012_v37 = vpop.permute.xlu1 %1011  ;;  %v7510_v38 = vpop.permute.xlu0 %966  ;;  %1841 = vmatprep.subr.bf16.mxu1 %v1772_v36 }
 0x1d3   : > { %v978_v39 = vsel %vm8779_vm12, %v965_v29, %v7510_v38  ;;  %v1687_v44 = vld [vmem:[#allocation2 + $0xe0] sm:$0xff] }
 0x1d4   : > { %991 = vst [vmem:[#allocation2 + $0x158] sm:$0xf] %v978_v39  ;;  %645 = vrot.lane.b32.xlu1 %v7449_v53, %s8780_s17  ;;  %643 = vrot.lane.b32.xlu0 %v7210_v0, %s8780_s17 }
 0x1d6   : > { %v1058_v40 = vpop.permute.xlu1 %1057  ;;  %v7518_v41 = vpop.permute.xlu0 %1013 }
 0x1d7   : > { %v1025_v43 = vsel %vm8778_vm13, %v1012_v37, %v7518_v41  ;;  %v1694_v45 = vld [vmem:[#allocation2 + $0x118] sm:$0xff] }
 0x1d8   : > { %1038 = vst [vmem:[#allocation2 + $0x158] sm:$0xf0] %v1025_v43  ;;  %691 = vrot.lane.b32.xlu1 %v7258_v5, %s8782_s26  ;;  %689 = vrot.lane.b32.xlu0 %v7456_v60, %s8782_s26  ;;  %v1771_v47 = vpack.c.bf16 %v1694_v45, %v1687_v44  ;;  %v768_v44 = vld [vmem:[%s7187_s10 + $0x18] sm:$0xf] }
 0x1da   : > { %v1105_v48 = vpop.permute.xlu1 %1104  ;;  %v7526_v49 = vpop.permute.xlu0 %1059  ;;  %1842 = vmatpush1.bf16.msra.mxu1 %v1771_v47 }
 0x1db   : > { %v1071_v50 = vsel %vm8776_vm14, %v1058_v40, %v7526_v49 }
 0x1dc   : > { %1084 = vst [vmem:[#allocation2 + $0x190] sm:$0xf] %v1071_v50  ;;  %738 = vrot.lane.b32.xlu1 %v7449_v53, %s8896_s25  ;;  %736 = vrot.lane.b32.xlu0 %v7210_v0, %s8896_s25 }
 0x1de   : > { %v963_v52 = vpop.permute.xlu1 %962  ;;  %v7535_v54 = vpop.permute.xlu0 %1106 }
 0x1df   : > { %v977_v55 = vsel %vm8779_vm12, %v963_v52, %v965_v29  ;;  %v1120_v56 = vsel %vm8777_vm15, %v1105_v48, %v7535_v54  ;;  %v1702_v10 = vld [vmem:[#allocation2 + $0x158] sm:$0xff]  ;;  %vm8785_vm12 = vcmask 449536  }
 0x1e0   : > { %990 = vst [vmem:[#allocation2 + $0x150] sm:$0xf] %v977_v55  ;;  %1134 = vst [vmem:[#allocation2 + $0x190] sm:$0xf0] %v1120_v56  ;;  %602 = vrot.lane.b32.xlu1 %v582_v51, %s6825_s9  ;;  %600 = vrot.lane.b32.xlu0 %v7271_v6, %s6825_s9  ;;  %s8897_s9 = smov 106  }
 0x1e1   : > { %v6316_v55 = vld [vmem:[%s7187_s10 + $0x18] ss:$0 sps:$4 sm:$0xff]  }
 0x1e2   : > { %v1056_v58 = vpop.permute.xlu1 %1055  ;;  %v1010_v59 = vpop.permute.xlu0 %1009 }
 0x1e3   : > { %v1070_v61 = vsel %vm8776_vm14, %v1056_v58, %v1058_v40  ;;  %v1024_v62 = vsel %vm8778_vm13, %v1010_v59, %v1012_v37  ;;  %vm8787_vm14 = vcmask 56320   ;;  %vm8784_vm13 = vcmask 457728   ;;  %v861_v59 = vld [vmem:[%s7187_s10 + $0x18] sm:$0xf] }
 0x1e4   : > { %1083 = vst [vmem:[#allocation2 + $0x188] sm:$0xf] %v1070_v61  ;;  %1037 = vst [vmem:[#allocation2 + $0x150] sm:$0xf0] %v1024_v62  ;;  %649 = vrot.lane.b32.xlu1 %v6314_v57, %s8780_s17  ;;  %647 = vrot.lane.b32.xlu0 %v7258_v5, %s8780_s17  ;;  %s8899_s17 = smov 27  }
 0x1e6   : > { %v1155_v3 = vpop.permute.xlu1 %1154  ;;  %v1103_v7 = vpop.permute.xlu0 %1102 }
 0x1e7   : > { %v1119_v8 = vsel %vm8777_vm15, %v1103_v7, %v1105_v48  ;;  %v1709_v11 = vld [vmem:[#allocation2 + $0x190] sm:$0xff]  ;;  %vm8786_vm15 = vcmask 48128  }
 0x1e8   : > { %1133 = vst [vmem:[#allocation2 + $0x188] sm:$0xf0] %v1119_v8  ;;  %695 = vrot.lane.b32.xlu1 %v675_v1, %s8782_s26  ;;  %693 = vrot.lane.b32.xlu0 %v7271_v6, %s8782_s26  ;;  %v1779_v13 = vpack.c.bf16 %v1709_v11, %v1702_v10  ;;  %s8900_s26 = smov 26   ;;  %v6317_v10 = vld [vmem:[%s7187_s10 + $0x18] ss:$0 sps:$4 sm:$0xff]  }
 0x1ea   : > { %v1205_v16 = vpop.permute.xlu1 %1204  ;;  %v7555_v19 = vpop.permute.xlu0 %1156  ;;  %1843 = vmatprep.subr.bf16.mxu1 %v1779_v13 }
 0x1eb   : > { %v1170_v20 = vsel %vm8787_vm14, %v1155_v3, %v7555_v19  ;;  %v1701_v25 = vld [vmem:[#allocation2 + $0x150] sm:$0xff] }
 0x1ec   : > { %1184 = vst [vmem:[#allocation2 + $0x1c8] sm:$0xf] %v1170_v20  ;;  %742 = vrot.lane.b32.xlu1 %v6315_v14, %s8896_s25  ;;  %740 = vrot.lane.b32.xlu0 %v7258_v5, %s8896_s25  ;;  %s8898_s25 = smov 28  }
 0x1ee   : > { %v1254_v22 = vpop.permute.xlu1 %1253  ;;  %v7562_v23 = vpop.permute.xlu0 %1206 }
 0x1ef   : > { %v1220_v24 = vsel %vm8786_vm15, %v1205_v16, %v7562_v23  ;;  %v1708_v26 = vld [vmem:[#allocation2 + $0x188] sm:$0xff] }
 0x1f0   : > { %1234 = vst [vmem:[#allocation2 + $0x1c8] sm:$0xf0] %v1220_v24  ;;  %784 = vrot.lane.b32.xlu1 %v7258_v5, %s8897_s9  ;;  %782 = vrot.lane.b32.xlu0 %v7456_v60, %s8897_s9  ;;  %v1778_v27 = vpack.c.bf16 %v1708_v26, %v1701_v25 }
 0x1f2   : > { %v1301_v28 = vpop.permute.xlu1 %1300  ;;  %v7570_v29 = vpop.permute.xlu0 %1255  ;;  %1844 = vmatpush1.bf16.msra.mxu1 %v1778_v27 }
 0x1f3   : > { %v1267_v30 = vsel %vm8784_vm13, %v1254_v22, %v7570_v29 }
 0x1f4   : > { %1280 = vst [vmem:[#allocation2 + $0x200] sm:$0xf] %v1267_v30  ;;  %831 = vrot.lane.b32.xlu1 %v7449_v53, %s8898_s25  ;;  %829 = vrot.lane.b32.xlu0 %v7210_v0, %s8898_s25 }
 0x1f6   : > { %v1153_v31 = vpop.permute.xlu1 %1152  ;;  %v7578_v33 = vpop.permute.xlu0 %1302 }
 0x1f7   : > { %v1169_v34 = vsel %vm8787_vm14, %v1153_v31, %v1155_v3  ;;  %v1314_v36 = vsel %vm8785_vm12, %v1301_v28, %v7578_v33  ;;  %v1716_v50 = vld [vmem:[#allocation2 + $0x1c8] sm:$0xff]  ;;  %vm8789_vm14 = vcmask 359424  }
 0x1f8   : > { %1183 = vst [vmem:[#allocation2 + $0x1c0] sm:$0xf] %v1169_v34  ;;  %1327 = vst [vmem:[#allocation2 + $0x200] sm:$0xf0] %v1314_v36  ;;  %877 = vrot.lane.b32.xlu1 %v7258_v5, %s8899_s17  ;;  %875 = vrot.lane.b32.xlu0 %v7456_v60, %s8899_s17 }
 0x1fa   : > { %v1252_v37 = vpop.permute.xlu1 %1251  ;;  %v1203_v39 = vpop.permute.xlu0 %1202 }
 0x1fb   : > { %v1266_v40 = vsel %vm8784_vm13, %v1252_v37, %v1254_v22  ;;  %v1219_v43 = vsel %vm8786_vm15, %v1203_v39, %v1205_v16  ;;  %vm8827_vm13 = vcmask 441344   ;;  %vm8788_vm15 = vcmask 367616  }
 0x1fc   : > { %1279 = vst [vmem:[#allocation2 + $0x1f8] sm:$0xf] %v1266_v40  ;;  %1233 = vst [vmem:[#allocation2 + $0x1c0] sm:$0xf0] %v1219_v43  ;;  %924 = vrot.lane.b32.xlu1 %v7449_v53, %s8900_s26  ;;  %922 = vrot.lane.b32.xlu0 %v7210_v0, %s8900_s26 }
 0x1fe   : > { %v1347_v45 = vpop.permute.xlu1 %1346  ;;  %v1299_v47 = vpop.permute.xlu0 %1298 }
 0x1ff   : > { %v1313_v48 = vsel %vm8785_vm12, %v1299_v47, %v1301_v28  ;;  %v1723_v51 = vld [vmem:[#allocation2 + $0x200] sm:$0xff]  ;;  %vm1405_vm12 = vcmask 375808  }
 0x200   : > { %1326 = vst [vmem:[#allocation2 + $0x1f8] sm:$0xf0] %v1313_v48  ;;  %788 = vrot.lane.b32.xlu1 %v768_v44, %s8897_s9  ;;  %786 = vrot.lane.b32.xlu0 %v7271_v6, %s8897_s9  ;;  %v1786_v52 = vpack.c.bf16 %v1723_v51, %v1716_v50  ;;  %s8903_s9 = smov 8   ;;  %v954_v47 = vld [vmem:[%s7187_s10 + $0x18] sm:$0xf] }
 0x202   : > { %v1394_v56 = vpop.permute.xlu1 %1393  ;;  %v7599_v57 = vpop.permute.xlu0 %1348  ;;  %1845 = vmatprep.subr.bf16.mxu1 %v1786_v52 }
 0x203   : > { %v1360_v58 = vsel %vm8827_vm13, %v1347_v45, %v7599_v57  ;;  %v1715_v3 = vld [vmem:[#allocation2 + $0x1c0] sm:$0xff] }
 0x204   : > { %1373 = vst [vmem:[#allocation2 + $0x238] sm:$0xf] %v1360_v58  ;;  %835 = vrot.lane.b32.xlu1 %v6316_v55, %s8898_s25  ;;  %833 = vrot.lane.b32.xlu0 %v7258_v5, %s8898_s25  ;;  %v6318_v58 = vld [vmem:[%s7187_s10 + $0x18] ss:$0 sps:$4 sm:$0xff]  }
 0x206   : > { %v1440_v61 = vpop.permute.xlu1 %1439  ;;  %v7607_v62 = vpop.permute.xlu0 %1395 }
 0x207   : > { %v1407_v1 = vsel %vm1405_vm12, %v1394_v56, %v7607_v62  ;;  %v1722_v7 = vld [vmem:[#allocation2 + $0x1f8] sm:$0xff] }
 0x208   : > { %1420 = vst [vmem:[#allocation2 + $0x238] sm:$0xf0] %v1407_v1  ;;  %881 = vrot.lane.b32.xlu1 %v861_v59, %s8899_s17  ;;  %879 = vrot.lane.b32.xlu0 %v7271_v6, %s8899_s17  ;;  %v1785_v8 = vpack.c.bf16 %v1722_v7, %v1715_v3  ;;  %s8901_s17 = smov 17   ;;  %v1047_v3 = vld [vmem:[%s7187_s10 + $0x18] sm:$0xf] }
 0x209   : > { %v7666_v7 = vld [vmem:[%s7187_s10 + $0x18] sm:$0xff] }
 0x20a   : > { %v1487_v11 = vpop.permute.xlu1 %1486  ;;  %v7615_v13 = vpop.permute.xlu0 %1441  ;;  %1846 = vmatpush1.bf16.msra.mxu1 %v1785_v8 }
 0x20b   : > { %v1453_v14 = vsel %vm8788_vm15, %v1440_v61, %v7615_v13 }
 0x20c   : > { %1466 = vst [vmem:[#allocation2 + $0x270] sm:$0xf] %v1453_v14  ;;  %928 = vrot.lane.b32.xlu1 %v6317_v10, %s8900_s26  ;;  %926 = vrot.lane.b32.xlu0 %v7258_v5, %s8900_s26  ;;  %s8902_s26 = smov 16  }
 0x20e   : > { %v1345_v16 = vpop.permute.xlu1 %1344  ;;  %v7622_v20 = vpop.permute.xlu0 %1488 }
 0x20f   : > { %v1359_v22 = vsel %vm8827_vm13, %v1345_v16, %v1347_v45  ;;  %v1500_v24 = vsel %vm8789_vm14, %v1487_v11, %v7622_v20  ;;  %v1730_v36 = vld [vmem:[#allocation2 + $0x238] sm:$0xff]  ;;  %v7678_v16 = vcombine.low %v7666_v7, %v7666_v7 }
 0x210   : > { %1372 = vst [vmem:[#allocation2 + $0x230] sm:$0xf] %v1359_v22  ;;  %1513 = vst [vmem:[#allocation2 + $0x270] sm:$0xf0] %v1500_v24  ;;  %970 = vrot.lane.b32.xlu1 %v7258_v5, %s6833_s14  ;;  %968 = vrot.lane.b32.xlu0 %v7456_v60, %s6833_s14 }
 0x212   : > { %v1438_v25 = vpop.permute.xlu1 %1437  ;;  %v1392_v26 = vpop.permute.xlu0 %1391 }
 0x213   : > { %v1452_v27 = vsel %vm8788_vm15, %v1438_v25, %v1440_v61  ;;  %v1406_v28 = vsel %vm1405_vm12, %v1392_v26, %v1394_v56  ;;  %vm8790_vm15 = vcmask 293888  }
 0x214   : > { %1465 = vst [vmem:[#allocation2 + $0x268] sm:$0xf] %v1452_v27  ;;  %1419 = vst [vmem:[#allocation2 + $0x230] sm:$0xf0] %v1406_v28  ;;  %1017 = vrot.lane.b32.xlu1 %v7449_v53, %s8901_s17  ;;  %1015 = vrot.lane.b32.xlu0 %v7210_v0, %s8901_s17 }
 0x216   : > { %v1531_v30 = vpop.permute.xlu1 %1530  ;;  %v1485_v31 = vpop.permute.xlu0 %1484 }
 0x217   : > { %v1499_v34 = vsel %vm8789_vm14, %v1485_v31, %v1487_v11  ;;  %v1737_v37 = vld [vmem:[#allocation2 + $0x270] sm:$0xff]  ;;  %vm1591_vm14 = vcmask 285696  }
 0x218   : > { %1512 = vst [vmem:[#allocation2 + $0x268] sm:$0xf0] %v1499_v34  ;;  %1063 = vrot.lane.b32.xlu1 %v7258_v5, %s8902_s26  ;;  %1061 = vrot.lane.b32.xlu0 %v7456_v60, %s8902_s26  ;;  %v1793_v39 = vpack.c.bf16 %v1737_v37, %v1730_v36 }
 0x21a   : > { %v7642_v40 = vpop.permute.xlu1 %1534  ;;  %v1533_v43 = vpop.permute.xlu0 %1532  ;;  %1847 = vmatprep.subr.bf16.mxu1 %v1793_v39 }
 0x21b   : > { %v1545_v44 = vsel %vm8790_vm15, %v1531_v30, %v1533_v43  ;;  %v1546_v45 = vsel %vm8790_vm15, %v1533_v43, %v7642_v40  ;;  %v1729_v52 = vld [vmem:[#allocation2 + $0x230] sm:$0xff]  ;;  %vm8791_vm15 = vcmask 277504  }
 0x21c   : > { %1558 = vst [vmem:[#allocation2 + $0x2a0] sm:$0xf] %v1545_v44  ;;  %1559 = vst [vmem:[#allocation2 + $0x2a8] sm:$0xf] %v1546_v45  ;;  %1110 = vrot.lane.b32.xlu1 %v7449_v53, %s8903_s9  ;;  %1108 = vrot.lane.b32.xlu0 %v7210_v0, %s8903_s9 }
 0x21e   : > { %v1580_v48 = vpop.permute.xlu1 %1579  ;;  %v1578_v50 = vpop.permute.xlu0 %1577 }
 0x21f   : > { %v1592_v51 = vsel %vm1591_vm14, %v1578_v50, %v1580_v48  ;;  %v1736_v55 = vld [vmem:[#allocation2 + $0x268] sm:$0xff] }
 0x220   : > { %1605 = vst [vmem:[#allocation2 + $0x2a0] sm:$0xf0] %v1592_v51  ;;  %974 = vrot.lane.b32.xlu1 %v954_v47, %s6833_s14  ;;  %972 = vrot.lane.b32.xlu0 %v7271_v6, %s6833_s14  ;;  %v1792_v56 = vpack.c.bf16 %v1736_v55, %v1729_v52  ;;  %s8904_s14 = smov 7   ;;  %v7699_v50 = vld [vmem:[#allocation11] sm:$0xf]  ;;  %v7710_v51 = vld [vmem:[%s7187_s10 + $0x14] sm:$0xff] }
 0x222   : > { %v1624_v59 = vpop.permute.xlu1 %1623  ;;  %v7657_v61 = vpop.permute.xlu0 %1581  ;;  %1848 = vmatpush1.bf16.msra.mxu1 %v1792_v56 }
 0x223   : > { %v1593_v1 = vsel %vm1591_vm14, %v1580_v48, %v7657_v61 }
 0x224   : > { %1606 = vst [vmem:[#allocation2 + $0x2a8] sm:$0xf0] %v1593_v1  ;;  %1021 = vrot.lane.b32.xlu1 %v6318_v58, %s8901_s17  ;;  %1019 = vrot.lane.b32.xlu0 %v7258_v5, %s8901_s17  ;;  %s8905_s17 = smov 56  }
 0x226   : > { %v7668_v8 = vpop.permute.xlu1 %1627  ;;  %v1626_v10 = vpop.permute.xlu0 %1625 }
 0x227   : > { %v1638_v11 = vsel %vm8791_vm15, %v1624_v59, %v1626_v10  ;;  %v1639_v14 = vsel %vm8791_vm15, %v1626_v10, %v7668_v8  ;;  %v1743_v30 = vld [vmem:[#allocation2 + $0x2a0] sm:$0xff]  ;;  %vm8792_vm15 = vcmask 1045504  }
 0x228   : > { %1651 = vst [vmem:[#allocation2 + $0x2d8] sm:$0xf] %v1638_v11  ;;  %1652 = vst [vmem:[#allocation2 + $0x2e0] sm:$0xf] %v1639_v14  ;;  %1067 = vrot.lane.b32.xlu1 %v1047_v3, %s8902_s26  ;;  %1065 = vrot.lane.b32.xlu0 %v7271_v6, %s8902_s26  ;;  %s8906_s26 = smov 55  }
 0x22a   : > { %v459_v22 = vpop.permute.xlu1 %458  ;;  %v457_v24 = vpop.permute.xlu0 %456 }
 0x22b   : > { %v467_v25 = vsel %vm464_vm2, %v7386_v18, %v457_v24  ;;  %v468_v26 = vsel %vm464_vm2, %v457_v24, %v459_v22  ;;  %v1744_v36 = vld [vmem:[#allocation2 + $0x2a8] sm:$0xff] }
 0x22c   : > { %480 = vst [vmem:[#allocation2 + $0x10] sm:$0xf0] %v467_v25  ;;  %481 = vst [vmem:[#allocation2 + $0x18] sm:$0xf0] %v468_v26  ;;  %1114 = vrot.lane.b32.xlu1 %v7678_v16, %s8903_s9  ;;  %1112 = vrot.lane.b32.xlu0 %v7258_v5, %s8903_s9 }
 0x22e   : > { %v506_v27 = vpop.permute.xlu1 %505  ;;  %v504_v28 = vpop.permute.xlu0 %503 }
 0x22f   : > { %v514_v31 = vsel %vm511_vm0, %v7372_v12, %v504_v28  ;;  %v515_v34 = vsel %vm511_vm0, %v504_v28, %v506_v27  ;;  %v1751_v18 = vld [vmem:[#allocation2 + $0x2e0] sm:$0xf]  ;;  %v1750_v37 = vld [vmem:[#allocation2 + $0x2d8] sm:$0xf] }
 0x230   : > { %527 = vst [vmem:[#allocation2 + $0x48] sm:$0xf] %v514_v31  ;;  %528 = vst [vmem:[#allocation2 + $0x50] sm:$0xf] %v515_v34  ;;  %1160 = vrot.lane.b32.xlu1 %v7258_v5, %s8904_s14  ;;  %1158 = vrot.lane.b32.xlu0 %v7456_v60, %s8904_s14  ;;  %v1800_v39 = vpack.c.bf16 %v1751_v18, %v1744_v36  ;;  %v1799_v43 = vpack.c.bf16 %v1750_v37, %v1743_v30 }
 0x231   : > { %v7703_v60 = vcombine.high %v7346_v9, %v7346_v9  ;;  %v7745_v36 = vcombine.high %v7710_v51, %v7710_v51 }
 0x232   : > { %v553_v44 = vpop.permute.xlu1 %552  ;;  %v551_v45 = vpop.permute.xlu0 %550  ;;  %5547 = vmatprep.subr.msk.bf16.mxu1 %vm8792_vm15, %v1800_v39  ;;  %v1817_v12 = vsel %vm8792_vm15, %v1799_v43, 0  ;;  %vm484_vm15 = vcmask 80900  }
 0x233   : > { %v561_v47 = vsel %vm558_vm1, %v7384_v17, %v551_v45  ;;  %v562_v48 = vsel %vm558_vm1, %v551_v45, %v553_v44  ;;  %1850 = vmatpush1.bf16.msra.mxu1 %v1817_v12  ;;  %v1662_v59 = vld [vmem:[#allocation2 + $0x18] sm:$0xff]  ;;  %v1661_v10 = vld [vmem:[#allocation2 + $0x10] sm:$0xff] }
 0x234   : > { %574 = vst [vmem:[#allocation2 + $0x48] sm:$0xf0] %v561_v47  ;;  %575 = vst [vmem:[#allocation2 + $0x50] sm:$0xf0] %v562_v48  ;;  %1210 = vrot.lane.b32.xlu1 %v7449_v53, %s6838_s1  ;;  %1208 = vrot.lane.b32.xlu0 %v7210_v0, %s6838_s1  ;;  %v7724_v0 = vcombine.low %v7710_v51, %v7710_v51  ;;  %v6322_v47 = vld [vmem:[%s7187_s10 + $0x1c] ss:$0 sps:$4 sm:$0xff]  }
 0x236   : > { %v463_v17 = vpop.permute.xlu1 %462  ;;  %v461_v52 = vpop.permute.xlu0 %460  ;;  %5548 = vmatmul.mubr.msk.bf16.vlgmr.msra.gmra.mrb[0].mxu1 %vm697_vm5, %v7699_v50 }
 0x237   : > { %485 = vst.msk [vmem:[#allocation2 + $0x30] sm:$0xf0] %vm484_vm15, %v463_v17  ;;  %v469_v55 = vsel %vm464_vm2, %v459_v22, %v461_v52  ;;  %v470_v56 = vsel %vm464_vm2, %v461_v52, %v463_v17  ;;  %1910 = vmatprep.mubr.bf16.mxu1 %v6848_v2 }
 0x238   : > { %482 = vst [vmem:[#allocation2 + $0x20] sm:$0xf0] %v469_v55  ;;  %483 = vst [vmem:[#allocation2 + $0x28] sm:$0xf0] %v470_v56  ;;  %1259 = vrot.lane.b32.xlu1 %v7710_v51, %s8905_s17  ;;  %1257 = vrot.lane.b32.xlu0 %v7703_v60, %s8905_s17 }
 0x23a   : > { %v510_v53 = vpop.permute.xlu1 %509  ;;  %v508_v58 = vpop.permute.xlu0 %507 }
 0x23b   : > { %531 = vst.msk [vmem:[#allocation2 + $0x68] sm:$0xf] %vm436_vm7, %v510_v53  ;;  %v516_v1 = vsel %vm511_vm0, %v506_v27, %v508_v58  ;;  %v517_v2 = vsel %vm511_vm0, %v508_v58, %v510_v53  ;;  %v1669_v3 = vld [vmem:[#allocation2 + $0x50] sm:$0xff]  ;;  %v1668_v11 = vld [vmem:[#allocation2 + $0x48] sm:$0xff] }
 0x23c   : > { %529 = vst [vmem:[#allocation2 + $0x58] sm:$0xf] %v516_v1  ;;  %530 = vst [vmem:[#allocation2 + $0x60] sm:$0xf] %v517_v2  ;;  %1306 = vrot.lane.b32.xlu1 %v7724_v0, %s8906_s26  ;;  %1304 = vrot.lane.b32.xlu0 %v7346_v9, %s8906_s26  ;;  %v1760_v14 = vpack.c.bf16 %v1669_v3, %v1662_v59  ;;  %v1759_v22 = vpack.c.bf16 %v1668_v11, %v1661_v10 }
 0x23e   : > { %v557_v24 = vpop.permute.xlu1 %556  ;;  %v555_v25 = vpop.permute.xlu0 %554  ;;  %1878 = vmatprep.subr.bf16.mxu1 %v1760_v14 }
 0x23f   : > { %578 = vst.msk [vmem:[#allocation2 + $0x68] sm:$0xf0] %vm484_vm15, %v557_v24  ;;  %v563_v26 = vsel %vm558_vm1, %v553_v44, %v555_v25  ;;  %v564_v27 = vsel %vm558_vm1, %v555_v25, %v557_v24  ;;  %1879 = vmatpush1.bf16.msra.mxu1 %v1759_v22  ;;  %v1664_v39 = vld [vmem:[#allocation2 + $0x28] sm:$0xff]  ;;  %v1663_v45 = vld [vmem:[#allocation2 + $0x20] sm:$0xff] }
 0x240   : > { %576 = vst [vmem:[#allocation2 + $0x58] sm:$0xf0] %v563_v26  ;;  %577 = vst [vmem:[#allocation2 + $0x60] sm:$0xf0] %v564_v27  ;;  %1164 = vrot.lane.b32.xlu1 %v7666_v7, %s8904_s14  ;;  %1162 = vrot.lane.b32.xlu0 %v7271_v6, %s8904_s14  ;;  %v1243_v6 = vld [vmem:[%s7187_s10 + $0x1c] sm:$0xf] }
 0x242   : > { %v599_v28 = vpop.permute.xlu1 %598  ;;  %v597_v30 = vpop.permute.xlu0 %596 }
 0x243   : > { %v607_v31 = vsel %vm604_vm3, %v7407_v32, %v597_v30  ;;  %v608_v34 = vsel %vm604_vm3, %v597_v30, %v599_v28 }
 0x244   : > { %620 = vst [vmem:[#allocation2 + $0x80] sm:$0xf] %v607_v31  ;;  %621 = vst [vmem:[#allocation2 + $0x88] sm:$0xf] %v608_v34  ;;  %1214 = vrot.lane.b32.xlu1 %v7678_v16, %s6838_s1  ;;  %1212 = vrot.lane.b32.xlu0 %v7258_v5, %s6838_s1  ;;  %v6498_v34 = vld [vmem:[%s7187_s10 + $0xc] sm:$0xff] }
 0x246   : > { %v646_v18 = vpop.permute.xlu1 %645  ;;  %v644_v37 = vpop.permute.xlu0 %643 }
 0x247   : > { %v654_v32 = vsel %vm8797_vm4, %v7415_v35, %v644_v37  ;;  %v655_v43 = vsel %vm8797_vm4, %v644_v37, %v646_v18  ;;  %v1671_v44 = vld [vmem:[#allocation2 + $0x60] sm:$0xff]  ;;  %v1670_v12 = vld [vmem:[#allocation2 + $0x58] sm:$0xff] }
 0x248   : > { %667 = vst [vmem:[#allocation2 + $0x80] sm:$0xf0] %v654_v32  ;;  %668 = vst [vmem:[#allocation2 + $0x88] sm:$0xf0] %v655_v43  ;;  %1263 = vrot.lane.b32.xlu1 %v1243_v6, %s8905_s17  ;;  %1261 = vrot.lane.b32.xlu0 %v7745_v36, %s8905_s17  ;;  %v1762_v5 = vpack.c.bf16 %v1671_v44, %v1664_v39  ;;  %v1761_v16 = vpack.c.bf16 %v1670_v12, %v1663_v45  ;;  %v1336_v6 = vld [vmem:[%s7187_s10 + $0x1c] sm:$0xf] }
 0x249   : > { %v6323_v43 = vld [vmem:[%s7187_s10 + $0x1c] ss:$0 sps:$4 sm:$0xff]  }
 0x24a   : > { %v692_v48 = vpop.permute.xlu1 %691  ;;  %v690_v17 = vpop.permute.xlu0 %689  ;;  %1919 = vmatprep.subr.bf16.mxu0 %v1762_v5 }
 0x24b   : > { %v700_v35 = vsel %vm697_vm5, %v7424_v42, %v690_v17  ;;  %v701_v52 = vsel %vm697_vm5, %v690_v17, %v692_v48  ;;  %1920 = vmatpush1.bf16.msra.mxu0 %v1761_v16  ;;  %v1429_v16 = vld [vmem:[%s7187_s10 + $0x1c] sm:$0xf] }
 0x24c   : > { %713 = vst [vmem:[#allocation2 + $0xb8] sm:$0xf] %v700_v35  ;;  %714 = vst [vmem:[#allocation2 + $0xc0] sm:$0xf] %v701_v52  ;;  %1310 = vrot.lane.b32.xlu1 %v6322_v47, %s8906_s26  ;;  %1308 = vrot.lane.b32.xlu0 %v7710_v51, %s8906_s26 }
 0x24e   : > { %v739_v55 = vpop.permute.xlu1 %738  ;;  %v737_v56 = vpop.permute.xlu0 %736 }
 0x24f   : > { %v747_v53 = vsel %vm744_vm6, %v7432_v46, %v737_v56  ;;  %v748_v58 = vsel %vm744_vm6, %v737_v56, %v739_v55  ;;  %v1676_v10 = vld [vmem:[#allocation2 + $0x88] sm:$0xff]  ;;  %v1675_v24 = vld [vmem:[#allocation2 + $0x80] sm:$0xff] }
 0x250   : > { %760 = vst [vmem:[#allocation2 + $0xb8] sm:$0xf0] %v747_v53  ;;  %761 = vst [vmem:[#allocation2 + $0xc0] sm:$0xf0] %v748_v58  ;;  %1352 = vrot.lane.b32.xlu1 %v7710_v51, %s8907_s12  ;;  %1350 = vrot.lane.b32.xlu0 %v7703_v60, %s8907_s12 }
 0x252   : > { %v603_v42 = vpop.permute.xlu1 %602  ;;  %v601_v59 = vpop.permute.xlu0 %600 }
 0x253   : > { %624 = vst.msk [vmem:[#allocation2 + $0xa0] sm:$0xf] %vm436_vm7, %v603_v42  ;;  %v609_v1 = vsel %vm604_vm3, %v599_v28, %v601_v59  ;;  %v610_v2 = vsel %vm604_vm3, %v601_v59, %v603_v42  ;;  %v6324_v42 = vld [vmem:[%s7187_s10 + $0x1c] ss:$0 sps:$4 sm:$0xff]   ;;  %vm8910_vm3 = vcmask 146432  }
 0x254   : > { %622 = vst [vmem:[#allocation2 + $0x90] sm:$0xf] %v609_v1  ;;  %623 = vst [vmem:[#allocation2 + $0x98] sm:$0xf] %v610_v2  ;;  %1399 = vrot.lane.b32.xlu1 %v7724_v0, %s6842_s24  ;;  %1397 = vrot.lane.b32.xlu0 %v7346_v9, %s6842_s24 }
 0x256   : > { %v650_v46 = vpop.permute.xlu1 %649  ;;  %v648_v3 = vpop.permute.xlu0 %647 }
 0x257   : > { %671 = vst.msk [vmem:[#allocation2 + $0xa0] sm:$0xf0] %vm484_vm15, %v650_v46  ;;  %v656_v11 = vsel %vm8797_vm4, %v646_v18, %v648_v3  ;;  %v657_v14 = vsel %vm8797_vm4, %v648_v3, %v650_v46  ;;  %v1683_v22 = vld [vmem:[#allocation2 + $0xc0] sm:$0xff]  ;;  %v1682_v25 = vld [vmem:[#allocation2 + $0xb8] sm:$0xff]  ;;  %vm8926_vm4 = vcmask 56320  }
 0x258   : > { %669 = vst [vmem:[#allocation2 + $0x90] sm:$0xf0] %v656_v11  ;;  %670 = vst [vmem:[#allocation2 + $0x98] sm:$0xf0] %v657_v14  ;;  %1445 = vrot.lane.b32.xlu1 %v7710_v51, %s6843_s23  ;;  %1443 = vrot.lane.b32.xlu0 %v7703_v60, %s6843_s23  ;;  %v1767_v9 = vpack.c.bf16 %v1683_v22, %v1676_v10  ;;  %v1766_v26 = vpack.c.bf16 %v1682_v25, %v1675_v24 }
 0x25a   : > { %v696_v27 = vpop.permute.xlu1 %695  ;;  %v694_v28 = vpop.permute.xlu0 %693  ;;  %1880 = vmatprep.subr.bf16.mxu1 %v1767_v9 }
 0x25b   : > { %717 = vst.msk [vmem:[#allocation2 + $0xd8] sm:$0xf] %vm436_vm7, %v696_v27  ;;  %v702_v30 = vsel %vm697_vm5, %v692_v48, %v694_v28  ;;  %v703_v31 = vsel %vm697_vm5, %v694_v28, %v696_v27  ;;  %1881 = vmatpush1.bf16.msra.mxu1 %v1766_v26 }
 0x25c   : > { %715 = vst [vmem:[#allocation2 + $0xc8] sm:$0xf] %v702_v30  ;;  %716 = vst [vmem:[#allocation2 + $0xd0] sm:$0xf] %v703_v31  ;;  %1492 = vrot.lane.b32.xlu1 %v7724_v0, %s8908_s15  ;;  %1490 = vrot.lane.b32.xlu0 %v6498_v34, %s8908_s15 }
 0x25e   : > { %v743_v18 = vpop.permute.xlu1 %742  ;;  %v741_v37 = vpop.permute.xlu0 %740 }
 0x25f   : > { %764 = vst.msk [vmem:[#allocation2 + $0xd8] sm:$0xf0] %vm484_vm15, %v743_v18  ;;  %v749_v39 = vsel %vm744_vm6, %v739_v55, %v741_v37  ;;  %v750_v32 = vsel %vm744_vm6, %v741_v37, %v743_v18  ;;  %v1678_v17 = vld [vmem:[#allocation2 + $0x98] sm:$0xff]  ;;  %v1677_v55 = vld [vmem:[#allocation2 + $0x90] sm:$0xff]  ;;  %vm8911_vm6 = vmmov %vm8910_vm3 }
 0x260   : > { %762 = vst [vmem:[#allocation2 + $0xc8] sm:$0xf0] %v749_v39  ;;  %763 = vst [vmem:[#allocation2 + $0xd0] sm:$0xf0] %v750_v32  ;;  %1356 = vrot.lane.b32.xlu1 %v1336_v6, %s8907_s12  ;;  %1354 = vrot.lane.b32.xlu0 %v7745_v36, %s8907_s12  ;;  %v1522_v6 = vld [vmem:[%s7187_s10 + $0x1c] sm:$0xf] }
 0x262   : > { %v785_v44 = vpop.permute.xlu1 %784  ;;  %v783_v45 = vpop.permute.xlu0 %782 }
 0x263   : > { %v793_v12 = vsel %vm790_vm8, %v7462_v63, %v783_v45  ;;  %v794_v5 = vsel %vm790_vm8, %v783_v45, %v785_v44 }
 0x264   : > { %806 = vst [vmem:[#allocation2 + $0xf0] sm:$0xf] %v793_v12  ;;  %807 = vst [vmem:[#allocation2 + $0xf8] sm:$0xf] %v794_v5  ;;  %1403 = vrot.lane.b32.xlu1 %v6323_v43, %s6842_s24  ;;  %1401 = vrot.lane.b32.xlu0 %v7710_v51, %s6842_s24  ;;  %v1615_v5 = vld [vmem:[%s7187_s10 + $0x1c] sm:$0xf] }
 0x265   : > { %s8966_s24 = smov 108  }
 0x266   : > { %v832_v47 = vpop.permute.xlu1 %831  ;;  %v830_v48 = vpop.permute.xlu0 %829 }
 0x267   : > { %v840_v35 = vsel %vm837_vm9, %v7472_v4, %v830_v48  ;;  %v841_v52 = vsel %vm837_vm9, %v830_v48, %v832_v47  ;;  %v1685_v63 = vld [vmem:[#allocation2 + $0xd0] sm:$0xff]  ;;  %v1684_v56 = vld [vmem:[#allocation2 + $0xc8] sm:$0xff] }
 0x268   : > { %853 = vst [vmem:[#allocation2 + $0xf0] sm:$0xf0] %v840_v35  ;;  %854 = vst [vmem:[#allocation2 + $0xf8] sm:$0xf0] %v841_v52  ;;  %1449 = vrot.lane.b32.xlu1 %v1429_v16, %s6843_s23  ;;  %1447 = vrot.lane.b32.xlu0 %v7745_v36, %s6843_s23  ;;  %v1769_v53 = vpack.c.bf16 %v1685_v63, %v1678_v17  ;;  %v1768_v58 = vpack.c.bf16 %v1684_v56, %v1677_v55  ;;  %s8909_s23 = smov 36  }
 0x269   : > { %v1151_v35 = vcombine.high %v7666_v7, %v7666_v7 }
 0x26a   : > { %v878_v59 = vpop.permute.xlu1 %877  ;;  %v876_v1 = vpop.permute.xlu0 %875  ;;  %1921 = vmatprep.subr.bf16.mxu0 %v1769_v53 }
 0x26b   : > { %v886_v4 = vsel %vm883_vm10, %v7483_v15, %v876_v1  ;;  %v887_v2 = vsel %vm883_vm10, %v876_v1, %v878_v59  ;;  %1922 = vmatpush1.bf16.msra.mxu0 %v1768_v58 }
 0x26c   : > { %899 = vst [vmem:[#allocation2 + $0x128] sm:$0xf] %v886_v4  ;;  %900 = vst [vmem:[#allocation2 + $0x130] sm:$0xf] %v887_v2  ;;  %1496 = vrot.lane.b32.xlu1 %v6324_v42, %s8908_s15  ;;  %1494 = vrot.lane.b32.xlu0 %v7710_v51, %s8908_s15 }
 0x26e   : > { %v925_v46 = vpop.permute.xlu1 %924  ;;  %v923_v3 = vpop.permute.xlu0 %922 }
 0x26f   : > { %v933_v10 = vsel %vm930_vm11, %v7491_v21, %v923_v3  ;;  %v934_v11 = vsel %vm930_vm11, %v923_v3, %v925_v46  ;;  %v1690_v9 = vld [vmem:[#allocation2 + $0xf8] sm:$0xff]  ;;  %v1689_v30 = vld [vmem:[#allocation2 + $0xf0] sm:$0xff] }
 0x270   : > { %946 = vst [vmem:[#allocation2 + $0x128] sm:$0xf0] %v933_v10  ;;  %947 = vst [vmem:[#allocation2 + $0x130] sm:$0xf0] %v934_v11  ;;  %1538 = vrot.lane.b32.xlu1 %v7710_v51, %s8909_s23  ;;  %1536 = vrot.lane.b32.xlu0 %v7703_v60, %s8909_s23 }
 0x272   : > { %v789_v15 = vpop.permute.xlu1 %788  ;;  %v787_v14 = vpop.permute.xlu0 %786 }
 0x273   : > { %810 = vst.msk [vmem:[#allocation2 + $0x110] sm:$0xf] %vm436_vm7, %v789_v15  ;;  %v795_v22 = vsel %vm790_vm8, %v785_v44, %v787_v14  ;;  %v796_v24 = vsel %vm790_vm8, %v787_v14, %v789_v15  ;;  %vm8912_vm8 = vcmask 138240  }
 0x274   : > { %808 = vst [vmem:[#allocation2 + $0x100] sm:$0xf] %v795_v22  ;;  %809 = vst [vmem:[#allocation2 + $0x108] sm:$0xf] %v796_v24  ;;  %1585 = vrot.lane.b32.xlu1 %v7724_v0, %s6846_s22  ;;  %1583 = vrot.lane.b32.xlu0 %v6498_v34, %s6846_s22 }
 0x276   : > { %v836_v21 = vpop.permute.xlu1 %835  ;;  %v834_v25 = vpop.permute.xlu0 %833 }
 0x277   : > { %857 = vst.msk [vmem:[#allocation2 + $0x110] sm:$0xf0] %vm484_vm15, %v836_v21  ;;  %v842_v26 = vsel %vm837_vm9, %v832_v47, %v834_v25  ;;  %v843_v27 = vsel %vm837_vm9, %v834_v25, %v836_v21  ;;  %v1697_v28 = vld [vmem:[#allocation2 + $0x130] sm:$0xff]  ;;  %v1696_v31 = vld [vmem:[#allocation2 + $0x128] sm:$0xff] }
 0x278   : > { %855 = vst [vmem:[#allocation2 + $0x100] sm:$0xf0] %v842_v26  ;;  %856 = vst [vmem:[#allocation2 + $0x108] sm:$0xf0] %v843_v27  ;;  %1631 = vrot.lane.b32.xlu1 %v7710_v51, %s6847_s16  ;;  %1629 = vrot.lane.b32.xlu0 %v7703_v60, %s6847_s16  ;;  %v1774_v0 = vpack.c.bf16 %v1697_v28, %v1690_v9  ;;  %v1773_v34 = vpack.c.bf16 %v1696_v31, %v1689_v30  ;;  %v6325_v60 = vld [vmem:[%s7187_s10 + $0x1c] ss:$0 sps:$4 sm:$0xff]  }
 0x279   : > { %s6851_s10 = smov 111  }
 0x27a   : > { %v882_v18 = vpop.permute.xlu1 %881  ;;  %v880_v37 = vpop.permute.xlu0 %879  ;;  %1882 = vmatprep.subr.bf16.mxu1 %v1774_v0 }
 0x27b   : > { %903 = vst.msk [vmem:[#allocation2 + $0x148] sm:$0xf] %vm436_vm7, %v882_v18  ;;  %v888_v39 = vsel %vm883_vm10, %v878_v59, %v880_v37  ;;  %v889_v32 = vsel %vm883_vm10, %v880_v37, %v882_v18  ;;  %1883 = vmatpush1.bf16.msra.mxu1 %v1773_v34  ;;  %v1806_v59 = vld [vmem:[#allocation13] sm:$0xff] }
 0x27c   : > { %901 = vst [vmem:[#allocation2 + $0x138] sm:$0xf] %v888_v39  ;;  %902 = vst [vmem:[#allocation2 + $0x140] sm:$0xf] %v889_v32  ;;  %1542 = vrot.lane.b32.xlu1 %v1522_v6, %s8909_s23  ;;  %1540 = vrot.lane.b32.xlu0 %v7745_v36, %s8909_s23  ;;  %s8802_s23 = smov 120  }
 0x27e   : > { %v929_v43 = vpop.permute.xlu1 %928  ;;  %v927_v44 = vpop.permute.xlu0 %926 }
 0x27f   : > { %950 = vst.msk [vmem:[#allocation2 + $0x148] sm:$0xf0] %vm484_vm15, %v929_v43  ;;  %v935_v45 = vsel %vm930_vm11, %v925_v46, %v927_v44  ;;  %v936_v12 = vsel %vm930_vm11, %v927_v44, %v929_v43  ;;  %v1692_v63 = vld [vmem:[#allocation2 + $0x108] sm:$0xff]  ;;  %vm8913_vm11 = vmmov %vm8912_vm8  ;;  %v1691_v53 = vld [vmem:[#allocation2 + $0x100] sm:$0xff] }
 0x280   : > { %948 = vst [vmem:[#allocation2 + $0x138] sm:$0xf0] %v935_v45  ;;  %949 = vst [vmem:[#allocation2 + $0x140] sm:$0xf0] %v936_v12  ;;  %1589 = vrot.lane.b32.xlu1 %v6325_v60, %s6846_s22  ;;  %1587 = vrot.lane.b32.xlu0 %v7710_v51, %s6846_s22  ;;  %s8965_s22 = smov 118  }
 0x282   : > { %v971_v16 = vpop.permute.xlu1 %970  ;;  %v969_v47 = vpop.permute.xlu0 %968 }
 0x283   : > { %v979_v48 = vsel %vm8910_vm3, %v7510_v38, %v969_v47  ;;  %v980_v17 = vsel %vm8911_vm6, %v969_v47, %v971_v16  ;;  %vm8914_vm3 = vcmask 130048  }
 0x284   : > { %992 = vst [vmem:[#allocation2 + $0x160] sm:$0xf] %v979_v48  ;;  %993 = vst [vmem:[#allocation2 + $0x168] sm:$0xf] %v980_v17  ;;  %1635 = vrot.lane.b32.xlu1 %v1615_v5, %s6847_s16  ;;  %1633 = vrot.lane.b32.xlu0 %v7745_v36, %s6847_s16  ;;  %s8963_s16 = smov 127  }
 0x285   : > { %vm8915_vm6 = vmmov %vm8914_vm3 }
 0x286   : > { %v1018_v52 = vpop.permute.xlu1 %1017  ;;  %v1016_v51 = vpop.permute.xlu0 %1015 }
 0x287   : > { %v1026_v55 = vsel %vm8912_vm8, %v7518_v41, %v1016_v51  ;;  %v1027_v38 = vsel %vm8913_vm11, %v1016_v51, %v1018_v52  ;;  %v1699_v56 = vld [vmem:[#allocation2 + $0x140] sm:$0xff]  ;;  %v1698_v58 = vld [vmem:[#allocation2 + $0x138] sm:$0xff]  ;;  %vm8916_vm8 = vcmask 64512  }
 0x288   : > { %1039 = vst [vmem:[#allocation2 + $0x160] sm:$0xf0] %v1026_v55  ;;  %1040 = vst [vmem:[#allocation2 + $0x168] sm:$0xf0] %v1027_v38  ;;  %1166 = vrot.lane.b32.xlu1 %v1151_v35, %s8904_s14  ;;  %1116 = vrot.lane.b32.xlu0 %v7666_v7, %s8903_s9  ;;  %v1776_v42 = vpack.c.bf16 %v1699_v56, %v1692_v63  ;;  %v1775_v36 = vpack.c.bf16 %v1698_v58, %v1691_v53  ;;  %s8800_s9 = smov 122   ;;  %s8974_s14 = smov 116  }
 0x289   : > { %vm8917_vm11 = vmmov %vm8916_vm8 }
 0x28a   : > { %v1064_v1 = vpop.permute.xlu1 %1063  ;;  %v1062_v4 = vpop.permute.xlu0 %1061  ;;  %1923 = vmatprep.subr.bf16.mxu0 %v1776_v42 }
 0x28b   : > { %v1072_v41 = vsel %vm8914_vm3, %v7526_v49, %v1062_v4  ;;  %v1073_v2 = vsel %vm8915_vm6, %v1062_v4, %v1064_v1  ;;  %1924 = vmatpush1.bf16.msra.mxu0 %v1775_v36  ;;  %vm8918_vm3 = vcmask 146432  }
 0x28c   : > { %1085 = vst [vmem:[#allocation2 + $0x198] sm:$0xf] %v1072_v41  ;;  %1086 = vst [vmem:[#allocation2 + $0x1a0] sm:$0xf] %v1073_v2  ;;  %1216 = vrot.lane.b32.xlu0 %v7666_v7, %s6838_s1  ;;  %1809 = vperm.xlu1 %6280, %v1806_v59   ;;  %s8964_s1 = smov 126  }
 0x28d   : > { %vm8919_vm6 = vmmov %vm8918_vm3 }
 0x28e   : > { %v1111_v46 = vpop.permute.xlu1 %1110  ;;  %v1109_v3 = vpop.permute.xlu0 %1108 }
 0x28f   : > { %v1121_v10 = vsel %vm8916_vm8, %v7535_v54, %v1109_v3  ;;  %v1122_v11 = vsel %vm8917_vm11, %v1109_v3, %v1111_v46  ;;  %v1704_v21 = vld [vmem:[#allocation2 + $0x168] sm:$0xff]  ;;  %vm8920_vm8 = vcmask 138240   ;;  %v1703_v26 = vld [vmem:[#allocation2 + $0x160] sm:$0xff] }
 0x290   : > { %1135 = vst [vmem:[#allocation2 + $0x198] sm:$0xf0] %v1121_v10  ;;  %1136 = vst [vmem:[#allocation2 + $0x1a0] sm:$0xf0] %v1122_v11 }
 0x291   : > { %vm8921_vm11 = vmmov %vm8920_vm8 }
 0x292   : > { %v975_v15 = vpop.permute.xlu1 %974  ;;  %v973_v49 = vpop.permute.xlu0 %972 }
 0x293   : > { %996 = vst.msk [vmem:[#allocation2 + $0x180] sm:$0xf] %vm436_vm7, %v975_v15  ;;  %v981_v14 = vsel %vm8918_vm3, %v971_v16, %v973_v49  ;;  %v982_v22 = vsel %vm8919_vm6, %v973_v49, %v975_v15  ;;  %vm8922_vm3 = vcmask 130048  }
 0x294   : > { %994 = vst [vmem:[#allocation2 + $0x170] sm:$0xf] %v981_v14  ;;  %995 = vst [vmem:[#allocation2 + $0x178] sm:$0xf] %v982_v22 }
 0x295   : > { %vm8923_vm6 = vmmov %vm8922_vm3 }
 0x296   : > { %v1022_v7 = vpop.permute.xlu1 %1021  ;;  %v1020_v24 = vpop.permute.xlu0 %1019 }
 0x297   : > { %1043 = vst.msk [vmem:[#allocation2 + $0x180] sm:$0xf0] %vm484_vm15, %v1022_v7  ;;  %v1028_v54 = vsel %vm8920_vm8, %v1018_v52, %v1020_v24  ;;  %v1029_v25 = vsel %vm8921_vm11, %v1020_v24, %v1022_v7  ;;  %v1711_v9 = vld [vmem:[#allocation2 + $0x1a0] sm:$0xff]  ;;  %v1710_v27 = vld [vmem:[#allocation2 + $0x198] sm:$0xff]  ;;  %vm8924_vm8 = vcmask 64512  }
 0x298   : > { %1041 = vst [vmem:[#allocation2 + $0x170] sm:$0xf0] %v1028_v54  ;;  %1042 = vst [vmem:[#allocation2 + $0x178] sm:$0xf0] %v1029_v25  ;;  %v1781_v28 = vpack.c.bf16 %v1711_v9, %v1704_v21  ;;  %v1780_v30 = vpack.c.bf16 %v1710_v27, %v1703_v26 }
 0x299   : > { %vm8925_vm11 = vmmov %vm8924_vm8 }
 0x29a   : > { %v1068_v31 = vpop.permute.xlu1 %1067  ;;  %v1066_v0 = vpop.permute.xlu0 %1065  ;;  %1884 = vmatprep.subr.bf16.mxu1 %v1781_v28 }
 0x29b   : > { %1089 = vst.msk [vmem:[#allocation2 + $0x1b8] sm:$0xf] %vm436_vm7, %v1068_v31  ;;  %v1074_v34 = vsel %vm8922_vm3, %v1064_v1, %v1066_v0  ;;  %v1075_v6 = vsel %vm8923_vm6, %v1066_v0, %v1068_v31  ;;  %1885 = vmatpush1.bf16.msra.mxu1 %v1780_v30  ;;  %vm8927_vm3 = vmmov %vm8926_vm4  ;;  %vm8928_vm6 = vcmask 48128  }
 0x29c   : > { %1087 = vst [vmem:[#allocation2 + $0x1a8] sm:$0xf] %v1074_v34  ;;  %1088 = vst [vmem:[#allocation2 + $0x1b0] sm:$0xf] %v1075_v6 }
 0x29e   : > { %v7887_v18 = vpop.permute.xlu1 %1114  ;;  %v1113_v37 = vpop.permute.xlu0 %1112 }
 0x29f   : > { %v1123_v39 = vsel %vm8924_vm8, %v1111_v46, %v1113_v37  ;;  %v1124_v32 = vsel %vm8925_vm11, %v1113_v37, %v7887_v18  ;;  %v1706_v16 = vld [vmem:[#allocation2 + $0x178] sm:$0xff]  ;;  %vm8929_vm8 = vmmov %vm8928_vm6  ;;  %v1705_v35 = vld [vmem:[#allocation2 + $0x170] sm:$0xff] }
 0x2a0   : > { %1137 = vst [vmem:[#allocation2 + $0x1a8] sm:$0xf0] %v1123_v39  ;;  %1138 = vst [vmem:[#allocation2 + $0x1b0] sm:$0xf0] %v1124_v32 }
 0x2a2   : > { %v1161_v60 = vpop.permute.xlu1 %1160  ;;  %v1159_v43 = vpop.permute.xlu0 %1158 }
 0x2a3   : > { %v1171_v44 = vsel %vm8926_vm4, %v7555_v19, %v1159_v43  ;;  %v1172_v45 = vsel %vm8927_vm3, %v1159_v43, %v1161_v60  ;;  %vm8930_vm4 = vcmask 457728   ;;  %vm8932_vm3 = vcmask 449536  }
 0x2a4   : > { %1185 = vst [vmem:[#allocation2 + $0x1d0] sm:$0xf] %v1171_v44  ;;  %1186 = vst [vmem:[#allocation2 + $0x1d8] sm:$0xf] %v1172_v45 }
 0x2a5   : > { %vm8931_vm11 = vmmov %vm8930_vm4 }
 0x2a6   : > { %v1211_v12 = vpop.permute.xlu1 %1210  ;;  %v1209_v5 = vpop.permute.xlu0 %1208 }
 0x2a7   : > { %v1221_v47 = vsel %vm8928_vm6, %v7562_v23, %v1209_v5  ;;  %v1222_v48 = vsel %vm8929_vm8, %v1209_v5, %v1211_v12  ;;  %v1713_v17 = vld [vmem:[#allocation2 + $0x1b0] sm:$0xff]  ;;  %v1712_v52 = vld [vmem:[#allocation2 + $0x1a8] sm:$0xff]  ;;  %vm8933_vm6 = vmmov %vm8932_vm3  ;;  %vm8934_vm8 = vcmask 56320  }
 0x2a8   : > { %1235 = vst [vmem:[#allocation2 + $0x1d0] sm:$0xf0] %v1221_v47  ;;  %1236 = vst [vmem:[#allocation2 + $0x1d8] sm:$0xf0] %v1222_v48  ;;  %v1783_v51 = vpack.c.bf16 %v1713_v17, %v1706_v16  ;;  %v1782_v63 = vpack.c.bf16 %v1712_v52, %v1705_v35 }
 0x2aa   : > { %v1260_v19 = vpop.permute.xlu1 %1259  ;;  %v1258_v55 = vpop.permute.xlu0 %1257  ;;  %1925 = vmatprep.subr.bf16.mxu0 %v1783_v51 }
 0x2ab   : > { %v1268_v38 = vsel %vm8930_vm4, %v7570_v29, %v1258_v55  ;;  %v1269_v56 = vsel %vm8931_vm11, %v1258_v55, %v1260_v19  ;;  %1926 = vmatpush1.bf16.msra.mxu0 %v1782_v63  ;;  %vm8935_vm4 = vmmov %vm8934_vm8  ;;  %vm8936_vm11 = vcmask 48128  }
 0x2ac   : > { %1281 = vst [vmem:[#allocation2 + $0x208] sm:$0xf] %v1268_v38  ;;  %1282 = vst [vmem:[#allocation2 + $0x210] sm:$0xf] %v1269_v56 }
 0x2ae   : > { %v1307_v23 = vpop.permute.xlu1 %1306  ;;  %v1305_v53 = vpop.permute.xlu0 %1304 }
 0x2af   : > { %v1315_v58 = vsel %vm8932_vm3, %v7578_v33, %v1305_v53  ;;  %v1316_v42 = vsel %vm8933_vm6, %v1305_v53, %v1307_v23  ;;  %v1718_v2 = vld [vmem:[#allocation2 + $0x1d8] sm:$0xff]  ;;  %vm8937_vm3 = vmmov %vm8936_vm11  ;;  %v1717_v10 = vld [vmem:[#allocation2 + $0x1d0] sm:$0xff]  ;;  %vm8938_vm6 = vcmask 457728  }
 0x2b0   : > { %1328 = vst [vmem:[#allocation2 + $0x208] sm:$0xf0] %v1315_v58  ;;  %1329 = vst [vmem:[#allocation2 + $0x210] sm:$0xf0] %v1316_v42 }
 0x2b2   : > { %v7904_v36 = vpop.permute.xlu1 %1164  ;;  %v1163_v59 = vpop.permute.xlu0 %1162 }
 0x2b3   : > { %v1173_v1 = vsel %vm8934_vm8, %v1161_v60, %v1163_v59  ;;  %v1174_v29 = vsel %vm8935_vm4, %v1163_v59, %v7904_v36  ;;  %vm8939_vm8 = vmmov %vm8938_vm6  ;;  %vm8940_vm4 = vcmask 449536  }
 0x2b4   : > { %1187 = vst [vmem:[#allocation2 + $0x1e0] sm:$0xf] %v1173_v1  ;;  %1188 = vst [vmem:[#allocation2 + $0x1e8] sm:$0xf] %v1174_v29 }
 0x2b6   : > { %v7909_v4 = vpop.permute.xlu1 %1214  ;;  %v1213_v41 = vpop.permute.xlu0 %1212 }
 0x2b7   : > { %v1223_v33 = vsel %vm8936_vm11, %v1211_v12, %v1213_v41  ;;  %v1224_v46 = vsel %vm8937_vm3, %v1213_v41, %v7909_v4  ;;  %v1725_v3 = vld [vmem:[#allocation2 + $0x210] sm:$0xff]  ;;  %v1724_v11 = vld [vmem:[#allocation2 + $0x208] sm:$0xff]  ;;  %vm8941_vm11 = vmmov %vm8940_vm4  ;;  %vm8942_vm3 = vcmask 367616  }
 0x2b8   : > { %1237 = vst [vmem:[#allocation2 + $0x1e0] sm:$0xf0] %v1223_v33  ;;  %1238 = vst [vmem:[#allocation2 + $0x1e8] sm:$0xf0] %v1224_v46  ;;  %v1788_v15 = vpack.c.bf16 %v1725_v3, %v1718_v2  ;;  %v1787_v49 = vpack.c.bf16 %v1724_v11, %v1717_v10 }
 0x2ba   : > { %v1264_v14 = vpop.permute.xlu1 %1263  ;;  %v1262_v22 = vpop.permute.xlu0 %1261  ;;  %1886 = vmatprep.subr.bf16.mxu1 %v1788_v15 }
 0x2bb   : > { %1285 = vst.msk [vmem:[#allocation2 + $0x228] sm:$0xf] %vm436_vm7, %v1264_v14  ;;  %v1270_v7 = vsel %vm8938_vm6, %v1260_v19, %v1262_v22  ;;  %v1271_v24 = vsel %vm8939_vm8, %v1262_v22, %v1264_v14  ;;  %1887 = vmatpush1.bf16.msra.mxu1 %v1787_v49  ;;  %vm8943_vm6 = vmmov %vm8942_vm3  ;;  %vm8944_vm8 = vcmask 359424  }
 0x2bc   : > { %1283 = vst [vmem:[#allocation2 + $0x218] sm:$0xf] %v1270_v7  ;;  %1284 = vst [vmem:[#allocation2 + $0x220] sm:$0xf] %v1271_v24 }
 0x2be   : > { %v1311_v21 = vpop.permute.xlu1 %1310  ;;  %v1309_v54 = vpop.permute.xlu0 %1308 }
 0x2bf   : > { %1332 = vst.msk [vmem:[#allocation2 + $0x228] sm:$0xf0] %vm484_vm15, %v1311_v21  ;;  %v1317_v25 = vsel %vm8940_vm4, %v1307_v23, %v1309_v54  ;;  %v1318_v9 = vsel %vm8941_vm11, %v1309_v54, %v1311_v21  ;;  %v1720_v34 = vld [vmem:[#allocation2 + $0x1e8] sm:$0xff]  ;;  %v1719_v32 = vld [vmem:[#allocation2 + $0x1e0] sm:$0xff]  ;;  %vm8945_vm4 = vmmov %vm8944_vm8 }
 0x2c0   : > { %1330 = vst [vmem:[#allocation2 + $0x218] sm:$0xf0] %v1317_v25  ;;  %1331 = vst [vmem:[#allocation2 + $0x220] sm:$0xf0] %v1318_v9 }
 0x2c1   : > { %vm8946_vm11 = vmmov %vm8942_vm3 }
 0x2c2   : > { %v1353_v26 = vpop.permute.xlu1 %1352  ;;  %v1351_v27 = vpop.permute.xlu0 %1350 }
 0x2c3   : > { %v1361_v28 = vsel %vm8827_vm13, %v7599_v57, %v1351_v27  ;;  %v1362_v30 = vsel %vm8827_vm13, %v1351_v27, %v1353_v26 }
 0x2c4   : > { %1374 = vst [vmem:[#allocation2 + $0x240] sm:$0xf] %v1361_v28  ;;  %1375 = vst [vmem:[#allocation2 + $0x248] sm:$0xf] %v1362_v30 }
 0x2c6   : > { %v1400_v31 = vpop.permute.xlu1 %1399  ;;  %v1398_v0 = vpop.permute.xlu0 %1397 }
 0x2c7   : > { %v1408_v6 = vsel %vm1405_vm12, %v7607_v62, %v1398_v0  ;;  %v1409_v37 = vsel %vm1405_vm12, %v1398_v0, %v1400_v31  ;;  %v1727_v39 = vld [vmem:[#allocation2 + $0x220] sm:$0xff]  ;;  %v1726_v60 = vld [vmem:[#allocation2 + $0x218] sm:$0xff] }
 0x2c8   : > { %1421 = vst [vmem:[#allocation2 + $0x240] sm:$0xf0] %v1408_v6  ;;  %1422 = vst [vmem:[#allocation2 + $0x248] sm:$0xf0] %v1409_v37  ;;  %v1790_v43 = vpack.c.bf16 %v1727_v39, %v1720_v34  ;;  %v1789_v44 = vpack.c.bf16 %v1726_v60, %v1719_v32 }
 0x2ca   : > { %v1446_v57 = vpop.permute.xlu1 %1445  ;;  %v1444_v45 = vpop.permute.xlu0 %1443  ;;  %1927 = vmatprep.subr.bf16.mxu0 %v1790_v43 }
 0x2cb   : > { %v1454_v12 = vsel %vm8942_vm3, %v7615_v13, %v1444_v45  ;;  %v1455_v5 = vsel %vm8943_vm6, %v1444_v45, %v1446_v57  ;;  %1928 = vmatpush1.bf16.msra.mxu0 %v1789_v44  ;;  %vm8948_vm6 = vmmov %vm8945_vm4 }
 0x2cc   : > { %1467 = vst [vmem:[#allocation2 + $0x278] sm:$0xf] %v1454_v12  ;;  %1468 = vst [vmem:[#allocation2 + $0x280] sm:$0xf] %v1455_v5 }
 0x2ce   : > { %v1493_v62 = vpop.permute.xlu1 %1492  ;;  %v1491_v16 = vpop.permute.xlu0 %1490 }
 0x2cf   : > { %v1501_v47 = vsel %vm8944_vm8, %v7622_v20, %v1491_v16  ;;  %v1502_v48 = vsel %vm8945_vm4, %v1491_v16, %v1493_v62  ;;  %v1732_v19 = vld [vmem:[#allocation2 + $0x248] sm:$0xff]  ;;  %v1731_v56 = vld [vmem:[#allocation2 + $0x240] sm:$0xff]  ;;  %vm8949_vm8 = vcmask 293888  }
 0x2d0   : > { %1514 = vst [vmem:[#allocation2 + $0x278] sm:$0xf0] %v1501_v47  ;;  %1515 = vst [vmem:[#allocation2 + $0x280] sm:$0xf0] %v1502_v48  ;;  %v1672_v16 = vld [vmem:[#allocation2 + $0x68] sm:$0xff] }
 0x2d2   : > { %v1357_v17 = vpop.permute.xlu1 %1356  ;;  %v1355_v35 = vpop.permute.xlu0 %1354 }
 0x2d3   : > { %1378 = vst.msk [vmem:[#allocation2 + $0x260] sm:$0xf] %vm436_vm7, %v1357_v17  ;;  %v1363_v13 = vsel %vm8827_vm13, %v1353_v26, %v1355_v35  ;;  %v1364_v52 = vsel %vm8827_vm13, %v1355_v35, %v1357_v17  ;;  %v6849_v17 = vmov 0.0   ;;  %v1665_v35 = vld [vmem:[#allocation2 + $0x30] sm:$0xff] }
 0x2d4   : > { %1376 = vst [vmem:[#allocation2 + $0x250] sm:$0xf] %v1363_v13  ;;  %1377 = vst [vmem:[#allocation2 + $0x258] sm:$0xf] %v1364_v52  ;;  %v1763_v13 = vpack.c.bf16 %v1672_v16, %v1665_v35 }
 0x2d6   : > { %v1404_v51 = vpop.permute.xlu1 %1403  ;;  %v1402_v63 = vpop.permute.xlu0 %1401 }
 0x2d7   : > { %1425 = vst.msk [vmem:[#allocation2 + $0x260] sm:$0xf0] %vm484_vm15, %v1404_v51  ;;  %v1410_v20 = vsel %vm1405_vm12, %v1400_v31, %v1402_v63  ;;  %v1411_v55 = vsel %vm1405_vm12, %v1402_v63, %v1404_v51  ;;  %v1739_v38 = vld [vmem:[#allocation2 + $0x280] sm:$0xff]  ;;  %v1738_v23 = vld [vmem:[#allocation2 + $0x278] sm:$0xff]  ;;  %vm8947_vm12 = vmmov %vm8945_vm4 }
 0x2d8   : > { %1423 = vst [vmem:[#allocation2 + $0x250] sm:$0xf0] %v1410_v20  ;;  %1424 = vst [vmem:[#allocation2 + $0x258] sm:$0xf0] %v1411_v55  ;;  %v1795_v53 = vpack.c.bf16 %v1739_v38, %v1732_v19  ;;  %v1794_v58 = vpack.c.bf16 %v1738_v23, %v1731_v56  ;;  %v1686_v63 = vld [vmem:[#allocation2 + $0xd8] sm:$0xff]  ;;  %v1679_v55 = vld [vmem:[#allocation2 + $0xa0] sm:$0xff] }
 0x2d9   : > { %vm8950_vm4 = vmmov %vm8949_vm8  ;;  %v1770_v38 = vpack.c.bf16 %v1686_v63, %v1679_v55  ;;  %v1700_v23 = vld [vmem:[#allocation2 + $0x148] sm:$0xff] }
 0x2da   : > { %v1450_v42 = vpop.permute.xlu1 %1449  ;;  %v1448_v59 = vpop.permute.xlu0 %1447  ;;  %1888 = vmatprep.subr.bf16.mxu1 %v1795_v53  ;;  %v2008_v53 = vlaneseq }
 0x2db   : > { %1471 = vst.msk [vmem:[#allocation2 + $0x298] sm:$0xf] %vm436_vm7, %v1450_v42  ;;  %v1456_v1 = vsel %vm8946_vm11, %v1446_v57, %v1448_v59  ;;  %v1457_v29 = vsel %vm8942_vm3, %v1448_v59, %v1450_v42  ;;  %1889 = vmatpush1.bf16.msra.mxu1 %v1794_v58  ;;  %vm8951_vm11 = vcmask 277504  }
 0x2dc   : > { %1469 = vst [vmem:[#allocation2 + $0x288] sm:$0xf] %v1456_v1  ;;  %1470 = vst [vmem:[#allocation2 + $0x290] sm:$0xf] %v1457_v29  ;;  %v1693_v29 = vld [vmem:[#allocation2 + $0x110] sm:$0xff] }
 0x2dd   : > { %vm8952_vm3 = vmmov %vm8951_vm11 }
 0x2de   : > { %v1497_v41 = vpop.permute.xlu1 %1496  ;;  %v1495_v2 = vpop.permute.xlu0 %1494 }
 0x2df   : > { %1518 = vst.msk [vmem:[#allocation2 + $0x298] sm:$0xf0] %vm484_vm15, %v1497_v41  ;;  %v1503_v33 = vsel %vm8947_vm12, %v1493_v62, %v1495_v2  ;;  %v1504_v46 = vsel %vm8948_vm6, %v1495_v2, %v1497_v41  ;;  %v1734_v22 = vld [vmem:[#allocation2 + $0x258] sm:$0xff]  ;;  %v1733_v54 = vld [vmem:[#allocation2 + $0x250] sm:$0xff]  ;;  %vm8953_vm12 = vmmov %vm8950_vm4  ;;  %v1777_v41 = vpack.c.bf16 %v1700_v23, %v1693_v29 }
 0x2e0   : > { %1516 = vst [vmem:[#allocation2 + $0x288] sm:$0xf0] %v1503_v33  ;;  %1517 = vst [vmem:[#allocation2 + $0x290] sm:$0xf0] %v1504_v46  ;;  %v7981_v33 = vshrl.u32 %v2008_v53, 7 }
 0x2e1   : > { %vm8954_vm6 = vmmov %vm8950_vm4 }
 0x2e2   : > { %v1539_v3 = vpop.permute.xlu1 %1538  ;;  %v1537_v10 = vpop.permute.xlu0 %1536 }
 0x2e3   : > { %v1547_v11 = vsel %vm8949_vm8, %v7642_v40, %v1537_v10  ;;  %v1548_v15 = vsel %vm8950_vm4, %v1537_v10, %v1539_v3  ;;  %vm8955_vm8 = vcmask 1045504   ;;  %v6499_v10 = vld [vmem:[#allocation11] sm:$0xf] }
 0x2e4   : > { %1560 = vst [vmem:[#allocation2 + $0x2b0] sm:$0xf] %v1547_v11  ;;  %1561 = vst [vmem:[#allocation2 + $0x2b8] sm:$0xf] %v1548_v15  ;;  %v2010_v11 = vsub.s32 0, %v7981_v33  ;;  %v2014_v15 = vsub.s32 1, %v7981_v33 }
 0x2e5   : > { %vm8956_vm4 = vmmov %vm8955_vm8 }
 0x2e6   : > { %v1586_v49 = vpop.permute.xlu1 %1585  ;;  %v1584_v14 = vpop.permute.xlu0 %1583 }
 0x2e7   : > { %v1594_v7 = vsel %vm1591_vm14, %v7657_v61, %v1584_v14  ;;  %v1595_v24 = vsel %vm1591_vm14, %v1584_v14, %v1586_v49  ;;  %v1741_v21 = vld [vmem:[#allocation2 + $0x290] sm:$0xff]  ;;  %v1740_v25 = vld [vmem:[#allocation2 + $0x288] sm:$0xff] }
 0x2e8   : > { %1607 = vst [vmem:[#allocation2 + $0x2b0] sm:$0xf0] %v1594_v7  ;;  %1608 = vst [vmem:[#allocation2 + $0x2b8] sm:$0xf0] %v1595_v24  ;;  %v1797_v9 = vpack.c.bf16 %v1741_v21, %v1734_v22  ;;  %v1796_v26 = vpack.c.bf16 %v1740_v25, %v1733_v54  ;;  %v1728_v14 = vld [vmem:[#allocation2 + $0x228] sm:$0xff]  ;;  %v1742_v21 = vld [vmem:[#allocation2 + $0x298] sm:$0xff] }
 0x2e9   : > { %v7987_v22 = vld [vmem:[#allocation17] sm:$0x7f] }
 0x2ea   : > { %v1632_v40 = vpop.permute.xlu1 %1631  ;;  %v1630_v27 = vpop.permute.xlu0 %1629  ;;  %1929 = vmatprep.subr.bf16.mxu0 %v1797_v9  ;;  %v2011_v54 = vrot.slane %v7987_v22, %v2010_v11  ;;  %v2015_v9 = vrot.slane %v7987_v22, %v2014_v15 }
 0x2eb   : > { %v1640_v28 = vsel %vm8951_vm11, %v7668_v8, %v1630_v27  ;;  %v1641_v30 = vsel %vm8952_vm3, %v1630_v27, %v1632_v40  ;;  %1930 = vmatpush1.bf16.msra.mxu0 %v1796_v26  ;;  %vm8957_vm11 = vmmov %vm8952_vm3 }
 0x2ec   : > { %1653 = vst [vmem:[#allocation2 + $0x2e8] sm:$0xf] %v1640_v28  ;;  %1654 = vst [vmem:[#allocation2 + $0x2f0] sm:$0xf] %v1641_v30  ;;  %v1735_v28 = vld [vmem:[#allocation2 + $0x260] sm:$0xff] }
 0x2ee   : > { %v1543_v61 = vpop.permute.xlu1 %1542  ;;  %v1541_v31 = vpop.permute.xlu0 %1540 }
 0x2ef   : > { %1564 = vst.msk [vmem:[#allocation2 + $0x2d0] sm:$0xf] %vm436_vm7, %v1543_v61  ;;  %v1549_v0 = vsel %vm8953_vm12, %v1539_v3, %v1541_v31  ;;  %v1550_v34 = vsel %vm8954_vm6, %v1541_v31, %v1543_v61  ;;  %v1746_v39 = vld [vmem:[#allocation2 + $0x2b8] sm:$0xff]  ;;  %v1745_v43 = vld [vmem:[#allocation2 + $0x2b0] sm:$0xff]  ;;  %vm8959_vm12 = vcmask 64512   ;;  %vm6850_vm6 = vmmov 0  }
 0x2f0   : > { %1562 = vst [vmem:[#allocation2 + $0x2c0] sm:$0xf] %v1549_v0  ;;  %1563 = vst [vmem:[#allocation2 + $0x2c8] sm:$0xf] %v1550_v34  ;;  %v1798_v0 = vpack.c.bf16 %v1742_v21, %v1735_v28 }
 0x2f2   : > { %v1590_v6 = vpop.permute.xlu1 %1589  ;;  %v1588_v37 = vpop.permute.xlu0 %1587 }
 0x2f3   : > { %1611 = vst.msk [vmem:[#allocation2 + $0x2d0] sm:$0xf0] %vm484_vm15, %v1590_v6  ;;  %v1596_v8 = vsel %vm1591_vm14, %v1586_v49, %v1588_v37  ;;  %v1597_v32 = vsel %vm1591_vm14, %v1588_v37, %v1590_v6  ;;  %v1753_v60 = vld [vmem:[#allocation2 + $0x2f0] sm:$0xf]  ;;  %v1752_v44 = vld [vmem:[#allocation2 + $0x2e8] sm:$0xf] }
 0x2f4   : > { %1609 = vst [vmem:[#allocation2 + $0x2c0] sm:$0xf0] %v1596_v8  ;;  %1610 = vst [vmem:[#allocation2 + $0x2c8] sm:$0xf0] %v1597_v32  ;;  %v1802_v57 = vpack.c.bf16 %v1753_v60, %v1746_v39  ;;  %v1801_v45 = vpack.c.bf16 %v1752_v44, %v1745_v43  ;;  %vm8958_vm14 = vcmask 56320   ;;  %v2018_v43 = vsub.s32 2, %v7981_v33 }
 0x2f5   : > { %v6852_v32 = vmov -1e+30   ;;  %v2022_v44 = vsub.s32 3, %v7981_v33 }
 0x2f6   : > { %v1636_v12 = vpop.permute.xlu1 %1635  ;;  %v1634_v5 = vpop.permute.xlu0 %1633  ;;  %5549 = vmatprep.subr.msk.bf16.mxu1 %vm8955_vm8, %v1802_v57  ;;  %v1823_v62 = vsel %vm8956_vm4, %v1801_v45, 0  ;;  %vm8960_vm8 = vcmask 48128   ;;  %v2019_v57 = vrot.slane %v7987_v22, %v2018_v43 }
 0x2f7   : > { %1657 = vst.msk [vmem:[#allocation2 + $0x308] sm:$0xf] %vm436_vm7, %v1636_v12  ;;  %v1642_v47 = vsel %vm8957_vm11, %v1632_v40, %v1634_v5  ;;  %v1643_v48 = vsel %vm8952_vm3, %v1634_v5, %v1636_v12  ;;  %1891 = vmatpush1.bf16.msra.mxu1 %v1823_v62  ;;  %vm2000_vm11 = vcmask 908288   ;;  %vm2084_vm3 = vcmask 1048440  }
 0x2f8   : > { %1655 = vst [vmem:[#allocation2 + $0x2f8] sm:$0xf] %v1642_v47  ;;  %1656 = vst [vmem:[#allocation2 + $0x300] sm:$0xf] %v1643_v48  ;;  %5916 = vmatprep.subr.bf16.mxu1 %v6849_v17  ;;  %v2023_v12 = vrot.slane %v7987_v22, %v2022_v44 }
 0x2f9   : > { %2001 = vst.msk [vmem:[#allocation3] sm:$0xff] %vm2000_vm11, %v6852_v32 }
 0x2fa   : > { %v1167_v52 = vpop.permute.xlu1 %1166  ;;  %v1117_v51 = vpop.permute.xlu0 %1116  ;;  %5550 = vmatmul.mubr.msk.bf16.vlgmr.msra.gmra.mrb[4].mxu1 %vm697_vm5, %v7699_v50  ;;  %v1749_v34 = vld [vmem:[#allocation2 + $0x2d0] sm:$0xff] }
 0x2fb   : > { %v1175_v19 = vsel %vm8958_vm14, %v7904_v36, %v1167_v52  ;;  %v1125_v20 = vsel %vm8959_vm12, %v7887_v18, %v1117_v51  ;;  %5917 = vmatpush3.bf16.msra.mxu1 %v1763_v13  ;;  %5930 = vmatprep.mubr.msk.bf16.mxu1 %vm6850_vm6, %v6849_v17  ;;  %v1748_v56 = vld [vmem:[#allocation2 + $0x2c8] sm:$0xff]  ;;  %v1747_v58 = vld [vmem:[#allocation2 + $0x2c0] sm:$0xff]  ;;  %v2026_v13 = vsub.s32 4, %v7981_v33  ;;  %v2030_v52 = vsub.s32 5, %v7981_v33 }
 0x2fc   : > { %1189 = vst.msk [vmem:[#allocation2 + $0x1f0] sm:$0xf] %vm436_vm7, %v1175_v19  ;;  %5918 = vmatprep.subr.bf16.mxu1 %v6849_v17  ;;  %vm8961_vm7 = vmmov %vm8956_vm4  ;;  %vm2002_vm14 = vcmask 1048520   ;;  %vm2091_vm12 = vcmask 990208   ;;  %vm2181_vm6 = vcmask 973824  }
 0x2fd   : > { %1139 = vst.msk [vmem:[#allocation2 + $0x1b8] sm:$0xf0] %vm484_vm15, %v1125_v20  ;;  %v2027_v51 = vrot.slane %v7987_v22, %v2026_v13  ;;  %v2031_v19 = vrot.slane %v7987_v22, %v2030_v52 }
 0x2fe   : > { %v1217_v50 = vpop.permute.xlu0 %1216  ;;  %v1756_v26 = vld [vmem:[#allocation2 + $0x308] sm:$0xf]  ;;  %2003 = vst.msk [vmem:[#allocation3 + $0x30] sm:$0xff] %vm2002_vm14, %v6852_v32  ;;  %vm8830_vm14 = vcmask 1043456  }
 0x2ff   : > { %v1225_v36 = vsel %vm8960_vm8, %v7909_v4, %v1217_v50  ;;  %5919 = vmatpush3.bf16.msra.mxu1 %v1770_v38  ;;  %v1755_v18 = vld [vmem:[#allocation2 + $0x300] sm:$0xf]  ;;  %v1754_v42 = vld [vmem:[#allocation2 + $0x2f8] sm:$0xf]  ;;  %v1805_v6 = vpack.c.bf16 %v1756_v26, %v1749_v34  ;;  %vm2271_vm8 = vcmask 809984  }
 0x300   : > { %1239 = vst.msk [vmem:[#allocation2 + $0x1f0] sm:$0xf0] %vm484_vm15, %v1225_v36  ;;  %v1804_v59 = vpack.c.bf16 %v1755_v18, %v1748_v56  ;;  %5920 = vmatprep.subr.bf16.mxu1 %v6849_v17  ;;  %v1803_v1 = vpack.c.bf16 %v1754_v42, %v1747_v58  ;;  %v1707_v4 = vld [vmem:[#allocation2 + $0x180] sm:$0xff]  ;;  %vm8962_vm15 = vmmov %vm8956_vm4  ;;  %v2034_v42 = vsub.s32 6, %v7981_v33 }
 0x301   : > { %v1835_v8 = vsel %vm8962_vm15, %v1805_v6, 0 }
 0x302   : > { %5551 = vmatprep.subr.msk.bf16.mxu0 %vm8961_vm7, %v1804_v59  ;;  %v1829_v2 = vsel %vm8956_vm4, %v1803_v1, 0  ;;  %v2035_v59 = vrot.slane %v7987_v22, %v2034_v42  ;;  %v2348_v42 = vld [vmem:[#allocation20 + $0x18] sm:$0xff] }
 0x303   : > { %1932 = vmatpush1.bf16.msra.mxu0 %v1829_v2  ;;  %5921 = vmatpush3.bf16.msra.mxu1 %v1777_v41 }
 0x304   : > { %v1714_v46 = vld [vmem:[#allocation2 + $0x1b8] sm:$0xff]  ;;  %5922 = vmatprep.subr.bf16.mxu1 %v6849_v17 }
 0x305   : > { %v1784_v3 = vpack.c.bf16 %v1714_v46, %v1707_v4 }
 0x306   : > { %5552 = vmatmul.mubr.msk.bf16.vlgmr.msra.gmra.mrb[0].mxu0 %vm697_vm5, %v6499_v10 }
 0x307   : > { %5923 = vmatpush3.bf16.msra.mxu1 %v1784_v3  ;;  %v1721_v49 = vld [vmem:[#allocation2 + $0x1f0] sm:$0xff] }
 0x308   : > { %5924 = vmatprep.subr.bf16.mxu1 %v6849_v17  ;;  %v1791_v7 = vpack.c.bf16 %v1728_v14, %v1721_v49 }
 0x309   : > { %v1871_v24 = vpop.f32.mrb[0].mxu1 }
 0x30a   : > { %v1873_v25 = vpop.f32.mrb[1].mxu1 }
 0x30b   : > { %5925 = vmatpush3.bf16.msra.mxu1 %v1791_v7  ;;  %v7996_v40 = vpop.permute.xlu1 %1809  ;;  %v1875_v27 = vpop.f32.mrb[2].mxu1 }
 0x30c   : > { %5926 = vmatprep.subr.bf16.mxu1 %v6849_v17  ;;  %v1872_v30 = vadd.f32 %v1871_v24, %v7996_v40  ;;  %v1874_v61 = vadd.f32 %v1873_v25, %v7996_v40  ;;  %v1876_v31 = vpop.f32.mrb[3].mxu1 }
 0x30e   : > { %v2043_v37 = vadd.f32 %v2011_v54, %v1872_v30  ;;  %v2044_v39 = vadd.f32 %v2015_v9, %v1874_v61 }
 0x30f   : > { %5927 = vmatpush3.bf16.msra.mxu1 %v1798_v0 }
 0x310   : > { %5928 = vmatprep.subr.bf16.mxu1 %v6849_v17  ;;  %2057 = vrot.lane.b32.xlu0 %v2043_v37, %s6851_s10 }
 0x311   : > { %2059 = vrot.lane.b32.xlu1 %v2044_v39, %s6851_s10 }
 0x313   : > { %5929 = vmatpush3.bf16.msra.mxu1 %v1835_v8 }
 0x316   : > { %5931 = vmatmul.mubr.msk.bf16.vlgmr.msra.gmra.mrb[8].mxu1 %vm697_vm5, %v6499_v10 }
 0x382   : > { %v2058_v60 = vpop.permute.xlu0 %2057 }
 0x383   : > { %2085 = vst.msk [vmem:[#allocation3] sm:$0xff] %vm2084_vm3, %v2058_v60  ;;  %v2060_v18 = vpop.permute.xlu1 %2059  ;;  %vm2737_vm3 = vcmask 719872  }
 0x384   : > { %v2071_v58 = vsel %vm2000_vm11, %v2058_v60, %v2060_v18 }
 0x38a   : > { %v2093_v36 = vld [vmem:[#allocation3] sm:$0xff] }
 0x3cd   : > { %v1912_v45 = vpop.f32.mrb[4].mxu1 }
 0x3ce   : > { %v1913_v5 = vadd.f32 %v1912_v45, %v7996_v40  ;;  %v1914_v62 = vpop.f32.mrb[5].mxu1 }
 0x3cf   : > { %v1915_v16 = vadd.f32 %v1914_v62, %v7996_v40  ;;  %v1916_v47 = vpop.f32.mrb[6].mxu1 }
 0x3d0   : > { %v2045_v48 = vadd.f32 %v2019_v57, %v1913_v5  ;;  %v1917_v17 = vpop.f32.mrb[7].mxu1 }
 0x3d1   : > { %v2046_v35 = vadd.f32 %v2023_v12, %v1915_v16 }
 0x3d2   : > { %2061 = vrot.lane.b32.xlu0 %v2045_v48, %s6851_s10 }
 0x3d3   : > { %2063 = vrot.lane.b32.xlu1 %v2046_v35, %s6851_s10 }
 0x3d9   : > { %v1953_v63 = vpop.f32.mrb[0].mxu0 }
 0x3da   : > { %v1954_v20 = vadd.f32 %v1953_v63, %v7996_v40  ;;  %v1955_v55 = vpop.f32.mrb[1].mxu0 }
 0x3db   : > { %v1956_v38 = vadd.f32 %v1955_v55, %v7996_v40  ;;  %v1957_v50 = vpop.f32.mrb[2].mxu0 }
 0x3dc   : > { %v2047_v56 = vadd.f32 %v2027_v51, %v1954_v20  ;;  %v1958_v23 = vpop.f32.mrb[3].mxu0 }
 0x3dd   : > { %v2048_v53 = vadd.f32 %v2031_v19, %v1956_v38 }
 0x3de   : > { %2065 = vrot.lane.b32.xlu0 %v2047_v56, %s6851_s10 }
 0x3df   : > { %2067 = vrot.lane.b32.xlu1 %v2048_v53, %s6851_s10 }
 0x3e3   : > { %2107 = vrot.lane.b32.xlu1 %v2093_v36, %s8963_s16 }
 0x3e7   : > { %2109 = vrot.lane.b32.xlu1 %v2071_v58, %s8963_s16 }
 0x3e9   : > { %v1994_v1 = vpop.f32.mrb[8].mxu1 }
 0x3ea   : > { %v1995_v29 = vadd.f32 %v1994_v1, %v7996_v40  ;;  %v5932_v41 = vpop.f32.mrb[9].mxu1 }
 0x3eb   : > { %v1997_v2 = vpop.f32.mrb[10].mxu1  ;;  %2143 = vrot.lane.b32.xlu1 %v2071_v58, %s8964_s1  ;;  %v2350_v41 = vld [vmem:[#allocation20 + $0x28] sm:$0xff] }
 0x3ec   : > { %v2049_v4 = vadd.f32 %v2035_v59, %v1995_v29  ;;  %v5933_v46 = vpop.f32.mrb[11].mxu1  ;;  %v2345_v59 = vld [vmem:[#allocation20] sm:$0xff]  ;;  %v2347_v29 = vld [vmem:[#allocation20 + $0x10] sm:$0xff]  ;;  %v2352_v2 = vld [vmem:[#allocation20 + $0x38] sm:$0xff] }
 0x3ed   : > { %v5938_v46 = vpack.c.bf16 %v2352_v2, %v2350_v41  ;;  %v2386_v41 = vld [vmem:[#allocation20 + $0x148] sm:$0xff]  ;;  %v2388_v2 = vld [vmem:[#allocation20 + $0x158] sm:$0xff] }
 0x3ee   : > { %2069 = vrot.lane.b32.xlu0 %v2049_v4, %s6851_s10  ;;  %v5936_v4 = vpack.c.bf16 %v2347_v29, %v2345_v59  ;;  %v2383_v29 = vld [vmem:[#allocation20 + $0x130] sm:$0xff]  ;;  %s8804_s10 = smov 114  }
 0x444   : > { %v2062_v3 = vpop.permute.xlu0 %2061 }
 0x445   : > { %v2064_v10 = vpop.permute.xlu1 %2063  ;;  %v2072_v24 = vsel %vm2000_vm11, %v2060_v18, %v2062_v3 }
 0x446   : > { %v2073_v49 = vsel %vm2000_vm11, %v2062_v3, %v2064_v10  ;;  %v2349_v3 = vld [vmem:[#allocation20 + $0x20] sm:$0xff] }
 0x447   : > { %2113 = vrot.lane.b32.xlu1 %v2073_v49, %s8963_s16 }
 0x44b   : > { %2147 = vrot.lane.b32.xlu1 %v2073_v49, %s8964_s1 }
 0x44f   : > { %2141 = vrot.lane.b32.xlu1 %v2093_v36, %s8964_s1 }
 0x450   : > { %v2066_v14 = vpop.permute.xlu0 %2065 }
 0x451   : > { %v2068_v22 = vpop.permute.xlu1 %2067  ;;  %v2074_v21 = vsel %vm2000_vm11, %v2064_v10, %v2066_v14  ;;  %v2351_v10 = vld [vmem:[#allocation20 + $0x30] sm:$0xff] }
 0x452   : > { %v8036_v7 = vsel %vm2000_vm11, %v2066_v14, %v2068_v22  ;;  %v2356_v14 = vld [vmem:[#allocation20 + $0x58] sm:$0xff] }
 0x453   : > { %2117 = vrot.lane.b32.xlu0 %v8036_v7, %s8963_s16 }
 0x455   : > { %v2108_v26 = vpop.permute.xlu1 %2107 }
 0x457   : > { %2111 = vrot.lane.b32.xlu0 %v2072_v24, %s8963_s16 }
 0x459   : > { %v2110_v40 = vpop.permute.xlu1 %2109 }
 0x45a   : > { %v2121_v61 = vsel %vm464_vm2, %v2108_v26, %v2110_v40 }
 0x45b   : > { %2145 = vrot.lane.b32.xlu0 %v2072_v24, %s8964_s1  ;;  %v2134_v31 = vmax.f32 %v2093_v36, %v2121_v61 }
 0x45d   : > { %v2144_v27 = vpop.permute.xlu1 %2143 }
 0x45f   : > { %2115 = vrot.lane.b32.xlu0 %v2074_v21, %s8963_s16 }
 0x460   : > { %v2070_v54 = vpop.permute.xlu0 %2069 }
 0x461   : > { %v2076_v25 = vsel %vm2000_vm11, %v2068_v22, %v2070_v54  ;;  %v5940_v22 = vpack.c.bf16 %v2351_v10, %v2349_v3  ;;  %v2358_v54 = vld [vmem:[#allocation20 + $0x68] sm:$0xff]  ;;  %v2385_v3 = vld [vmem:[#allocation20 + $0x140] sm:$0xff]  ;;  %v2387_v10 = vld [vmem:[#allocation20 + $0x150] sm:$0xff] }
 0x462   : > { %2092 = vst.msk [vmem:[#allocation3 + $0x30] sm:$0xff] %vm2091_vm12, %v2076_v25  ;;  %v2360_v25 = vld [vmem:[#allocation20 + $0x78] sm:$0xff] }
 0x463   : > { %2149 = vrot.lane.b32.xlu0 %v2074_v21, %s8964_s1  ;;  %v5946_v26 = vpack.c.bf16 %v2360_v25, %v2358_v54  ;;  %v2394_v54 = vld [vmem:[#allocation20 + $0x188] sm:$0xff]  ;;  %v2396_v25 = vld [vmem:[#allocation20 + $0x198] sm:$0xff] }
 0x467   : > { %2151 = vrot.lane.b32.xlu0 %v8036_v7, %s8964_s1 }
 0x469   : > { %v2099_v9 = vld [vmem:[#allocation3 + $0x30] sm:$0xff] }
 0x46a   : > { %2119 = vrot.lane.b32.xlu1 %v2099_v9, %s8963_s16 }
 0x46b   : > { %2153 = vrot.lane.b32.xlu0 %v2099_v9, %s8964_s1 }
 0x4b9   : > { %v2114_v28 = vpop.permute.xlu1 %2113 }
 0x4bd   : > { %v2148_v30 = vpop.permute.xlu1 %2147 }
 0x4c1   : > { %v2142_v0 = vpop.permute.xlu1 %2141 }
 0x4c2   : > { %v2155_v34 = vsel %vm511_vm0, %v2142_v0, %v2144_v27  ;;  %v2361_v0 = vld [vmem:[#allocation20 + $0x80] sm:$0xff] }
 0x4c3   : > { %v8054_v6 = vmax.f32 %v2134_v31, %v2155_v34  ;;  %v2363_v34 = vld [vmem:[#allocation20 + $0x90] sm:$0xff] }
 0x4c5   : > { %v2118_v37 = vpop.permute.xlu0 %2117  ;;  %2197 = vrot.lane.b32.xlu0 %v8054_v6, %s8965_s22 }
 0x4c9   : > { %v2112_v39 = vpop.permute.xlu0 %2111 }
 0x4ca   : > { %v2122_v8 = vsel %vm464_vm2, %v2110_v40, %v2112_v39  ;;  %v2123_v32 = vsel %vm464_vm2, %v2112_v39, %v2114_v28  ;;  %v2357_v40 = vld [vmem:[#allocation20 + $0x60] sm:$0xff]  ;;  %v2368_v39 = vld [vmem:[#allocation20 + $0xb8] sm:$0xff] }
 0x4cb   : > { %v2135_v60 = vmax.f32 %v2071_v58, %v2122_v8  ;;  %v2136_v43 = vmax.f32 %v2072_v24, %v2123_v32  ;;  %v2346_v58 = vld [vmem:[#allocation20 + $0x8] sm:$0xff]  ;;  %v2353_v24 = vld [vmem:[#allocation20 + $0x40] sm:$0xff]  ;;  %v5952_v8 = vpack.c.bf16 %v2363_v34, %v2361_v0  ;;  %v2399_v34 = vld [vmem:[#allocation20 + $0x1b0] sm:$0xff] }
 0x4cc   : > { %v5934_v1 = vpack.c.bf16 %v2348_v42, %v2346_v58  ;;  %v2384_v58 = vld [vmem:[#allocation20 + $0x138] sm:$0xff]  ;;  %v2397_v0 = vld [vmem:[#allocation20 + $0x1a0] sm:$0xff] }
 0x4cd   : > { %v2146_v44 = vpop.permute.xlu0 %2145 }
 0x4ce   : > { %v2156_v57 = vsel %vm511_vm0, %v2144_v27, %v2146_v44  ;;  %v2157_v45 = vsel %vm511_vm0, %v2146_v44, %v2148_v30  ;;  %5935 = vmatprep.subr.bf16.mxu0 %v5934_v1  ;;  %v2359_v27 = vld [vmem:[#allocation20 + $0x70] sm:$0xff]  ;;  %v2370_v44 = vld [vmem:[#allocation20 + $0xc8] sm:$0xff]  ;;  %v2381_v1 = vld [vmem:[#allocation20 + $0x120] sm:$0xff] }
 0x4cf   : > { %v8062_v12 = vmax.f32 %v2135_v60, %v2156_v57  ;;  %v8064_v5 = vmax.f32 %v2136_v43, %v2157_v45  ;;  %5937 = vmatpush1.bf16.msra.mxu0 %v5936_v4  ;;  %v5948_v61 = vpack.c.bf16 %v2359_v27, %v2357_v40  ;;  %v2365_v60 = vld [vmem:[#allocation20 + $0xa0] sm:$0xff]  ;;  %v2367_v43 = vld [vmem:[#allocation20 + $0xb0] sm:$0xff]  ;;  %v2372_v57 = vld [vmem:[#allocation20 + $0xd8] sm:$0xff]  ;;  %v5972_v4 = vpack.c.bf16 %v2383_v29, %v2381_v1 }
 0x4d0   : > { %5939 = vmatprep.subr.bf16.mxu0 %v5938_v46  ;;  %v5956_v45 = vpack.c.bf16 %v2367_v43, %v2365_v60  ;;  %v5974_v46 = vpack.c.bf16 %v2388_v2, %v2386_v41  ;;  %v2393_v40 = vld [vmem:[#allocation20 + $0x180] sm:$0xff]  ;;  %v2395_v27 = vld [vmem:[#allocation20 + $0x190] sm:$0xff]  ;;  %v2402_v43 = vld [vmem:[#allocation20 + $0x1c8] sm:$0xff] }
 0x4d1   : > { %v2116_v62 = vpop.permute.xlu0 %2115  ;;  %2233 = vrot.lane.b32.xlu0 %v8062_v12, %s8966_s24  ;;  %2199 = vrot.lane.b32.xlu1 %v8062_v12, %s8965_s22 }
 0x4d2   : > { %v2124_v16 = vsel %vm464_vm2, %v2114_v28, %v2116_v62  ;;  %v2125_v17 = vsel %vm464_vm2, %v2116_v62, %v2118_v37  ;;  %v2362_v28 = vld [vmem:[#allocation20 + $0x88] sm:$0xff]  ;;  %v5958_v62 = vpack.c.bf16 %v2372_v57, %v2370_v44  ;;  %v2404_v44 = vld [vmem:[#allocation20 + $0x1d8] sm:$0xff] }
 0x4d3   : > { %v2137_v47 = vmax.f32 %v2073_v49, %v2124_v16  ;;  %v2138_v52 = vmax.f32 %v2074_v21, %v2125_v17  ;;  %v2354_v49 = vld [vmem:[#allocation20 + $0x48] sm:$0xff]  ;;  %v2355_v21 = vld [vmem:[#allocation20 + $0x50] sm:$0xff]  ;;  %5941 = vmatpush1.bf16.msra.mxu0 %v5940_v22  ;;  %v2369_v16 = vld [vmem:[#allocation20 + $0xc0] sm:$0xff]  ;;  %v5976_v22 = vpack.c.bf16 %v2387_v10, %v2385_v3 }
 0x4d4   : > { %v2376_v17 = vld [vmem:[#allocation20 + $0xf8] sm:$0xff] }
 0x4d5   : > { %v2150_v48 = vpop.permute.xlu0 %2149  ;;  %2201 = vrot.lane.b32.xlu0 %v8064_v5, %s8965_s22 }
 0x4d6   : > { %v2158_v35 = vsel %vm511_vm0, %v2148_v30, %v2150_v48  ;;  %v2364_v30 = vld [vmem:[#allocation20 + $0x98] sm:$0xff] }
 0x4d7   : > { %v8075_v13 = vmax.f32 %v2137_v47, %v2158_v35  ;;  %v5950_v31 = vpack.c.bf16 %v2364_v30, %v2362_v28  ;;  %v2371_v47 = vld [vmem:[#allocation20 + $0xd0] sm:$0xff]  ;;  %v2398_v28 = vld [vmem:[#allocation20 + $0x1a8] sm:$0xff]  ;;  %v2400_v30 = vld [vmem:[#allocation20 + $0x1b8] sm:$0xff] }
 0x4d8   : > { %v5960_v35 = vpack.c.bf16 %v2371_v47, %v2369_v16  ;;  %v2401_v16 = vld [vmem:[#allocation20 + $0x1c0] sm:$0xff]  ;;  %v2403_v47 = vld [vmem:[#allocation20 + $0x1d0] sm:$0xff] }
 0x4d9   : > { %v2152_v51 = vpop.permute.xlu0 %2151  ;;  %2237 = vrot.lane.b32.xlu0 %v8075_v13, %s8966_s24  ;;  %2203 = vrot.lane.b32.xlu1 %v8075_v13, %s8965_s22 }
 0x4da   : > { %v2159_v63 = vsel %vm511_vm0, %v2150_v48, %v2152_v51  ;;  %v2374_v48 = vld [vmem:[#allocation20 + $0xe8] sm:$0xff] }
 0x4db   : > { %v8082_v19 = vmax.f32 %v2138_v52, %v2159_v63  ;;  %v5962_v52 = vpack.c.bf16 %v2376_v17, %v2374_v48  ;;  %v2375_v63 = vld [vmem:[#allocation20 + $0xf0] sm:$0xff]  ;;  %v5992_v48 = vpack.c.bf16 %v2403_v47, %v2401_v16  ;;  %v2406_v17 = vld [vmem:[#allocation20 + $0x1e8] sm:$0xff] }
 0x4dc   : > { %v2120_v20 = vpop.permute.xlu1 %2119  ;;  %v2411_v16 = vld [vmem:[#allocation20 + $0x210] sm:$0xff] }
 0x4dd   : > { %v2126_v55 = vsel %vm464_vm2, %v2118_v37, %v2120_v20  ;;  %v2140_v38 = vmax.f32 %v2099_v9, %v2120_v20  ;;  %v2154_v50 = vpop.permute.xlu0 %2153  ;;  %2239 = vrot.lane.b32.xlu0 %v8082_v19, %s8966_s24  ;;  %2205 = vrot.lane.b32.xlu1 %v8082_v19, %s8965_s22  ;;  %v5944_v9 = vpack.c.bf16 %v2355_v21, %v2353_v24  ;;  %v2366_v37 = vld [vmem:[#allocation20 + $0xa8] sm:$0xff]  ;;  %v2389_v24 = vld [vmem:[#allocation20 + $0x160] sm:$0xff]  ;;  %v2391_v21 = vld [vmem:[#allocation20 + $0x170] sm:$0xff] }
 0x4de   : > { %v2139_v56 = vmax.f32 %v8036_v7, %v2126_v55  ;;  %v2160_v23 = vsel %vm511_vm0, %v2152_v51, %v2154_v50  ;;  %v5942_v7 = vpack.c.bf16 %v2356_v14, %v2354_v49  ;;  %v5954_v32 = vpack.c.bf16 %v2368_v39, %v2366_v37  ;;  %v2373_v51 = vld [vmem:[#allocation20 + $0xe0] sm:$0xff]  ;;  %v2378_v20 = vld [vmem:[#allocation20 + $0x108] sm:$0xff]  ;;  %v2380_v55 = vld [vmem:[#allocation20 + $0x118] sm:$0xff] }
 0x4df   : > { %v2174_v53 = vmax.f32 %v2140_v38, %v2154_v50  ;;  %v5964_v38 = vpack.c.bf16 %v2375_v63, %v2373_v51  ;;  %v5966_v50 = vpack.c.bf16 %v2380_v55, %v2378_v20  ;;  %v2390_v49 = vld [vmem:[#allocation20 + $0x168] sm:$0xff]  ;;  %v2392_v14 = vld [vmem:[#allocation20 + $0x178] sm:$0xff]  ;;  %v5988_v37 = vpack.c.bf16 %v2399_v34, %v2397_v0  ;;  %v2405_v20 = vld [vmem:[#allocation20 + $0x1e0] sm:$0xff] }
 0x4e0   : > { %v8091_v36 = vmax.f32 %v2139_v56, %v2160_v23  ;;  %5943 = vmatprep.subr.bf16.mxu0 %v5942_v7  ;;  %v2377_v56 = vld [vmem:[#allocation20 + $0x100] sm:$0xff]  ;;  %v2379_v23 = vld [vmem:[#allocation20 + $0x110] sm:$0xff]  ;;  %v5978_v7 = vpack.c.bf16 %v2392_v14, %v2390_v49 }
 0x4e1   : > { %2182 = vst.msk [vmem:[#allocation4 + $0x30] sm:$0xff] %vm2181_vm6, %v2174_v53  ;;  %2235 = vrot.lane.b32.xlu1 %v8064_v5, %s8966_s24  ;;  %5945 = vmatpush1.bf16.msra.mxu0 %v5944_v9  ;;  %v2382_v53 = vld [vmem:[#allocation20 + $0x128] sm:$0xff]  ;;  %v5968_v42 = vpack.c.bf16 %v2379_v23, %v2377_v56  ;;  %v5980_v9 = vpack.c.bf16 %v2391_v21, %v2389_v24  ;;  %v2407_v55 = vld [vmem:[#allocation20 + $0x1f0] sm:$0xff]  ;;  %vm2757_vm6 = vcmask 15364  }
 0x4e2   : > { %5947 = vmatprep.subr.bf16.mxu0 %v5946_v26  ;;  %v5970_v59 = vpack.c.bf16 %v2384_v58, %v2382_v53  ;;  %v5982_v26 = vpack.c.bf16 %v2396_v25, %v2394_v54  ;;  %v5996_v23 = vpack.c.bf16 %v2407_v55, %v2405_v20 }
 0x4e5   : > { %2231 = vrot.lane.b32.xlu1 %v8054_v6, %s8966_s24  ;;  %5949 = vmatpush1.bf16.msra.mxu0 %v5948_v61  ;;  %v5984_v61 = vpack.c.bf16 %v2395_v27, %v2393_v40 }
 0x4e6   : > { %5951 = vmatprep.subr.bf16.mxu0 %v5950_v31  ;;  %v5986_v31 = vpack.c.bf16 %v2400_v30, %v2398_v28 }
 0x4e8   : > { %v8097_v18 = vld [vmem:[#allocation4 + $0x30] sm:$0xff] }
 0x4e9   : > { %2209 = vrot.lane.b32.xlu0 %v8097_v18, %s8965_s22  ;;  %2207 = vrot.lane.b32.xlu1 %v8091_v36, %s8965_s22  ;;  %s8806_s22 = smov 115  }
 0x4ea   : > { %5953 = vmatpush1.bf16.msra.mxu0 %v5952_v8 }
 0x4eb   : > { %5955 = vmatprep.subr.bf16.mxu0 %v5954_v32 }
 0x4ed   : > { %2243 = vrot.lane.b32.xlu0 %v8097_v18, %s8966_s24  ;;  %2241 = vrot.lane.b32.xlu1 %v8091_v36, %s8966_s24  ;;  %s8843_s24 = smov 91  }
 0x4ee   : > { %5957 = vmatpush1.bf16.msra.mxu0 %v5956_v45 }
 0x4ef   : > { %5959 = vmatprep.subr.bf16.mxu0 %v5958_v62  ;;  %v5990_v62 = vpack.c.bf16 %v2404_v44, %v2402_v43 }
 0x4f2   : > { %5961 = vmatpush1.bf16.msra.mxu0 %v5960_v35  ;;  %v2408_v35 = vld [vmem:[#allocation20 + $0x1f8] sm:$0xff] }
 0x4f3   : > { %5963 = vmatprep.subr.bf16.mxu0 %v5962_v52  ;;  %v5994_v63 = vpack.c.bf16 %v2408_v35, %v2406_v17  ;;  %v2414_v35 = vld [vmem:[#allocation20 + $0x228] sm:$0xff] }
 0x4f6   : > { %5965 = vmatpush1.bf16.msra.mxu0 %v5964_v38 }
 0x4f7   : > { %5967 = vmatprep.subr.bf16.mxu0 %v5966_v50 }
 0x4fa   : > { %5969 = vmatpush1.bf16.msra.mxu0 %v5968_v42  ;;  %v2410_v42 = vld [vmem:[#allocation20 + $0x208] sm:$0xff] }
 0x4fb   : > { %5971 = vmatprep.subr.bf16.mxu0 %v5970_v59  ;;  %v2412_v59 = vld [vmem:[#allocation20 + $0x218] sm:$0xff] }
 0x4fe   : > { %5973 = vmatpush1.bf16.msra.mxu0 %v5972_v4  ;;  %v5998_v4 = vpack.c.bf16 %v2412_v59, %v2410_v42 }
 0x4ff   : > { %5975 = vmatprep.subr.bf16.mxu0 %v5974_v46 }
 0x502   : > { %5977 = vmatpush1.bf16.msra.mxu0 %v5976_v22 }
 0x503   : > { %5979 = vmatprep.subr.bf16.mxu0 %v5978_v7 }
 0x506   : > { %5981 = vmatpush1.bf16.msra.mxu0 %v5980_v9 }
 0x507   : > { %5983 = vmatprep.subr.bf16.mxu0 %v5982_v26 }
 0x50a   : > { %5985 = vmatpush1.bf16.msra.mxu0 %v5984_v61 }
 0x50b   : > { %5987 = vmatprep.subr.bf16.mxu0 %v5986_v31 }
 0x50e   : > { %5989 = vmatpush1.bf16.msra.mxu0 %v5988_v37 }
 0x50f   : > { %5991 = vmatprep.subr.bf16.mxu0 %v5990_v62  ;;  %v2409_v62 = vld [vmem:[#allocation20 + $0x200] sm:$0xff] }
 0x512   : > { %5993 = vmatpush1.bf16.msra.mxu0 %v5992_v48 }
 0x513   : > { %5995 = vmatprep.subr.bf16.mxu0 %v5994_v63 }
 0x516   : > { %5997 = vmatpush1.bf16.msra.mxu0 %v5996_v23  ;;  %v2415_v23 = vld [vmem:[#allocation20 + $0x230] sm:$0xff] }
 0x517   : > { %5999 = vmatprep.subr.bf16.mxu0 %v5998_v4 }
 0x537   : > { %v2198_v39 = vpop.permute.xlu0 %2197 }
 0x543   : > { %v2234_v8 = vpop.permute.xlu0 %2233  ;;  %v2200_v32 = vpop.permute.xlu1 %2199 }
 0x544   : > { %v2211_v46 = vsel %vm558_vm1, %v2198_v39, %v2200_v32 }
 0x545   : > { %v2224_v14 = vmax.f32 %v8054_v6, %v2211_v46 }
 0x547   : > { %v2202_v60 = vpop.permute.xlu0 %2201 }
 0x548   : > { %v2212_v38 = vsel %vm558_vm1, %v2200_v32, %v2202_v60 }
 0x549   : > { %v2225_v1 = vmax.f32 %v8062_v12, %v2212_v38  ;;  %v6000_v38 = vpack.c.bf16 %v2411_v16, %v2409_v62  ;;  %v2436_v62 = vld [vmem:[#allocation20 + $0x2d8] sm:$0xff] }
 0x54b   : > { %v2204_v57 = vpop.permute.xlu1 %2203  ;;  %v2238_v45 = vpop.permute.xlu0 %2237 }
 0x54c   : > { %v2213_v50 = vsel %vm558_vm1, %v2202_v60, %v2204_v57 }
 0x54d   : > { %v2226_v29 = vmax.f32 %v8064_v5, %v2213_v50  ;;  %v2413_v50 = vld [vmem:[#allocation20 + $0x220] sm:$0xff] }
 0x54f   : > { %v2206_v52 = vpop.permute.xlu1 %2205  ;;  %v2240_v51 = vpop.permute.xlu0 %2239 }
 0x550   : > { %v2214_v56 = vsel %vm558_vm1, %v2204_v57, %v2206_v52  ;;  %v2248_v58 = vsel %vm697_vm5, %v2238_v45, %v2240_v51 }
 0x551   : > { %v2227_v53 = vmax.f32 %v8075_v13, %v2214_v56 }
 0x553   : > { %v8114_v41 = vmax.f32 %v2227_v53, %v2248_v58  ;;  %v2236_v2 = vpop.permute.xlu1 %2235  ;;  %v2418_v53 = vld [vmem:[#allocation20 + $0x248] sm:$0xff]  ;;  %v2420_v58 = vld [vmem:[#allocation20 + $0x258] sm:$0xff] }
 0x554   : > { %v2246_v3 = vsel %vm697_vm5, %v2234_v8, %v2236_v2  ;;  %v2247_v13 = vsel %vm697_vm5, %v2236_v2, %v2238_v45 }
 0x555   : > { %v2259_v10 = vmax.f32 %v2225_v1, %v2246_v3  ;;  %v8119_v49 = vmax.f32 %v2226_v29, %v2247_v13  ;;  %v6004_v1 = vpack.c.bf16 %v2415_v23, %v2413_v50  ;;  %v6006_v29 = vpack.c.bf16 %v2420_v58, %v2418_v53  ;;  %v2417_v13 = vld [vmem:[#allocation20 + $0x240] sm:$0xff]  ;;  %v2444_v50 = vld [vmem:[#allocation20 + $0x318] sm:$0xff]  ;;  %v2443_v58 = vld [vmem:[#allocation20 + $0x310] sm:$0xff] }
 0x556   : > { %v2441_v53 = vld [vmem:[#allocation20 + $0x300] sm:$0xff] }
 0x557   : > { %v2232_v22 = vpop.permute.xlu1 %2231  ;;  %v6281_v12 = vpack.i.bf16 %v8119_v49, %v2259_v10  ;;  %v6286_v54 = vpack.i.bf16 %v8114_v41, %v8119_v49 }
 0x558   : > { %v2245_v5 = vsel %vm697_vm5, %v2232_v22, %v2234_v8  ;;  %v2424_v22 = vld [vmem:[#allocation20 + $0x278] sm:$0xff] }
 0x559   : > { %v2258_v7 = vmax.f32 %v2224_v14, %v2245_v5  ;;  %6282 = vrot.lane.b32.xlu1 %v6281_v12, %s8898_s25  ;;  %v2422_v14 = vld [vmem:[#allocation20 + $0x268] sm:$0xff] }
 0x55b   : > { %v2210_v24 = vpop.permute.xlu0 %2209  ;;  %2265 = vst [vmem:[#allocation3] sm:$0xff] %v2258_v7  ;;  %v2208_v21 = vpop.permute.xlu1 %2207  ;;  %2285 = vrot.lane.b32.xlu0 %v2258_v7, %s8898_s25 }
 0x55c   : > { %v2215_v25 = vsel %vm558_vm1, %v2206_v52, %v2208_v21  ;;  %v2216_v6 = vsel %vm558_vm1, %v2208_v21, %v2210_v24  ;;  %v2230_v9 = vmax.f32 %v8097_v18, %v2210_v24  ;;  %v2416_v52 = vld [vmem:[#allocation20 + $0x238] sm:$0xff]  ;;  %vm8967_vm1 = vcmask 457728  }
 0x55d   : > { %6287 = vrot.lane.b32.xlu1 %v6286_v54, %s8905_s17  ;;  %v2228_v40 = vmax.f32 %v8082_v19, %v2215_v25  ;;  %v2229_v27 = vmax.f32 %v8091_v36, %v2216_v6  ;;  %v6002_v56 = vpack.c.bf16 %v2416_v52, %v2414_v35  ;;  %vm8969_vm7 = vmmov %vm8967_vm1  ;;  %v2438_v35 = vld [vmem:[#allocation20 + $0x2e8] sm:$0xff]  ;;  %v2440_v52 = vld [vmem:[#allocation20 + $0x2f8] sm:$0xff] }
 0x55e   : > { %vm8970_vm4 = vmmov %vm8967_vm1 }
 0x55f   : > { %v2244_v26 = vpop.permute.xlu0 %2243  ;;  %v2242_v28 = vpop.permute.xlu1 %2241  ;;  %2316 = vrot.lane.b32.xlu0 %v2259_v10, %s8905_s17  ;;  %vm8971_vm15 = vmmov %vm8967_vm1 }
 0x560   : > { %v2264_v30 = vmax.f32 %v2230_v9, %v2244_v26  ;;  %v2249_v61 = vsel %vm697_vm5, %v2240_v51, %v2242_v28  ;;  %v2250_v31 = vsel %vm697_vm5, %v2242_v28, %v2244_v26  ;;  %vm8968_vm5 = vmmov %vm8967_vm1  ;;  %v2423_v28 = vld [vmem:[#allocation20 + $0x270] sm:$0xff] }
 0x561   : > { %v8137_v0 = vmax.f32 %v2228_v40, %v2249_v61  ;;  %v8139_v34 = vmax.f32 %v2229_v27, %v2250_v31  ;;  %v6010_v40 = vpack.c.bf16 %v2424_v22, %v2422_v14  ;;  %v2421_v27 = vld [vmem:[#allocation20 + $0x260] sm:$0xff]  ;;  %v2428_v31 = vld [vmem:[#allocation20 + $0x298] sm:$0xff]  ;;  %v2451_v22 = vld [vmem:[#allocation20 + $0x350] sm:$0xff] }
 0x562   : > { %2272 = vst.msk [vmem:[#allocation3 + $0x30] sm:$0xff] %vm2271_vm8, %v2264_v30  ;;  %v2449_v14 = vld [vmem:[#allocation20 + $0x340] sm:$0xff]  ;;  %vm8182_vm8 = vmor %vm2757_vm6, %vm8830_vm14  ;;  %vm8821_vm6 = vcmask 736256  }
 0x563   : > { %v6291_v18 = vpack.i.bf16 %v8137_v0, %v8114_v41  ;;  %v6296_v19 = vpack.i.bf16 %v8139_v34, %v8137_v0 }
 0x565   : > { %6292 = vrot.lane.b32.xlu1 %v6291_v18, %s8898_s25  ;;  %6297 = vrot.lane.b32.xlu0 %v6296_v19, %s8905_s17 }
 0x569   : > { %2295 = vrot.lane.b32.xlu1 %v8139_v34, %s8898_s25  ;;  %v2314_v36 = vld [vmem:[#allocation3 + $0x30] sm:$0xff]  ;;  %s8798_s25 = smov 121  }
 0x56a   : > { %2326 = vrot.lane.b32.xlu0 %v2314_v36, %s8905_s17  ;;  %v6012_v36 = vpack.c.bf16 %v2423_v28, %v2421_v27  ;;  %v2457_v28 = vld [vmem:[#allocation20 + $0x380] sm:$0xff] }
 0x5cb   : > { %v6283_v37 = vpop.permute.xlu1 %6282 }
 0x5cc   : > { %v6285_v39 = vunpack.i.h.bf16 %v6283_v37  ;;  %v6284_v8 = vunpack.i.l.bf16 %v6283_v37 }
 0x5cd   : > { %v2286_v32 = vpop.permute.xlu0 %2285 }
 0x5ce   : > { %v2297_v60 = vsel %vm837_vm9, %v2286_v32, %v6284_v8  ;;  %v2298_v43 = vsel %vm837_vm9, %v6284_v8, %v6285_v39  ;;  %v2427_v8 = vld [vmem:[#allocation20 + $0x290] sm:$0xff]  ;;  %v2430_v32 = vld [vmem:[#allocation20 + $0x2a8] sm:$0xff] }
 0x5cf   : > { %v6288_v44 = vpop.permute.xlu1 %6287  ;;  %v2308_v47 = vmax.f32 %v2258_v7, %v2297_v60  ;;  %v2309_v17 = vmax.f32 %v2259_v10, %v2298_v43  ;;  %v2419_v10 = vld [vmem:[#allocation20 + $0x250] sm:$0xff]  ;;  %v2432_v60 = vld [vmem:[#allocation20 + $0x2b8] sm:$0xff] }
 0x5d0   : > { %v6290_v57 = vunpack.i.h.bf16 %v6288_v44  ;;  %v6289_v45 = vunpack.i.l.bf16 %v6288_v44  ;;  %v6008_v21 = vpack.c.bf16 %v2419_v10, %v2417_v13  ;;  %v6018_v43 = vpack.c.bf16 %v2432_v60, %v2430_v32  ;;  %v2429_v44 = vld [vmem:[#allocation20 + $0x2a0] sm:$0xff] }
 0x5d1   : > { %v2317_v48 = vpop.permute.xlu0 %2316 }
 0x5d2   : > { %v2328_v51 = vsel %vm8967_vm1, %v2317_v48, %v6289_v45  ;;  %v2329_v63 = vsel %vm8968_vm5, %v6289_v45, %v6290_v57  ;;  %v2434_v45 = vld [vmem:[#allocation20 + $0x2c8] sm:$0xff]  ;;  %v2433_v48 = vld [vmem:[#allocation20 + $0x2c0] sm:$0xff]  ;;  %vm2804_vm1 = vcmask 998400   ;;  %vm2836_vm5 = vcmask 982016  }
 0x5d3   : > { %v2339_v20 = vmax.f32 %v2308_v47, %v2328_v51  ;;  %v2340_v55 = vmax.f32 %v2309_v17, %v2329_v63  ;;  %v6022_v47 = vpack.c.bf16 %v2436_v62, %v2434_v45  ;;  %v2435_v17 = vld [vmem:[#allocation20 + $0x2d0] sm:$0xff]  ;;  %v6026_v63 = vpack.c.bf16 %v2440_v52, %v2438_v35 }
 0x5d4   : > { %v6024_v51 = vpack.c.bf16 %v2435_v17, %v2433_v48  ;;  %v2474_v48 = vld [vmem:[#allocation20 + $0x408] sm:$0xff]  ;;  %v2476_v17 = vld [vmem:[#allocation20 + $0x418] sm:$0xff] }
 0x5d5   : > { %2587 = vmatprep.mubr.f32.mxu0 %v2340_v55  ;;  %v2439_v55 = vld [vmem:[#allocation20 + $0x2f0] sm:$0xff]  ;;  %v6062_v52 = vpack.c.bf16 %v2476_v17, %v2474_v48  ;;  %v2509_v48 = vld [vmem:[#allocation20 + $0x520] sm:$0xff] }
 0x5d6   : > { %2588 = vmatmul.mubr.f32.vlgmr.msra.gmra.mrb[4].mxu0 %v2339_v20  ;;  %v2437_v20 = vld [vmem:[#allocation20 + $0x2e0] sm:$0xff]  ;;  %v2511_v17 = vld [vmem:[#allocation20 + $0x530] sm:$0x7] }
 0x5d7   : > { %6001 = vmatpush1.bf16.msra.mxu0 %v6000_v38  ;;  %v6293_v42 = vpop.permute.xlu1 %6292  ;;  %v6298_v59 = vpop.permute.xlu0 %6297  ;;  %v2442_v38 = vld [vmem:[#allocation20 + $0x308] sm:$0xff] }
 0x5d8   : > { %v6295_v2 = vunpack.i.h.bf16 %v6293_v42  ;;  %v6294_v4 = vunpack.i.l.bf16 %v6293_v42  ;;  %v6300_v46 = vunpack.i.h.bf16 %v6298_v59  ;;  %v6299_v3 = vunpack.i.l.bf16 %v6298_v59  ;;  %6003 = vmatprep.subr.bf16.mxu0 %v6002_v56  ;;  %v2446_v42 = vld [vmem:[#allocation20 + $0x328] sm:$0xff]  ;;  %v2448_v59 = vld [vmem:[#allocation20 + $0x338] sm:$0xff] }
 0x5d9   : > { %v6028_v56 = vpack.c.bf16 %v2439_v55, %v2437_v20  ;;  %v6030_v23 = vpack.c.bf16 %v2444_v50, %v2442_v38  ;;  %v2478_v55 = vld [vmem:[#allocation20 + $0x428] sm:$0xff]  ;;  %v2480_v38 = vld [vmem:[#allocation20 + $0x438] sm:$0xff] }
 0x5da   : > { %v2299_v12 = vsel %vm837_vm9, %v6285_v39, %v6294_v4  ;;  %v2300_v5 = vsel %vm837_vm9, %v6294_v4, %v6295_v2  ;;  %v2330_v25 = vsel %vm8969_vm7, %v6290_v57, %v6299_v3  ;;  %v2331_v26 = vsel %vm8970_vm4, %v6299_v3, %v6300_v46  ;;  %v2425_v39 = vld [vmem:[#allocation20 + $0x280] sm:$0xff]  ;;  %v2431_v57 = vld [vmem:[#allocation20 + $0x2b0] sm:$0xff]  ;;  %v2452_v3 = vld [vmem:[#allocation20 + $0x358] sm:$0xff] }
 0x5db   : > { %v2310_v7 = vmax.f32 %v8119_v49, %v2299_v12  ;;  %6005 = vmatpush1.bf16.msra.mxu0 %v6004_v1  ;;  %v8157_v24 = vpop.permute.xlu1 %2295  ;;  %v2311_v54 = vmax.f32 %v8114_v41, %v2300_v5  ;;  %v2426_v41 = vld [vmem:[#allocation20 + $0x288] sm:$0xff]  ;;  %v6020_v16 = vpack.c.bf16 %v2431_v57, %v2429_v44  ;;  %v6032_v1 = vpack.c.bf16 %v2443_v58, %v2441_v53  ;;  %v2447_v4 = vld [vmem:[#allocation20 + $0x330] sm:$0xff]  ;;  %v2456_v5 = vld [vmem:[#allocation20 + $0x378] sm:$0xff] }
 0x5dc   : > { %v2301_v6 = vsel %vm837_vm9, %v6295_v2, %v8157_v24  ;;  %v8163_v9 = vpop.permute.xlu0 %2326  ;;  %6007 = vmatprep.subr.bf16.mxu0 %v6006_v29  ;;  %v6014_v37 = vpack.c.bf16 %v2428_v31, %v2426_v41  ;;  %v6034_v29 = vpack.c.bf16 %v2448_v59, %v2446_v42  ;;  %v2445_v2 = vld [vmem:[#allocation20 + $0x320] sm:$0xff]  ;;  %v2454_v12 = vld [vmem:[#allocation20 + $0x368] sm:$0xff]  ;;  %v2472_v57 = vld [vmem:[#allocation20 + $0x3f8] sm:$0xff]  ;;  %v2313_v20 = vmax.f32 %v8139_v34, %v8157_v24 }
 0x5dd   : > { %v2312_v49 = vmax.f32 %v8137_v0, %v2301_v6  ;;  %v2332_v30 = vsel %vm8971_vm15, %v6300_v46, %v8163_v9  ;;  %v2342_v61 = vmax.f32 %v2311_v54, %v2331_v26  ;;  %v8169_v18 = vmax.f32 %v2310_v7, %v2330_v25  ;;  %v2450_v46 = vld [vmem:[#allocation20 + $0x348] sm:$0xff]  ;;  %v2453_v54 = vld [vmem:[#allocation20 + $0x360] sm:$0xff]  ;;  %v2455_v25 = vld [vmem:[#allocation20 + $0x370] sm:$0xff] }
 0x5de   : > { %v6016_v0 = vpack.c.bf16 %v2427_v8, %v2425_v39  ;;  %v6036_v13 = vpack.c.bf16 %v2447_v4, %v2445_v2  ;;  %v6038_v10 = vpack.c.bf16 %v2452_v3, %v2450_v46  ;;  %v6040_v7 = vpack.c.bf16 %v2451_v22, %v2449_v14  ;;  %v2458_v6 = vld [vmem:[#allocation20 + $0x388] sm:$0xff]  ;;  %v2460_v26 = vld [vmem:[#allocation20 + $0x398] sm:$0xff]  ;;  %v2479_v53 = vld [vmem:[#allocation20 + $0x430] sm:$0xff] }
 0x5df   : > { %v8171_v19 = vmax.f32 %v2312_v49, %v2332_v30  ;;  %6009 = vmatpush1.bf16.msra.mxu0 %v6008_v21  ;;  %2658 = vmatprep.mubr.f32.mxu0 %v2342_v61  ;;  %v6042_v21 = vpack.c.bf16 %v2456_v5, %v2454_v12  ;;  %v6046_v27 = vpack.c.bf16 %v2460_v26, %v2458_v6  ;;  %v2459_v49 = vld [vmem:[#allocation20 + $0x390] sm:$0xff]  ;;  %v2462_v30 = vld [vmem:[#allocation20 + $0x3a8] sm:$0xff]  ;;  %v2464_v61 = vld [vmem:[#allocation20 + $0x3b8] sm:$0xff]  ;;  %vm2516_vm9 = vcmask 1042432  }
 0x5e0   : > { %6011 = vmatprep.subr.bf16.mxu0 %v6010_v40  ;;  %v6044_v40 = vpack.c.bf16 %v2455_v25, %v2453_v54  ;;  %v6048_v41 = vpack.c.bf16 %v2459_v49, %v2457_v28  ;;  %v6050_v31 = vpack.c.bf16 %v2464_v61, %v2462_v30  ;;  %v2466_v39 = vld [vmem:[#allocation20 + $0x3c8] sm:$0xff]  ;;  %v2468_v8 = vld [vmem:[#allocation20 + $0x3d8] sm:$0xff]  ;;  %v2344_v58 = vmax.f32 %v2313_v20, %v8163_v9  ;;  %v2481_v24 = vld [vmem:[#allocation20 + $0x440] sm:$0xff] }
 0x5e1   : > { %v6054_v60 = vpack.c.bf16 %v2468_v8, %v2466_v39  ;;  %v2470_v44 = vld [vmem:[#allocation20 + $0x3e8] sm:$0xff]  ;;  %v2484_v59 = vld [vmem:[#allocation20 + $0x458] sm:$0xff]  ;;  %v2487_v9 = vld [vmem:[#allocation20 + $0x470] sm:$0xff]  ;;  %vm8975_vm7 = vcmask 949248   ;;  %vm8852_vm4 = vcmask 932864   ;;  %vm8851_vm15 = vcmask 941056  }
 0x5e2   : > { %v6058_v62 = vpack.c.bf16 %v2472_v57, %v2470_v44  ;;  %v2482_v42 = vld [vmem:[#allocation20 + $0x448] sm:$0xff]  ;;  %v2488_v4 = vld [vmem:[#allocation20 + $0x478] sm:$0xff]  ;;  %v2489_v12 = vld [vmem:[#allocation20 + $0x480] sm:$0xff] }
 0x5e3   : > { %6013 = vmatpush1.bf16.msra.mxu0 %v6012_v36  ;;  %v2461_v36 = vld [vmem:[#allocation20 + $0x3a0] sm:$0xff]  ;;  %v6070_v34 = vpack.c.bf16 %v2484_v59, %v2482_v42  ;;  %v2486_v2 = vld [vmem:[#allocation20 + $0x468] sm:$0xff]  ;;  %v2492_v14 = vld [vmem:[#allocation20 + $0x498] sm:$0xff] }
 0x5e4   : > { %6015 = vmatprep.subr.bf16.mxu0 %v6014_v37  ;;  %v2463_v37 = vld [vmem:[#allocation20 + $0x3b0] sm:$0xff]  ;;  %v6074_v3 = vpack.c.bf16 %v2488_v4, %v2486_v2  ;;  %v2493_v6 = vld [vmem:[#allocation20 + $0x4a0] sm:$0xff] }
 0x5e5   : > { %v6052_v32 = vpack.c.bf16 %v2463_v37, %v2461_v36  ;;  %v2491_v5 = vld [vmem:[#allocation20 + $0x490] sm:$0xff]  ;;  %v2497_v30 = vld [vmem:[#allocation20 + $0x4c0] sm:$0xff] }
 0x5e6   : > { %v6080_v54 = vpack.c.bf16 %v2491_v5, %v2489_v12  ;;  %v2495_v26 = vld [vmem:[#allocation20 + $0x4b0] sm:$0xff]  ;;  %v2501_v39 = vld [vmem:[#allocation20 + $0x4e0] sm:$0xff] }
 0x5e7   : > { %6017 = vmatpush1.bf16.msra.mxu0 %v6016_v0  ;;  %v2465_v0 = vld [vmem:[#allocation20 + $0x3c0] sm:$0xff]  ;;  %v6084_v28 = vpack.c.bf16 %v2495_v26, %v2493_v6  ;;  %v2499_v61 = vld [vmem:[#allocation20 + $0x4d0] sm:$0xff] }
 0x5e8   : > { %6019 = vmatprep.subr.bf16.mxu0 %v6018_v43  ;;  %v2467_v43 = vld [vmem:[#allocation20 + $0x3d0] sm:$0xff]  ;;  %v6088_v36 = vpack.c.bf16 %v2499_v61, %v2497_v30  ;;  %v2505_v44 = vld [vmem:[#allocation20 + $0x500] sm:$0xff] }
 0x5e9   : > { %v6056_v45 = vpack.c.bf16 %v2467_v43, %v2465_v0  ;;  %v2503_v8 = vld [vmem:[#allocation20 + $0x4f0] sm:$0xff] }
 0x5ea   : > { %v6092_v0 = vpack.c.bf16 %v2503_v8, %v2501_v39  ;;  %v2507_v57 = vld [vmem:[#allocation20 + $0x510] sm:$0xff] }
 0x5eb   : > { %6021 = vmatpush1.bf16.msra.mxu0 %v6020_v16  ;;  %v2469_v16 = vld [vmem:[#allocation20 + $0x3e0] sm:$0xff] }
 0x5ec   : > { %6023 = vmatprep.subr.bf16.mxu0 %v6022_v47  ;;  %v2471_v47 = vld [vmem:[#allocation20 + $0x3f0] sm:$0xff] }
 0x5ed   : > { %v6060_v35 = vpack.c.bf16 %v2471_v47, %v2469_v16  ;;  %v6096_v16 = vpack.c.bf16 %v2507_v57, %v2505_v44 }
 0x5ef   : > { %6025 = vmatpush1.bf16.msra.mxu0 %v6024_v51  ;;  %v2473_v51 = vld [vmem:[#allocation20 + $0x400] sm:$0xff] }
 0x5f0   : > { %6027 = vmatprep.subr.bf16.mxu0 %v6026_v63  ;;  %v2475_v63 = vld [vmem:[#allocation20 + $0x410] sm:$0xff] }
 0x5f1   : > { %v6064_v50 = vpack.c.bf16 %v2475_v63, %v2473_v51 }
 0x5f3   : > { %6029 = vmatpush1.bf16.msra.mxu0 %v6028_v56  ;;  %v6066_v56 = vpack.c.bf16 %v2480_v38, %v2478_v55 }
 0x5f4   : > { %6031 = vmatprep.subr.bf16.mxu0 %v6030_v23  ;;  %v2477_v23 = vld [vmem:[#allocation20 + $0x420] sm:$0xff] }
 0x5f7   : > { %6033 = vmatpush1.bf16.msra.mxu0 %v6032_v1  ;;  %v6068_v1 = vpack.c.bf16 %v2479_v53, %v2477_v23  ;;  %v8214_v23 = vld [vmem:[#allocation14] sm:$0xff] }
 0x5f8   : > { %6035 = vmatprep.subr.bf16.mxu0 %v6034_v29  ;;  %v2483_v29 = vld [vmem:[#allocation20 + $0x450] sm:$0xff]  ;;  %v5585_v53 = vcombine.high %v8214_v23, %v8214_v23 }
 0x5f9   : > { %v6072_v46 = vpack.c.bf16 %v2483_v29, %v2481_v24 }
 0x5fa   : > { %5615 = vmatprep.mubr.msk.bf16.mxu1 %vm2737_vm3, %v5585_v53 }
 0x5fb   : > { %6037 = vmatpush1.bf16.msra.mxu0 %v6036_v13  ;;  %v2485_v13 = vld [vmem:[#allocation20 + $0x460] sm:$0xff] }
 0x5fc   : > { %6039 = vmatprep.subr.bf16.mxu0 %v6038_v10  ;;  %v2490_v10 = vld [vmem:[#allocation20 + $0x488] sm:$0xff] }
 0x5fd   : > { %v6078_v22 = vpack.c.bf16 %v2492_v14, %v2490_v10 }
 0x5ff   : > { %6041 = vmatpush1.bf16.msra.mxu0 %v6040_v7  ;;  %v2494_v7 = vld [vmem:[#allocation20 + $0x4a8] sm:$0xff] }
 0x600   : > { %6043 = vmatprep.subr.bf16.mxu0 %v6042_v21  ;;  %v2496_v21 = vld [vmem:[#allocation20 + $0x4b8] sm:$0xff] }
 0x601   : > { %v6082_v25 = vpack.c.bf16 %v2496_v21, %v2494_v7 }
 0x603   : > { %6045 = vmatpush1.bf16.msra.mxu0 %v6044_v40  ;;  %v2498_v40 = vld [vmem:[#allocation20 + $0x4c8] sm:$0xff] }
 0x604   : > { %6047 = vmatprep.subr.bf16.mxu0 %v6046_v27  ;;  %v2500_v27 = vld [vmem:[#allocation20 + $0x4d8] sm:$0xff] }
 0x605   : > { %v6086_v49 = vpack.c.bf16 %v2500_v27, %v2498_v40 }
 0x607   : > { %6049 = vmatpush1.bf16.msra.mxu0 %v6048_v41  ;;  %v2502_v41 = vld [vmem:[#allocation20 + $0x4e8] sm:$0xff] }
 0x608   : > { %6051 = vmatprep.subr.bf16.mxu0 %v6050_v31  ;;  %v2504_v31 = vld [vmem:[#allocation20 + $0x4f8] sm:$0xff] }
 0x609   : > { %v6090_v37 = vpack.c.bf16 %v2504_v31, %v2502_v41 }
 0x60b   : > { %6053 = vmatpush1.bf16.msra.mxu0 %v6052_v32  ;;  %v2506_v32 = vld [vmem:[#allocation20 + $0x508] sm:$0xff] }
 0x60c   : > { %6055 = vmatprep.subr.bf16.mxu0 %v6054_v60  ;;  %v2508_v60 = vld [vmem:[#allocation20 + $0x518] sm:$0xff] }
 0x60d   : > { %v6094_v43 = vpack.c.bf16 %v2508_v60, %v2506_v32 }
 0x60f   : > { %6057 = vmatpush1.bf16.msra.mxu0 %v6056_v45  ;;  %v2510_v45 = vld [vmem:[#allocation20 + $0x528] sm:$0xff] }
 0x610   : > { %6059 = vmatprep.subr.bf16.mxu0 %v6058_v62  ;;  %v2512_v62 = vld [vmem:[#allocation20 + $0x538] sm:$0x7] }
 0x611   : > { %v6098_v47 = vpack.c.bf16 %v2512_v62, %v2510_v45 }
 0x613   : > { %6061 = vmatpush1.bf16.msra.mxu0 %v6060_v35  ;;  %v6101_v35 = vpack.c.bf16 %v2511_v17, %v2509_v48 }
 0x614   : > { %6063 = vmatprep.subr.bf16.mxu0 %v6062_v52 }
 0x616   : > { %2659 = vmatmul.mubr.f32.vlgmr.msra.gmra.mrb[4].mxu0 %v8169_v18  ;;  %v6076_v18 = vpack.c.bf16 %v2487_v9, %v2485_v13 }
 0x617   : > { %6065 = vmatpush1.bf16.msra.mxu0 %v6064_v50  ;;  %5556 = vmatprep.mubr.msk.f32.mxu0 %vm883_vm10, %v2344_v58  ;;  %vm6853_vm10 = vmmov 1  }
 0x618   : > { %6067 = vmatprep.subr.bf16.mxu0 %v6066_v56  ;;  %vm6099_vm11 = vmpackc.low %vm2516_vm9, %vm6853_vm10  ;;  %v3204_v56 = vld [vmem:[#allocation16] sm:$0xff]  ;;  %vm8853_vm9 = vcmask 744448   ;;  %vm8820_vm10 = vcmask 752640  }
 0x61b   : > { %6069 = vmatpush1.bf16.msra.mxu0 %v6068_v1 }
 0x61c   : > { %6071 = vmatprep.subr.bf16.mxu0 %v6070_v34 }
 0x61f   : > { %6073 = vmatpush1.bf16.msra.mxu0 %v6072_v46 }
 0x620   : > { %6075 = vmatprep.subr.bf16.mxu0 %v6074_v3 }
 0x623   : > { %6077 = vmatpush1.bf16.msra.mxu0 %v6076_v18 }
 0x624   : > { %6079 = vmatprep.subr.bf16.mxu0 %v6078_v22 }
 0x627   : > { %6081 = vmatpush1.bf16.msra.mxu0 %v6080_v54 }
 0x628   : > { %6083 = vmatprep.subr.bf16.mxu0 %v6082_v25 }
 0x62b   : > { %6085 = vmatpush1.bf16.msra.mxu0 %v6084_v28 }
 0x62c   : > { %6087 = vmatprep.subr.bf16.mxu0 %v6086_v49 }
 0x62f   : > { %6089 = vmatpush1.bf16.msra.mxu0 %v6088_v36 }
 0x630   : > { %6091 = vmatprep.subr.bf16.mxu0 %v6090_v37 }
 0x633   : > { %6093 = vmatpush1.bf16.msra.mxu0 %v6092_v0 }
 0x634   : > { %6095 = vmatprep.subr.bf16.mxu0 %v6094_v43 }
 0x637   : > { %6097 = vmatpush1.bf16.msra.mxu0 %v6096_v16 }
 0x638   : > { %6100 = vmatprep.subr.msk.bf16.mxu0 %vm6099_vm11, %v6098_v47 }
 0x63b   : > { %6103 = vmatpush1.bf16.msk.msra.mxu0 %vm6099_vm11, %v6101_v35  ;;  %vm8822_vm11 = vcmask 703488  }
 0x63e   : > { %2730 = vmatmul.mubr.f32.vlgmr.msra.gmra.mrb[4].mxu0 %v8171_v19 }
 0x711   : > { %v2731_v52 = vpop.f32.mrb[4].mxu0 }
 0x712   : > { %2736 = vst [vmem:[#allocation5] sm:$0xff] %v2731_v52  ;;  %v2742_v51 = vmax.f32 %v2731_v52, 0.0  ;;  %v2733_v63 = vpop.f32.mrb[5].mxu0 }
 0x713   : > { %2738 = vst.msk [vmem:[#allocation5 + $0x8] sm:$0xff] %vm2737_vm3, %v2733_v63 }
 0x714   : > { %2744 = vst [vmem:[#allocation6] sm:$0xff] %v2742_v51 }
 0x71a   : > { %v2741_v20 = vld [vmem:[#allocation5 + $0x8] sm:$0xff] }
 0x71b   : > { %v2743_v55 = vmax.f32 %v2741_v20, 0.0 }
 0x71d   : > { %2745 = vst.msk [vmem:[#allocation6 + $0x8] sm:$0xff] %vm2737_vm3, %v2743_v55 }
 0x724   : > { %v2777_v38 = vld [vmem:[#allocation6 + $0x8] sm:$0xff] }
 0x725   : > { %v5801_v19 = vpack.c.bf16 %v2777_v38, %v2742_v51 }
 0x727   : > { %2785 = vrot.lane.b32.xlu0 %v5801_v19, %s8964_s1  ;;  %2769 = vrot.lane.b32.xlu1 %v5801_v19, %s8963_s16  ;;  %2759 = vst.msk [vmem:[#allocation7] sm:$0xff] %vm8182_vm8, %v5801_v19 }
 0x72b   : > { %2817 = vrot.lane.b32.xlu0 %v5801_v19, %s8798_s25  ;;  %2801 = vrot.lane.b32.xlu1 %v5801_v19, %s8800_s9  ;;  %s8845_s25 = smov 86   ;;  %s8810_s9 = smov 90  }
 0x72f   : > { %2849 = vrot.lane.b32.xlu0 %v5801_v19, %s8974_s14  ;;  %2833 = vrot.lane.b32.xlu1 %v5801_v19, %s8802_s23  ;;  %s8818_s23 = smov 85  }
 0x733   : > { %2881 = vrot.lane.b32.xlu0 %v5801_v19, %s8804_s10  ;;  %2865 = vrot.lane.b32.xlu1 %v5801_v19, %s8806_s22  ;;  %s8814_s10 = smov 79   ;;  %s8816_s22 = smov 80  }
 0x737   : > { %2913 = vrot.lane.b32.xlu0 %v5801_v19, %s8843_s24  ;;  %2897 = vrot.lane.b32.xlu1 %v5801_v19, %s8808_s0  ;;  %s8841_s0 = smov 78  }
 0x73b   : > { %2945 = vrot.lane.b32.xlu0 %v5801_v19, %s8845_s25  ;;  %2929 = vrot.lane.b32.xlu1 %v5801_v19, %s8810_s9  ;;  %s8839_s9 = smov 49  }
 0x73f   : > { %2977 = vrot.lane.b32.xlu0 %v5801_v19, %s8812_s2  ;;  %2961 = vrot.lane.b32.xlu1 %v5801_v19, %s8818_s23  ;;  %s8837_s2 = smov 50   ;;  %s8831_s23 = smov 43  }
 0x743   : > { %3009 = vrot.lane.b32.xlu0 %v5801_v19, %s8814_s10  ;;  %2993 = vrot.lane.b32.xlu1 %v5801_v19, %s8816_s22  ;;  %s8835_s10 = smov 48   ;;  %s8833_s22 = smov 42  }
 0x747   : > { %3041 = vrot.lane.b32.xlu0 %v5801_v19, %s8905_s17  ;;  %3025 = vrot.lane.b32.xlu1 %v5801_v19, %s8841_s0  ;;  %s8985_s0 = smov 92  }
 0x74b   : > { %3073 = vrot.lane.b32.xlu0 %v5801_v19, %s8907_s12  ;;  %3057 = vrot.lane.b32.xlu1 %v5801_v19, %s8906_s26 }
 0x74f   : > { %3105 = vrot.lane.b32.xlu0 %v5801_v19, %s8839_s9  ;;  %3089 = vrot.lane.b32.xlu1 %v5801_v19, %s8837_s2  ;;  %s8983_s2 = smov 114   ;;  %s8984_s9 = smov 115  }
 0x753   : > { %3137 = vrot.lane.b32.xlu0 %v5801_v19, %s8908_s15  ;;  %3121 = vrot.lane.b32.xlu1 %v5801_v19, %s8835_s10  ;;  %s8982_s10 = smov 120  }
 0x757   : > { %3169 = vrot.lane.b32.xlu0 %v5801_v19, %s8833_s22  ;;  %3153 = vrot.lane.b32.xlu1 %v5801_v19, %s8831_s23  ;;  %s8981_s22 = smov 122  }
 0x75b   : > { %3207 = vperm.xlu1 %6280, %v3204_v56  }
 0x799   : > { %v2786_v58 = vpop.permute.xlu0 %2785  ;;  %v2770_v42 = vpop.permute.xlu1 %2769 }
 0x79a   : > { %v2787_v59 = vrot.slane %v2786_v58, 4  ;;  %v2771_v1 = vrot.slane %v2770_v42, 4 }
 0x79c   : > { %v2789_v34 = vsel %vm511_vm0, %v2786_v58, %v2787_v59  ;;  %v2773_v24 = vsel %vm464_vm2, %v2770_v42, %v2771_v1 }
 0x79d   : > { %2791 = vst.msk [vmem:[#allocation7 + $0x10] sm:$0xff] %vm8182_vm8, %v2789_v34  ;;  %2775 = vst.msk [vmem:[#allocation7 + $0x8] sm:$0xff] %vm8182_vm8, %v2773_v24  ;;  %v2818_v29 = vpop.permute.xlu0 %2817  ;;  %v2802_v2 = vpop.permute.xlu1 %2801 }
 0x79e   : > { %v2819_v4 = vrot.slane %v2818_v29, 4  ;;  %v2803_v46 = vrot.slane %v2802_v2, 4 }
 0x7a0   : > { %v2821_v3 = vsel %vm2091_vm12, %v2818_v29, %v2819_v4  ;;  %v2805_v13 = vsel %vm2804_vm1, %v2802_v2, %v2803_v46 }
 0x7a1   : > { %2823 = vst.msk [vmem:[#allocation7 + $0x20] sm:$0xff] %vm8182_vm8, %v2821_v3  ;;  %2807 = vst.msk [vmem:[#allocation7 + $0x18] sm:$0xff] %vm8182_vm8, %v2805_v13  ;;  %v2850_v9 = vpop.permute.xlu0 %2849  ;;  %v2834_v10 = vpop.permute.xlu1 %2833 }
 0x7a2   : > { %v2851_v14 = vrot.slane %v2850_v9, 4  ;;  %v2835_v18 = vrot.slane %v2834_v10, 4 }
 0x7a4   : > { %v2853_v22 = vsel %vm8975_vm7, %v2850_v9, %v2851_v14  ;;  %v2837_v12 = vsel %vm2836_vm5, %v2834_v10, %v2835_v18  ;;  %v6326_v5 = vld [vmem:[#allocation7 + $0x4] ss:$8 sps:$4 sm:$0xff]   ;;  %v6328_v7 = vld [vmem:[#allocation7] ss:$8 sps:$4 sm:$0xff]   ;;  %vm8824_vm7 = vcmask 687104  }
 0x7a5   : > { %2855 = vst.msk [vmem:[#allocation7 + $0x30] sm:$0xff] %vm8182_vm8, %v2853_v22  ;;  %2839 = vst.msk [vmem:[#allocation7 + $0x28] sm:$0xff] %vm8182_vm8, %v2837_v12  ;;  %v2882_v21 = vpop.permute.xlu0 %2881  ;;  %v2866_v54 = vpop.permute.xlu1 %2865  ;;  %3360 = vmatprep.subr.bf16.mxu1 %v6326_v5 }
 0x7a6   : > { %v2883_v25 = vrot.slane %v2882_v21, 4  ;;  %v2867_v6 = vrot.slane %v2866_v54, 4  ;;  %3361 = vmatpush1.bf16.msra.mxu1 %v6328_v7 }
 0x7a8   : > { %v2885_v26 = vsel %vm8852_vm4, %v2882_v21, %v2883_v25  ;;  %v2869_v40 = vsel %vm8851_vm15, %v2866_v54, %v2867_v6  ;;  %v6329_v27 = vld [vmem:[#allocation7 + $0x14] ss:$8 sps:$4 sm:$0xff]   ;;  %v6331_v28 = vld [vmem:[#allocation7 + $0x10] ss:$8 sps:$4 sm:$0xff]  }
 0x7a9   : > { %2887 = vst.msk [vmem:[#allocation7 + $0x40] sm:$0xff] %vm8182_vm8, %v2885_v26  ;;  %2871 = vst.msk [vmem:[#allocation7 + $0x38] sm:$0xff] %vm8182_vm8, %v2869_v40  ;;  %v2914_v49 = vpop.permute.xlu0 %2913  ;;  %v2898_v30 = vpop.permute.xlu1 %2897  ;;  %3362 = vmatprep.subr.bf16.mxu1 %v6329_v27 }
 0x7aa   : > { %v2915_v61 = vrot.slane %v2914_v49, 4  ;;  %v2899_v41 = vrot.slane %v2898_v30, 4  ;;  %3363 = vmatpush1.bf16.msra.mxu1 %v6331_v28 }
 0x7ac   : > { %v2917_v31 = vsel %vm8853_vm9, %v2914_v49, %v2915_v61  ;;  %v2901_v36 = vsel %vm8820_vm10, %v2898_v30, %v2899_v41  ;;  %v6332_v37 = vld [vmem:[#allocation7 + $0x24] ss:$8 sps:$4 sm:$0xff]   ;;  %v6334_v39 = vld [vmem:[#allocation7 + $0x20] ss:$8 sps:$4 sm:$0xff]   ;;  %vm8823_vm10 = vcmask 695296  }
 0x7ad   : > { %2919 = vst.msk [vmem:[#allocation7 + $0x50] sm:$0xff] %vm8182_vm8, %v2917_v31  ;;  %2903 = vst.msk [vmem:[#allocation7 + $0x48] sm:$0xff] %vm8182_vm8, %v2901_v36  ;;  %v2946_v8 = vpop.permute.xlu0 %2945  ;;  %v2930_v32 = vpop.permute.xlu1 %2929  ;;  %3364 = vmatprep.subr.bf16.mxu1 %v6332_v37 }
 0x7ae   : > { %v2947_v60 = vrot.slane %v2946_v8, 4  ;;  %v2931_v0 = vrot.slane %v2930_v32, 4  ;;  %3365 = vmatpush1.bf16.msra.mxu1 %v6334_v39 }
 0x7b0   : > { %v2949_v43 = vsel %vm8822_vm11, %v2946_v8, %v2947_v60  ;;  %v2933_v44 = vsel %vm8821_vm6, %v2930_v32, %v2931_v0  ;;  %v6335_v57 = vld [vmem:[#allocation7 + $0x34] ss:$8 sps:$4 sm:$0xff]   ;;  %v6337_v45 = vld [vmem:[#allocation7 + $0x30] ss:$8 sps:$4 sm:$0xff]   ;;  %vm3012_vm6 = vcmask 646144   ;;  %vm8825_vm11 = vcmask 654336  }
 0x7b1   : > { %2951 = vst.msk [vmem:[#allocation7 + $0x60] sm:$0xff] %vm8182_vm8, %v2949_v43  ;;  %2935 = vst.msk [vmem:[#allocation7 + $0x58] sm:$0xff] %vm8182_vm8, %v2933_v44  ;;  %v2978_v62 = vpop.permute.xlu0 %2977  ;;  %v2962_v16 = vpop.permute.xlu1 %2961  ;;  %3366 = vmatprep.subr.bf16.mxu1 %v6335_v57 }
 0x7b2   : > { %v2979_v47 = vrot.slane %v2978_v62, 4  ;;  %v2963_v48 = vrot.slane %v2962_v16, 4  ;;  %3367 = vmatpush1.bf16.msra.mxu1 %v6337_v45 }
 0x7b4   : > { %v2981_v17 = vsel %vm8824_vm7, %v2978_v62, %v2979_v47  ;;  %v2965_v35 = vsel %vm8823_vm10, %v2962_v16, %v2963_v48  ;;  %v6338_v52 = vld [vmem:[#allocation7 + $0x44] ss:$8 sps:$4 sm:$0xff]   ;;  %v6340_v51 = vld [vmem:[#allocation7 + $0x40] ss:$8 sps:$4 sm:$0xff]   ;;  %vm8826_vm10 = vcmask 637952   ;;  %vm8976_vm7 = vcmask 457728  }
 0x7b5   : > { %2983 = vst.msk [vmem:[#allocation7 + $0x70] sm:$0xff] %vm8182_vm8, %v2981_v17  ;;  %2967 = vst.msk [vmem:[#allocation7 + $0x68] sm:$0xff] %vm8182_vm8, %v2965_v35  ;;  %v3010_v63 = vpop.permute.xlu0 %3009  ;;  %v2994_v20 = vpop.permute.xlu1 %2993  ;;  %3368 = vmatprep.subr.bf16.mxu1 %v6338_v52  ;;  %v5584_v35 = vcombine.low %v8214_v23, %v8214_v23  ;;  %v2739_v52 = vld [vmem:[#allocation19] sm:$0x3] }
 0x7b6   : > { %v3011_v55 = vrot.slane %v3010_v63, 4  ;;  %v2995_v38 = vrot.slane %v2994_v20, 4  ;;  %3369 = vmatpush1.bf16.msra.mxu1 %v6340_v51  ;;  %v8303_v51 = vrot.slane %v2739_v52, %v2010_v11 }
 0x7b8   : > { %v3013_v19 = vsel %vm3012_vm6, %v3010_v63, %v3011_v55  ;;  %v2997_v56 = vsel %vm8825_vm11, %v2994_v20, %v2995_v38  ;;  %v6341_v53 = vld [vmem:[#allocation7 + $0x54] ss:$8 sps:$4 sm:$0xff]   ;;  %v6343_v58 = vld [vmem:[#allocation7 + $0x50] ss:$8 sps:$4 sm:$0xff]   ;;  %vm8977_vm11 = vcmask 449536   ;;  %v8307_v63 = vrot.slane %v2739_v52, %v2014_v15 }
 0x7b9   : > { %3015 = vst.msk [vmem:[#allocation7 + $0x80] sm:$0xff] %vm8182_vm8, %v3013_v19  ;;  %2999 = vst.msk [vmem:[#allocation7 + $0x78] sm:$0xff] %vm8182_vm8, %v2997_v56  ;;  %v3042_v42 = vpop.permute.xlu0 %3041  ;;  %v3026_v59 = vpop.permute.xlu1 %3025  ;;  %3370 = vmatprep.subr.bf16.mxu1 %v6341_v53 }
 0x7ba   : > { %v3043_v1 = vrot.slane %v3042_v42, 4  ;;  %v3027_v34 = vrot.slane %v3026_v59, 4  ;;  %3371 = vmatpush1.bf16.msra.mxu1 %v6343_v58 }
 0x7bc   : > { %v3045_v24 = vsel %vm8976_vm7, %v3042_v42, %v3043_v1  ;;  %v3029_v29 = vsel %vm8826_vm10, %v3026_v59, %v3027_v34  ;;  %v6344_v2 = vld [vmem:[#allocation7 + $0x64] ss:$8 sps:$4 sm:$0xff]   ;;  %v6346_v4 = vld [vmem:[#allocation7 + $0x60] ss:$8 sps:$4 sm:$0xff]   ;;  %vm8829_vm7 = vcmask 400384   ;;  %vm8828_vm10 = vcmask 408576  }
 0x7bd   : > { %3047 = vst.msk [vmem:[#allocation7 + $0x90] sm:$0xff] %vm8182_vm8, %v3045_v24  ;;  %3031 = vst.msk [vmem:[#allocation7 + $0x88] sm:$0xff] %vm8182_vm8, %v3029_v29  ;;  %v3074_v46 = vpop.permute.xlu0 %3073  ;;  %v3058_v3 = vpop.permute.xlu1 %3057  ;;  %3372 = vmatprep.subr.bf16.mxu1 %v6344_v2  ;;  %v8344_v2 = vld [vmem:[#allocation14 + $0x8] sm:$0xff] }
 0x7be   : > { %v3075_v13 = vrot.slane %v3074_v46, 4  ;;  %v3059_v9 = vrot.slane %v3058_v3, 4  ;;  %3373 = vmatpush1.bf16.msra.mxu1 %v6346_v4  ;;  %v5644_v4 = vcombine.high %v8344_v2, %v8344_v2 }
 0x7c0   : > { %v3077_v10 = vsel %vm8827_vm13, %v3074_v46, %v3075_v13  ;;  %v3061_v14 = vsel %vm8977_vm11, %v3058_v3, %v3059_v9  ;;  %v6347_v18 = vld [vmem:[#allocation7 + $0x74] ss:$8 sps:$4 sm:$0xff]   ;;  %v6349_v22 = vld [vmem:[#allocation7 + $0x70] ss:$8 sps:$4 sm:$0xff]   ;;  %vm3124_vm11 = vcmask 392192   ;;  %vm8978_vm13 = vcmask 359424  }
 0x7c1   : > { %3079 = vst.msk [vmem:[#allocation7 + $0xa0] sm:$0xff] %vm8182_vm8, %v3077_v10  ;;  %3063 = vst.msk [vmem:[#allocation7 + $0x98] sm:$0xff] %vm8182_vm8, %v3061_v14  ;;  %v3106_v12 = vpop.permute.xlu0 %3105  ;;  %v3090_v5 = vpop.permute.xlu1 %3089  ;;  %3374 = vmatprep.subr.bf16.mxu1 %v6347_v18  ;;  %v3860_v46 = vld [vmem:[#allocation16 + $0x8] sm:$0xff] }
 0x7c2   : > { %v3107_v7 = vrot.slane %v3106_v12, 4  ;;  %v3091_v21 = vrot.slane %v3090_v5, 4  ;;  %3375 = vmatpush1.bf16.msra.mxu1 %v6349_v22 }
 0x7c4   : > { %v3109_v54 = vsel %vm8829_vm7, %v3106_v12, %v3107_v7  ;;  %v3093_v25 = vsel %vm8828_vm10, %v3090_v5, %v3091_v21  ;;  %v6350_v6 = vld [vmem:[#allocation7 + $0x84] ss:$8 sps:$4 sm:$0xff]   ;;  %v6352_v26 = vld [vmem:[#allocation7 + $0x80] ss:$8 sps:$4 sm:$0xff]   ;;  %vm3172_vm10 = vcmask 343040   ;;  %vm3156_vm7 = vcmask 351232  }
 0x7c5   : > { %3111 = vst.msk [vmem:[#allocation7 + $0xb0] sm:$0xff] %vm8182_vm8, %v3109_v54  ;;  %3095 = vst.msk [vmem:[#allocation7 + $0xa8] sm:$0xff] %vm8182_vm8, %v3093_v25  ;;  %v3138_v40 = vpop.permute.xlu0 %3137  ;;  %v3122_v27 = vpop.permute.xlu1 %3121  ;;  %3376 = vmatprep.subr.bf16.mxu1 %v6350_v6 }
 0x7c6   : > { %v3139_v28 = vrot.slane %v3138_v40, 4  ;;  %v3123_v49 = vrot.slane %v3122_v27, 4  ;;  %3377 = vmatpush1.bf16.msra.mxu1 %v6352_v26 }
 0x7c8   : > { %v3141_v30 = vsel %vm8978_vm13, %v3138_v40, %v3139_v28  ;;  %v3125_v61 = vsel %vm3124_vm11, %v3122_v27, %v3123_v49  ;;  %v6353_v41 = vld [vmem:[#allocation7 + $0x94] ss:$8 sps:$4 sm:$0xff]   ;;  %v6355_v31 = vld [vmem:[#allocation7 + $0x90] ss:$8 sps:$4 sm:$0xff]   ;;  %vm3426_vm13 = vcmask 1047896  }
 0x7c9   : > { %3143 = vst.msk [vmem:[#allocation7 + $0xc0] sm:$0xff] %vm8182_vm8, %v3141_v30  ;;  %3127 = vst.msk [vmem:[#allocation7 + $0xb8] sm:$0xff] %vm8182_vm8, %v3125_v61  ;;  %v3170_v36 = vpop.permute.xlu0 %3169  ;;  %v3154_v37 = vpop.permute.xlu1 %3153  ;;  %3378 = vmatprep.subr.bf16.mxu1 %v6353_v41 }
 0x7ca   : > { %v3171_v39 = vrot.slane %v3170_v36, 4  ;;  %v3155_v8 = vrot.slane %v3154_v37, 4  ;;  %3379 = vmatpush1.bf16.msra.mxu1 %v6355_v31 }
 0x7cc   : > { %v3173_v32 = vsel %vm3172_vm10, %v3170_v36, %v3171_v39  ;;  %v3157_v60 = vsel %vm3156_vm7, %v3154_v37, %v3155_v8  ;;  %v6356_v0 = vld [vmem:[#allocation7 + $0xa4] ss:$8 sps:$4 sm:$0xff]   ;;  %v6358_v43 = vld [vmem:[#allocation7 + $0xa0] ss:$8 sps:$4 sm:$0xff]  }
 0x7cd   : > { %3175 = vst.msk [vmem:[#allocation7 + $0xd0] sm:$0xff] %vm8182_vm8, %v3173_v32  ;;  %3159 = vst.msk [vmem:[#allocation7 + $0xc8] sm:$0xff] %vm8182_vm8, %v3157_v60  ;;  %3380 = vmatprep.subr.bf16.mxu1 %v6356_v0 }
 0x7ce   : > { %3381 = vmatpush1.bf16.msra.mxu1 %v6358_v43 }
 0x7d0   : > { %v6359_v44 = vld [vmem:[#allocation7 + $0xb4] ss:$8 sps:$4 sm:$0xff]   ;;  %v6361_v57 = vld [vmem:[#allocation7 + $0xb0] ss:$8 sps:$4 sm:$0xff]  }
 0x7d1   : > { %3382 = vmatprep.subr.bf16.mxu1 %v6359_v44 }
 0x7d2   : > { %3383 = vmatpush1.bf16.msra.mxu1 %v6361_v57 }
 0x7d4   : > { %v6362_v45 = vld [vmem:[#allocation7 + $0xc4] ss:$8 sps:$4 sm:$0xff]   ;;  %v6364_v62 = vld [vmem:[#allocation7 + $0xc0] ss:$8 sps:$4 sm:$0xff]   ;;  %v3203_v16 = vld [vmem:[#allocation7 + $0xd0] sm:$0xff] }
 0x7d5   : > { %3384 = vmatprep.subr.bf16.mxu1 %v6362_v45  ;;  %v5613_v47 = vcombine.high %v3203_v16, %v3203_v16  ;;  %v5612_v48 = vcombine.low %v3203_v16, %v3203_v16 }
 0x7d6   : > { %3385 = vmatpush1.bf16.msra.mxu1 %v6364_v62 }
 0x7d7   : > { %5614 = vmatprep.subr.msk.bf16.mxu1 %vm8830_vm14, %v5613_v47  ;;  %v3355_v17 = vsel %vm8830_vm14, %v5612_v48, 0  ;;  %vm8979_vm14 = vcmask 367616  }
 0x7da   : > { %3387 = vmatpush1.bf16.msra.mxu1 %v3355_v17  ;;  %v3208_v20 = vpop.permute.xlu1 %3207 }
 0x7dd   : > { %3393 = vmatmul.mubr.bf16.vlgmr.msra.gmra.mrb[12].mxu1 %v5584_v35 }
 0x7de   : > { %5674 = vmatprep.mubr.msk.bf16.mxu1 %vm2737_vm3, %v5644_v4 }
 0x8b0   : > { %v3394_v55 = vpop.f32.mrb[12].mxu1 }
 0x8b1   : > { %v3395_v38 = vadd.f32 %v3394_v55, %v3208_v20  ;;  %v3396_v19 = vpop.f32.mrb[13].mxu1 }
 0x8b2   : > { %v3397_v56 = vadd.f32 %v3396_v19, %v3208_v20  ;;  %v3398_v53 = vpop.f32.mrb[14].mxu1 }
 0x8b3   : > { %v3412_v58 = vmul.f32 %v8303_v51, %v3395_v38  ;;  %v3399_v23 = vpop.f32.mrb[15].mxu1 }
 0x8b4   : > { %v3413_v42 = vmul.f32 %v8307_v63, %v3397_v56 }
 0x8b5   : > { %v3414_v59 = vmax.f32 %v3412_v58, 0.0 }
 0x8b6   : > { %v3415_v1 = vmax.f32 %v3413_v42, 0.0 }
 0x8b7   : > { %3418 = vrot.lane.b32.xlu0 %v3414_v59, %s8831_s23 }
 0x8b8   : > { %3420 = vrot.lane.b32.xlu1 %v3415_v1, %s8831_s23  ;;  %s8980_s23 = smov 121  }
 0x929   : > { %v3419_v33 = vpop.permute.xlu0 %3418 }
 0x92a   : > { %v3421_v11 = vpop.permute.xlu1 %3420  ;;  %3427 = vst.msk [vmem:[#allocation6] sm:$0xff] %vm3426_vm13, %v3419_v33 }
 0x92b   : > { %v3423_v15 = vsel %vm3156_vm7, %v3419_v33, %v3421_v11 }
 0x92c   : > { %3428 = vst.msk [vmem:[#allocation6 + $0x8] sm:$0xff] %vm8979_vm14, %v3423_v15  ;;  %vm8997_vm14 = vcmask 949248  }
 0x931   : > { %v3455_v34 = vld [vmem:[#allocation6] sm:$0xff] }
 0x933   : > { %v3456_v24 = vld [vmem:[#allocation6 + $0x8] sm:$0xff] }
 0x934   : > { %v5828_v29 = vpack.c.bf16 %v3456_v24, %v3455_v34 }
 0x936   : > { %3464 = vrot.lane.b32.xlu1 %v5828_v29, %s8964_s1  ;;  %3449 = vrot.lane.b32.xlu0 %v5828_v29, %s8963_s16  ;;  %3439 = vst.msk [vmem:[#allocation7] sm:$0xff] %vm8182_vm8, %v5828_v29 }
 0x93a   : > { %3494 = vrot.lane.b32.xlu1 %v5828_v29, %s8980_s23  ;;  %3479 = vrot.lane.b32.xlu0 %v5828_v29, %s8981_s22 }
 0x93e   : > { %3524 = vrot.lane.b32.xlu1 %v5828_v29, %s8974_s14  ;;  %3509 = vrot.lane.b32.xlu0 %v5828_v29, %s8982_s10 }
 0x942   : > { %3554 = vrot.lane.b32.xlu1 %v5828_v29, %s8983_s2  ;;  %3539 = vrot.lane.b32.xlu0 %v5828_v29, %s8984_s9 }
 0x946   : > { %3584 = vrot.lane.b32.xlu1 %v5828_v29, %s8843_s24  ;;  %3569 = vrot.lane.b32.xlu0 %v5828_v29, %s8985_s0  ;;  %s8992_s24 = smov 49  }
 0x94a   : > { %3614 = vrot.lane.b32.xlu1 %v5828_v29, %s8845_s25  ;;  %3599 = vrot.lane.b32.xlu0 %v5828_v29, %s8986_s3  ;;  %s8993_s25 = smov 50  }
 0x94e   : > { %3644 = vrot.lane.b32.xlu1 %v5828_v29, %s8987_s4  ;;  %3629 = vrot.lane.b32.xlu0 %v5828_v29, %s8988_s5 }
 0x952   : > { %3674 = vrot.lane.b32.xlu1 %v5828_v29, %s8989_s6  ;;  %3659 = vrot.lane.b32.xlu0 %v5828_v29, %s8990_s7 }
 0x956   : > { %3704 = vrot.lane.b32.xlu1 %v5828_v29, %s8905_s17  ;;  %3689 = vrot.lane.b32.xlu0 %v5828_v29, %s8991_s13 }
 0x95a   : > { %3734 = vrot.lane.b32.xlu1 %v5828_v29, %s8907_s12  ;;  %3719 = vrot.lane.b32.xlu0 %v5828_v29, %s8906_s26 }
 0x95e   : > { %3764 = vrot.lane.b32.xlu1 %v5828_v29, %s8992_s24  ;;  %3749 = vrot.lane.b32.xlu0 %v5828_v29, %s8993_s25 }
 0x962   : > { %3794 = vrot.lane.b32.xlu1 %v5828_v29, %s8908_s15  ;;  %3779 = vrot.lane.b32.xlu0 %v5828_v29, %s8994_s29 }
 0x966   : > { %3824 = vrot.lane.b32.xlu1 %v5828_v29, %s8995_s28  ;;  %3809 = vrot.lane.b32.xlu0 %v5828_v29, %s8996_s20 }
 0x96a   : > { %3863 = vperm.xlu0 %6301, %v3860_v46  }
 0x9a8   : > { %v3465_v3 = vpop.permute.xlu1 %3464  ;;  %v3450_v13 = vpop.permute.xlu0 %3449 }
 0x9a9   : > { %v3466_v9 = vrot.slane %v3465_v3, 4  ;;  %v3451_v10 = vrot.slane %v3450_v13, 4 }
 0x9ab   : > { %v3467_v14 = vsel %vm511_vm0, %v3465_v3, %v3466_v9  ;;  %v3452_v18 = vsel %vm464_vm2, %v3450_v13, %v3451_v10 }
 0x9ac   : > { %3469 = vst.msk [vmem:[#allocation7 + $0x10] sm:$0xff] %vm8182_vm8, %v3467_v14  ;;  %3454 = vst.msk [vmem:[#allocation7 + $0x8] sm:$0xff] %vm8182_vm8, %v3452_v18  ;;  %v3495_v22 = vpop.permute.xlu1 %3494  ;;  %v3480_v12 = vpop.permute.xlu0 %3479 }
 0x9ad   : > { %v3496_v5 = vrot.slane %v3495_v22, 4  ;;  %v3481_v7 = vrot.slane %v3480_v12, 4 }
 0x9af   : > { %v3497_v21 = vsel %vm2091_vm12, %v3495_v22, %v3496_v5  ;;  %v3482_v54 = vsel %vm2804_vm1, %v3480_v12, %v3481_v7 }
 0x9b0   : > { %3499 = vst.msk [vmem:[#allocation7 + $0x20] sm:$0xff] %vm8182_vm8, %v3497_v21  ;;  %3484 = vst.msk [vmem:[#allocation7 + $0x18] sm:$0xff] %vm8182_vm8, %v3482_v54  ;;  %v3525_v25 = vpop.permute.xlu1 %3524  ;;  %v3510_v6 = vpop.permute.xlu0 %3509 }
 0x9b1   : > { %v3526_v26 = vrot.slane %v3525_v25, 4  ;;  %v3511_v40 = vrot.slane %v3510_v6, 4 }
 0x9b3   : > { %v3527_v27 = vsel %vm8997_vm14, %v3525_v25, %v3526_v26  ;;  %v3512_v28 = vsel %vm2836_vm5, %v3510_v6, %v3511_v40  ;;  %v6369_v49 = vld [vmem:[#allocation7 + $0x4] ss:$8 sps:$4 sm:$0xff]   ;;  %v6371_v30 = vld [vmem:[#allocation7] ss:$8 sps:$4 sm:$0xff]   ;;  %vm8998_vm14 = vcmask 752640  }
 0x9b4   : > { %3529 = vst.msk [vmem:[#allocation7 + $0x30] sm:$0xff] %vm8182_vm8, %v3527_v27  ;;  %3514 = vst.msk [vmem:[#allocation7 + $0x28] sm:$0xff] %vm8182_vm8, %v3512_v28  ;;  %v3555_v61 = vpop.permute.xlu1 %3554  ;;  %v3540_v41 = vpop.permute.xlu0 %3539  ;;  %4016 = vmatprep.subr.bf16.mxu1 %v6369_v49 }
 0x9b5   : > { %v3556_v31 = vrot.slane %v3555_v61, 4  ;;  %v3541_v36 = vrot.slane %v3540_v41, 4  ;;  %4017 = vmatpush1.bf16.msra.mxu1 %v6371_v30 }
 0x9b7   : > { %v3557_v37 = vsel %vm8852_vm4, %v3555_v61, %v3556_v31  ;;  %v3542_v39 = vsel %vm8851_vm15, %v3540_v41, %v3541_v36  ;;  %v6372_v8 = vld [vmem:[#allocation7 + $0x14] ss:$8 sps:$4 sm:$0xff]   ;;  %v6374_v32 = vld [vmem:[#allocation7 + $0x10] ss:$8 sps:$4 sm:$0xff]   ;;  %vm8999_vm15 = vcmask 703488   ;;  %vm9000_vm4 = vcmask 736256  }
 0x9b8   : > { %3559 = vst.msk [vmem:[#allocation7 + $0x40] sm:$0xff] %vm8182_vm8, %v3557_v37  ;;  %3544 = vst.msk [vmem:[#allocation7 + $0x38] sm:$0xff] %vm8182_vm8, %v3542_v39  ;;  %v3585_v60 = vpop.permute.xlu1 %3584  ;;  %v3570_v0 = vpop.permute.xlu0 %3569  ;;  %4018 = vmatprep.subr.bf16.mxu1 %v6372_v8 }
 0x9b9   : > { %v3586_v43 = vrot.slane %v3585_v60, 4  ;;  %v3571_v44 = vrot.slane %v3570_v0, 4  ;;  %4019 = vmatpush1.bf16.msra.mxu1 %v6374_v32 }
 0x9bb   : > { %v3587_v57 = vsel %vm8853_vm9, %v3585_v60, %v3586_v43  ;;  %v3572_v45 = vsel %vm8998_vm14, %v3570_v0, %v3571_v44  ;;  %v6375_v62 = vld [vmem:[#allocation7 + $0x24] ss:$8 sps:$4 sm:$0xff]   ;;  %v6377_v16 = vld [vmem:[#allocation7 + $0x20] ss:$8 sps:$4 sm:$0xff]   ;;  %vm9001_vm14 = vcmask 687104   ;;  %vm9002_vm9 = vcmask 695296  }
 0x9bc   : > { %3589 = vst.msk [vmem:[#allocation7 + $0x50] sm:$0xff] %vm8182_vm8, %v3587_v57  ;;  %3574 = vst.msk [vmem:[#allocation7 + $0x48] sm:$0xff] %vm8182_vm8, %v3572_v45  ;;  %v3615_v47 = vpop.permute.xlu1 %3614  ;;  %v3600_v48 = vpop.permute.xlu0 %3599  ;;  %4020 = vmatprep.subr.bf16.mxu1 %v6375_v62 }
 0x9bd   : > { %v3616_v17 = vrot.slane %v3615_v47, 4  ;;  %v3601_v35 = vrot.slane %v3600_v48, 4  ;;  %4021 = vmatpush1.bf16.msra.mxu1 %v6377_v16 }
 0x9bf   : > { %v3617_v52 = vsel %vm8999_vm15, %v3615_v47, %v3616_v17  ;;  %v3602_v20 = vsel %vm9000_vm4, %v3600_v48, %v3601_v35  ;;  %v6378_v55 = vld [vmem:[#allocation7 + $0x34] ss:$8 sps:$4 sm:$0xff]   ;;  %v6380_v38 = vld [vmem:[#allocation7 + $0x30] ss:$8 sps:$4 sm:$0xff]   ;;  %vm9003_vm4 = vcmask 654336   ;;  %vm9004_vm15 = vcmask 457728  }
 0x9c0   : > { %3619 = vst.msk [vmem:[#allocation7 + $0x60] sm:$0xff] %vm8182_vm8, %v3617_v52  ;;  %3604 = vst.msk [vmem:[#allocation7 + $0x58] sm:$0xff] %vm8182_vm8, %v3602_v20  ;;  %v3645_v19 = vpop.permute.xlu1 %3644  ;;  %v3630_v56 = vpop.permute.xlu0 %3629  ;;  %4022 = vmatprep.subr.bf16.mxu1 %v6378_v55 }
 0x9c1   : > { %v3646_v53 = vrot.slane %v3645_v19, 4  ;;  %v3631_v58 = vrot.slane %v3630_v56, 4  ;;  %4023 = vmatpush1.bf16.msra.mxu1 %v6380_v38 }
 0x9c3   : > { %v3647_v23 = vsel %vm9001_vm14, %v3645_v19, %v3646_v53  ;;  %v3632_v42 = vsel %vm9002_vm9, %v3630_v56, %v3631_v58  ;;  %v6381_v59 = vld [vmem:[#allocation7 + $0x44] ss:$8 sps:$4 sm:$0xff]   ;;  %v6383_v1 = vld [vmem:[#allocation7 + $0x40] ss:$8 sps:$4 sm:$0xff]   ;;  %vm9005_vm9 = vcmask 637952   ;;  %vm9006_vm14 = vcmask 441344  }
 0x9c4   : > { %3649 = vst.msk [vmem:[#allocation7 + $0x70] sm:$0xff] %vm8182_vm8, %v3647_v23  ;;  %3634 = vst.msk [vmem:[#allocation7 + $0x68] sm:$0xff] %vm8182_vm8, %v3632_v42  ;;  %v3675_v33 = vpop.permute.xlu1 %3674  ;;  %v3660_v11 = vpop.permute.xlu0 %3659  ;;  %4024 = vmatprep.subr.bf16.mxu1 %v6381_v59  ;;  %v5643_v23 = vcombine.low %v8344_v2, %v8344_v2 }
 0x9c5   : > { %v3676_v15 = vrot.slane %v3675_v33, 4  ;;  %v3661_v34 = vrot.slane %v3660_v11, 4  ;;  %4025 = vmatpush1.bf16.msra.mxu1 %v6383_v1 }
 0x9c7   : > { %v3677_v24 = vsel %vm3012_vm6, %v3675_v33, %v3676_v15  ;;  %v3662_v29 = vsel %vm9003_vm4, %v3660_v11, %v3661_v34  ;;  %v6384_v4 = vld [vmem:[#allocation7 + $0x54] ss:$8 sps:$4 sm:$0xff]   ;;  %v6386_v46 = vld [vmem:[#allocation7 + $0x50] ss:$8 sps:$4 sm:$0xff]   ;;  %vm9007_vm4 = vcmask 449536  }
 0x9c8   : > { %3679 = vst.msk [vmem:[#allocation7 + $0x80] sm:$0xff] %vm8182_vm8, %v3677_v24  ;;  %3664 = vst.msk [vmem:[#allocation7 + $0x78] sm:$0xff] %vm8182_vm8, %v3662_v29  ;;  %v3705_v3 = vpop.permute.xlu1 %3704  ;;  %v3690_v13 = vpop.permute.xlu0 %3689  ;;  %4026 = vmatprep.subr.bf16.mxu1 %v6384_v4  ;;  %v4057_v4 = vld [vmem:[#allocation5] sm:$0xff] }
 0x9c9   : > { %v3706_v9 = vrot.slane %v3705_v3, 4  ;;  %v3691_v10 = vrot.slane %v3690_v13, 4  ;;  %4027 = vmatpush1.bf16.msra.mxu1 %v6386_v46 }
 0x9cb   : > { %v3707_v14 = vsel %vm9004_vm15, %v3705_v3, %v3706_v9  ;;  %v3692_v18 = vsel %vm9005_vm9, %v3690_v13, %v3691_v10  ;;  %v6387_v22 = vld [vmem:[#allocation7 + $0x64] ss:$8 sps:$4 sm:$0xff]   ;;  %v6389_v12 = vld [vmem:[#allocation7 + $0x60] ss:$8 sps:$4 sm:$0xff]   ;;  %vm9008_vm15 = vcmask 400384   ;;  %vm9009_vm9 = vcmask 408576  }
 0x9cc   : > { %3709 = vst.msk [vmem:[#allocation7 + $0x90] sm:$0xff] %vm8182_vm8, %v3707_v14  ;;  %3694 = vst.msk [vmem:[#allocation7 + $0x88] sm:$0xff] %vm8182_vm8, %v3692_v18  ;;  %v3735_v5 = vpop.permute.xlu1 %3734  ;;  %v3720_v7 = vpop.permute.xlu0 %3719  ;;  %4028 = vmatprep.subr.bf16.mxu1 %v6387_v22  ;;  %v4058_v13 = vld [vmem:[#allocation5 + $0x8] sm:$0xff] }
 0x9cd   : > { %v3736_v21 = vrot.slane %v3735_v5, 4  ;;  %v3721_v54 = vrot.slane %v3720_v7, 4  ;;  %4029 = vmatpush1.bf16.msra.mxu1 %v6389_v12 }
 0x9cf   : > { %v3737_v25 = vsel %vm9006_vm14, %v3735_v5, %v3736_v21  ;;  %v3722_v6 = vsel %vm9007_vm4, %v3720_v7, %v3721_v54  ;;  %v6390_v26 = vld [vmem:[#allocation7 + $0x74] ss:$8 sps:$4 sm:$0xff]   ;;  %v6392_v40 = vld [vmem:[#allocation7 + $0x70] ss:$8 sps:$4 sm:$0xff]   ;;  %vm9010_vm14 = vcmask 359424   ;;  %vm9011_vm4 = vcmask 1043456  }
 0x9d0   : > { %3739 = vst.msk [vmem:[#allocation7 + $0xa0] sm:$0xff] %vm8182_vm8, %v3737_v25  ;;  %3724 = vst.msk [vmem:[#allocation7 + $0x98] sm:$0xff] %vm8182_vm8, %v3722_v6  ;;  %v3765_v27 = vpop.permute.xlu1 %3764  ;;  %v3750_v28 = vpop.permute.xlu0 %3749  ;;  %4030 = vmatprep.subr.bf16.mxu1 %v6390_v26  ;;  %v4511_v21 = vld [vmem:[#allocation16 + $0x10] sm:$0xff] }
 0x9d1   : > { %v3766_v49 = vrot.slane %v3765_v27, 4  ;;  %v3751_v30 = vrot.slane %v3750_v28, 4  ;;  %4031 = vmatpush1.bf16.msra.mxu1 %v6392_v40  ;;  %v8467_v54 = vld [vmem:[#allocation14 + $0x10] sm:$0xff] }
 0x9d2   : > { %v5703_v25 = vcombine.high %v8467_v54, %v8467_v54 }
 0x9d3   : > { %v3767_v61 = vsel %vm9008_vm15, %v3765_v27, %v3766_v49  ;;  %v3752_v41 = vsel %vm9009_vm9, %v3750_v28, %v3751_v30  ;;  %v6393_v31 = vld [vmem:[#allocation7 + $0x84] ss:$8 sps:$4 sm:$0xff]   ;;  %v6395_v36 = vld [vmem:[#allocation7 + $0x80] ss:$8 sps:$4 sm:$0xff]   ;;  %vm9012_vm15 = vmmov %vm9011_vm4  ;;  %vm9013_vm9 = vcmask 367616  }
 0x9d4   : > { %3769 = vst.msk [vmem:[#allocation7 + $0xb0] sm:$0xff] %vm8182_vm8, %v3767_v61  ;;  %3754 = vst.msk [vmem:[#allocation7 + $0xa8] sm:$0xff] %vm8182_vm8, %v3752_v41  ;;  %v3795_v37 = vpop.permute.xlu1 %3794  ;;  %v3780_v39 = vpop.permute.xlu0 %3779  ;;  %4032 = vmatprep.subr.bf16.mxu1 %v6393_v31 }
 0x9d5   : > { %v3796_v8 = vrot.slane %v3795_v37, 4  ;;  %v3781_v32 = vrot.slane %v3780_v39, 4  ;;  %4033 = vmatpush1.bf16.msra.mxu1 %v6395_v36 }
 0x9d7   : > { %v3797_v60 = vsel %vm9010_vm14, %v3795_v37, %v3796_v8  ;;  %v3782_v0 = vsel %vm3124_vm11, %v3780_v39, %v3781_v32  ;;  %v6396_v43 = vld [vmem:[#allocation7 + $0x94] ss:$8 sps:$4 sm:$0xff]   ;;  %v6398_v44 = vld [vmem:[#allocation7 + $0x90] ss:$8 sps:$4 sm:$0xff]   ;;  %vm9016_vm14 = vcmask 949248  }
 0x9d8   : > { %3799 = vst.msk [vmem:[#allocation7 + $0xc0] sm:$0xff] %vm8182_vm8, %v3797_v60  ;;  %3784 = vst.msk [vmem:[#allocation7 + $0xb8] sm:$0xff] %vm8182_vm8, %v3782_v0  ;;  %v3825_v57 = vpop.permute.xlu1 %3824  ;;  %v3810_v45 = vpop.permute.xlu0 %3809  ;;  %4034 = vmatprep.subr.bf16.mxu1 %v6396_v43 }
 0x9d9   : > { %v3826_v62 = vrot.slane %v3825_v57, 4  ;;  %v3811_v16 = vrot.slane %v3810_v45, 4  ;;  %4035 = vmatpush1.bf16.msra.mxu1 %v6398_v44 }
 0x9db   : > { %v3827_v47 = vsel %vm3172_vm10, %v3825_v57, %v3826_v62  ;;  %v3812_v48 = vsel %vm3156_vm7, %v3810_v45, %v3811_v16  ;;  %v6399_v17 = vld [vmem:[#allocation7 + $0xa4] ss:$8 sps:$4 sm:$0xff]   ;;  %v6401_v35 = vld [vmem:[#allocation7 + $0xa0] ss:$8 sps:$4 sm:$0xff]  }
 0x9dc   : > { %3829 = vst.msk [vmem:[#allocation7 + $0xd0] sm:$0xff] %vm8182_vm8, %v3827_v47  ;;  %3814 = vst.msk [vmem:[#allocation7 + $0xc8] sm:$0xff] %vm8182_vm8, %v3812_v48  ;;  %4036 = vmatprep.subr.bf16.mxu1 %v6399_v17 }
 0x9dd   : > { %4037 = vmatpush1.bf16.msra.mxu1 %v6401_v35 }
 0x9df   : > { %v6402_v52 = vld [vmem:[#allocation7 + $0xb4] ss:$8 sps:$4 sm:$0xff]   ;;  %v6404_v20 = vld [vmem:[#allocation7 + $0xb0] ss:$8 sps:$4 sm:$0xff]  }
 0x9e0   : > { %4038 = vmatprep.subr.bf16.mxu1 %v6402_v52 }
 0x9e1   : > { %4039 = vmatpush1.bf16.msra.mxu1 %v6404_v20 }
 0x9e3   : > { %v6405_v55 = vld [vmem:[#allocation7 + $0xc4] ss:$8 sps:$4 sm:$0xff]   ;;  %v6407_v38 = vld [vmem:[#allocation7 + $0xc0] ss:$8 sps:$4 sm:$0xff]   ;;  %v3858_v19 = vld [vmem:[#allocation7 + $0xd0] sm:$0xff] }
 0x9e4   : > { %4040 = vmatprep.subr.bf16.mxu1 %v6405_v55  ;;  %v5672_v56 = vcombine.high %v3858_v19, %v3858_v19  ;;  %v5671_v53 = vcombine.low %v3858_v19, %v3858_v19 }
 0x9e5   : > { %4041 = vmatpush1.bf16.msra.mxu1 %v6407_v38 }
 0x9e6   : > { %5673 = vmatprep.subr.msk.bf16.mxu1 %vm9011_vm4, %v5672_v56  ;;  %v4011_v58 = vsel %vm9012_vm15, %v5671_v53, 0  ;;  %vm9017_vm4 = vcmask 932864   ;;  %vm9018_vm15 = vcmask 941056  }
 0x9e9   : > { %4043 = vmatpush1.bf16.msra.mxu1 %v4011_v58  ;;  %v3864_v42 = vpop.permute.xlu0 %3863 }
 0x9ec   : > { %4049 = vmatmul.mubr.bf16.vlgmr.msra.gmra.mrb[16].mxu1 %v5643_v23 }
 0x9ed   : > { %5733 = vmatprep.mubr.msk.bf16.mxu1 %vm2737_vm3, %v5703_v25 }
 0xabf   : > { %v4050_v59 = vpop.f32.mrb[16].mxu1 }
 0xac0   : > { %v4051_v1 = vadd.f32 %v4050_v59, %v3864_v42  ;;  %v4052_v33 = vpop.f32.mrb[17].mxu1 }
 0xac1   : > { %v4054_v11 = vpop.f32.mrb[18].mxu1  ;;  %v4053_v34 = vadd.f32 %v4052_v33, %v3864_v42 }
 0xac2   : > { %v4059_v15 = vmul.f32 %v4051_v1, %v8303_v51  ;;  %v4055_v24 = vpop.f32.mrb[19].mxu1 }
 0xac3   : > { %v4060_v29 = vmul.f32 %v4053_v34, %v8307_v63 }
 0xac4   : > { %4063 = vrot.lane.b32.xlu1 %v4059_v15, %s8996_s20 }
 0xac8   : > { %4065 = vrot.lane.b32.xlu1 %v4060_v29, %s8996_s20 }
 0xb36   : > { %v4064_v46 = vpop.permute.xlu1 %4063 }
 0xb37   : > { %v4070_v2 = vadd.f32 %v4064_v46, %v4057_v4 }
 0xb39   : > { %4072 = vst.msk [vmem:[#allocation5] sm:$0xff] %vm3426_vm13, %v4070_v2 }
 0xb3a   : > { %v4066_v3 = vpop.permute.xlu1 %4065 }
 0xb3b   : > { %v4067_v9 = vsel %vm3156_vm7, %v4064_v46, %v4066_v3 }
 0xb3c   : > { %v4071_v10 = vadd.f32 %v4067_v9, %v4058_v13 }
 0xb3e   : > { %4073 = vst.msk [vmem:[#allocation5 + $0x8] sm:$0xff] %vm9013_vm9, %v4071_v10  ;;  %vm9019_vm9 = vcmask 744448  }
 0xb40   : > { %v4074_v14 = vld [vmem:[#allocation5] sm:$0xff] }
 0xb41   : > { %v4076_v18 = vmax.f32 %v4074_v14, 0.0 }
 0xb43   : > { %4078 = vst [vmem:[#allocation6] sm:$0xff] %v4076_v18 }
 0xb45   : > { %v4075_v22 = vld [vmem:[#allocation5 + $0x8] sm:$0xff] }
 0xb46   : > { %v4077_v12 = vmax.f32 %v4075_v22, 0.0 }
 0xb48   : > { %4079 = vst.msk [vmem:[#allocation6 + $0x8] sm:$0xff] %vm2737_vm3, %v4077_v12 }
 0xb4f   : > { %v4107_v5 = vld [vmem:[#allocation6 + $0x8] sm:$0xff] }
 0xb50   : > { %v5855_v7 = vpack.c.bf16 %v4107_v5, %v4076_v18 }
 0xb52   : > { %4115 = vrot.lane.b32.xlu1 %v5855_v7, %s8964_s1  ;;  %4100 = vrot.lane.b32.xlu0 %v5855_v7, %s8963_s16  ;;  %4090 = vst.msk [vmem:[#allocation7] sm:$0xff] %vm8182_vm8, %v5855_v7 }
 0xb56   : > { %4145 = vrot.lane.b32.xlu1 %v5855_v7, %s8980_s23  ;;  %4130 = vrot.lane.b32.xlu0 %v5855_v7, %s8981_s22 }
 0xb5a   : > { %4175 = vrot.lane.b32.xlu1 %v5855_v7, %s8974_s14  ;;  %4160 = vrot.lane.b32.xlu0 %v5855_v7, %s8982_s10 }
 0xb5e   : > { %4205 = vrot.lane.b32.xlu1 %v5855_v7, %s8983_s2  ;;  %4190 = vrot.lane.b32.xlu0 %v5855_v7, %s8984_s9 }
 0xb62   : > { %4235 = vrot.lane.b32.xlu1 %v5855_v7, %s9014_s30  ;;  %4220 = vrot.lane.b32.xlu0 %v5855_v7, %s8985_s0 }
 0xb66   : > { %4265 = vrot.lane.b32.xlu1 %v5855_v7, %s9015_s19  ;;  %4250 = vrot.lane.b32.xlu0 %v5855_v7, %s8986_s3 }
 0xb6a   : > { %4295 = vrot.lane.b32.xlu1 %v5855_v7, %s8987_s4  ;;  %4280 = vrot.lane.b32.xlu0 %v5855_v7, %s8988_s5 }
 0xb6e   : > { %4325 = vrot.lane.b32.xlu1 %v5855_v7, %s8989_s6  ;;  %4310 = vrot.lane.b32.xlu0 %v5855_v7, %s8990_s7 }
 0xb72   : > { %4355 = vrot.lane.b32.xlu1 %v5855_v7, %s8905_s17  ;;  %4340 = vrot.lane.b32.xlu0 %v5855_v7, %s8991_s13 }
 0xb76   : > { %4385 = vrot.lane.b32.xlu1 %v5855_v7, %s8907_s12  ;;  %4370 = vrot.lane.b32.xlu0 %v5855_v7, %s8906_s26 }
 0xb7a   : > { %4415 = vrot.lane.b32.xlu1 %v5855_v7, %s8992_s24  ;;  %4400 = vrot.lane.b32.xlu0 %v5855_v7, %s8993_s25 }
 0xb7e   : > { %4445 = vrot.lane.b32.xlu1 %v5855_v7, %s8908_s15  ;;  %4430 = vrot.lane.b32.xlu0 %v5855_v7, %s8994_s29 }
 0xb82   : > { %4475 = vrot.lane.b32.xlu1 %v5855_v7, %s8995_s28  ;;  %4460 = vrot.lane.b32.xlu0 %v5855_v7, %s8996_s20 }
 0xb86   : > { %4514 = vperm.xlu0 %6301, %v4511_v21  }
 0xbc4   : > { %v4116_v6 = vpop.permute.xlu1 %4115  ;;  %v4101_v26 = vpop.permute.xlu0 %4100 }
 0xbc5   : > { %v4117_v40 = vrot.slane %v4116_v6, 4  ;;  %v4102_v27 = vrot.slane %v4101_v26, 4 }
 0xbc7   : > { %v4118_v28 = vsel %vm511_vm0, %v4116_v6, %v4117_v40  ;;  %v4103_v49 = vsel %vm464_vm2, %v4101_v26, %v4102_v27 }
 0xbc8   : > { %4120 = vst.msk [vmem:[#allocation7 + $0x10] sm:$0xff] %vm8182_vm8, %v4118_v28  ;;  %4105 = vst.msk [vmem:[#allocation7 + $0x8] sm:$0xff] %vm8182_vm8, %v4103_v49  ;;  %v4146_v30 = vpop.permute.xlu1 %4145  ;;  %v4131_v61 = vpop.permute.xlu0 %4130 }
 0xbc9   : > { %v4147_v41 = vrot.slane %v4146_v30, 4  ;;  %v4132_v31 = vrot.slane %v4131_v61, 4 }
 0xbcb   : > { %v4148_v36 = vsel %vm2091_vm12, %v4146_v30, %v4147_v41  ;;  %v4133_v37 = vsel %vm2804_vm1, %v4131_v61, %v4132_v31 }
 0xbcc   : > { %4150 = vst.msk [vmem:[#allocation7 + $0x20] sm:$0xff] %vm8182_vm8, %v4148_v36  ;;  %4135 = vst.msk [vmem:[#allocation7 + $0x18] sm:$0xff] %vm8182_vm8, %v4133_v37  ;;  %v4176_v39 = vpop.permute.xlu1 %4175  ;;  %v4161_v8 = vpop.permute.xlu0 %4160 }
 0xbcd   : > { %v4177_v32 = vrot.slane %v4176_v39, 4  ;;  %v4162_v60 = vrot.slane %v4161_v8, 4 }
 0xbcf   : > { %v4178_v0 = vsel %vm9016_vm14, %v4176_v39, %v4177_v32  ;;  %v4163_v43 = vsel %vm2836_vm5, %v4161_v8, %v4162_v60  ;;  %v6412_v44 = vld [vmem:[#allocation7 + $0x4] ss:$8 sps:$4 sm:$0xff]   ;;  %v6414_v57 = vld [vmem:[#allocation7] ss:$8 sps:$4 sm:$0xff]   ;;  %vm9020_vm14 = vcmask 752640  }
 0xbd0   : > { %4180 = vst.msk [vmem:[#allocation7 + $0x30] sm:$0xff] %vm8182_vm8, %v4178_v0  ;;  %4165 = vst.msk [vmem:[#allocation7 + $0x28] sm:$0xff] %vm8182_vm8, %v4163_v43  ;;  %v4206_v45 = vpop.permute.xlu1 %4205  ;;  %v4191_v62 = vpop.permute.xlu0 %4190  ;;  %4667 = vmatprep.subr.bf16.mxu1 %v6412_v44 }
 0xbd1   : > { %v4207_v16 = vrot.slane %v4206_v45, 4  ;;  %v4192_v47 = vrot.slane %v4191_v62, 4  ;;  %4668 = vmatpush1.bf16.msra.mxu1 %v6414_v57 }
 0xbd3   : > { %v4208_v48 = vsel %vm9017_vm4, %v4206_v45, %v4207_v16  ;;  %v4193_v17 = vsel %vm9018_vm15, %v4191_v62, %v4192_v47  ;;  %v6415_v35 = vld [vmem:[#allocation7 + $0x14] ss:$8 sps:$4 sm:$0xff]   ;;  %v6417_v52 = vld [vmem:[#allocation7 + $0x10] ss:$8 sps:$4 sm:$0xff]   ;;  %vm9021_vm4 = vcmask 703488   ;;  %vm9022_vm15 = vcmask 736256  }
 0xbd4   : > { %4210 = vst.msk [vmem:[#allocation7 + $0x40] sm:$0xff] %vm8182_vm8, %v4208_v48  ;;  %4195 = vst.msk [vmem:[#allocation7 + $0x38] sm:$0xff] %vm8182_vm8, %v4193_v17  ;;  %v4236_v20 = vpop.permute.xlu1 %4235  ;;  %v4221_v55 = vpop.permute.xlu0 %4220  ;;  %4669 = vmatprep.subr.bf16.mxu1 %v6415_v35 }
 0xbd5   : > { %v4237_v38 = vrot.slane %v4236_v20, 4  ;;  %v4222_v19 = vrot.slane %v4221_v55, 4  ;;  %4670 = vmatpush1.bf16.msra.mxu1 %v6417_v52 }
 0xbd7   : > { %v4238_v56 = vsel %vm9019_vm9, %v4236_v20, %v4237_v38  ;;  %v4223_v53 = vsel %vm9020_vm14, %v4221_v55, %v4222_v19  ;;  %v6418_v58 = vld [vmem:[#allocation7 + $0x24] ss:$8 sps:$4 sm:$0xff]   ;;  %v6420_v23 = vld [vmem:[#allocation7 + $0x20] ss:$8 sps:$4 sm:$0xff]   ;;  %vm9023_vm9 = vcmask 687104   ;;  %vm9024_vm14 = vcmask 695296  }
 0xbd8   : > { %4240 = vst.msk [vmem:[#allocation7 + $0x50] sm:$0xff] %vm8182_vm8, %v4238_v56  ;;  %4225 = vst.msk [vmem:[#allocation7 + $0x48] sm:$0xff] %vm8182_vm8, %v4223_v53  ;;  %v4266_v42 = vpop.permute.xlu1 %4265  ;;  %v4251_v59 = vpop.permute.xlu0 %4250  ;;  %4671 = vmatprep.subr.bf16.mxu1 %v6418_v58 }
 0xbd9   : > { %v4267_v1 = vrot.slane %v4266_v42, 4  ;;  %v4252_v33 = vrot.slane %v4251_v59, 4  ;;  %4672 = vmatpush1.bf16.msra.mxu1 %v6420_v23 }
 0xbdb   : > { %v4268_v11 = vsel %vm9021_vm4, %v4266_v42, %v4267_v1  ;;  %v4253_v15 = vsel %vm9022_vm15, %v4251_v59, %v4252_v33  ;;  %v6421_v34 = vld [vmem:[#allocation7 + $0x34] ss:$8 sps:$4 sm:$0xff]   ;;  %v6423_v24 = vld [vmem:[#allocation7 + $0x30] ss:$8 sps:$4 sm:$0xff]   ;;  %vm9025_vm4 = vcmask 654336   ;;  %vm9026_vm15 = vcmask 457728  }
 0xbdc   : > { %4270 = vst.msk [vmem:[#allocation7 + $0x60] sm:$0xff] %vm8182_vm8, %v4268_v11  ;;  %4255 = vst.msk [vmem:[#allocation7 + $0x58] sm:$0xff] %vm8182_vm8, %v4253_v15  ;;  %v4296_v29 = vpop.permute.xlu1 %4295  ;;  %v4281_v4 = vpop.permute.xlu0 %4280  ;;  %4673 = vmatprep.subr.bf16.mxu1 %v6421_v34 }
 0xbdd   : > { %v4297_v46 = vrot.slane %v4296_v29, 4  ;;  %v4282_v2 = vrot.slane %v4281_v4, 4  ;;  %4674 = vmatpush1.bf16.msra.mxu1 %v6423_v24 }
 0xbdf   : > { %v4298_v3 = vsel %vm9023_vm9, %v4296_v29, %v4297_v46  ;;  %v4283_v13 = vsel %vm9024_vm14, %v4281_v4, %v4282_v2  ;;  %v6424_v9 = vld [vmem:[#allocation7 + $0x44] ss:$8 sps:$4 sm:$0xff]   ;;  %v6426_v10 = vld [vmem:[#allocation7 + $0x40] ss:$8 sps:$4 sm:$0xff]   ;;  %vm9027_vm9 = vcmask 637952   ;;  %vm9028_vm14 = vcmask 441344  }
 0xbe0   : > { %4300 = vst.msk [vmem:[#allocation7 + $0x70] sm:$0xff] %vm8182_vm8, %v4298_v3  ;;  %4285 = vst.msk [vmem:[#allocation7 + $0x68] sm:$0xff] %vm8182_vm8, %v4283_v13  ;;  %v4326_v14 = vpop.permute.xlu1 %4325  ;;  %v4311_v18 = vpop.permute.xlu0 %4310  ;;  %4675 = vmatprep.subr.bf16.mxu1 %v6424_v9  ;;  %v5702_v3 = vcombine.low %v8467_v54, %v8467_v54 }
 0xbe1   : > { %v4327_v22 = vrot.slane %v4326_v14, 4  ;;  %v4312_v12 = vrot.slane %v4311_v18, 4  ;;  %4676 = vmatpush1.bf16.msra.mxu1 %v6426_v10 }
 0xbe3   : > { %v4328_v5 = vsel %vm3012_vm6, %v4326_v14, %v4327_v22  ;;  %v4313_v7 = vsel %vm9025_vm4, %v4311_v18, %v4312_v12  ;;  %v6427_v21 = vld [vmem:[#allocation7 + $0x54] ss:$8 sps:$4 sm:$0xff]   ;;  %v6429_v25 = vld [vmem:[#allocation7 + $0x50] ss:$8 sps:$4 sm:$0xff]   ;;  %vm9029_vm4 = vcmask 449536  }
 0xbe4   : > { %4330 = vst.msk [vmem:[#allocation7 + $0x80] sm:$0xff] %vm8182_vm8, %v4328_v5  ;;  %4315 = vst.msk [vmem:[#allocation7 + $0x78] sm:$0xff] %vm8182_vm8, %v4313_v7  ;;  %v4356_v6 = vpop.permute.xlu1 %4355  ;;  %v4341_v26 = vpop.permute.xlu0 %4340  ;;  %4677 = vmatprep.subr.bf16.mxu1 %v6427_v21 }
 0xbe5   : > { %v4357_v40 = vrot.slane %v4356_v6, 4  ;;  %v4342_v27 = vrot.slane %v4341_v26, 4  ;;  %4678 = vmatpush1.bf16.msra.mxu1 %v6429_v25 }
 0xbe7   : > { %v4358_v28 = vsel %vm9026_vm15, %v4356_v6, %v4357_v40  ;;  %v4343_v49 = vsel %vm9027_vm9, %v4341_v26, %v4342_v27  ;;  %v6430_v30 = vld [vmem:[#allocation7 + $0x64] ss:$8 sps:$4 sm:$0xff]   ;;  %v6432_v61 = vld [vmem:[#allocation7 + $0x60] ss:$8 sps:$4 sm:$0xff]   ;;  %vm9030_vm15 = vcmask 400384   ;;  %vm9031_vm9 = vcmask 408576  }
 0xbe8   : > { %4360 = vst.msk [vmem:[#allocation7 + $0x90] sm:$0xff] %vm8182_vm8, %v4358_v28  ;;  %4345 = vst.msk [vmem:[#allocation7 + $0x88] sm:$0xff] %vm8182_vm8, %v4343_v49  ;;  %v4386_v41 = vpop.permute.xlu1 %4385  ;;  %v4371_v31 = vpop.permute.xlu0 %4370  ;;  %4679 = vmatprep.subr.bf16.mxu1 %v6430_v30  ;;  %v5154_v49 = vld [vmem:[#allocation16 + $0x18] sm:$0xff] }
 0xbe9   : > { %v4387_v36 = vrot.slane %v4386_v41, 4  ;;  %v4372_v37 = vrot.slane %v4371_v31, 4  ;;  %4680 = vmatpush1.bf16.msra.mxu1 %v6432_v61  ;;  %v8589_v30 = vld [vmem:[#allocation14 + $0x18] sm:$0xff] }
 0xbea   : > { %v5762_v61 = vcombine.high %v8589_v30, %v8589_v30  ;;  %v5761_v50 = vcombine.low %v8589_v30, %v8589_v30  ;;  %v5351_v30 = vld [vmem:[#allocation5] sm:$0xff] }
 0xbeb   : > { %v4388_v39 = vsel %vm9028_vm14, %v4386_v41, %v4387_v36  ;;  %v4373_v8 = vsel %vm9029_vm4, %v4371_v31, %v4372_v37  ;;  %v6433_v32 = vld [vmem:[#allocation7 + $0x74] ss:$8 sps:$4 sm:$0xff]   ;;  %v6435_v60 = vld [vmem:[#allocation7 + $0x70] ss:$8 sps:$4 sm:$0xff]   ;;  %vm9032_vm14 = vcmask 359424   ;;  %vm9033_vm4 = vcmask 1043456  }
 0xbec   : > { %4390 = vst.msk [vmem:[#allocation7 + $0xa0] sm:$0xff] %vm8182_vm8, %v4388_v39  ;;  %4375 = vst.msk [vmem:[#allocation7 + $0x98] sm:$0xff] %vm8182_vm8, %v4373_v8  ;;  %v4416_v0 = vpop.permute.xlu1 %4415  ;;  %v4401_v43 = vpop.permute.xlu0 %4400  ;;  %4681 = vmatprep.subr.bf16.mxu1 %v6433_v32  ;;  %5792 = vmatprep.mubr.msk.bf16.mxu0 %vm2737_vm3, %v5762_v61 }
 0xbed   : > { %v4417_v44 = vrot.slane %v4416_v0, 4  ;;  %v4402_v57 = vrot.slane %v4401_v43, 4  ;;  %4682 = vmatpush1.bf16.msra.mxu1 %v6435_v60 }
 0xbef   : > { %v4418_v45 = vsel %vm9030_vm15, %v4416_v0, %v4417_v44  ;;  %v4403_v62 = vsel %vm9031_vm9, %v4401_v43, %v4402_v57  ;;  %v6436_v16 = vld [vmem:[#allocation7 + $0x84] ss:$8 sps:$4 sm:$0xff]   ;;  %v6438_v47 = vld [vmem:[#allocation7 + $0x80] ss:$8 sps:$4 sm:$0xff]   ;;  %vm9034_vm15 = vmmov %vm9033_vm4  ;;  %vm9035_vm9 = vcmask 367616  }
 0xbf0   : > { %4420 = vst.msk [vmem:[#allocation7 + $0xb0] sm:$0xff] %vm8182_vm8, %v4418_v45  ;;  %4405 = vst.msk [vmem:[#allocation7 + $0xa8] sm:$0xff] %vm8182_vm8, %v4403_v62  ;;  %v4446_v48 = vpop.permute.xlu1 %4445  ;;  %v4431_v17 = vpop.permute.xlu0 %4430  ;;  %4683 = vmatprep.subr.bf16.mxu1 %v6436_v16 }
 0xbf1   : > { %v4447_v35 = vrot.slane %v4446_v48, 4  ;;  %v4432_v52 = vrot.slane %v4431_v17, 4  ;;  %4684 = vmatpush1.bf16.msra.mxu1 %v6438_v47 }
 0xbf3   : > { %v4448_v20 = vsel %vm9032_vm14, %v4446_v48, %v4447_v35  ;;  %v4433_v55 = vsel %vm3124_vm11, %v4431_v17, %v4432_v52  ;;  %v6439_v38 = vld [vmem:[#allocation7 + $0x94] ss:$8 sps:$4 sm:$0xff]   ;;  %v6441_v19 = vld [vmem:[#allocation7 + $0x90] ss:$8 sps:$4 sm:$0xff]   ;;  %vm9041_vm14 = vcmask 703488  }
 0xbf4   : > { %4450 = vst.msk [vmem:[#allocation7 + $0xc0] sm:$0xff] %vm8182_vm8, %v4448_v20  ;;  %4435 = vst.msk [vmem:[#allocation7 + $0xb8] sm:$0xff] %vm8182_vm8, %v4433_v55  ;;  %v4476_v56 = vpop.permute.xlu1 %4475  ;;  %v4461_v53 = vpop.permute.xlu0 %4460  ;;  %4685 = vmatprep.subr.bf16.mxu1 %v6439_v38 }
 0xbf5   : > { %v4477_v58 = vrot.slane %v4476_v56, 4  ;;  %v4462_v23 = vrot.slane %v4461_v53, 4  ;;  %4686 = vmatpush1.bf16.msra.mxu1 %v6441_v19 }
 0xbf7   : > { %v4478_v42 = vsel %vm3172_vm10, %v4476_v56, %v4477_v58  ;;  %v4463_v59 = vsel %vm3156_vm7, %v4461_v53, %v4462_v23  ;;  %v6442_v1 = vld [vmem:[#allocation7 + $0xa4] ss:$8 sps:$4 sm:$0xff]   ;;  %v6444_v33 = vld [vmem:[#allocation7 + $0xa0] ss:$8 sps:$4 sm:$0xff]  }
 0xbf8   : > { %4480 = vst.msk [vmem:[#allocation7 + $0xd0] sm:$0xff] %vm8182_vm8, %v4478_v42  ;;  %4465 = vst.msk [vmem:[#allocation7 + $0xc8] sm:$0xff] %vm8182_vm8, %v4463_v59  ;;  %4687 = vmatprep.subr.bf16.mxu1 %v6442_v1 }
 0xbf9   : > { %4688 = vmatpush1.bf16.msra.mxu1 %v6444_v33 }
 0xbfb   : > { %v6445_v11 = vld [vmem:[#allocation7 + $0xb4] ss:$8 sps:$4 sm:$0xff]   ;;  %v6447_v15 = vld [vmem:[#allocation7 + $0xb0] ss:$8 sps:$4 sm:$0xff]  }
 0xbfc   : > { %4689 = vmatprep.subr.bf16.mxu1 %v6445_v11 }
 0xbfd   : > { %4690 = vmatpush1.bf16.msra.mxu1 %v6447_v15 }
 0xbff   : > { %v6448_v34 = vld [vmem:[#allocation7 + $0xc4] ss:$8 sps:$4 sm:$0xff]   ;;  %v6450_v24 = vld [vmem:[#allocation7 + $0xc0] ss:$8 sps:$4 sm:$0xff]   ;;  %v4509_v29 = vld [vmem:[#allocation7 + $0xd0] sm:$0xff] }
 0xc00   : > { %4691 = vmatprep.subr.bf16.mxu1 %v6448_v34  ;;  %v5731_v4 = vcombine.high %v4509_v29, %v4509_v29  ;;  %v5730_v46 = vcombine.low %v4509_v29, %v4509_v29 }
 0xc01   : > { %4692 = vmatpush1.bf16.msra.mxu1 %v6450_v24 }
 0xc02   : > { %5732 = vmatprep.subr.msk.bf16.mxu1 %vm9033_vm4, %v5731_v4  ;;  %v4662_v2 = vsel %vm9034_vm15, %v5730_v46, 0  ;;  %vm9042_vm4 = vcmask 736256   ;;  %vm9043_vm15 = vcmask 687104  }
 0xc05   : > { %4694 = vmatpush1.bf16.msra.mxu1 %v4662_v2  ;;  %v4515_v13 = vpop.permute.xlu0 %4514 }
 0xc08   : > { %4700 = vmatmul.mubr.bf16.vlgmr.msra.gmra.mrb[20].mxu1 %v5702_v3 }
 0xcdb   : > { %v4701_v9 = vpop.f32.mrb[20].mxu1 }
 0xcdc   : > { %v4702_v10 = vadd.f32 %v4701_v9, %v4515_v13  ;;  %v4703_v14 = vpop.f32.mrb[21].mxu1 }
 0xcdd   : > { %v4704_v18 = vadd.f32 %v4703_v14, %v4515_v13  ;;  %v4705_v22 = vpop.f32.mrb[22].mxu1 }
 0xcde   : > { %v4708_v12 = vmul.f32 %v4702_v10, %v8303_v51  ;;  %v4706_v5 = vpop.f32.mrb[23].mxu1 }
 0xcdf   : > { %v4709_v7 = vmul.f32 %v4704_v18, %v8307_v63 }
 0xce0   : > { %v4710_v21 = vmax.f32 %v4708_v12, 0.0 }
 0xce1   : > { %v4711_v25 = vmax.f32 %v4709_v7, 0.0 }
 0xce2   : > { %4714 = vrot.lane.b32.xlu1 %v4710_v21, %s8996_s20 }
 0xce3   : > { %4716 = vrot.lane.b32.xlu0 %v4711_v25, %s8996_s20 }
 0xd54   : > { %v4715_v54 = vpop.permute.xlu1 %4714 }
 0xd55   : > { %4721 = vst.msk [vmem:[#allocation6] sm:$0xff] %vm3426_vm13, %v4715_v54  ;;  %v4717_v6 = vpop.permute.xlu0 %4716 }
 0xd56   : > { %v4718_v26 = vsel %vm3156_vm7, %v4715_v54, %v4717_v6 }
 0xd57   : > { %4722 = vst.msk [vmem:[#allocation6 + $0x8] sm:$0xff] %vm9035_vm9, %v4718_v26  ;;  %vm9044_vm9 = vcmask 695296  }
 0xd5c   : > { %v4749_v40 = vld [vmem:[#allocation6] sm:$0xff] }
 0xd5e   : > { %v4750_v27 = vld [vmem:[#allocation6 + $0x8] sm:$0xff] }
 0xd5f   : > { %v5882_v28 = vpack.c.bf16 %v4750_v27, %v4749_v40 }
 0xd61   : > { %4758 = vrot.lane.b32.xlu0 %v5882_v28, %s8964_s1  ;;  %4743 = vrot.lane.b32.xlu1 %v5882_v28, %s8963_s16  ;;  %4733 = vst.msk [vmem:[#allocation7] sm:$0xff] %vm8182_vm8, %v5882_v28 }
 0xd65   : > { %4788 = vrot.lane.b32.xlu0 %v5882_v28, %s8980_s23  ;;  %4773 = vrot.lane.b32.xlu1 %v5882_v28, %s8981_s22 }
 0xd69   : > { %4818 = vrot.lane.b32.xlu0 %v5882_v28, %s8974_s14  ;;  %4803 = vrot.lane.b32.xlu1 %v5882_v28, %s8982_s10 }
 0xd6d   : > { %4848 = vrot.lane.b32.xlu0 %v5882_v28, %s8983_s2  ;;  %4833 = vrot.lane.b32.xlu1 %v5882_v28, %s8984_s9  ;;  %s5907_s2 = sshll.u32 %s6940_s11, 8 }
 0xd71   : > { %4878 = vrot.lane.b32.xlu0 %v5882_v28, %s9014_s30  ;;  %4863 = vrot.lane.b32.xlu1 %v5882_v28, %s8985_s0  ;;  %s5546_s0 = sshll.u32 %s7183_s18, 4  ;;  %s6873_s30 = smov [#allocation22]  }
 0xd72   : > { %s6730_s11 = sshll.u32 %s6873_s30, 4  ;;  %s6731_s11 = int_to_ptr.vmem [resolvable:$false] %s6730_s11 }
 0xd75   : > { %4908 = vrot.lane.b32.xlu0 %v5882_v28, %s9015_s19  ;;  %4893 = vrot.lane.b32.xlu1 %v5882_v28, %s8986_s3  ;;  %s415_s3 = scalar_lea.vmem [#allocation22], %s5546_s0 }
 0xd79   : > { %4938 = vrot.lane.b32.xlu0 %v5882_v28, %s8987_s4  ;;  %4923 = vrot.lane.b32.xlu1 %v5882_v28, %s8988_s5  ;;  %s5387_s4 = sshll.u32 %s415_s3, 4  ;;  %s8690_s4 = int_to_ptr.vmem [resolvable:$true] %s5387_s4 }
 0xd7a   : > { %p6733_p3 = scmp.lt.s32.totalorder %s8690_s4, %s6731_s11 }
 0xd7d   : > { %4968 = vrot.lane.b32.xlu0 %v5882_v28, %s8989_s6  ;;  %4953 = vrot.lane.b32.xlu1 %v5882_v28, %s8990_s7  ;;  %s8688_s7 = scalar_lea.hbm %s8741_s8, %s5907_s2 }
 0xd81   : > { %4998 = vrot.lane.b32.xlu0 %v5882_v28, %s8905_s17  ;;  %4983 = vrot.lane.b32.xlu1 %v5882_v28, %s8991_s13 }
 0xd85   : > { %5028 = vrot.lane.b32.xlu0 %v5882_v28, %s8907_s12  ;;  %5013 = vrot.lane.b32.xlu1 %v5882_v28, %s8906_s26 }
 0xd89   : > { %5058 = vrot.lane.b32.xlu0 %v5882_v28, %s8992_s24  ;;  %5043 = vrot.lane.b32.xlu1 %v5882_v28, %s8993_s25 }
 0xd8d   : > { %5088 = vrot.lane.b32.xlu0 %v5882_v28, %s8908_s15  ;;  %5073 = vrot.lane.b32.xlu1 %v5882_v28, %s8994_s29  ;;  %s6726_s29 = scalar_lea.vmem %s8690_s4, 256 }
 0xd8e   : > { %p6727_p5 = scmp.ne.s32.totalorder %s8690_s4, %s6726_s29 }
 0xd90   : > { %p6728_p4 = pnand %p6727_p5, %p9056_p7 }
 0xd91   : > { %5118 = vrot.lane.b32.xlu0 %v5882_v28, %s8995_s28  ;;  %5103 = vrot.lane.b32.xlu1 %v5882_v28, %s8996_s20  ;;  %s5373_s28 = scalar_lea.sflag [#allocation10], %s7183_s18 }
 0xd92   : > { %p6729_p1 = pneg %p6728_p4 }
 0xd95   : > { %5157 = vperm.xlu1 %6280, %v5154_v49  }
 0xdd3   : > { %v4759_v41 = vpop.permute.xlu0 %4758  ;;  %v4744_v31 = vpop.permute.xlu1 %4743 }
 0xdd4   : > { %v4760_v36 = vrot.slane %v4759_v41, 4  ;;  %v4745_v37 = vrot.slane %v4744_v31, 4 }
 0xdd6   : > { %v4761_v39 = vsel %vm511_vm0, %v4759_v41, %v4760_v36  ;;  %v4746_v8 = vsel %vm464_vm2, %v4744_v31, %v4745_v37  ;;  %vm9036_vm0 = vcmask 949248   ;;  %vm9037_vm2 = vcmask 932864  }
 0xdd7   : > { %4763 = vst.msk [vmem:[#allocation7 + $0x10] sm:$0xff] %vm8182_vm8, %v4761_v39  ;;  %4748 = vst.msk [vmem:[#allocation7 + $0x8] sm:$0xff] %vm8182_vm8, %v4746_v8  ;;  %v4789_v32 = vpop.permute.xlu0 %4788  ;;  %v4774_v60 = vpop.permute.xlu1 %4773 }
 0xdd8   : > { %v4790_v0 = vrot.slane %v4789_v32, 4  ;;  %v4775_v43 = vrot.slane %v4774_v60, 4 }
 0xdda   : > { %v4791_v44 = vsel %vm2091_vm12, %v4789_v32, %v4790_v0  ;;  %v4776_v57 = vsel %vm2804_vm1, %v4774_v60, %v4775_v43  ;;  %vm9038_vm12 = vcmask 941056   ;;  %vm9039_vm1 = vcmask 744448  }
 0xddb   : > { %4793 = vst.msk [vmem:[#allocation7 + $0x20] sm:$0xff] %vm8182_vm8, %v4791_v44  ;;  %4778 = vst.msk [vmem:[#allocation7 + $0x18] sm:$0xff] %vm8182_vm8, %v4776_v57  ;;  %v4819_v45 = vpop.permute.xlu0 %4818  ;;  %v4804_v62 = vpop.permute.xlu1 %4803 }
 0xddc   : > { %v4820_v16 = vrot.slane %v4819_v45, 4  ;;  %v4805_v47 = vrot.slane %v4804_v62, 4 }
 0xdde   : > { %v4821_v48 = vsel %vm9036_vm0, %v4819_v45, %v4820_v16  ;;  %v4806_v17 = vsel %vm2836_vm5, %v4804_v62, %v4805_v47  ;;  %v6455_v35 = vld [vmem:[#allocation7] ss:$8 sps:$4 sm:$0xff]   ;;  %v6457_v52 = vld [vmem:[#allocation7 + $0x4] ss:$8 sps:$4 sm:$0xff]   ;;  %vm9040_vm5 = vcmask 752640   ;;  %vm9045_vm0 = vcmask 654336  }
 0xddf   : > { %4823 = vst.msk [vmem:[#allocation7 + $0x30] sm:$0xff] %vm8182_vm8, %v4821_v48  ;;  %4808 = vst.msk [vmem:[#allocation7 + $0x28] sm:$0xff] %vm8182_vm8, %v4806_v17  ;;  %v4849_v20 = vpop.permute.xlu0 %4848  ;;  %v4834_v55 = vpop.permute.xlu1 %4833  ;;  %5310 = vmatprep.subr.bf16.mxu0 %v6457_v52 }
 0xde0   : > { %v4850_v38 = vrot.slane %v4849_v20, 4  ;;  %v4835_v19 = vrot.slane %v4834_v55, 4  ;;  %5311 = vmatpush1.bf16.msra.mxu0 %v6455_v35 }
 0xde2   : > { %v4851_v56 = vsel %vm9037_vm2, %v4849_v20, %v4850_v38  ;;  %v4836_v53 = vsel %vm9038_vm12, %v4834_v55, %v4835_v19  ;;  %v6458_v58 = vld [vmem:[#allocation7 + $0x10] ss:$8 sps:$4 sm:$0xff]   ;;  %v6460_v23 = vld [vmem:[#allocation7 + $0x14] ss:$8 sps:$4 sm:$0xff]   ;;  %vm9046_vm2 = vcmask 457728   ;;  %vm9047_vm12 = vcmask 637952  }
 0xde3   : > { %4853 = vst.msk [vmem:[#allocation7 + $0x40] sm:$0xff] %vm8182_vm8, %v4851_v56  ;;  %4838 = vst.msk [vmem:[#allocation7 + $0x38] sm:$0xff] %vm8182_vm8, %v4836_v53  ;;  %v4879_v42 = vpop.permute.xlu0 %4878  ;;  %v4864_v59 = vpop.permute.xlu1 %4863  ;;  %5312 = vmatprep.subr.bf16.mxu0 %v6460_v23 }
 0xde4   : > { %v4880_v1 = vrot.slane %v4879_v42, 4  ;;  %v4865_v33 = vrot.slane %v4864_v59, 4  ;;  %5313 = vmatpush1.bf16.msra.mxu0 %v6458_v58 }
 0xde6   : > { %v4881_v11 = vsel %vm9039_vm1, %v4879_v42, %v4880_v1  ;;  %v4866_v15 = vsel %vm9040_vm5, %v4864_v59, %v4865_v33  ;;  %v6461_v34 = vld [vmem:[#allocation7 + $0x20] ss:$8 sps:$4 sm:$0xff]   ;;  %v6463_v24 = vld [vmem:[#allocation7 + $0x24] ss:$8 sps:$4 sm:$0xff]   ;;  %vm9049_vm1 = vcmask 449536   ;;  %vm9050_vm5 = vcmask 400384  }
 0xde7   : > { %4883 = vst.msk [vmem:[#allocation7 + $0x50] sm:$0xff] %vm8182_vm8, %v4881_v11  ;;  %4868 = vst.msk [vmem:[#allocation7 + $0x48] sm:$0xff] %vm8182_vm8, %v4866_v15  ;;  %v4909_v29 = vpop.permute.xlu0 %4908  ;;  %v4894_v4 = vpop.permute.xlu1 %4893  ;;  %5314 = vmatprep.subr.bf16.mxu0 %v6463_v24 }
 0xde8   : > { %v4910_v46 = vrot.slane %v4909_v29, 4  ;;  %v4895_v2 = vrot.slane %v4894_v4, 4  ;;  %5315 = vmatpush1.bf16.msra.mxu0 %v6461_v34 }
 0xdea   : > { %v4911_v3 = vsel %vm9041_vm14, %v4909_v29, %v4910_v46  ;;  %v4896_v13 = vsel %vm9042_vm4, %v4894_v4, %v4895_v2  ;;  %v6464_v9 = vld [vmem:[#allocation7 + $0x30] ss:$8 sps:$4 sm:$0xff]   ;;  %v6466_v10 = vld [vmem:[#allocation7 + $0x34] ss:$8 sps:$4 sm:$0xff]   ;;  %vm9051_vm14 = vcmask 408576   ;;  %vm9052_vm4 = vcmask 359424  }
 0xdeb   : > { %4913 = vst.msk [vmem:[#allocation7 + $0x60] sm:$0xff] %vm8182_vm8, %v4911_v3  ;;  %4898 = vst.msk [vmem:[#allocation7 + $0x58] sm:$0xff] %vm8182_vm8, %v4896_v13  ;;  %v4939_v14 = vpop.permute.xlu0 %4938  ;;  %v4924_v18 = vpop.permute.xlu1 %4923  ;;  %5316 = vmatprep.subr.bf16.mxu0 %v6466_v10 }
 0xdec   : > { %v4940_v22 = vrot.slane %v4939_v14, 4  ;;  %v4925_v12 = vrot.slane %v4924_v18, 4  ;;  %5317 = vmatpush1.bf16.msra.mxu0 %v6464_v9 }
 0xdee   : > { %v4941_v5 = vsel %vm9043_vm15, %v4939_v14, %v4940_v22  ;;  %v4926_v7 = vsel %vm9044_vm9, %v4924_v18, %v4925_v12  ;;  %v6467_v21 = vld [vmem:[#allocation7 + $0x40] ss:$8 sps:$4 sm:$0xff]   ;;  %v6469_v25 = vld [vmem:[#allocation7 + $0x44] ss:$8 sps:$4 sm:$0xff]  }
 0xdef   : > { %4943 = vst.msk [vmem:[#allocation7 + $0x70] sm:$0xff] %vm8182_vm8, %v4941_v5  ;;  %4928 = vst.msk [vmem:[#allocation7 + $0x68] sm:$0xff] %vm8182_vm8, %v4926_v7  ;;  %v4969_v54 = vpop.permute.xlu0 %4968  ;;  %v4954_v6 = vpop.permute.xlu1 %4953  ;;  %5318 = vmatprep.subr.bf16.mxu0 %v6469_v25 }
 0xdf0   : > { %v4970_v26 = vrot.slane %v4969_v54, 4  ;;  %v4955_v40 = vrot.slane %v4954_v6, 4  ;;  %5319 = vmatpush1.bf16.msra.mxu0 %v6467_v21 }
 0xdf2   : > { %v4971_v27 = vsel %vm3012_vm6, %v4969_v54, %v4970_v26  ;;  %v4956_v28 = vsel %vm9045_vm0, %v4954_v6, %v4955_v40  ;;  %v6470_v49 = vld [vmem:[#allocation7 + $0x50] ss:$8 sps:$4 sm:$0xff]   ;;  %v6472_v61 = vld [vmem:[#allocation7 + $0x54] ss:$8 sps:$4 sm:$0xff]   ;;  %vm9048_vm6 = vcmask 441344  }
 0xdf3   : > { %4973 = vst.msk [vmem:[#allocation7 + $0x80] sm:$0xff] %vm8182_vm8, %v4971_v27  ;;  %4958 = vst.msk [vmem:[#allocation7 + $0x78] sm:$0xff] %vm8182_vm8, %v4956_v28  ;;  %v4999_v41 = vpop.permute.xlu0 %4998  ;;  %v4984_v31 = vpop.permute.xlu1 %4983  ;;  %5320 = vmatprep.subr.bf16.mxu0 %v6472_v61 }
 0xdf4   : > { %v5000_v36 = vrot.slane %v4999_v41, 4  ;;  %v4985_v37 = vrot.slane %v4984_v31, 4  ;;  %5321 = vmatpush1.bf16.msra.mxu0 %v6470_v49 }
 0xdf6   : > { %v5001_v39 = vsel %vm9046_vm2, %v4999_v41, %v5000_v36  ;;  %v4986_v8 = vsel %vm9047_vm12, %v4984_v31, %v4985_v37  ;;  %v6473_v32 = vld [vmem:[#allocation7 + $0x60] ss:$8 sps:$4 sm:$0xff]   ;;  %v6475_v60 = vld [vmem:[#allocation7 + $0x64] ss:$8 sps:$4 sm:$0xff]  }
 0xdf7   : > { %5003 = vst.msk [vmem:[#allocation7 + $0x90] sm:$0xff] %vm8182_vm8, %v5001_v39  ;;  %4988 = vst.msk [vmem:[#allocation7 + $0x88] sm:$0xff] %vm8182_vm8, %v4986_v8  ;;  %v5029_v0 = vpop.permute.xlu0 %5028  ;;  %v5014_v43 = vpop.permute.xlu1 %5013  ;;  %5322 = vmatprep.subr.bf16.mxu0 %v6475_v60  ;;  %v5352_v41 = vld [vmem:[#allocation5 + $0x8] sm:$0xff] }
 0xdf8   : > { %v5030_v44 = vrot.slane %v5029_v0, 4  ;;  %v5015_v57 = vrot.slane %v5014_v43, 4  ;;  %5323 = vmatpush1.bf16.msra.mxu0 %v6473_v32 }
 0xdfa   : > { %v5031_v45 = vsel %vm9048_vm6, %v5029_v0, %v5030_v44  ;;  %v5016_v62 = vsel %vm9049_vm1, %v5014_v43, %v5015_v57  ;;  %v6476_v16 = vld [vmem:[#allocation7 + $0x70] ss:$8 sps:$4 sm:$0xff]   ;;  %v6478_v47 = vld [vmem:[#allocation7 + $0x74] ss:$8 sps:$4 sm:$0xff]  }
 0xdfb   : > { %5033 = vst.msk [vmem:[#allocation7 + $0xa0] sm:$0xff] %vm8182_vm8, %v5031_v45  ;;  %5018 = vst.msk [vmem:[#allocation7 + $0x98] sm:$0xff] %vm8182_vm8, %v5016_v62  ;;  %v5059_v48 = vpop.permute.xlu0 %5058  ;;  %v5044_v17 = vpop.permute.xlu1 %5043  ;;  %5324 = vmatprep.subr.bf16.mxu0 %v6478_v47 }
 0xdfc   : > { %v5060_v35 = vrot.slane %v5059_v48, 4  ;;  %v5045_v52 = vrot.slane %v5044_v17, 4  ;;  %5325 = vmatpush1.bf16.msra.mxu0 %v6476_v16 }
 0xdfe   : > { %v5061_v20 = vsel %vm9050_vm5, %v5059_v48, %v5060_v35  ;;  %v5046_v55 = vsel %vm9051_vm14, %v5044_v17, %v5045_v52  ;;  %v6479_v38 = vld [vmem:[#allocation7 + $0x80] ss:$8 sps:$4 sm:$0xff]   ;;  %v6481_v19 = vld [vmem:[#allocation7 + $0x84] ss:$8 sps:$4 sm:$0xff]  }
 0xdff   : > { %5063 = vst.msk [vmem:[#allocation7 + $0xb0] sm:$0xff] %vm8182_vm8, %v5061_v20  ;;  %5048 = vst.msk [vmem:[#allocation7 + $0xa8] sm:$0xff] %vm8182_vm8, %v5046_v55  ;;  %v5089_v56 = vpop.permute.xlu0 %5088  ;;  %v5074_v53 = vpop.permute.xlu1 %5073  ;;  %5326 = vmatprep.subr.bf16.mxu0 %v6481_v19 }
 0xe00   : > { %v5090_v58 = vrot.slane %v5089_v56, 4  ;;  %v5075_v23 = vrot.slane %v5074_v53, 4  ;;  %5327 = vmatpush1.bf16.msra.mxu0 %v6479_v38 }
 0xe02   : > { %v5091_v42 = vsel %vm9052_vm4, %v5089_v56, %v5090_v58  ;;  %v5076_v59 = vsel %vm3124_vm11, %v5074_v53, %v5075_v23  ;;  %v6482_v1 = vld [vmem:[#allocation7 + $0x90] ss:$8 sps:$4 sm:$0xff]   ;;  %v6484_v33 = vld [vmem:[#allocation7 + $0x94] ss:$8 sps:$4 sm:$0xff]  }
 0xe03   : > { %5093 = vst.msk [vmem:[#allocation7 + $0xc0] sm:$0xff] %vm8182_vm8, %v5091_v42  ;;  %5078 = vst.msk [vmem:[#allocation7 + $0xb8] sm:$0xff] %vm8182_vm8, %v5076_v59  ;;  %v5119_v11 = vpop.permute.xlu0 %5118  ;;  %v5104_v15 = vpop.permute.xlu1 %5103  ;;  %5328 = vmatprep.subr.bf16.mxu0 %v6484_v33 }
 0xe04   : > { %v5120_v34 = vrot.slane %v5119_v11, 4  ;;  %v5105_v24 = vrot.slane %v5104_v15, 4  ;;  %5329 = vmatpush1.bf16.msra.mxu0 %v6482_v1 }
 0xe06   : > { %v5121_v29 = vsel %vm3172_vm10, %v5119_v11, %v5120_v34  ;;  %v5106_v4 = vsel %vm3156_vm7, %v5104_v15, %v5105_v24  ;;  %v6485_v46 = vld [vmem:[#allocation7 + $0xa0] ss:$8 sps:$4 sm:$0xff]   ;;  %v6487_v2 = vld [vmem:[#allocation7 + $0xa4] ss:$8 sps:$4 sm:$0xff]   ;;  %vm9053_vm10 = vcmask 1043456  }
 0xe07   : > { %5123 = vst.msk [vmem:[#allocation7 + $0xd0] sm:$0xff] %vm8182_vm8, %v5121_v29  ;;  %5108 = vst.msk [vmem:[#allocation7 + $0xc8] sm:$0xff] %vm8182_vm8, %v5106_v4  ;;  %5330 = vmatprep.subr.bf16.mxu0 %v6487_v2  ;;  %vm9055_vm8 = vcmask 367616  }
 0xe08   : > { %5331 = vmatpush1.bf16.msra.mxu0 %v6485_v46  ;;  %vm9054_vm11 = vmmov %vm9053_vm10 }
 0xe0a   : > { %v6488_v3 = vld [vmem:[#allocation7 + $0xb0] ss:$8 sps:$4 sm:$0xff]   ;;  %v6490_v13 = vld [vmem:[#allocation7 + $0xb4] ss:$8 sps:$4 sm:$0xff]  }
 0xe0b   : > { %5332 = vmatprep.subr.bf16.mxu0 %v6490_v13 }
 0xe0c   : > { %5333 = vmatpush1.bf16.msra.mxu0 %v6488_v3 }
 0xe0e   : > { %v6491_v9 = vld [vmem:[#allocation7 + $0xc0] ss:$8 sps:$4 sm:$0xff]   ;;  %v6493_v10 = vld [vmem:[#allocation7 + $0xc4] ss:$8 sps:$4 sm:$0xff]   ;;  %v5152_v14 = vld [vmem:[#allocation7 + $0xd0] sm:$0xff] }
 0xe0f   : > { %5334 = vmatprep.subr.bf16.mxu0 %v6493_v10  ;;  %v5790_v18 = vcombine.high %v5152_v14, %v5152_v14  ;;  %v5789_v22 = vcombine.low %v5152_v14, %v5152_v14 }
 0xe10   : > { %5335 = vmatpush1.bf16.msra.mxu0 %v6491_v9 }
 0xe11   : > { %5791 = vmatprep.subr.msk.bf16.mxu0 %vm9053_vm10, %v5790_v18  ;;  %v5305_v12 = vsel %vm9054_vm11, %v5789_v22, 0 }
 0xe14   : > { %5337 = vmatpush1.bf16.msra.mxu0 %v5305_v12  ;;  %v5158_v5 = vpop.permute.xlu1 %5157 }
 0xe17   : > { %5343 = vmatmul.mubr.bf16.vlgmr.msra.gmra.mrb[8].mxu0 %v5761_v50 }
 0xeea   : > { %v5344_v7 = vpop.f32.mrb[8].mxu0 }
 0xeeb   : > { %v5345_v21 = vadd.f32 %v5344_v7, %v5158_v5  ;;  %v5346_v25 = vpop.f32.mrb[9].mxu0 }
 0xeec   : > { %v5347_v54 = vadd.f32 %v5346_v25, %v5158_v5  ;;  %v5348_v6 = vpop.f32.mrb[10].mxu0 }
 0xeed   : > { %v5353_v26 = vmul.f32 %v5345_v21, %v8303_v51  ;;  %v5349_v40 = vpop.f32.mrb[11].mxu0 }
 0xeee   : > { %v5354_v27 = vmul.f32 %v5347_v54, %v8307_v63 }
 0xeef   : > { %5357 = vrot.lane.b32.xlu0 %v5353_v26, %s8996_s20 }
 0xef0   : > { %5359 = vrot.lane.b32.xlu1 %v5354_v27, %s8996_s20  ;;  %s6732_s20 = scalar_lea.vmem %s6731_s11, 512 }
 0xef1   : > { %p6734_p9 = scmp.lt.s32.totalorder %s6732_s20, %s6726_s29 }
 0xef3   : > { %p6735_p6 = por %p6734_p9, %p6733_p3 }
 0xef5   : > { %p6736_p0 = pnand %p6735_p6, %p6729_p1 }
 0xf61   : > { %v5358_v28 = vpop.permute.xlu0 %5357 }
 0xf62   : > { %v5364_v49 = vadd.f32 %v5358_v28, %v5351_v30  ;;  %v5360_v61 = vpop.permute.xlu1 %5359 }
 0xf63   : > { %v5361_v31 = vsel %vm3156_vm7, %v5358_v28, %v5360_v61 }
 0xf64   : > { %5366 = vst.msk [vmem:[#allocation5] sm:$0xff] %vm3426_vm13, %v5364_v49  ;;  %v5365_v51 = vadd.f32 %v5361_v31, %v5352_v41 }
 0xf66   : > { %5367 = vst.msk [vmem:[#allocation5 + $0x8] sm:$0xff] %vm9055_vm8, %v5365_v51 }
 0xf6b   : > { %v5368_v63 = vld [vmem:[#allocation5] sm:$0xff] }
 0xf6c   : > { %5370 = vst [vmem:[%s415_s3] sm:$0xff] %v5368_v63 }
 0xf6d   : > { %v5369_v36 = vld [vmem:[#allocation5 + $0x8] sm:$0xff] }
 0xf6e   : > { %5371 = vst.msk [vmem:[%s415_s3 + $0x8] sm:$0xff] %vm2737_vm3, %v5369_v36 }
 0xf6f   : > { %6739 = shalt.err (!%p6736_p0)
}
 0xf70   : > { %s6740_s13 = scalar_lea.hbm %s8688_s7, 256  ;;  %s6744_s12 = scalar_lea.hbm %s8741_s8, 512 }
 0xf71   : > { %p6741_p2 = scmp.ne.s32.totalorder %s8688_s7, %s6740_s13  ;;  %p6745_p12 = scmp.lt.u32.totalorder %s8688_s7, %s8741_s8 }
 0xf72   : > { %p6746_p11 = scmp.lt.u32.totalorder %s6744_s12, %s6740_s13  ;;  %p6748_p5 = scmp.lt.u32.totalorder %s6740_s13, %s8688_s7 }
 0xf73   : > { %p6742_p8 = pnand %p6741_p2, %p9056_p7 }
 0xf74   : > { %p6747_p13 = por %p6746_p11, %p6745_p12 }
 0xf75   : > { %p6743_p10 = pneg %p6742_p8 }
 0xf76   : > { %p6749_p4 = por %p6748_p5, %p6747_p13 }
 0xf78   : > { %p6750_p1 = pnand %p6749_p4, %p6743_p10 }
 0xf7a   : > { %6753 = shalt.err (!%p6750_p1)
}
 0xf7b   : > { %6138 = dma.vmem_to_hbm [thread:$0]  (%p9056_p7), %s8690_s4, 256, %s8688_s7, %s5373_s28  }
 0xf7c PF: > { %s9057_s26 = sld [smem:[#allocation34_spill]]  ;;  %s9058_s16 = sld [smem:[#allocation31_spill]] }
 0xf7d   : > { %s5399_s1 = sand.u32 1, %s6796_s27  }
 0xf7e   : > { %s5400_s25 = scalar_lea.sflag [#allocation10], %s5399_s1 }
 0xf82   : > { %p9059_p3 = scmp.ne.s32.totalorder %s9057_s26, 0  ;;  %p9060_p9 = scmp.ge.s32.totalorder %s9058_s16, 2 }
 0xf84   : > { %p6167_p6 = pnand %p9060_p9, %p9059_p3 }
 0xf86   : > { %6791 = dma.done.wait (!%p6167_p6), %s5400_s25, 256  }
 0xf87   : > { %6793 = vsyncadd (!%p6167_p6), %s5400_s25, 4294967040  ;;  %s9061_s30 = sld [smem:[#allocation32_spill]]  ;;  %s9062_s27 = sld [smem:[#allocation29_spill]] }
 0xf88   : > { %s9063_s28 = sld [smem:[#allocation30_spill]]  ;;  %s9064_s29 = sld [smem:[#allocation33_spill]] }
 0xf8d   : > { %p25_p0 = scmp.ge.s32.totalorder %s9061_s30, 4  }
 0xf8f   :  { %27 = sbr.rel (!%p25_p0) target bundleno = 18 (0x12), region = 131 }
 0xf96   :  { %5405 = vsyncpa [#allocation9], 1 }
 0xf97   :  { %5407 = vsyncpa [#allocation9 + $0x1], 1 }
 0xf98   :  { %5408 = vsyncpa [#allocation12], 1 }
 0xf99   :  { %5409 = vsyncpa [#allocation15], 1 }
 0xf9a   :  { %5410 = vsyncpa [#allocation18], 1 }
 0xf9b   :  { %5411 = vsyncpa [#allocation21], 1 }
 0xf9c   :  { %5412 = vsyncpa [#allocation10], 1 }
 0xf9d   :  { %5414 = vsyncpa [#allocation10 + $0x1], 1 }

</bundles_post_ra>
